<compile_context>
chip_gen: v7x
topology: tpu7x:2x2x1
jax: 0.10.0
libtpu: 0.0.40
codegen_flags: <defaults>
</compile_context>

<pallas_src>
import functools

import jax
import jax.numpy as jnp
from jax.experimental import pallas as pl
from jax.experimental.pallas import tpu as pltpu

BN_EPS = 1e-5
VMEM_LIMIT_BYTES = 32 * 1024 * 1024   # fits v7x's 64 MiB physical VMEM comfortably


def _round_up(x, m):
    return ((x + m - 1) // m) * m


def _pick_tk(K):
    """Return (tk, Kp): K tile (multiple of 128) and padded K."""
    Kp = _round_up(K, 128)
    if Kp <= 1024:
        return Kp, Kp
    units = Kp // 128
    for d in (4, 3, 2):
        if units % d == 0:
            return 128 * d, Kp
    return 128, Kp


# ----------------------------------------------------------------------------
# Pallas kernels
# ----------------------------------------------------------------------------
def _mm_kernel(a_ref, b_ref, bias_ref, o_ref, acc_ref, *, relu):
    """out = relu?((A @ B) + bias); K-blocked with f32 VMEM accumulator."""
    @pl.when(pl.program_id(1) == 0)
    def _():
        acc_ref[...] = jnp.zeros_like(acc_ref)

    acc_ref[...] += jnp.dot(a_ref[...], b_ref[...],
                            preferred_element_type=jnp.float32)

    @pl.when(pl.program_id(1) == pl.num_programs(1) - 1)
    def _():
        out = acc_ref[...] + bias_ref[...]
        if relu:
            out = jnp.maximum(out, 0.0)
        o_ref[...] = out.astype(o_ref.dtype)


def _mm_res_kernel(a_ref, b_ref, bias_ref, res_ref, o_ref, acc_ref, *, relu):
    """out = relu?((A @ B) + bias + residual)."""
    @pl.when(pl.program_id(1) == 0)
    def _():
        acc_ref[...] = jnp.zeros_like(acc_ref)

    acc_ref[...] += jnp.dot(a_ref[...], b_ref[...],
                            preferred_element_type=jnp.float32)

    @pl.when(pl.program_id(1) == pl.num_programs(1) - 1)
    def _():
        out = acc_ref[...] + bias_ref[...] + res_ref[...].astype(jnp.float32)
        if relu:
            out = jnp.maximum(out, 0.0)
        o_ref[...] = out.astype(o_ref.dtype)


def _maxpool_kernel(v_ref, o_ref):
    # v_ref: (9, tm, C) stacked window views -> elementwise max over shifts.
    o_ref[...] = jnp.max(v_ref[...], axis=0)


def _avgpool_fc_kernel(x_ref, w_ref, b_ref, o_ref, *, inv_hw):
    # x_ref: (N, H*W, C); fused global average pool + linear layer.
    pooled = jnp.sum(x_ref[...].astype(jnp.float32), axis=1) * inv_hw   # (N, C)
    o_ref[...] = (jnp.dot(pooled, w_ref[...],
                          preferred_element_type=jnp.float32) + b_ref[...])


# ----------------------------------------------------------------------------
# Fused, tiled matmul wrapper (conv-as-matmul hot path)
# ----------------------------------------------------------------------------
def matmul_fused(a, b, bias, residual=None, relu=False, out_dtype=jnp.bfloat16):
    """out = relu?((a @ b) + bias [+ residual]), bf16 MXU / f32 accumulate."""
    M, K = a.shape
    Kb, N = b.shape
    assert K == Kb

    tm = min(256, _round_up(M, 8))
    Mp = _round_up(M, tm)
    tk, Kp = _pick_tk(K)

    if (Mp, Kp) != (M, K):
        a = jnp.pad(a, ((0, Mp - M), (0, Kp - K)))
    if Kp != K:
        b = jnp.pad(b, ((0, Kp - K), (0, 0)))

    grid = (Mp // tm, Kp // tk)   # M parallel, K (reduction) last / arbitrary

    in_specs = [
        pl.BlockSpec((tm, tk), lambda i, k: (i, k)),
        pl.BlockSpec((tk, N), lambda i, k: (k, 0)),
        pl.BlockSpec((1, N), lambda i, k: (0, 0)),
    ]
    operands = [a, b, bias]
    if residual is not None:
        if Mp != M:
            residual = jnp.pad(residual, ((0, Mp - M), (0, 0)))
        in_specs.append(pl.BlockSpec((tm, N), lambda i, k: (i, 0)))
        operands.append(residual)
        kernel = functools.partial(_mm_res_kernel, relu=relu)
    else:
        kernel = functools.partial(_mm_kernel, relu=relu)

    bytes_accessed = (a.size * a.dtype.itemsize
                      + b.size * b.dtype.itemsize * grid[0]
                      + Mp * N * jnp.dtype(out_dtype).itemsize)
    if residual is not None:
        bytes_accessed += residual.size * residual.dtype.itemsize

    out = pl.pallas_call(
        kernel,
        out_shape=jax.ShapeDtypeStruct((Mp, N), out_dtype),
        grid=grid,
        in_specs=in_specs,
        out_specs=pl.BlockSpec((tm, N), lambda i, k: (i, 0)),
        scratch_shapes=[pltpu.VMEM((tm, N), jnp.float32)],
        compiler_params=pltpu.CompilerParams(
            dimension_semantics=("parallel", "arbitrary"),
            vmem_limit_bytes=VMEM_LIMIT_BYTES),
        cost_estimate=pl.CostEstimate(
            flops=2 * Mp * N * Kp, transcendentals=0,
            bytes_accessed=int(bytes_accessed)),
    )(*operands)

    return out[:M] if Mp != M else out


# ----------------------------------------------------------------------------
# Glue: im2col, conv-as-matmul, pooling wrappers
# ----------------------------------------------------------------------------
def im2col(x_nhwc, kh, kw, stride, pad):
    N, H, W, C = x_nhwc.shape
    xp = jnp.pad(x_nhwc, ((0, 0), (pad, pad), (pad, pad), (0, 0)))
    Ho = (H + 2 * pad - kh) // stride + 1
    Wo = (W + 2 * pad - kw) // stride + 1
    cols = []
    for i in range(kh):
        for j in range(kw):
            cols.append(xp[:, i:i + stride * Ho:stride, j:j + stride * Wo:stride, :])
    patches = jnp.stack(cols, axis=3)                 # (N, Ho, Wo, kh*kw, C)
    return patches.reshape(N * Ho * Wo, kh * kw * C), Ho, Wo


def conv_bn(x_nhwc, w, scale, bias, stride, pad, relu, residual=None):
    """w has PyTorch layout (Cout, Cin, kh, kw), no conv bias (bias=False)."""
    cout, cin, kh, kw = w.shape
    patches, Ho, Wo = im2col(x_nhwc, kh, kw, stride, pad)     # bf16 patches
    wmat = jnp.transpose(w, (2, 3, 1, 0)).reshape(kh * kw * cin, cout)
    wmat = (wmat * scale).astype(jnp.bfloat16)        # fold BN scale into weights
    res_flat = None if residual is None else residual.reshape(-1, cout)
    out = matmul_fused(patches, wmat, bias, residual=res_flat, relu=relu)
    return out.reshape(x_nhwc.shape[0], Ho, Wo, cout)


def maxpool_3x3_s2_p1(x_nhwc):
    N, H, W, C = x_nhwc.shape
    k, s, pad = 3, 2, 1
    Ho = (H + 2 * pad - k) // s + 1
    Wo = (W + 2 * pad - k) // s + 1
    xp = jnp.pad(x_nhwc, ((0, 0), (pad, pad), (pad, pad), (0, 0)),
                 constant_values=-jnp.inf)
    views = [xp[:, i:i + s * Ho:s, j:j + s * Wo:s, :].reshape(N * Ho * Wo, C)
             for i in range(k) for j in range(k)]
    stacked = jnp.stack(views, axis=0)                # (9, M, C)
    M = N * Ho * Wo
    tm = min(256, _round_up(M, 8))
    Mp = _round_up(M, tm)
    if Mp != M:
        stacked = jnp.pad(stacked, ((0, 0), (0, Mp - M), (0, 0)))
    out = pl.pallas_call(
        _maxpool_kernel,
        out_shape=jax.ShapeDtypeStruct((Mp, C), x_nhwc.dtype),
        grid=(Mp // tm,),
        in_specs=[pl.BlockSpec((9, tm, C), lambda i: (0, i, 0))],
        out_specs=pl.BlockSpec((tm, C), lambda i: (i, 0)),
        compiler_params=pltpu.CompilerParams(
            dimension_semantics=("parallel",),
            vmem_limit_bytes=VMEM_LIMIT_BYTES),
    )(stacked)
    if Mp != M:
        out = out[:M]
    return out.reshape(N, Ho, Wo, C)


def avgpool_fc(x_nhwc, fc_w, fc_b):
    """Fused global average pool + final linear layer (tiny shapes)."""
    N, H, W, C = x_nhwc.shape
    num_classes = fc_w.shape[0]
    x = x_nhwc.reshape(N, H * W, C)
    w = fc_w.T.astype(jnp.float32)                    # (C, num_classes)
    b = fc_b.reshape(1, num_classes).astype(jnp.float32)
    kernel = functools.partial(_avgpool_fc_kernel, inv_hw=1.0 / float(H * W))
    return pl.pallas_call(
        kernel,
        out_shape=jax.ShapeDtypeStruct((N, num_classes), jnp.float32),
    )(x, w, b)


# ----------------------------------------------------------------------------
# Parameters (deterministic init, PyTorch shapes)
# ----------------------------------------------------------------------------
def init_params(key, blocks_num=(1, 1, 1, 1), num_classes=10):
    keys = iter(jax.random.split(key, 64))

    def kaiming(cout, cin, kh, kw):
        fan_out = cout * kh * kw                     # kaiming_normal_ fan_out, relu
        std = (2.0 / fan_out) ** 0.5
        return jax.random.normal(next(keys), (cout, cin, kh, kw), jnp.float32) * std

    def bn(c):  # eval-mode BN with default buffers
        scale = jnp.full((1, c), 1.0 / (1.0 + BN_EPS) ** 0.5, jnp.float32)
        bias = jnp.zeros((1, c), jnp.float32)
        return scale, bias

    params = {"conv1_w": kaiming(64, 3, 7, 7)}
    params["bn1_scale"], params["bn1_bias"] = bn(64)

    in_ch = 64
    layers = []
    for c, s, nblk in zip((64, 128, 256, 512), (1, 2, 2, 2), blocks_num):
        blocks = []
        for bi in range(nblk):
            stride = s if bi == 0 else 1
            blk = {"stride": stride,
                   "conv1_w": kaiming(c, in_ch, 3, 3),
                   "conv2_w": kaiming(c, c, 3, 3)}
            blk["bn1_scale"], blk["bn1_bias"] = bn(c)
            blk["bn2_scale"], blk["bn2_bias"] = bn(c)
            if stride != 1 or in_ch != c:            # BasicBlock.expansion == 1
                blk["down_w"] = kaiming(c, in_ch, 1, 1)
                blk["down_scale"], blk["down_bias"] = bn(c)
            blocks.append(blk)
            in_ch = c
        layers.append(blocks)
    params["layers"] = layers

    bound = 1.0 / (512 ** 0.5)                       # nn.Linear default init
    params["fc_w"] = jax.random.uniform(next(keys), (num_classes, 512),
                                        jnp.float32, -bound, bound)
    params["fc_b"] = jax.random.uniform(next(keys), (num_classes,),
                                        jnp.float32, -bound, bound)
    return params


# ----------------------------------------------------------------------------
# Forward pass
# ----------------------------------------------------------------------------
def basic_block(x, p):
    stride = p["stride"]
    if "down_w" in p:
        identity = conv_bn(x, p["down_w"], p["down_scale"], p["down_bias"],
                           stride=stride, pad=0, relu=False)
    else:
        identity = x
    out = conv_bn(x, p["conv1_w"], p["bn1_scale"], p["bn1_bias"],
                  stride=stride, pad=1, relu=True)
    # conv2 + bn2 + residual add + relu fused in one Pallas kernel call
    out = conv_bn(out, p["conv2_w"], p["bn2_scale"], p["bn2_bias"],
                  stride=1, pad=1, relu=True, residual=identity)
    return out


def resnet_forward(x_nchw, params):
    x = jnp.transpose(x_nchw, (0, 2, 3, 1)).astype(jnp.bfloat16)   # NCHW -> NHWC, bf16
    x = conv_bn(x, params["conv1_w"], params["bn1_scale"], params["bn1_bias"],
                stride=2, pad=3, relu=True)
    x = maxpool_3x3_s2_p1(x)
    for stage in params["layers"]:
        for blk in stage:
            x = basic_block(x, blk)
    logits = avgpool_fc(x, params["fc_w"], params["fc_b"])   # fused pool + FC
    return logits                                            # (N, num_classes) f32


if __name__ == "__main__":
    key = jax.random.PRNGKey(0)
    pkey, xkey = jax.random.split(key)
    params = init_params(pkey, blocks_num=(1, 1, 1, 1), num_classes=10)
    x = jax.random.normal(xkey, (2, 3, 32, 32), jnp.float32)   # small NCHW input

    fwd = jax.jit(lambda xx: resnet_forward(xx, params))
    out = fwd(x)
    jax.block_until_ready(out)
    assert out.shape == (2, 10) and out.dtype == jnp.float32
    print("KERNEL_OK")
</pallas_src>

<mosaic_0001>
module attributes {stable_mosaic.version = 11 : i64} {
  func.func @_mm_kernel(%arg0: i32, %arg1: i32, %arg2: memref<256x256xbf16, #tpu.memory_space<vmem>>, %arg3: memref<256x64xbf16, #tpu.memory_space<vmem>>, %arg4: memref<1x64xf32, #tpu.memory_space<vmem>>, %arg5: memref<256x64xbf16, #tpu.memory_space<vmem>>, %arg6: memref<256x64xf32, #tpu.memory_space<vmem>>) attributes {dimension_semantics = [#tpu.dimension_semantics<parallel>, #tpu.dimension_semantics<arbitrary>], iteration_bounds = array<i64: 2, 1>, scalar_prefetch = 0 : i64, scratch_operands = 1 : i64, tpu.core_type = #tpu.core_type<tc>, window_params = [{transform_indices = @transform_0, window_bounds = array<i64: 256, 256>}, {transform_indices = @transform_1, window_bounds = array<i64: 256, 64>}, {pipeline_mode = #tpu.pipeline_mode<synchronous>, transform_indices = @transform_2, window_bounds = array<i64: 1, 64>}, {transform_indices = @transform_3, window_bounds = array<i64: 256, 64>}]} {
    %c0_i32 = arith.constant 0 : i32
    %0 = arith.cmpi eq, %arg1, %c0_i32 : i32
    %1 = arith.extui %0 : i1 to i32
    %c0_i32_0 = arith.constant 0 : i32
    %2 = arith.cmpi ne, %1, %c0_i32_0 : i32
    scf.if %2 {
      %cst_10 = arith.constant 0.000000e+00 : f32
      %12 = vector.broadcast %cst_10 : f32 to vector<256x64xf32>
      %c0_11 = arith.constant 0 : index
      %c0_12 = arith.constant 0 : index
      %13 = vector.load %arg6[%c0_11, %c0_12] : memref<256x64xf32, #tpu.memory_space<vmem>>, vector<256x64xf32>
      tpu.vector_store %arg6[%c0_11, %c0_12], %12 {strides = array<i32>} : memref<256x64xf32, #tpu.memory_space<vmem>>, vector<256x64xf32>,
    } else {
    }
    %c0 = arith.constant 0 : index
    %c0_1 = arith.constant 0 : index
    %3 = vector.load %arg6[%c0, %c0_1] : memref<256x64xf32, #tpu.memory_space<vmem>>, vector<256x64xf32>
    %c0_2 = arith.constant 0 : index
    %c0_3 = arith.constant 0 : index
    %4 = vector.load %arg2[%c0_2, %c0_3] : memref<256x256xbf16, #tpu.memory_space<vmem>>, vector<256x256xbf16>
    %c0_4 = arith.constant 0 : index
    %c0_5 = arith.constant 0 : index
    %5 = vector.load %arg3[%c0_4, %c0_5] : memref<256x64xbf16, #tpu.memory_space<vmem>>, vector<256x64xbf16>
    %cst = arith.constant dense<0.000000e+00> : vector<256x64xf32>
    %6 = tpu.matmul %4, %5, %cst {dimension_numbers = #tpu.dot_dimension_numbers<[1], [0], [0], [1], [0, 0, 1, 1], [], []>} : vector<256x256xbf16>, vector<256x64xbf16>, vector<256x64xf32> -> vector<256x64xf32>
    %7 = arith.addf %3, %6 : vector<256x64xf32>
    %c0_6 = arith.constant 0 : index
    %c0_7 = arith.constant 0 : index
    %8 = vector.load %arg6[%c0_6, %c0_7] : memref<256x64xf32, #tpu.memory_space<vmem>>, vector<256x64xf32>
    tpu.vector_store %arg6[%c0_6, %c0_7], %7 {strides = array<i32>} : memref<256x64xf32, #tpu.memory_space<vmem>>, vector<256x64xf32>,
    %c0_i32_8 = arith.constant 0 : i32
    %9 = arith.cmpi eq, %arg1, %c0_i32_8 : i32
    %10 = arith.extui %9 : i1 to i32
    %c0_i32_9 = arith.constant 0 : i32
    %11 = arith.cmpi ne, %10, %c0_i32_9 : i32
    scf.if %11 {
      %c0_10 = arith.constant 0 : index
      %c0_11 = arith.constant 0 : index
      %12 = vector.load %arg6[%c0_10, %c0_11] : memref<256x64xf32, #tpu.memory_space<vmem>>, vector<256x64xf32>
      %c0_12 = arith.constant 0 : index
      %c0_13 = arith.constant 0 : index
      %13 = vector.load %arg4[%c0_12, %c0_13] : memref<1x64xf32, #tpu.memory_space<vmem>>, vector<1x64xf32>
      %14 = vector.broadcast %13 : vector<1x64xf32> to vector<256x64xf32>
      %15 = arith.addf %12, %14 : vector<256x64xf32>
      %cst_14 = arith.constant 0.000000e+00 : f32
      %16 = vector.broadcast %cst_14 : f32 to vector<256x64xf32>
      %17 = arith.maximumf %15, %16 : vector<256x64xf32>
      %18 = arith.truncf %17 : vector<256x64xf32> to vector<256x64xbf16>
      %c0_15 = arith.constant 0 : index
      %c0_16 = arith.constant 0 : index
      %19 = vector.load %arg5[%c0_15, %c0_16] : memref<256x64xbf16, #tpu.memory_space<vmem>>, vector<256x64xbf16>
      tpu.vector_store %arg5[%c0_15, %c0_16], %18 {strides = array<i32>} : memref<256x64xbf16, #tpu.memory_space<vmem>>, vector<256x64xbf16>,
    } else {
    }
    return
  }
  func.func @transform_0(%arg0: i32, %arg1: i32) -> (i32, i32) {
    %c0_i32 = arith.constant 0 : i32
    return %arg0, %arg1 : i32, i32
  }
  func.func @transform_1(%arg0: i32, %arg1: i32) -> (i32, i32) {
    %c0_i32 = arith.constant 0 : i32
    %c0_i32_0 = arith.constant 0 : i32
    return %arg1, %c0_i32 : i32, i32
  }
  func.func @transform_2(%arg0: i32, %arg1: i32) -> (i32, i32) {
    %c0_i32 = arith.constant 0 : i32
    %c0_i32_0 = arith.constant 0 : i32
    %c0_i32_1 = arith.constant 0 : i32
    return %c0_i32, %c0_i32_0 : i32, i32
  }
  func.func @transform_3(%arg0: i32, %arg1: i32) -> (i32, i32) {
    %c0_i32 = arith.constant 0 : i32
    %c0_i32_0 = arith.constant 0 : i32
    return %arg0, %c0_i32 : i32, i32
  }
}

module attributes {stable_mosaic.version = 11 : i64} {
  func.func @_maxpool_kernel(%arg0: i32, %arg1: memref<9x128x64xbf16, #tpu.memory_space<vmem>>, %arg2: memref<128x64xbf16, #tpu.memory_space<vmem>>) attributes {dimension_semantics = [#tpu.dimension_semantics<parallel>], iteration_bounds = array<i64: 1>, scalar_prefetch = 0 : i64, scratch_operands = 0 : i64, tpu.core_type = #tpu.core_type<tc>, window_params = [{transform_indices = @transform_0, window_bounds = array<i64: 9, 128, 64>}, {transform_indices = @transform_1, window_bounds = array<i64: 128, 64>}]} {
    %c0 = arith.constant 0 : index
    %c0_0 = arith.constant 0 : index
    %c0_1 = arith.constant 0 : index
    %0 = vector.load %arg1[%c0, %c0_0, %c0_1] : memref<9x128x64xbf16, #tpu.memory_space<vmem>>, vector<9x128x64xbf16>
    %cst = arith.constant dense<0xFF80> : vector<128x64xbf16>
    %1 = vector.multi_reduction <maximumf>, %0, %cst [0] : vector<9x128x64xbf16> to vector<128x64xbf16>
    %c0_2 = arith.constant 0 : index
    %c0_3 = arith.constant 0 : index
    %2 = vector.load %arg2[%c0_2, %c0_3] : memref<128x64xbf16, #tpu.memory_space<vmem>>, vector<128x64xbf16>
    tpu.vector_store %arg2[%c0_2, %c0_3], %1 {strides = array<i32>} : memref<128x64xbf16, #tpu.memory_space<vmem>>, vector<128x64xbf16>,
    return
  }
  func.func @transform_0(%arg0: i32) -> (i32, i32, i32) {
    %c0_i32 = arith.constant 0 : i32
    %c0_i32_0 = arith.constant 0 : i32
    %c0_i32_1 = arith.constant 0 : i32
    return %c0_i32, %arg0, %c0_i32_0 : i32, i32, i32
  }
  func.func @transform_1(%arg0: i32) -> (i32, i32) {
    %c0_i32 = arith.constant 0 : i32
    %c0_i32_0 = arith.constant 0 : i32
    return %arg0, %c0_i32 : i32, i32
  }
}

module attributes {stable_mosaic.version = 11 : i64} {
  func.func @_mm_kernel(%arg0: i32, %arg1: i32, %arg2: memref<128x640xbf16, #tpu.memory_space<vmem>>, %arg3: memref<640x64xbf16, #tpu.memory_space<vmem>>, %arg4: memref<1x64xf32, #tpu.memory_space<vmem>>, %arg5: memref<128x64xbf16, #tpu.memory_space<vmem>>, %arg6: memref<128x64xf32, #tpu.memory_space<vmem>>) attributes {dimension_semantics = [#tpu.dimension_semantics<parallel>, #tpu.dimension_semantics<arbitrary>], iteration_bounds = array<i64: 1, 1>, scalar_prefetch = 0 : i64, scratch_operands = 1 : i64, tpu.core_type = #tpu.core_type<tc>, window_params = [{transform_indices = @transform_0, window_bounds = array<i64: 128, 640>}, {transform_indices = @transform_1, window_bounds = array<i64: 640, 64>}, {pipeline_mode = #tpu.pipeline_mode<synchronous>, transform_indices = @transform_2, window_bounds = array<i64: 1, 64>}, {transform_indices = @transform_3, window_bounds = array<i64: 128, 64>}]} {
    %c0_i32 = arith.constant 0 : i32
    %0 = arith.cmpi eq, %arg1, %c0_i32 : i32
    %1 = arith.extui %0 : i1 to i32
    %c0_i32_0 = arith.constant 0 : i32
    %2 = arith.cmpi ne, %1, %c0_i32_0 : i32
    scf.if %2 {
      %cst_10 = arith.constant 0.000000e+00 : f32
      %12 = vector.broadcast %cst_10 : f32 to vector<128x64xf32>
      %c0_11 = arith.constant 0 : index
      %c0_12 = arith.constant 0 : index
      %13 = vector.load %arg6[%c0_11, %c0_12] : memref<128x64xf32, #tpu.memory_space<vmem>>, vector<128x64xf32>
      tpu.vector_store %arg6[%c0_11, %c0_12], %12 {strides = array<i32>} : memref<128x64xf32, #tpu.memory_space<vmem>>, vector<128x64xf32>,
    } else {
    }
    %c0 = arith.constant 0 : index
    %c0_1 = arith.constant 0 : index
    %3 = vector.load %arg6[%c0, %c0_1] : memref<128x64xf32, #tpu.memory_space<vmem>>, vector<128x64xf32>
    %c0_2 = arith.constant 0 : index
    %c0_3 = arith.constant 0 : index
    %4 = vector.load %arg2[%c0_2, %c0_3] : memref<128x640xbf16, #tpu.memory_space<vmem>>, vector<128x640xbf16>
    %c0_4 = arith.constant 0 : index
    %c0_5 = arith.constant 0 : index
    %5 = vector.load %arg3[%c0_4, %c0_5] : memref<640x64xbf16, #tpu.memory_space<vmem>>, vector<640x64xbf16>
    %cst = arith.constant dense<0.000000e+00> : vector<128x64xf32>
    %6 = tpu.matmul %4, %5, %cst {dimension_numbers = #tpu.dot_dimension_numbers<[1], [0], [0], [1], [0, 0, 1, 1], [], []>} : vector<128x640xbf16>, vector<640x64xbf16>, vector<128x64xf32> -> vector<128x64xf32>
    %7 = arith.addf %3, %6 : vector<128x64xf32>
    %c0_6 = arith.constant 0 : index
    %c0_7 = arith.constant 0 : index
    %8 = vector.load %arg6[%c0_6, %c0_7] : memref<128x64xf32, #tpu.memory_space<vmem>>, vector<128x64xf32>
    tpu.vector_store %arg6[%c0_6, %c0_7], %7 {strides = array<i32>} : memref<128x64xf32, #tpu.memory_space<vmem>>, vector<128x64xf32>,
    %c0_i32_8 = arith.constant 0 : i32
    %9 = arith.cmpi eq, %arg1, %c0_i32_8 : i32
    %10 = arith.extui %9 : i1 to i32
    %c0_i32_9 = arith.constant 0 : i32
    %11 = arith.cmpi ne, %10, %c0_i32_9 : i32
    scf.if %11 {
      %c0_10 = arith.constant 0 : index
      %c0_11 = arith.constant 0 : index
      %12 = vector.load %arg6[%c0_10, %c0_11] : memref<128x64xf32, #tpu.memory_space<vmem>>, vector<128x64xf32>
      %c0_12 = arith.constant 0 : index
      %c0_13 = arith.constant 0 : index
      %13 = vector.load %arg4[%c0_12, %c0_13] : memref<1x64xf32, #tpu.memory_space<vmem>>, vector<1x64xf32>
      %14 = vector.broadcast %13 : vector<1x64xf32> to vector<128x64xf32>
      %15 = arith.addf %12, %14 : vector<128x64xf32>
      %cst_14 = arith.constant 0.000000e+00 : f32
      %16 = vector.broadcast %cst_14 : f32 to vector<128x64xf32>
      %17 = arith.maximumf %15, %16 : vector<128x64xf32>
      %18 = arith.truncf %17 : vector<128x64xf32> to vector<128x64xbf16>
      %c0_15 = arith.constant 0 : index
      %c0_16 = arith.constant 0 : index
      %19 = vector.load %arg5[%c0_15, %c0_16] : memref<128x64xbf16, #tpu.memory_space<vmem>>, vector<128x64xbf16>
      tpu.vector_store %arg5[%c0_15, %c0_16], %18 {strides = array<i32>} : memref<128x64xbf16, #tpu.memory_space<vmem>>, vector<128x64xbf16>,
    } else {
    }
    return
  }
  func.func @transform_0(%arg0: i32, %arg1: i32) -> (i32, i32) {
    %c0_i32 = arith.constant 0 : i32
    return %arg0, %arg1 : i32, i32
  }
  func.func @transform_1(%arg0: i32, %arg1: i32) -> (i32, i32) {
    %c0_i32 = arith.constant 0 : i32
    %c0_i32_0 = arith.constant 0 : i32
    return %arg1, %c0_i32 : i32, i32
  }
  func.func @transform_2(%arg0: i32, %arg1: i32) -> (i32, i32) {
    %c0_i32 = arith.constant 0 : i32
    %c0_i32_0 = arith.constant 0 : i32
    %c0_i32_1 = arith.constant 0 : i32
    return %c0_i32, %c0_i32_0 : i32, i32
  }
  func.func @transform_3(%arg0: i32, %arg1: i32) -> (i32, i32) {
    %c0_i32 = arith.constant 0 : i32
    %c0_i32_0 = arith.constant 0 : i32
    return %arg0, %c0_i32 : i32, i32
  }
}

module attributes {stable_mosaic.version = 11 : i64} {
  func.func @_mm_res_kernel(%arg0: i32, %arg1: i32, %arg2: memref<128x640xbf16, #tpu.memory_space<vmem>>, %arg3: memref<640x64xbf16, #tpu.memory_space<vmem>>, %arg4: memref<1x64xf32, #tpu.memory_space<vmem>>, %arg5: memref<128x64xbf16, #tpu.memory_space<vmem>>, %arg6: memref<128x64xbf16, #tpu.memory_space<vmem>>, %arg7: memref<128x64xf32, #tpu.memory_space<vmem>>) attributes {dimension_semantics = [#tpu.dimension_semantics<parallel>, #tpu.dimension_semantics<arbitrary>], iteration_bounds = array<i64: 1, 1>, scalar_prefetch = 0 : i64, scratch_operands = 1 : i64, tpu.core_type = #tpu.core_type<tc>, window_params = [{transform_indices = @transform_0, window_bounds = array<i64: 128, 640>}, {transform_indices = @transform_1, window_bounds = array<i64: 640, 64>}, {pipeline_mode = #tpu.pipeline_mode<synchronous>, transform_indices = @transform_2, window_bounds = array<i64: 1, 64>}, {transform_indices = @transform_3, window_bounds = array<i64: 128, 64>}, {transform_indices = @transform_4, window_bounds = array<i64: 128, 64>}]} {
    %c0_i32 = arith.constant 0 : i32
    %0 = arith.cmpi eq, %arg1, %c0_i32 : i32
    %1 = arith.extui %0 : i1 to i32
    %c0_i32_0 = arith.constant 0 : i32
    %2 = arith.cmpi ne, %1, %c0_i32_0 : i32
    scf.if %2 {
      %cst_10 = arith.constant 0.000000e+00 : f32
      %12 = vector.broadcast %cst_10 : f32 to vector<128x64xf32>
      %c0_11 = arith.constant 0 : index
      %c0_12 = arith.constant 0 : index
      %13 = vector.load %arg7[%c0_11, %c0_12] : memref<128x64xf32, #tpu.memory_space<vmem>>, vector<128x64xf32>
      tpu.vector_store %arg7[%c0_11, %c0_12], %12 {strides = array<i32>} : memref<128x64xf32, #tpu.memory_space<vmem>>, vector<128x64xf32>,
    } else {
    }
    %c0 = arith.constant 0 : index
    %c0_1 = arith.constant 0 : index
    %3 = vector.load %arg7[%c0, %c0_1] : memref<128x64xf32, #tpu.memory_space<vmem>>, vector<128x64xf32>
    %c0_2 = arith.constant 0 : index
    %c0_3 = arith.constant 0 : index
    %4 = vector.load %arg2[%c0_2, %c0_3] : memref<128x640xbf16, #tpu.memory_space<vmem>>, vector<128x640xbf16>
    %c0_4 = arith.constant 0 : index
    %c0_5 = arith.constant 0 : index
    %5 = vector.load %arg3[%c0_4, %c0_5] : memref<640x64xbf16, #tpu.memory_space<vmem>>, vector<640x64xbf16>
    %cst = arith.constant dense<0.000000e+00> : vector<128x64xf32>
    %6 = tpu.matmul %4, %5, %cst {dimension_numbers = #tpu.dot_dimension_numbers<[1], [0], [0], [1], [0, 0, 1, 1], [], []>} : vector<128x640xbf16>, vector<640x64xbf16>, vector<128x64xf32> -> vector<128x64xf32>
    %7 = arith.addf %3, %6 : vector<128x64xf32>
    %c0_6 = arith.constant 0 : index
    %c0_7 = arith.constant 0 : index
    %8 = vector.load %arg7[%c0_6, %c0_7] : memref<128x64xf32, #tpu.memory_space<vmem>>, vector<128x64xf32>
    tpu.vector_store %arg7[%c0_6, %c0_7], %7 {strides = array<i32>} : memref<128x64xf32, #tpu.memory_space<vmem>>, vector<128x64xf32>,
    %c0_i32_8 = arith.constant 0 : i32
    %9 = arith.cmpi eq, %arg1, %c0_i32_8 : i32
    %10 = arith.extui %9 : i1 to i32
    %c0_i32_9 = arith.constant 0 : i32
    %11 = arith.cmpi ne, %10, %c0_i32_9 : i32
    scf.if %11 {
      %c0_10 = arith.constant 0 : index
      %c0_11 = arith.constant 0 : index
      %12 = vector.load %arg7[%c0_10, %c0_11] : memref<128x64xf32, #tpu.memory_space<vmem>>, vector<128x64xf32>
      %c0_12 = arith.constant 0 : index
      %c0_13 = arith.constant 0 : index
      %13 = vector.load %arg4[%c0_12, %c0_13] : memref<1x64xf32, #tpu.memory_space<vmem>>, vector<1x64xf32>
      %14 = vector.broadcast %13 : vector<1x64xf32> to vector<128x64xf32>
      %15 = arith.addf %12, %14 : vector<128x64xf32>
      %c0_14 = arith.constant 0 : index
      %c0_15 = arith.constant 0 : index
      %16 = vector.load %arg5[%c0_14, %c0_15] : memref<128x64xbf16, #tpu.memory_space<vmem>>, vector<128x64xbf16>
      %17 = arith.extf %16 : vector<128x64xbf16> to vector<128x64xf32>
      %18 = arith.addf %15, %17 : vector<128x64xf32>
      %cst_16 = arith.constant 0.000000e+00 : f32
      %19 = vector.broadcast %cst_16 : f32 to vector<128x64xf32>
      %20 = arith.maximumf %18, %19 : vector<128x64xf32>
      %21 = arith.truncf %20 : vector<128x64xf32> to vector<128x64xbf16>
      %c0_17 = arith.constant 0 : index
      %c0_18 = arith.constant 0 : index
      %22 = vector.load %arg6[%c0_17, %c0_18] : memref<128x64xbf16, #tpu.memory_space<vmem>>, vector<128x64xbf16>
      tpu.vector_store %arg6[%c0_17, %c0_18], %21 {strides = array<i32>} : memref<128x64xbf16, #tpu.memory_space<vmem>>, vector<128x64xbf16>,
    } else {
    }
    return
  }
  func.func @transform_0(%arg0: i32, %arg1: i32) -> (i32, i32) {
    %c0_i32 = arith.constant 0 : i32
    return %arg0, %arg1 : i32, i32
  }
  func.func @transform_1(%arg0: i32, %arg1: i32) -> (i32, i32) {
    %c0_i32 = arith.constant 0 : i32
    %c0_i32_0 = arith.constant 0 : i32
    return %arg1, %c0_i32 : i32, i32
  }
  func.func @transform_2(%arg0: i32, %arg1: i32) -> (i32, i32) {
    %c0_i32 = arith.constant 0 : i32
    %c0_i32_0 = arith.constant 0 : i32
    %c0_i32_1 = arith.constant 0 : i32
    return %c0_i32, %c0_i32_0 : i32, i32
  }
  func.func @transform_3(%arg0: i32, %arg1: i32) -> (i32, i32) {
    %c0_i32 = arith.constant 0 : i32
    %c0_i32_0 = arith.constant 0 : i32
    return %arg0, %c0_i32 : i32, i32
  }
  func.func @transform_4(%arg0: i32, %arg1: i32) -> (i32, i32) {
    %c0_i32 = arith.constant 0 : i32
    %c0_i32_0 = arith.constant 0 : i32
    return %arg0, %c0_i32 : i32, i32
  }
}

module attributes {stable_mosaic.version = 11 : i64} {
  func.func @_mm_kernel(%arg0: i32, %arg1: i32, %arg2: memref<32x128xbf16, #tpu.memory_space<vmem>>, %arg3: memref<128x128xbf16, #tpu.memory_space<vmem>>, %arg4: memref<1x128xf32, #tpu.memory_space<vmem>>, %arg5: memref<32x128xbf16, #tpu.memory_space<vmem>>, %arg6: memref<32x128xf32, #tpu.memory_space<vmem>>) attributes {dimension_semantics = [#tpu.dimension_semantics<parallel>, #tpu.dimension_semantics<arbitrary>], iteration_bounds = array<i64: 1, 1>, scalar_prefetch = 0 : i64, scratch_operands = 1 : i64, tpu.core_type = #tpu.core_type<tc>, window_params = [{transform_indices = @transform_0, window_bounds = array<i64: 32, 128>}, {transform_indices = @transform_1, window_bounds = array<i64: 128, 128>}, {pipeline_mode = #tpu.pipeline_mode<synchronous>, transform_indices = @transform_2, window_bounds = array<i64: 1, 128>}, {transform_indices = @transform_3, window_bounds = array<i64: 32, 128>}]} {
    %c0_i32 = arith.constant 0 : i32
    %0 = arith.cmpi eq, %arg1, %c0_i32 : i32
    %1 = arith.extui %0 : i1 to i32
    %c0_i32_0 = arith.constant 0 : i32
    %2 = arith.cmpi ne, %1, %c0_i32_0 : i32
    scf.if %2 {
      %cst_10 = arith.constant 0.000000e+00 : f32
      %12 = vector.broadcast %cst_10 : f32 to vector<32x128xf32>
      %c0_11 = arith.constant 0 : index
      %c0_12 = arith.constant 0 : index
      %13 = vector.load %arg6[%c0_11, %c0_12] : memref<32x128xf32, #tpu.memory_space<vmem>>, vector<32x128xf32>
      tpu.vector_store %arg6[%c0_11, %c0_12], %12 {strides = array<i32>} : memref<32x128xf32, #tpu.memory_space<vmem>>, vector<32x128xf32>,
    } else {
    }
    %c0 = arith.constant 0 : index
    %c0_1 = arith.constant 0 : index
    %3 = vector.load %arg6[%c0, %c0_1] : memref<32x128xf32, #tpu.memory_space<vmem>>, vector<32x128xf32>
    %c0_2 = arith.constant 0 : index
    %c0_3 = arith.constant 0 : index
    %4 = vector.load %arg2[%c0_2, %c0_3] : memref<32x128xbf16, #tpu.memory_space<vmem>>, vector<32x128xbf16>
    %c0_4 = arith.constant 0 : index
    %c0_5 = arith.constant 0 : index
    %5 = vector.load %arg3[%c0_4, %c0_5] : memref<128x128xbf16, #tpu.memory_space<vmem>>, vector<128x128xbf16>
    %cst = arith.constant dense<0.000000e+00> : vector<32x128xf32>
    %6 = tpu.matmul %4, %5, %cst {dimension_numbers = #tpu.dot_dimension_numbers<[1], [0], [0], [1], [0, 0, 1, 1], [], []>} : vector<32x128xbf16>, vector<128x128xbf16>, vector<32x128xf32> -> vector<32x128xf32>
    %7 = arith.addf %3, %6 : vector<32x128xf32>
    %c0_6 = arith.constant 0 : index
    %c0_7 = arith.constant 0 : index
    %8 = vector.load %arg6[%c0_6, %c0_7] : memref<32x128xf32, #tpu.memory_space<vmem>>, vector<32x128xf32>
    tpu.vector_store %arg6[%c0_6, %c0_7], %7 {strides = array<i32>} : memref<32x128xf32, #tpu.memory_space<vmem>>, vector<32x128xf32>,
    %c0_i32_8 = arith.constant 0 : i32
    %9 = arith.cmpi eq, %arg1, %c0_i32_8 : i32
    %10 = arith.extui %9 : i1 to i32
    %c0_i32_9 = arith.constant 0 : i32
    %11 = arith.cmpi ne, %10, %c0_i32_9 : i32
    scf.if %11 {
      %c0_10 = arith.constant 0 : index
      %c0_11 = arith.constant 0 : index
      %12 = vector.load %arg6[%c0_10, %c0_11] : memref<32x128xf32, #tpu.memory_space<vmem>>, vector<32x128xf32>
      %c0_12 = arith.constant 0 : index
      %c0_13 = arith.constant 0 : index
      %13 = vector.load %arg4[%c0_12, %c0_13] : memref<1x128xf32, #tpu.memory_space<vmem>>, vector<1x128xf32>
      %14 = vector.broadcast %13 : vector<1x128xf32> to vector<32x128xf32>
      %15 = arith.addf %12, %14 : vector<32x128xf32>
      %16 = arith.truncf %15 : vector<32x128xf32> to vector<32x128xbf16>
      %c0_14 = arith.constant 0 : index
      %c0_15 = arith.constant 0 : index
      %17 = vector.load %arg5[%c0_14, %c0_15] : memref<32x128xbf16, #tpu.memory_space<vmem>>, vector<32x128xbf16>
      tpu.vector_store %arg5[%c0_14, %c0_15], %16 {strides = array<i32>} : memref<32x128xbf16, #tpu.memory_space<vmem>>, vector<32x128xbf16>,
    } else {
    }
    return
  }
  func.func @transform_0(%arg0: i32, %arg1: i32) -> (i32, i32) {
    %c0_i32 = arith.constant 0 : i32
    return %arg0, %arg1 : i32, i32
  }
  func.func @transform_1(%arg0: i32, %arg1: i32) -> (i32, i32) {
    %c0_i32 = arith.constant 0 : i32
    %c0_i32_0 = arith.constant 0 : i32
    return %arg1, %c0_i32 : i32, i32
  }
  func.func @transform_2(%arg0: i32, %arg1: i32) -> (i32, i32) {
    %c0_i32 = arith.constant 0 : i32
    %c0_i32_0 = arith.constant 0 : i32
    %c0_i32_1 = arith.constant 0 : i32
    return %c0_i32, %c0_i32_0 : i32, i32
  }
  func.func @transform_3(%arg0: i32, %arg1: i32) -> (i32, i32) {
    %c0_i32 = arith.constant 0 : i32
    %c0_i32_0 = arith.constant 0 : i32
    return %arg0, %c0_i32 : i32, i32
  }
}

module attributes {stable_mosaic.version = 11 : i64} {
  func.func @_mm_kernel(%arg0: i32, %arg1: i32, %arg2: memref<32x640xbf16, #tpu.memory_space<vmem>>, %arg3: memref<640x128xbf16, #tpu.memory_space<vmem>>, %arg4: memref<1x128xf32, #tpu.memory_space<vmem>>, %arg5: memref<32x128xbf16, #tpu.memory_space<vmem>>, %arg6: memref<32x128xf32, #tpu.memory_space<vmem>>) attributes {dimension_semantics = [#tpu.dimension_semantics<parallel>, #tpu.dimension_semantics<arbitrary>], iteration_bounds = array<i64: 1, 1>, scalar_prefetch = 0 : i64, scratch_operands = 1 : i64, tpu.core_type = #tpu.core_type<tc>, window_params = [{transform_indices = @transform_0, window_bounds = array<i64: 32, 640>}, {transform_indices = @transform_1, window_bounds = array<i64: 640, 128>}, {pipeline_mode = #tpu.pipeline_mode<synchronous>, transform_indices = @transform_2, window_bounds = array<i64: 1, 128>}, {transform_indices = @transform_3, window_bounds = array<i64: 32, 128>}]} {
    %c0_i32 = arith.constant 0 : i32
    %0 = arith.cmpi eq, %arg1, %c0_i32 : i32
    %1 = arith.extui %0 : i1 to i32
    %c0_i32_0 = arith.constant 0 : i32
    %2 = arith.cmpi ne, %1, %c0_i32_0 : i32
    scf.if %2 {
      %cst_10 = arith.constant 0.000000e+00 : f32
      %12 = vector.broadcast %cst_10 : f32 to vector<32x128xf32>
      %c0_11 = arith.constant 0 : index
      %c0_12 = arith.constant 0 : index
      %13 = vector.load %arg6[%c0_11, %c0_12] : memref<32x128xf32, #tpu.memory_space<vmem>>, vector<32x128xf32>
      tpu.vector_store %arg6[%c0_11, %c0_12], %12 {strides = array<i32>} : memref<32x128xf32, #tpu.memory_space<vmem>>, vector<32x128xf32>,
    } else {
    }
    %c0 = arith.constant 0 : index
    %c0_1 = arith.constant 0 : index
    %3 = vector.load %arg6[%c0, %c0_1] : memref<32x128xf32, #tpu.memory_space<vmem>>, vector<32x128xf32>
    %c0_2 = arith.constant 0 : index
    %c0_3 = arith.constant 0 : index
    %4 = vector.load %arg2[%c0_2, %c0_3] : memref<32x640xbf16, #tpu.memory_space<vmem>>, vector<32x640xbf16>
    %c0_4 = arith.constant 0 : index
    %c0_5 = arith.constant 0 : index
    %5 = vector.load %arg3[%c0_4, %c0_5] : memref<640x128xbf16, #tpu.memory_space<vmem>>, vector<640x128xbf16>
    %cst = arith.constant dense<0.000000e+00> : vector<32x128xf32>
    %6 = tpu.matmul %4, %5, %cst {dimension_numbers = #tpu.dot_dimension_numbers<[1], [0], [0], [1], [0, 0, 1, 1], [], []>} : vector<32x640xbf16>, vector<640x128xbf16>, vector<32x128xf32> -> vector<32x128xf32>
    %7 = arith.addf %3, %6 : vector<32x128xf32>
    %c0_6 = arith.constant 0 : index
    %c0_7 = arith.constant 0 : index
    %8 = vector.load %arg6[%c0_6, %c0_7] : memref<32x128xf32, #tpu.memory_space<vmem>>, vector<32x128xf32>
    tpu.vector_store %arg6[%c0_6, %c0_7], %7 {strides = array<i32>} : memref<32x128xf32, #tpu.memory_space<vmem>>, vector<32x128xf32>,
    %c0_i32_8 = arith.constant 0 : i32
    %9 = arith.cmpi eq, %arg1, %c0_i32_8 : i32
    %10 = arith.extui %9 : i1 to i32
    %c0_i32_9 = arith.constant 0 : i32
    %11 = arith.cmpi ne, %10, %c0_i32_9 : i32
    scf.if %11 {
      %c0_10 = arith.constant 0 : index
      %c0_11 = arith.constant 0 : index
      %12 = vector.load %arg6[%c0_10, %c0_11] : memref<32x128xf32, #tpu.memory_space<vmem>>, vector<32x128xf32>
      %c0_12 = arith.constant 0 : index
      %c0_13 = arith.constant 0 : index
      %13 = vector.load %arg4[%c0_12, %c0_13] : memref<1x128xf32, #tpu.memory_space<vmem>>, vector<1x128xf32>
      %14 = vector.broadcast %13 : vector<1x128xf32> to vector<32x128xf32>
      %15 = arith.addf %12, %14 : vector<32x128xf32>
      %cst_14 = arith.constant 0.000000e+00 : f32
      %16 = vector.broadcast %cst_14 : f32 to vector<32x128xf32>
      %17 = arith.maximumf %15, %16 : vector<32x128xf32>
      %18 = arith.truncf %17 : vector<32x128xf32> to vector<32x128xbf16>
      %c0_15 = arith.constant 0 : index
      %c0_16 = arith.constant 0 : index
      %19 = vector.load %arg5[%c0_15, %c0_16] : memref<32x128xbf16, #tpu.memory_space<vmem>>, vector<32x128xbf16>
      tpu.vector_store %arg5[%c0_15, %c0_16], %18 {strides = array<i32>} : memref<32x128xbf16, #tpu.memory_space<vmem>>, vector<32x128xbf16>,
    } else {
    }
    return
  }
  func.func @transform_0(%arg0: i32, %arg1: i32) -> (i32, i32) {
    %c0_i32 = arith.constant 0 : i32
    return %arg0, %arg1 : i32, i32
  }
  func.func @transform_1(%arg0: i32, %arg1: i32) -> (i32, i32) {
    %c0_i32 = arith.constant 0 : i32
    %c0_i32_0 = arith.constant 0 : i32
    return %arg1, %c0_i32 : i32, i32
  }
  func.func @transform_2(%arg0: i32, %arg1: i32) -> (i32, i32) {
    %c0_i32 = arith.constant 0 : i32
    %c0_i32_0 = arith.constant 0 : i32
    %c0_i32_1 = arith.constant 0 : i32
    return %c0_i32, %c0_i32_0 : i32, i32
  }
  func.func @transform_3(%arg0: i32, %arg1: i32) -> (i32, i32) {
    %c0_i32 = arith.constant 0 : i32
    %c0_i32_0 = arith.constant 0 : i32
    return %arg0, %c0_i32 : i32, i32
  }
}

module attributes {stable_mosaic.version = 11 : i64} {
  func.func @_mm_res_kernel(%arg0: i32, %arg1: i32, %arg2: memref<32x384xbf16, #tpu.memory_space<vmem>>, %arg3: memref<384x128xbf16, #tpu.memory_space<vmem>>, %arg4: memref<1x128xf32, #tpu.memory_space<vmem>>, %arg5: memref<32x128xbf16, #tpu.memory_space<vmem>>, %arg6: memref<32x128xbf16, #tpu.memory_space<vmem>>, %arg7: memref<32x128xf32, #tpu.memory_space<vmem>>) attributes {dimension_semantics = [#tpu.dimension_semantics<parallel>, #tpu.dimension_semantics<arbitrary>], iteration_bounds = array<i64: 1, 3>, scalar_prefetch = 0 : i64, scratch_operands = 1 : i64, tpu.core_type = #tpu.core_type<tc>, window_params = [{transform_indices = @transform_0, window_bounds = array<i64: 32, 384>}, {transform_indices = @transform_1, window_bounds = array<i64: 384, 128>}, {pipeline_mode = #tpu.pipeline_mode<synchronous>, transform_indices = @transform_2, window_bounds = array<i64: 1, 128>}, {transform_indices = @transform_3, window_bounds = array<i64: 32, 128>}, {transform_indices = @transform_4, window_bounds = array<i64: 32, 128>}]} {
    %c0_i32 = arith.constant 0 : i32
    %0 = arith.cmpi eq, %arg1, %c0_i32 : i32
    %1 = arith.extui %0 : i1 to i32
    %c0_i32_0 = arith.constant 0 : i32
    %2 = arith.cmpi ne, %1, %c0_i32_0 : i32
    scf.if %2 {
      %cst_9 = arith.constant 0.000000e+00 : f32
      %12 = vector.broadcast %cst_9 : f32 to vector<32x128xf32>
      %c0_10 = arith.constant 0 : index
      %c0_11 = arith.constant 0 : index
      %13 = vector.load %arg7[%c0_10, %c0_11] : memref<32x128xf32, #tpu.memory_space<vmem>>, vector<32x128xf32>
      tpu.vector_store %arg7[%c0_10, %c0_11], %12 {strides = array<i32>} : memref<32x128xf32, #tpu.memory_space<vmem>>, vector<32x128xf32>,
    } else {
    }
    %c0 = arith.constant 0 : index
    %c0_1 = arith.constant 0 : index
    %3 = vector.load %arg7[%c0, %c0_1] : memref<32x128xf32, #tpu.memory_space<vmem>>, vector<32x128xf32>
    %c0_2 = arith.constant 0 : index
    %c0_3 = arith.constant 0 : index
    %4 = vector.load %arg2[%c0_2, %c0_3] : memref<32x384xbf16, #tpu.memory_space<vmem>>, vector<32x384xbf16>
    %c0_4 = arith.constant 0 : index
    %c0_5 = arith.constant 0 : index
    %5 = vector.load %arg3[%c0_4, %c0_5] : memref<384x128xbf16, #tpu.memory_space<vmem>>, vector<384x128xbf16>
    %cst = arith.constant dense<0.000000e+00> : vector<32x128xf32>
    %6 = tpu.matmul %4, %5, %cst {dimension_numbers = #tpu.dot_dimension_numbers<[1], [0], [0], [1], [0, 0, 1, 1], [], []>} : vector<32x384xbf16>, vector<384x128xbf16>, vector<32x128xf32> -> vector<32x128xf32>
    %7 = arith.addf %3, %6 : vector<32x128xf32>
    %c0_6 = arith.constant 0 : index
    %c0_7 = arith.constant 0 : index
    %8 = vector.load %arg7[%c0_6, %c0_7] : memref<32x128xf32, #tpu.memory_space<vmem>>, vector<32x128xf32>
    tpu.vector_store %arg7[%c0_6, %c0_7], %7 {strides = array<i32>} : memref<32x128xf32, #tpu.memory_space<vmem>>, vector<32x128xf32>,
    %c2_i32 = arith.constant 2 : i32
    %9 = arith.cmpi eq, %arg1, %c2_i32 : i32
    %10 = arith.extui %9 : i1 to i32
    %c0_i32_8 = arith.constant 0 : i32
    %11 = arith.cmpi ne, %10, %c0_i32_8 : i32
    scf.if %11 {
      %c0_9 = arith.constant 0 : index
      %c0_10 = arith.constant 0 : index
      %12 = vector.load %arg7[%c0_9, %c0_10] : memref<32x128xf32, #tpu.memory_space<vmem>>, vector<32x128xf32>
      %c0_11 = arith.constant 0 : index
      %c0_12 = arith.constant 0 : index
      %13 = vector.load %arg4[%c0_11, %c0_12] : memref<1x128xf32, #tpu.memory_space<vmem>>, vector<1x128xf32>
      %14 = vector.broadcast %13 : vector<1x128xf32> to vector<32x128xf32>
      %15 = arith.addf %12, %14 : vector<32x128xf32>
      %c0_13 = arith.constant 0 : index
      %c0_14 = arith.constant 0 : index
      %16 = vector.load %arg5[%c0_13, %c0_14] : memref<32x128xbf16, #tpu.memory_space<vmem>>, vector<32x128xbf16>
      %17 = arith.extf %16 : vector<32x128xbf16> to vector<32x128xf32>
      %18 = arith.addf %15, %17 : vector<32x128xf32>
      %cst_15 = arith.constant 0.000000e+00 : f32
      %19 = vector.broadcast %cst_15 : f32 to vector<32x128xf32>
      %20 = arith.maximumf %18, %19 : vector<32x128xf32>
      %21 = arith.truncf %20 : vector<32x128xf32> to vector<32x128xbf16>
      %c0_16 = arith.constant 0 : index
      %c0_17 = arith.constant 0 : index
      %22 = vector.load %arg6[%c0_16, %c0_17] : memref<32x128xbf16, #tpu.memory_space<vmem>>, vector<32x128xbf16>
      tpu.vector_store %arg6[%c0_16, %c0_17], %21 {strides = array<i32>} : memref<32x128xbf16, #tpu.memory_space<vmem>>, vector<32x128xbf16>,
    } else {
    }
    return
  }
  func.func @transform_0(%arg0: i32, %arg1: i32) -> (i32, i32) {
    %c0_i32 = arith.constant 0 : i32
    return %arg0, %arg1 : i32, i32
  }
  func.func @transform_1(%arg0: i32, %arg1: i32) -> (i32, i32) {
    %c0_i32 = arith.constant 0 : i32
    %c0_i32_0 = arith.constant 0 : i32
    return %arg1, %c0_i32 : i32, i32
  }
  func.func @transform_2(%arg0: i32, %arg1: i32) -> (i32, i32) {
    %c0_i32 = arith.constant 0 : i32
    %c0_i32_0 = arith.constant 0 : i32
    %c0_i32_1 = arith.constant 0 : i32
    return %c0_i32, %c0_i32_0 : i32, i32
  }
  func.func @transform_3(%arg0: i32, %arg1: i32) -> (i32, i32) {
    %c0_i32 = arith.constant 0 : i32
    %c0_i32_0 = arith.constant 0 : i32
    return %arg0, %c0_i32 : i32, i32
  }
  func.func @transform_4(%arg0: i32, %arg1: i32) -> (i32, i32) {
    %c0_i32 = arith.constant 0 : i32
    %c0_i32_0 = arith.constant 0 : i32
    return %arg0, %c0_i32 : i32, i32
  }
}

module attributes {stable_mosaic.version = 11 : i64} {
  func.func @_mm_kernel(%arg0: i32, %arg1: i32, %arg2: memref<8x128xbf16, #tpu.memory_space<vmem>>, %arg3: memref<128x256xbf16, #tpu.memory_space<vmem>>, %arg4: memref<1x256xf32, #tpu.memory_space<vmem>>, %arg5: memref<8x256xbf16, #tpu.memory_space<vmem>>, %arg6: memref<8x256xf32, #tpu.memory_space<vmem>>) attributes {dimension_semantics = [#tpu.dimension_semantics<parallel>, #tpu.dimension_semantics<arbitrary>], iteration_bounds = array<i64: 1, 1>, scalar_prefetch = 0 : i64, scratch_operands = 1 : i64, tpu.core_type = #tpu.core_type<tc>, window_params = [{transform_indices = @transform_0, window_bounds = array<i64: 8, 128>}, {transform_indices = @transform_1, window_bounds = array<i64: 128, 256>}, {pipeline_mode = #tpu.pipeline_mode<synchronous>, transform_indices = @transform_2, window_bounds = array<i64: 1, 256>}, {transform_indices = @transform_3, window_bounds = array<i64: 8, 256>}]} {
    %c0_i32 = arith.constant 0 : i32
    %0 = arith.cmpi eq, %arg1, %c0_i32 : i32
    %1 = arith.extui %0 : i1 to i32
    %c0_i32_0 = arith.constant 0 : i32
    %2 = arith.cmpi ne, %1, %c0_i32_0 : i32
    scf.if %2 {
      %cst_10 = arith.constant 0.000000e+00 : f32
      %12 = vector.broadcast %cst_10 : f32 to vector<8x256xf32>
      %c0_11 = arith.constant 0 : index
      %c0_12 = arith.constant 0 : index
      %13 = vector.load %arg6[%c0_11, %c0_12] : memref<8x256xf32, #tpu.memory_space<vmem>>, vector<8x256xf32>
      tpu.vector_store %arg6[%c0_11, %c0_12], %12 {strides = array<i32>} : memref<8x256xf32, #tpu.memory_space<vmem>>, vector<8x256xf32>,
    } else {
    }
    %c0 = arith.constant 0 : index
    %c0_1 = arith.constant 0 : index
    %3 = vector.load %arg6[%c0, %c0_1] : memref<8x256xf32, #tpu.memory_space<vmem>>, vector<8x256xf32>
    %c0_2 = arith.constant 0 : index
    %c0_3 = arith.constant 0 : index
    %4 = vector.load %arg2[%c0_2, %c0_3] : memref<8x128xbf16, #tpu.memory_space<vmem>>, vector<8x128xbf16>
    %c0_4 = arith.constant 0 : index
    %c0_5 = arith.constant 0 : index
    %5 = vector.load %arg3[%c0_4, %c0_5] : memref<128x256xbf16, #tpu.memory_space<vmem>>, vector<128x256xbf16>
    %cst = arith.constant dense<0.000000e+00> : vector<8x256xf32>
    %6 = tpu.matmul %4, %5, %cst {dimension_numbers = #tpu.dot_dimension_numbers<[1], [0], [0], [1], [0, 0, 1, 1], [], []>} : vector<8x128xbf16>, vector<128x256xbf16>, vector<8x256xf32> -> vector<8x256xf32>
    %7 = arith.addf %3, %6 : vector<8x256xf32>
    %c0_6 = arith.constant 0 : index
    %c0_7 = arith.constant 0 : index
    %8 = vector.load %arg6[%c0_6, %c0_7] : memref<8x256xf32, #tpu.memory_space<vmem>>, vector<8x256xf32>
    tpu.vector_store %arg6[%c0_6, %c0_7], %7 {strides = array<i32>} : memref<8x256xf32, #tpu.memory_space<vmem>>, vector<8x256xf32>,
    %c0_i32_8 = arith.constant 0 : i32
    %9 = arith.cmpi eq, %arg1, %c0_i32_8 : i32
    %10 = arith.extui %9 : i1 to i32
    %c0_i32_9 = arith.constant 0 : i32
    %11 = arith.cmpi ne, %10, %c0_i32_9 : i32
    scf.if %11 {
      %c0_10 = arith.constant 0 : index
      %c0_11 = arith.constant 0 : index
      %12 = vector.load %arg6[%c0_10, %c0_11] : memref<8x256xf32, #tpu.memory_space<vmem>>, vector<8x256xf32>
      %c0_12 = arith.constant 0 : index
      %c0_13 = arith.constant 0 : index
      %13 = vector.load %arg4[%c0_12, %c0_13] : memref<1x256xf32, #tpu.memory_space<vmem>>, vector<1x256xf32>
      %14 = vector.broadcast %13 : vector<1x256xf32> to vector<8x256xf32>
      %15 = arith.addf %12, %14 : vector<8x256xf32>
      %16 = arith.truncf %15 : vector<8x256xf32> to vector<8x256xbf16>
      %c0_14 = arith.constant 0 : index
      %c0_15 = arith.constant 0 : index
      %17 = vector.load %arg5[%c0_14, %c0_15] : memref<8x256xbf16, #tpu.memory_space<vmem>>, vector<8x256xbf16>
      tpu.vector_store %arg5[%c0_14, %c0_15], %16 {strides = array<i32>} : memref<8x256xbf16, #tpu.memory_space<vmem>>, vector<8x256xbf16>,
    } else {
    }
    return
  }
  func.func @transform_0(%arg0: i32, %arg1: i32) -> (i32, i32) {
    %c0_i32 = arith.constant 0 : i32
    return %arg0, %arg1 : i32, i32
  }
  func.func @transform_1(%arg0: i32, %arg1: i32) -> (i32, i32) {
    %c0_i32 = arith.constant 0 : i32
    %c0_i32_0 = arith.constant 0 : i32
    return %arg1, %c0_i32 : i32, i32
  }
  func.func @transform_2(%arg0: i32, %arg1: i32) -> (i32, i32) {
    %c0_i32 = arith.constant 0 : i32
    %c0_i32_0 = arith.constant 0 : i32
    %c0_i32_1 = arith.constant 0 : i32
    return %c0_i32, %c0_i32_0 : i32, i32
  }
  func.func @transform_3(%arg0: i32, %arg1: i32) -> (i32, i32) {
    %c0_i32 = arith.constant 0 : i32
    %c0_i32_0 = arith.constant 0 : i32
    return %arg0, %c0_i32 : i32, i32
  }
}

module attributes {stable_mosaic.version = 11 : i64} {
  func.func @_mm_kernel(%arg0: i32, %arg1: i32, %arg2: memref<8x384xbf16, #tpu.memory_space<vmem>>, %arg3: memref<384x256xbf16, #tpu.memory_space<vmem>>, %arg4: memref<1x256xf32, #tpu.memory_space<vmem>>, %arg5: memref<8x256xbf16, #tpu.memory_space<vmem>>, %arg6: memref<8x256xf32, #tpu.memory_space<vmem>>) attributes {dimension_semantics = [#tpu.dimension_semantics<parallel>, #tpu.dimension_semantics<arbitrary>], iteration_bounds = array<i64: 1, 3>, scalar_prefetch = 0 : i64, scratch_operands = 1 : i64, tpu.core_type = #tpu.core_type<tc>, window_params = [{transform_indices = @transform_0, window_bounds = array<i64: 8, 384>}, {transform_indices = @transform_1, window_bounds = array<i64: 384, 256>}, {pipeline_mode = #tpu.pipeline_mode<synchronous>, transform_indices = @transform_2, window_bounds = array<i64: 1, 256>}, {transform_indices = @transform_3, window_bounds = array<i64: 8, 256>}]} {
    %c0_i32 = arith.constant 0 : i32
    %0 = arith.cmpi eq, %arg1, %c0_i32 : i32
    %1 = arith.extui %0 : i1 to i32
    %c0_i32_0 = arith.constant 0 : i32
    %2 = arith.cmpi ne, %1, %c0_i32_0 : i32
    scf.if %2 {
      %cst_9 = arith.constant 0.000000e+00 : f32
      %12 = vector.broadcast %cst_9 : f32 to vector<8x256xf32>
      %c0_10 = arith.constant 0 : index
      %c0_11 = arith.constant 0 : index
      %13 = vector.load %arg6[%c0_10, %c0_11] : memref<8x256xf32, #tpu.memory_space<vmem>>, vector<8x256xf32>
      tpu.vector_store %arg6[%c0_10, %c0_11], %12 {strides = array<i32>} : memref<8x256xf32, #tpu.memory_space<vmem>>, vector<8x256xf32>,
    } else {
    }
    %c0 = arith.constant 0 : index
    %c0_1 = arith.constant 0 : index
    %3 = vector.load %arg6[%c0, %c0_1] : memref<8x256xf32, #tpu.memory_space<vmem>>, vector<8x256xf32>
    %c0_2 = arith.constant 0 : index
    %c0_3 = arith.constant 0 : index
    %4 = vector.load %arg2[%c0_2, %c0_3] : memref<8x384xbf16, #tpu.memory_space<vmem>>, vector<8x384xbf16>
    %c0_4 = arith.constant 0 : index
    %c0_5 = arith.constant 0 : index
    %5 = vector.load %arg3[%c0_4, %c0_5] : memref<384x256xbf16, #tpu.memory_space<vmem>>, vector<384x256xbf16>
    %cst = arith.constant dense<0.000000e+00> : vector<8x256xf32>
    %6 = tpu.matmul %4, %5, %cst {dimension_numbers = #tpu.dot_dimension_numbers<[1], [0], [0], [1], [0, 0, 1, 1], [], []>} : vector<8x384xbf16>, vector<384x256xbf16>, vector<8x256xf32> -> vector<8x256xf32>
    %7 = arith.addf %3, %6 : vector<8x256xf32>
    %c0_6 = arith.constant 0 : index
    %c0_7 = arith.constant 0 : index
    %8 = vector.load %arg6[%c0_6, %c0_7] : memref<8x256xf32, #tpu.memory_space<vmem>>, vector<8x256xf32>
    tpu.vector_store %arg6[%c0_6, %c0_7], %7 {strides = array<i32>} : memref<8x256xf32, #tpu.memory_space<vmem>>, vector<8x256xf32>,
    %c2_i32 = arith.constant 2 : i32
    %9 = arith.cmpi eq, %arg1, %c2_i32 : i32
    %10 = arith.extui %9 : i1 to i32
    %c0_i32_8 = arith.constant 0 : i32
    %11 = arith.cmpi ne, %10, %c0_i32_8 : i32
    scf.if %11 {
      %c0_9 = arith.constant 0 : index
      %c0_10 = arith.constant 0 : index
      %12 = vector.load %arg6[%c0_9, %c0_10] : memref<8x256xf32, #tpu.memory_space<vmem>>, vector<8x256xf32>
      %c0_11 = arith.constant 0 : index
      %c0_12 = arith.constant 0 : index
      %13 = vector.load %arg4[%c0_11, %c0_12] : memref<1x256xf32, #tpu.memory_space<vmem>>, vector<1x256xf32>
      %14 = vector.broadcast %13 : vector<1x256xf32> to vector<8x256xf32>
      %15 = arith.addf %12, %14 : vector<8x256xf32>
      %cst_13 = arith.constant 0.000000e+00 : f32
      %16 = vector.broadcast %cst_13 : f32 to vector<8x256xf32>
      %17 = arith.maximumf %15, %16 : vector<8x256xf32>
      %18 = arith.truncf %17 : vector<8x256xf32> to vector<8x256xbf16>
      %c0_14 = arith.constant 0 : index
      %c0_15 = arith.constant 0 : index
      %19 = vector.load %arg5[%c0_14, %c0_15] : memref<8x256xbf16, #tpu.memory_space<vmem>>, vector<8x256xbf16>
      tpu.vector_store %arg5[%c0_14, %c0_15], %18 {strides = array<i32>} : memref<8x256xbf16, #tpu.memory_space<vmem>>, vector<8x256xbf16>,
    } else {
    }
    return
  }
  func.func @transform_0(%arg0: i32, %arg1: i32) -> (i32, i32) {
    %c0_i32 = arith.constant 0 : i32
    return %arg0, %arg1 : i32, i32
  }
  func.func @transform_1(%arg0: i32, %arg1: i32) -> (i32, i32) {
    %c0_i32 = arith.constant 0 : i32
    %c0_i32_0 = arith.constant 0 : i32
    return %arg1, %c0_i32 : i32, i32
  }
  func.func @transform_2(%arg0: i32, %arg1: i32) -> (i32, i32) {
    %c0_i32 = arith.constant 0 : i32
    %c0_i32_0 = arith.constant 0 : i32
    %c0_i32_1 = arith.constant 0 : i32
    return %c0_i32, %c0_i32_0 : i32, i32
  }
  func.func @transform_3(%arg0: i32, %arg1: i32) -> (i32, i32) {
    %c0_i32 = arith.constant 0 : i32
    %c0_i32_0 = arith.constant 0 : i32
    return %arg0, %c0_i32 : i32, i32
  }
}

module attributes {stable_mosaic.version = 11 : i64} {
  func.func @_mm_res_kernel(%arg0: i32, %arg1: i32, %arg2: memref<8x384xbf16, #tpu.memory_space<vmem>>, %arg3: memref<384x256xbf16, #tpu.memory_space<vmem>>, %arg4: memref<1x256xf32, #tpu.memory_space<vmem>>, %arg5: memref<8x256xbf16, #tpu.memory_space<vmem>>, %arg6: memref<8x256xbf16, #tpu.memory_space<vmem>>, %arg7: memref<8x256xf32, #tpu.memory_space<vmem>>) attributes {dimension_semantics = [#tpu.dimension_semantics<parallel>, #tpu.dimension_semantics<arbitrary>], iteration_bounds = array<i64: 1, 6>, scalar_prefetch = 0 : i64, scratch_operands = 1 : i64, tpu.core_type = #tpu.core_type<tc>, window_params = [{transform_indices = @transform_0, window_bounds = array<i64: 8, 384>}, {transform_indices = @transform_1, window_bounds = array<i64: 384, 256>}, {pipeline_mode = #tpu.pipeline_mode<synchronous>, transform_indices = @transform_2, window_bounds = array<i64: 1, 256>}, {transform_indices = @transform_3, window_bounds = array<i64: 8, 256>}, {transform_indices = @transform_4, window_bounds = array<i64: 8, 256>}]} {
    %c0_i32 = arith.constant 0 : i32
    %0 = arith.cmpi eq, %arg1, %c0_i32 : i32
    %1 = arith.extui %0 : i1 to i32
    %c0_i32_0 = arith.constant 0 : i32
    %2 = arith.cmpi ne, %1, %c0_i32_0 : i32
    scf.if %2 {
      %cst_9 = arith.constant 0.000000e+00 : f32
      %12 = vector.broadcast %cst_9 : f32 to vector<8x256xf32>
      %c0_10 = arith.constant 0 : index
      %c0_11 = arith.constant 0 : index
      %13 = vector.load %arg7[%c0_10, %c0_11] : memref<8x256xf32, #tpu.memory_space<vmem>>, vector<8x256xf32>
      tpu.vector_store %arg7[%c0_10, %c0_11], %12 {strides = array<i32>} : memref<8x256xf32, #tpu.memory_space<vmem>>, vector<8x256xf32>,
    } else {
    }
    %c0 = arith.constant 0 : index
    %c0_1 = arith.constant 0 : index
    %3 = vector.load %arg7[%c0, %c0_1] : memref<8x256xf32, #tpu.memory_space<vmem>>, vector<8x256xf32>
    %c0_2 = arith.constant 0 : index
    %c0_3 = arith.constant 0 : index
    %4 = vector.load %arg2[%c0_2, %c0_3] : memref<8x384xbf16, #tpu.memory_space<vmem>>, vector<8x384xbf16>
    %c0_4 = arith.constant 0 : index
    %c0_5 = arith.constant 0 : index
    %5 = vector.load %arg3[%c0_4, %c0_5] : memref<384x256xbf16, #tpu.memory_space<vmem>>, vector<384x256xbf16>
    %cst = arith.constant dense<0.000000e+00> : vector<8x256xf32>
    %6 = tpu.matmul %4, %5, %cst {dimension_numbers = #tpu.dot_dimension_numbers<[1], [0], [0], [1], [0, 0, 1, 1], [], []>} : vector<8x384xbf16>, vector<384x256xbf16>, vector<8x256xf32> -> vector<8x256xf32>
    %7 = arith.addf %3, %6 : vector<8x256xf32>
    %c0_6 = arith.constant 0 : index
    %c0_7 = arith.constant 0 : index
    %8 = vector.load %arg7[%c0_6, %c0_7] : memref<8x256xf32, #tpu.memory_space<vmem>>, vector<8x256xf32>
    tpu.vector_store %arg7[%c0_6, %c0_7], %7 {strides = array<i32>} : memref<8x256xf32, #tpu.memory_space<vmem>>, vector<8x256xf32>,
    %c5_i32 = arith.constant 5 : i32
    %9 = arith.cmpi eq, %arg1, %c5_i32 : i32
    %10 = arith.extui %9 : i1 to i32
    %c0_i32_8 = arith.constant 0 : i32
    %11 = arith.cmpi ne, %10, %c0_i32_8 : i32
    scf.if %11 {
      %c0_9 = arith.constant 0 : index
      %c0_10 = arith.constant 0 : index
      %12 = vector.load %arg7[%c0_9, %c0_10] : memref<8x256xf32, #tpu.memory_space<vmem>>, vector<8x256xf32>
      %c0_11 = arith.constant 0 : index
      %c0_12 = arith.constant 0 : index
      %13 = vector.load %arg4[%c0_11, %c0_12] : memref<1x256xf32, #tpu.memory_space<vmem>>, vector<1x256xf32>
      %14 = vector.broadcast %13 : vector<1x256xf32> to vector<8x256xf32>
      %15 = arith.addf %12, %14 : vector<8x256xf32>
      %c0_13 = arith.constant 0 : index
      %c0_14 = arith.constant 0 : index
      %16 = vector.load %arg5[%c0_13, %c0_14] : memref<8x256xbf16, #tpu.memory_space<vmem>>, vector<8x256xbf16>
      %17 = arith.extf %16 : vector<8x256xbf16> to vector<8x256xf32>
      %18 = arith.addf %15, %17 : vector<8x256xf32>
      %cst_15 = arith.constant 0.000000e+00 : f32
      %19 = vector.broadcast %cst_15 : f32 to vector<8x256xf32>
      %20 = arith.maximumf %18, %19 : vector<8x256xf32>
      %21 = arith.truncf %20 : vector<8x256xf32> to vector<8x256xbf16>
      %c0_16 = arith.constant 0 : index
      %c0_17 = arith.constant 0 : index
      %22 = vector.load %arg6[%c0_16, %c0_17] : memref<8x256xbf16, #tpu.memory_space<vmem>>, vector<8x256xbf16>
      tpu.vector_store %arg6[%c0_16, %c0_17], %21 {strides = array<i32>} : memref<8x256xbf16, #tpu.memory_space<vmem>>, vector<8x256xbf16>,
    } else {
    }
    return
  }
  func.func @transform_0(%arg0: i32, %arg1: i32) -> (i32, i32) {
    %c0_i32 = arith.constant 0 : i32
    return %arg0, %arg1 : i32, i32
  }
  func.func @transform_1(%arg0: i32, %arg1: i32) -> (i32, i32) {
    %c0_i32 = arith.constant 0 : i32
    %c0_i32_0 = arith.constant 0 : i32
    return %arg1, %c0_i32 : i32, i32
  }
  func.func @transform_2(%arg0: i32, %arg1: i32) -> (i32, i32) {
    %c0_i32 = arith.constant 0 : i32
    %c0_i32_0 = arith.constant 0 : i32
    %c0_i32_1 = arith.constant 0 : i32
    return %c0_i32, %c0_i32_0 : i32, i32
  }
  func.func @transform_3(%arg0: i32, %arg1: i32) -> (i32, i32) {
    %c0_i32 = arith.constant 0 : i32
    %c0_i32_0 = arith.constant 0 : i32
    return %arg0, %c0_i32 : i32, i32
  }
  func.func @transform_4(%arg0: i32, %arg1: i32) -> (i32, i32) {
    %c0_i32 = arith.constant 0 : i32
    %c0_i32_0 = arith.constant 0 : i32
    return %arg0, %c0_i32 : i32, i32
  }
}

module attributes {stable_mosaic.version = 11 : i64} {
  func.func @_mm_kernel(%arg0: i32, %arg1: i32, %arg2: memref<8x256xbf16, #tpu.memory_space<vmem>>, %arg3: memref<256x512xbf16, #tpu.memory_space<vmem>>, %arg4: memref<1x512xf32, #tpu.memory_space<vmem>>, %arg5: memref<8x512xbf16, #tpu.memory_space<vmem>>, %arg6: memref<8x512xf32, #tpu.memory_space<vmem>>) attributes {dimension_semantics = [#tpu.dimension_semantics<parallel>, #tpu.dimension_semantics<arbitrary>], iteration_bounds = array<i64: 1, 1>, scalar_prefetch = 0 : i64, scratch_operands = 1 : i64, tpu.core_type = #tpu.core_type<tc>, window_params = [{transform_indices = @transform_0, window_bounds = array<i64: 8, 256>}, {transform_indices = @transform_1, window_bounds = array<i64: 256, 512>}, {pipeline_mode = #tpu.pipeline_mode<synchronous>, transform_indices = @transform_2, window_bounds = array<i64: 1, 512>}, {transform_indices = @transform_3, window_bounds = array<i64: 8, 512>}]} {
    %c0_i32 = arith.constant 0 : i32
    %0 = arith.cmpi eq, %arg1, %c0_i32 : i32
    %1 = arith.extui %0 : i1 to i32
    %c0_i32_0 = arith.constant 0 : i32
    %2 = arith.cmpi ne, %1, %c0_i32_0 : i32
    scf.if %2 {
      %cst_10 = arith.constant 0.000000e+00 : f32
      %12 = vector.broadcast %cst_10 : f32 to vector<8x512xf32>
      %c0_11 = arith.constant 0 : index
      %c0_12 = arith.constant 0 : index
      %13 = vector.load %arg6[%c0_11, %c0_12] : memref<8x512xf32, #tpu.memory_space<vmem>>, vector<8x512xf32>
      tpu.vector_store %arg6[%c0_11, %c0_12], %12 {strides = array<i32>} : memref<8x512xf32, #tpu.memory_space<vmem>>, vector<8x512xf32>,
    } else {
    }
    %c0 = arith.constant 0 : index
    %c0_1 = arith.constant 0 : index
    %3 = vector.load %arg6[%c0, %c0_1] : memref<8x512xf32, #tpu.memory_space<vmem>>, vector<8x512xf32>
    %c0_2 = arith.constant 0 : index
    %c0_3 = arith.constant 0 : index
    %4 = vector.load %arg2[%c0_2, %c0_3] : memref<8x256xbf16, #tpu.memory_space<vmem>>, vector<8x256xbf16>
    %c0_4 = arith.constant 0 : index
    %c0_5 = arith.constant 0 : index
    %5 = vector.load %arg3[%c0_4, %c0_5] : memref<256x512xbf16, #tpu.memory_space<vmem>>, vector<256x512xbf16>
    %cst = arith.constant dense<0.000000e+00> : vector<8x512xf32>
    %6 = tpu.matmul %4, %5, %cst {dimension_numbers = #tpu.dot_dimension_numbers<[1], [0], [0], [1], [0, 0, 1, 1], [], []>} : vector<8x256xbf16>, vector<256x512xbf16>, vector<8x512xf32> -> vector<8x512xf32>
    %7 = arith.addf %3, %6 : vector<8x512xf32>
    %c0_6 = arith.constant 0 : index
    %c0_7 = arith.constant 0 : index
    %8 = vector.load %arg6[%c0_6, %c0_7] : memref<8x512xf32, #tpu.memory_space<vmem>>, vector<8x512xf32>
    tpu.vector_store %arg6[%c0_6, %c0_7], %7 {strides = array<i32>} : memref<8x512xf32, #tpu.memory_space<vmem>>, vector<8x512xf32>,
    %c0_i32_8 = arith.constant 0 : i32
    %9 = arith.cmpi eq, %arg1, %c0_i32_8 : i32
    %10 = arith.extui %9 : i1 to i32
    %c0_i32_9 = arith.constant 0 : i32
    %11 = arith.cmpi ne, %10, %c0_i32_9 : i32
    scf.if %11 {
      %c0_10 = arith.constant 0 : index
      %c0_11 = arith.constant 0 : index
      %12 = vector.load %arg6[%c0_10, %c0_11] : memref<8x512xf32, #tpu.memory_space<vmem>>, vector<8x512xf32>
      %c0_12 = arith.constant 0 : index
      %c0_13 = arith.constant 0 : index
      %13 = vector.load %arg4[%c0_12, %c0_13] : memref<1x512xf32, #tpu.memory_space<vmem>>, vector<1x512xf32>
      %14 = vector.broadcast %13 : vector<1x512xf32> to vector<8x512xf32>
      %15 = arith.addf %12, %14 : vector<8x512xf32>
      %16 = arith.truncf %15 : vector<8x512xf32> to vector<8x512xbf16>
      %c0_14 = arith.constant 0 : index
      %c0_15 = arith.constant 0 : index
      %17 = vector.load %arg5[%c0_14, %c0_15] : memref<8x512xbf16, #tpu.memory_space<vmem>>, vector<8x512xbf16>
      tpu.vector_store %arg5[%c0_14, %c0_15], %16 {strides = array<i32>} : memref<8x512xbf16, #tpu.memory_space<vmem>>, vector<8x512xbf16>,
    } else {
    }
    return
  }
  func.func @transform_0(%arg0: i32, %arg1: i32) -> (i32, i32) {
    %c0_i32 = arith.constant 0 : i32
    return %arg0, %arg1 : i32, i32
  }
  func.func @transform_1(%arg0: i32, %arg1: i32) -> (i32, i32) {
    %c0_i32 = arith.constant 0 : i32
    %c0_i32_0 = arith.constant 0 : i32
    return %arg1, %c0_i32 : i32, i32
  }
  func.func @transform_2(%arg0: i32, %arg1: i32) -> (i32, i32) {
    %c0_i32 = arith.constant 0 : i32
    %c0_i32_0 = arith.constant 0 : i32
    %c0_i32_1 = arith.constant 0 : i32
    return %c0_i32, %c0_i32_0 : i32, i32
  }
  func.func @transform_3(%arg0: i32, %arg1: i32) -> (i32, i32) {
    %c0_i32 = arith.constant 0 : i32
    %c0_i32_0 = arith.constant 0 : i32
    return %arg0, %c0_i32 : i32, i32
  }
}

module attributes {stable_mosaic.version = 11 : i64} {
  func.func @_mm_kernel(%arg0: i32, %arg1: i32, %arg2: memref<8x384xbf16, #tpu.memory_space<vmem>>, %arg3: memref<384x512xbf16, #tpu.memory_space<vmem>>, %arg4: memref<1x512xf32, #tpu.memory_space<vmem>>, %arg5: memref<8x512xbf16, #tpu.memory_space<vmem>>, %arg6: memref<8x512xf32, #tpu.memory_space<vmem>>) attributes {dimension_semantics = [#tpu.dimension_semantics<parallel>, #tpu.dimension_semantics<arbitrary>], iteration_bounds = array<i64: 1, 6>, scalar_prefetch = 0 : i64, scratch_operands = 1 : i64, tpu.core_type = #tpu.core_type<tc>, window_params = [{transform_indices = @transform_0, window_bounds = array<i64: 8, 384>}, {transform_indices = @transform_1, window_bounds = array<i64: 384, 512>}, {pipeline_mode = #tpu.pipeline_mode<synchronous>, transform_indices = @transform_2, window_bounds = array<i64: 1, 512>}, {transform_indices = @transform_3, window_bounds = array<i64: 8, 512>}]} {
    %c0_i32 = arith.constant 0 : i32
    %0 = arith.cmpi eq, %arg1, %c0_i32 : i32
    %1 = arith.extui %0 : i1 to i32
    %c0_i32_0 = arith.constant 0 : i32
    %2 = arith.cmpi ne, %1, %c0_i32_0 : i32
    scf.if %2 {
      %cst_9 = arith.constant 0.000000e+00 : f32
      %12 = vector.broadcast %cst_9 : f32 to vector<8x512xf32>
      %c0_10 = arith.constant 0 : index
      %c0_11 = arith.constant 0 : index
      %13 = vector.load %arg6[%c0_10, %c0_11] : memref<8x512xf32, #tpu.memory_space<vmem>>, vector<8x512xf32>
      tpu.vector_store %arg6[%c0_10, %c0_11], %12 {strides = array<i32>} : memref<8x512xf32, #tpu.memory_space<vmem>>, vector<8x512xf32>,
    } else {
    }
    %c0 = arith.constant 0 : index
    %c0_1 = arith.constant 0 : index
    %3 = vector.load %arg6[%c0, %c0_1] : memref<8x512xf32, #tpu.memory_space<vmem>>, vector<8x512xf32>
    %c0_2 = arith.constant 0 : index
    %c0_3 = arith.constant 0 : index
    %4 = vector.load %arg2[%c0_2, %c0_3] : memref<8x384xbf16, #tpu.memory_space<vmem>>, vector<8x384xbf16>
    %c0_4 = arith.constant 0 : index
    %c0_5 = arith.constant 0 : index
    %5 = vector.load %arg3[%c0_4, %c0_5] : memref<384x512xbf16, #tpu.memory_space<vmem>>, vector<384x512xbf16>
    %cst = arith.constant dense<0.000000e+00> : vector<8x512xf32>
    %6 = tpu.matmul %4, %5, %cst {dimension_numbers = #tpu.dot_dimension_numbers<[1], [0], [0], [1], [0, 0, 1, 1], [], []>} : vector<8x384xbf16>, vector<384x512xbf16>, vector<8x512xf32> -> vector<8x512xf32>
    %7 = arith.addf %3, %6 : vector<8x512xf32>
    %c0_6 = arith.constant 0 : index
    %c0_7 = arith.constant 0 : index
    %8 = vector.load %arg6[%c0_6, %c0_7] : memref<8x512xf32, #tpu.memory_space<vmem>>, vector<8x512xf32>
    tpu.vector_store %arg6[%c0_6, %c0_7], %7 {strides = array<i32>} : memref<8x512xf32, #tpu.memory_space<vmem>>, vector<8x512xf32>,
    %c5_i32 = arith.constant 5 : i32
    %9 = arith.cmpi eq, %arg1, %c5_i32 : i32
    %10 = arith.extui %9 : i1 to i32
    %c0_i32_8 = arith.constant 0 : i32
    %11 = arith.cmpi ne, %10, %c0_i32_8 : i32
    scf.if %11 {
      %c0_9 = arith.constant 0 : index
      %c0_10 = arith.constant 0 : index
      %12 = vector.load %arg6[%c0_9, %c0_10] : memref<8x512xf32, #tpu.memory_space<vmem>>, vector<8x512xf32>
      %c0_11 = arith.constant 0 : index
      %c0_12 = arith.constant 0 : index
      %13 = vector.load %arg4[%c0_11, %c0_12] : memref<1x512xf32, #tpu.memory_space<vmem>>, vector<1x512xf32>
      %14 = vector.broadcast %13 : vector<1x512xf32> to vector<8x512xf32>
      %15 = arith.addf %12, %14 : vector<8x512xf32>
      %cst_13 = arith.constant 0.000000e+00 : f32
      %16 = vector.broadcast %cst_13 : f32 to vector<8x512xf32>
      %17 = arith.maximumf %15, %16 : vector<8x512xf32>
      %18 = arith.truncf %17 : vector<8x512xf32> to vector<8x512xbf16>
      %c0_14 = arith.constant 0 : index
      %c0_15 = arith.constant 0 : index
      %19 = vector.load %arg5[%c0_14, %c0_15] : memref<8x512xbf16, #tpu.memory_space<vmem>>, vector<8x512xbf16>
      tpu.vector_store %arg5[%c0_14, %c0_15], %18 {strides = array<i32>} : memref<8x512xbf16, #tpu.memory_space<vmem>>, vector<8x512xbf16>,
    } else {
    }
    return
  }
  func.func @transform_0(%arg0: i32, %arg1: i32) -> (i32, i32) {
    %c0_i32 = arith.constant 0 : i32
    return %arg0, %arg1 : i32, i32
  }
  func.func @transform_1(%arg0: i32, %arg1: i32) -> (i32, i32) {
    %c0_i32 = arith.constant 0 : i32
    %c0_i32_0 = arith.constant 0 : i32
    return %arg1, %c0_i32 : i32, i32
  }
  func.func @transform_2(%arg0: i32, %arg1: i32) -> (i32, i32) {
    %c0_i32 = arith.constant 0 : i32
    %c0_i32_0 = arith.constant 0 : i32
    %c0_i32_1 = arith.constant 0 : i32
    return %c0_i32, %c0_i32_0 : i32, i32
  }
  func.func @transform_3(%arg0: i32, %arg1: i32) -> (i32, i32) {
    %c0_i32 = arith.constant 0 : i32
    %c0_i32_0 = arith.constant 0 : i32
    return %arg0, %c0_i32 : i32, i32
  }
}

module attributes {stable_mosaic.version = 11 : i64} {
  func.func @_mm_res_kernel(%arg0: i32, %arg1: i32, %arg2: memref<8x512xbf16, #tpu.memory_space<vmem>>, %arg3: memref<512x512xbf16, #tpu.memory_space<vmem>>, %arg4: memref<1x512xf32, #tpu.memory_space<vmem>>, %arg5: memref<8x512xbf16, #tpu.memory_space<vmem>>, %arg6: memref<8x512xbf16, #tpu.memory_space<vmem>>, %arg7: memref<8x512xf32, #tpu.memory_space<vmem>>) attributes {dimension_semantics = [#tpu.dimension_semantics<parallel>, #tpu.dimension_semantics<arbitrary>], iteration_bounds = array<i64: 1, 9>, scalar_prefetch = 0 : i64, scratch_operands = 1 : i64, tpu.core_type = #tpu.core_type<tc>, window_params = [{transform_indices = @transform_0, window_bounds = array<i64: 8, 512>}, {transform_indices = @transform_1, window_bounds = array<i64: 512, 512>}, {pipeline_mode = #tpu.pipeline_mode<synchronous>, transform_indices = @transform_2, window_bounds = array<i64: 1, 512>}, {transform_indices = @transform_3, window_bounds = array<i64: 8, 512>}, {transform_indices = @transform_4, window_bounds = array<i64: 8, 512>}]} {
    %c0_i32 = arith.constant 0 : i32
    %0 = arith.cmpi eq, %arg1, %c0_i32 : i32
    %1 = arith.extui %0 : i1 to i32
    %c0_i32_0 = arith.constant 0 : i32
    %2 = arith.cmpi ne, %1, %c0_i32_0 : i32
    scf.if %2 {
      %cst_9 = arith.constant 0.000000e+00 : f32
      %12 = vector.broadcast %cst_9 : f32 to vector<8x512xf32>
      %c0_10 = arith.constant 0 : index
      %c0_11 = arith.constant 0 : index
      %13 = vector.load %arg7[%c0_10, %c0_11] : memref<8x512xf32, #tpu.memory_space<vmem>>, vector<8x512xf32>
      tpu.vector_store %arg7[%c0_10, %c0_11], %12 {strides = array<i32>} : memref<8x512xf32, #tpu.memory_space<vmem>>, vector<8x512xf32>,
    } else {
    }
    %c0 = arith.constant 0 : index
    %c0_1 = arith.constant 0 : index
    %3 = vector.load %arg7[%c0, %c0_1] : memref<8x512xf32, #tpu.memory_space<vmem>>, vector<8x512xf32>
    %c0_2 = arith.constant 0 : index
    %c0_3 = arith.constant 0 : index
    %4 = vector.load %arg2[%c0_2, %c0_3] : memref<8x512xbf16, #tpu.memory_space<vmem>>, vector<8x512xbf16>
    %c0_4 = arith.constant 0 : index
    %c0_5 = arith.constant 0 : index
    %5 = vector.load %arg3[%c0_4, %c0_5] : memref<512x512xbf16, #tpu.memory_space<vmem>>, vector<512x512xbf16>
    %cst = arith.constant dense<0.000000e+00> : vector<8x512xf32>
    %6 = tpu.matmul %4, %5, %cst {dimension_numbers = #tpu.dot_dimension_numbers<[1], [0], [0], [1], [0, 0, 1, 1], [], []>} : vector<8x512xbf16>, vector<512x512xbf16>, vector<8x512xf32> -> vector<8x512xf32>
    %7 = arith.addf %3, %6 : vector<8x512xf32>
    %c0_6 = arith.constant 0 : index
    %c0_7 = arith.constant 0 : index
    %8 = vector.load %arg7[%c0_6, %c0_7] : memref<8x512xf32, #tpu.memory_space<vmem>>, vector<8x512xf32>
    tpu.vector_store %arg7[%c0_6, %c0_7], %7 {strides = array<i32>} : memref<8x512xf32, #tpu.memory_space<vmem>>, vector<8x512xf32>,
    %c8_i32 = arith.constant 8 : i32
    %9 = arith.cmpi eq, %arg1, %c8_i32 : i32
    %10 = arith.extui %9 : i1 to i32
    %c0_i32_8 = arith.constant 0 : i32
    %11 = arith.cmpi ne, %10, %c0_i32_8 : i32
    scf.if %11 {
      %c0_9 = arith.constant 0 : index
      %c0_10 = arith.constant 0 : index
      %12 = vector.load %arg7[%c0_9, %c0_10] : memref<8x512xf32, #tpu.memory_space<vmem>>, vector<8x512xf32>
      %c0_11 = arith.constant 0 : index
      %c0_12 = arith.constant 0 : index
      %13 = vector.load %arg4[%c0_11, %c0_12] : memref<1x512xf32, #tpu.memory_space<vmem>>, vector<1x512xf32>
      %14 = vector.broadcast %13 : vector<1x512xf32> to vector<8x512xf32>
      %15 = arith.addf %12, %14 : vector<8x512xf32>
      %c0_13 = arith.constant 0 : index
      %c0_14 = arith.constant 0 : index
      %16 = vector.load %arg5[%c0_13, %c0_14] : memref<8x512xbf16, #tpu.memory_space<vmem>>, vector<8x512xbf16>
      %17 = arith.extf %16 : vector<8x512xbf16> to vector<8x512xf32>
      %18 = arith.addf %15, %17 : vector<8x512xf32>
      %cst_15 = arith.constant 0.000000e+00 : f32
      %19 = vector.broadcast %cst_15 : f32 to vector<8x512xf32>
      %20 = arith.maximumf %18, %19 : vector<8x512xf32>
      %21 = arith.truncf %20 : vector<8x512xf32> to vector<8x512xbf16>
      %c0_16 = arith.constant 0 : index
      %c0_17 = arith.constant 0 : index
      %22 = vector.load %arg6[%c0_16, %c0_17] : memref<8x512xbf16, #tpu.memory_space<vmem>>, vector<8x512xbf16>
      tpu.vector_store %arg6[%c0_16, %c0_17], %21 {strides = array<i32>} : memref<8x512xbf16, #tpu.memory_space<vmem>>, vector<8x512xbf16>,
    } else {
    }
    return
  }
  func.func @transform_0(%arg0: i32, %arg1: i32) -> (i32, i32) {
    %c0_i32 = arith.constant 0 : i32
    return %arg0, %arg1 : i32, i32
  }
  func.func @transform_1(%arg0: i32, %arg1: i32) -> (i32, i32) {
    %c0_i32 = arith.constant 0 : i32
    %c0_i32_0 = arith.constant 0 : i32
    return %arg1, %c0_i32 : i32, i32
  }
  func.func @transform_2(%arg0: i32, %arg1: i32) -> (i32, i32) {
    %c0_i32 = arith.constant 0 : i32
    %c0_i32_0 = arith.constant 0 : i32
    %c0_i32_1 = arith.constant 0 : i32
    return %c0_i32, %c0_i32_0 : i32, i32
  }
  func.func @transform_3(%arg0: i32, %arg1: i32) -> (i32, i32) {
    %c0_i32 = arith.constant 0 : i32
    %c0_i32_0 = arith.constant 0 : i32
    return %arg0, %c0_i32 : i32, i32
  }
  func.func @transform_4(%arg0: i32, %arg1: i32) -> (i32, i32) {
    %c0_i32 = arith.constant 0 : i32
    %c0_i32_0 = arith.constant 0 : i32
    return %arg0, %c0_i32 : i32, i32
  }
}

module attributes {stable_mosaic.version = 11 : i64} {
  func.func @_avgpool_fc_kernel(%arg0: memref<2x1x512xbf16, #tpu.memory_space<vmem>>, %arg1: memref<512x10xf32, #tpu.memory_space<vmem>>, %arg2: memref<1x10xf32, #tpu.memory_space<vmem>>, %arg3: memref<2x10xf32, #tpu.memory_space<vmem>>) attributes {dimension_semantics = [], scalar_prefetch = 0 : i64, scratch_operands = 0 : i64, tpu.core_type = #tpu.core_type<tc>} {
    %c0 = arith.constant 0 : index
    %c0_0 = arith.constant 0 : index
    %c0_1 = arith.constant 0 : index
    %0 = vector.load %arg0[%c0, %c0_0, %c0_1] : memref<2x1x512xbf16, #tpu.memory_space<vmem>>, vector<2x1x512xbf16>
    %1 = arith.extf %0 : vector<2x1x512xbf16> to vector<2x1x512xf32>
    %cst = arith.constant dense<0.000000e+00> : vector<2x512xf32>
    %2 = vector.multi_reduction <add>, %1, %cst [1] : vector<2x1x512xf32> to vector<2x512xf32>
    %cst_2 = arith.constant 1.000000e+00 : f32
    %3 = vector.broadcast %cst_2 : f32 to vector<2x512xf32>
    %4 = arith.mulf %2, %3 : vector<2x512xf32>
    %c0_3 = arith.constant 0 : index
    %c0_4 = arith.constant 0 : index
    %5 = vector.load %arg1[%c0_3, %c0_4] : memref<512x10xf32, #tpu.memory_space<vmem>>, vector<512x10xf32>
    %cst_5 = arith.constant dense<0.000000e+00> : vector<2x10xf32>
    %6 = tpu.matmul %4, %5, %cst_5 {dimension_numbers = #tpu.dot_dimension_numbers<[1], [0], [0], [1], [0, 0, 1, 1], [], []>} : vector<2x512xf32>, vector<512x10xf32>, vector<2x10xf32> -> vector<2x10xf32>
    %c0_6 = arith.constant 0 : index
    %c0_7 = arith.constant 0 : index
    %7 = vector.load %arg2[%c0_6, %c0_7] : memref<1x10xf32, #tpu.memory_space<vmem>>, vector<1x10xf32>
    %8 = vector.broadcast %7 : vector<1x10xf32> to vector<2x10xf32>
    %9 = arith.addf %6, %8 : vector<2x10xf32>
    %c0_8 = arith.constant 0 : index
    %c0_9 = arith.constant 0 : index
    %10 = vector.load %arg3[%c0_8, %c0_9] : memref<2x10xf32, #tpu.memory_space<vmem>>, vector<2x10xf32>
    tpu.vector_store %arg3[%c0_8, %c0_9], %9 {strides = array<i32>} : memref<2x10xf32, #tpu.memory_space<vmem>>, vector<2x10xf32>,
    return
  }
}

</mosaic_0001>

<bundles_post_ra>
// kernel: _lambda_.14
= control target key start
LH: loop header
LB: loop body
LE: loop exit
PB: predicated region body
PF: predicated region fallthrough
CT: control target
= control target key end

     0   :  { %s1585_s12 = smov 0   ;;  %s1587_s13 = smov 0   ;;  %s1871_s0 = inlined_call_operand.vmem [shape: bf16[512,256], index: 0, kind: input, shape index: {}]   ;;  %s1872_s1 = inlined_call_operand.vmem [shape: bf16[256,64], index: 1, kind: input, shape index: {}]   ;;  %s1873_s2 = inlined_call_operand.vmem [shape: f32[1,64], index: 2, kind: input, shape index: {}]   ;;  %s1874_s3 = inlined_call_operand.vmem [shape: bf16[512,64], index: 3, kind: output, shape index: {}]  }
   0x1   :  { %s1589_s14 = smov 0  }
   0x2 LB: > { %s25_s15 = sadd.s32 1, %s1558_s13  ;;  %p1201_p0 = scmp.ge.s32.totalorder %s1562_s14, 1  ;;  %s1562_s14 = sphi %s1589_s14, %s13_s14   ;;  %s1558_s13 = sphi %s1587_s13, %s1876_s13   ;;  %s1554_s12 = sphi %s1585_s12, %s1875_s12  }
   0x3   : > { %p27_p1 = scmp.ge.s32.totalorder %s25_s15, 2  ;;  %p169_p2 = scmp.lt.s32.totalorder %s1562_s14, 3 }
   0x5   : > { %s1878_s15 = smov (%p27_p1, %s25_s15), 0  ;;  %p170_p3 = pnand %p1201_p0, %p169_p2 }
   0x6   : > { %v1476_v0 = vld [vmem:[%s1872_s1 + $0x40] sm:$0xff] (!%p170_p3)   ;;  %s1202_s18 = sshll.u32 (!%p170_p3), %s1554_s12, 5  ;;  %v1478_v2 = vld [vmem:[%s1872_s1 + $0x48] sm:$0xff] (!%p170_p3)   ;;  %v1480_v4 = vld [vmem:[%s1872_s1 + $0x50] sm:$0xff] (!%p170_p3)   ;;  %vm232_vm0 = vcmask (!%p170_p3), 523264   ;;  %v1564_v48 = vmov (!%p170_p3), 0.0  }
   0x7   : > { %173 = sbr.rel (%p170_p3) target bundleno = 332 (0x14c), region = 32  ;;  %v1477_v1 = vld [vmem:[%s1872_s1] sm:$0xff] (!%p170_p3)   ;;  %1323 = vmatprep.subr.bf16.mxu0 (!%p170_p3), %v1476_v0  ;;  %1435 = vmatprep.subr.bf16.mxu1 (!%p170_p3), %v1476_v0  ;;  %v1479_v3 = vld [vmem:[%s1872_s1 + $0x8] sm:$0xff] (!%p170_p3)   ;;  %p205_p4 = scmp.lt.s32.totalorder (!%p170_p3), %s1202_s18, 63  ;;  %v1481_v5 = vld [vmem:[%s1872_s1 + $0x10] sm:$0xff] (!%p170_p3)   ;;  %233 = vst.msk [vmem:[#allocation2] sm:$0xff] (!%p170_p3), %vm232_vm0, %v1564_v48 }
   0x8   : > { %1324 = vmatpush3.bf16.msra.mxu0 (!%p170_p3), %v1477_v1  ;;  %1443 = vmatpush3.bf16.msra.mxu1 (!%p170_p3), %v1477_v1  ;;  %v1482_v6 = vld [vmem:[%s1872_s1 + $0x58] sm:$0xff] (!%p170_p3)   ;;  %v1484_v8 = vld [vmem:[%s1872_s1 + $0x60] sm:$0xff] (!%p170_p3)   ;;  %v1486_v10 = vld [vmem:[%s1872_s1 + $0x68] sm:$0xff] (!%p170_p3)   ;;  %234 = vst.msk [vmem:[#allocation2 + $0x8] sm:$0xff] (!%p170_p3), %vm232_vm0, %v1564_v48  ;;  %vm1077_vm1 = vcmask (!%p170_p3), 519168  }
   0x9   : > { %1325 = vmatprep.subr.bf16.mxu0 (!%p170_p3), %v1478_v2  ;;  %1436 = vmatprep.subr.bf16.mxu1 (!%p170_p3), %v1478_v2  ;;  %v1483_v7 = vld [vmem:[%s1872_s1 + $0x18] sm:$0xff] (!%p170_p3)   ;;  %v1485_v9 = vld [vmem:[%s1872_s1 + $0x20] sm:$0xff] (!%p170_p3)   ;;  %v1487_v13 = vld [vmem:[%s1872_s1 + $0x28] sm:$0xff] (!%p170_p3)   ;;  %235 = vst.msk [vmem:[#allocation2 + $0x10] sm:$0xff] (!%p170_p3), %vm232_vm0, %v1564_v48 }
   0xa   : > { %v1488_v14 = vld [vmem:[%s1872_s1 + $0x70] sm:$0xff] (!%p170_p3)   ;;  %v1490_v16 = vld [vmem:[%s1872_s1 + $0x78] sm:$0xff] (!%p170_p3)   ;;  %236 = vst.msk [vmem:[#allocation2 + $0x18] sm:$0xff] (!%p170_p3), %vm232_vm0, %v1564_v48  ;;  %237 = vst.msk [vmem:[#allocation2 + $0x20] sm:$0xff] (!%p170_p3), %vm232_vm0, %v1564_v48 }
   0xb   : > { %v1489_v15 = vld [vmem:[%s1872_s1 + $0x30] sm:$0xff] (!%p170_p3)   ;;  %v1491_v17 = vld [vmem:[%s1872_s1 + $0x38] sm:$0xff] (!%p170_p3)   ;;  %238 = vst.msk [vmem:[#allocation2 + $0x28] sm:$0xff] (!%p170_p3), %vm232_vm0, %v1564_v48  ;;  %239 = vst.msk [vmem:[#allocation2 + $0x30] sm:$0xff] (!%p170_p3), %vm232_vm0, %v1564_v48 }
   0xc   : > { %1326 = vmatpush3.bf16.msra.mxu0 (!%p170_p3), %v1479_v3  ;;  %1444 = vmatpush3.bf16.msra.mxu1 (!%p170_p3), %v1479_v3  ;;  %240 = vst.msk [vmem:[#allocation2 + $0x38] sm:$0xff] (!%p170_p3), %vm232_vm0, %v1564_v48  ;;  %241 = vst.msk [vmem:[#allocation2 + $0x40] sm:$0xff] (!%p170_p3), %vm232_vm0, %v1564_v48 }
   0xd   : > { %1327 = vmatprep.subr.bf16.mxu0 (!%p170_p3), %v1480_v4  ;;  %1437 = vmatprep.subr.bf16.mxu1 (!%p170_p3), %v1480_v4  ;;  %242 = vst.msk [vmem:[#allocation2 + $0x48] sm:$0xff] (!%p170_p3), %vm232_vm0, %v1564_v48  ;;  %243 = vst.msk [vmem:[#allocation2 + $0x50] sm:$0xff] (!%p170_p3), %vm232_vm0, %v1564_v48 }
   0xe   : > { %s1880_s18 = smov (!%p205_p4, %s1202_s18), 63  ;;  %244 = vst.msk [vmem:[#allocation2 + $0x58] sm:$0xff] %vm232_vm0, %v1564_v48  ;;  %245 = vst.msk [vmem:[#allocation2 + $0x60] sm:$0xff] %vm232_vm0, %v1564_v48  ;;  %v265_v51 = vld [vmem:[#allocation2] sm:$0xff] }
   0xf   : > { %s1290_s6 = sshll.u32 %s1880_s18, 3  ;;  %246 = vst.msk [vmem:[#allocation2 + $0x68] sm:$0xff] %vm232_vm0, %v1564_v48  ;;  %247 = vst.msk [vmem:[#allocation2 + $0x70] sm:$0xff] %vm232_vm0, %v1564_v48  ;;  %v266_v59 = vld [vmem:[#allocation2 + $0x8] sm:$0xff]  ;;  %s1206_s5 = sshll.u32 %s1880_s18, 2 }
  0x10   : > { %1328 = vmatpush3.bf16.msra.mxu0 %v1481_v5  ;;  %1445 = vmatpush3.bf16.msra.mxu1 %v1481_v5  ;;  %s1636_s11 = scalar_lea.vmem %s1871_s0, %s1290_s6  ;;  %248 = vst.msk [vmem:[#allocation2 + $0x78] sm:$0xff] %vm232_vm0, %v1564_v48  ;;  %249 = vst.msk [vmem:[#allocation2 + $0x80] sm:$0xff] %vm232_vm0, %v1564_v48  ;;  %s1744_s7 = scalar_lea.vmem %s1874_s3, %s1206_s5 }
  0x11   : > { %1329 = vmatprep.subr.bf16.mxu0 %v1482_v6  ;;  %1438 = vmatprep.subr.bf16.mxu1 %v1482_v6  ;;  %v1494_v11 = vld [vmem:[%s1636_s11 + $0x4] ss:$8 sps:$4 sm:$0xff]   ;;  %v1492_v18 = vld [vmem:[%s1636_s11] ss:$8 sps:$4 sm:$0xff]   ;;  %v1498_v20 = vld [vmem:[%s1636_s11 + $0x14] ss:$8 sps:$4 sm:$0xff]  }
  0x12   : > { %v1497_v12 = vld [vmem:[%s1636_s11 + $0x84] ss:$8 sps:$4 sm:$0xff]   ;;  %649 = vmatprep.mubr.bf16.mxu0 %v1494_v11  ;;  %v1495_v19 = vld [vmem:[%s1636_s11 + $0x80] ss:$8 sps:$4 sm:$0xff]   ;;  %v1500_v21 = vld [vmem:[%s1636_s11 + $0x94] ss:$8 sps:$4 sm:$0xff]  }
  0x13   : > { %713 = vmatprep.mubr.bf16.mxu1 %v1497_v12  ;;  %v1502_v22 = vld [vmem:[%s1636_s11 + $0x10] ss:$8 sps:$4 sm:$0xff]   ;;  %v1504_v24 = vld [vmem:[%s1636_s11 + $0x24] ss:$8 sps:$4 sm:$0xff]   ;;  %v1508_v26 = vld [vmem:[%s1636_s11 + $0x20] ss:$8 sps:$4 sm:$0xff]  }
  0x14   : > { %1330 = vmatpush3.bf16.msra.mxu0 %v1483_v7  ;;  %1446 = vmatpush3.bf16.msra.mxu1 %v1483_v7  ;;  %v1503_v23 = vld [vmem:[%s1636_s11 + $0x90] ss:$8 sps:$4 sm:$0xff]   ;;  %v1506_v25 = vld [vmem:[%s1636_s11 + $0xa4] ss:$8 sps:$4 sm:$0xff]   ;;  %v1509_v27 = vld [vmem:[%s1636_s11 + $0xa0] ss:$8 sps:$4 sm:$0xff]  }
  0x15   : > { %1331 = vmatprep.subr.bf16.mxu0 %v1484_v8  ;;  %1439 = vmatprep.subr.bf16.mxu1 %v1484_v8  ;;  %v1510_v28 = vld [vmem:[%s1636_s11 + $0x34] ss:$8 sps:$4 sm:$0xff]   ;;  %v1514_v30 = vld [vmem:[%s1636_s11 + $0x30] ss:$8 sps:$4 sm:$0xff]   ;;  %v1516_v32 = vld [vmem:[%s1636_s11 + $0x44] ss:$8 sps:$4 sm:$0xff]  }
  0x16   : > { %v1512_v29 = vld [vmem:[%s1636_s11 + $0xb4] ss:$8 sps:$4 sm:$0xff]   ;;  %v1515_v31 = vld [vmem:[%s1636_s11 + $0xb0] ss:$8 sps:$4 sm:$0xff]   ;;  %v1518_v33 = vld [vmem:[%s1636_s11 + $0xc4] ss:$8 sps:$4 sm:$0xff]  }
  0x17   : > { %v1520_v34 = vld [vmem:[%s1636_s11 + $0x40] ss:$8 sps:$4 sm:$0xff]   ;;  %v1522_v36 = vld [vmem:[%s1636_s11 + $0x54] ss:$8 sps:$4 sm:$0xff]   ;;  %v1526_v38 = vld [vmem:[%s1636_s11 + $0x50] ss:$8 sps:$4 sm:$0xff]  }
  0x18   : > { %1332 = vmatpush3.bf16.msra.mxu0 %v1485_v9  ;;  %1447 = vmatpush3.bf16.msra.mxu1 %v1485_v9  ;;  %v1521_v35 = vld [vmem:[%s1636_s11 + $0xc0] ss:$8 sps:$4 sm:$0xff]   ;;  %v1524_v37 = vld [vmem:[%s1636_s11 + $0xd4] ss:$8 sps:$4 sm:$0xff]   ;;  %v1527_v39 = vld [vmem:[%s1636_s11 + $0xd0] ss:$8 sps:$4 sm:$0xff]  }
  0x19   : > { %1333 = vmatprep.subr.bf16.mxu0 %v1486_v10  ;;  %1440 = vmatprep.subr.bf16.mxu1 %v1486_v10  ;;  %v1528_v40 = vld [vmem:[%s1636_s11 + $0x64] ss:$8 sps:$4 sm:$0xff]   ;;  %v1532_v42 = vld [vmem:[%s1636_s11 + $0x60] ss:$8 sps:$4 sm:$0xff]   ;;  %v1534_v44 = vld [vmem:[%s1636_s11 + $0x74] ss:$8 sps:$4 sm:$0xff]  }
  0x1a   : > { %v1530_v41 = vld [vmem:[%s1636_s11 + $0xe4] ss:$8 sps:$4 sm:$0xff]   ;;  %v1533_v43 = vld [vmem:[%s1636_s11 + $0xe0] ss:$8 sps:$4 sm:$0xff]   ;;  %v1536_v45 = vld [vmem:[%s1636_s11 + $0xf4] ss:$8 sps:$4 sm:$0xff]  }
  0x1b   : > { %v1538_v46 = vld [vmem:[%s1636_s11 + $0x70] ss:$8 sps:$4 sm:$0xff]   ;;  %250 = vst.msk [vmem:[#allocation2 + $0x88] sm:$0xff] %vm232_vm0, %v1564_v48  ;;  %251 = vst.msk [vmem:[#allocation2 + $0x90] sm:$0xff] %vm232_vm0, %v1564_v48  ;;  %v281_v53 = vld [vmem:[#allocation2 + $0x80] sm:$0xff] }
  0x1c   : > { %1334 = vmatpush3.bf16.msra.mxu0 %v1487_v13  ;;  %1448 = vmatpush3.bf16.msra.mxu1 %v1487_v13  ;;  %v1539_v47 = vld [vmem:[%s1636_s11 + $0xf0] ss:$8 sps:$4 sm:$0xff]   ;;  %252 = vst.msk [vmem:[#allocation2 + $0x98] sm:$0xff] %vm232_vm0, %v1564_v48  ;;  %253 = vst.msk [vmem:[#allocation2 + $0xa0] sm:$0xff] %vm232_vm0, %v1564_v48 }
  0x1d   : > { %1335 = vmatprep.subr.bf16.mxu0 %v1488_v14  ;;  %1441 = vmatprep.subr.bf16.mxu1 %v1488_v14  ;;  %254 = vst.msk [vmem:[#allocation2 + $0xa8] sm:$0xff] %vm232_vm0, %v1564_v48  ;;  %255 = vst.msk [vmem:[#allocation2 + $0xb0] sm:$0xff] %vm232_vm0, %v1564_v48  ;;  %v267_v7 = vld [vmem:[#allocation2 + $0x10] sm:$0xff] }
  0x1e   : > { %256 = vst.msk [vmem:[#allocation2 + $0xb8] sm:$0xff] %vm232_vm0, %v1564_v48  ;;  %257 = vst.msk [vmem:[#allocation2 + $0xc0] sm:$0xff] %vm232_vm0, %v1564_v48 }
  0x1f   : > { %258 = vst.msk [vmem:[#allocation2 + $0xc8] sm:$0xff] %vm232_vm0, %v1564_v48  ;;  %259 = vst.msk [vmem:[#allocation2 + $0xd0] sm:$0xff] %vm232_vm0, %v1564_v48 }
  0x20   : > { %1336 = vmatpush3.bf16.msra.mxu0 %v1489_v15  ;;  %1449 = vmatpush3.bf16.msra.mxu1 %v1489_v15  ;;  %260 = vst.msk [vmem:[#allocation2 + $0xd8] sm:$0xff] %vm232_vm0, %v1564_v48  ;;  %261 = vst.msk [vmem:[#allocation2 + $0xe0] sm:$0xff] %vm232_vm0, %v1564_v48  ;;  %v1730_v15 = vld [vmem:[%s1873_s2] ss:$0 sm:$0xff] }
  0x21   : > { %1337 = vmatprep.subr.bf16.mxu0 %v1490_v16  ;;  %1442 = vmatprep.subr.bf16.mxu1 %v1490_v16  ;;  %262 = vst.msk [vmem:[#allocation2 + $0xe8] sm:$0xff] %vm232_vm0, %v1564_v48  ;;  %263 = vst.msk [vmem:[#allocation2 + $0xf0] sm:$0xff] %vm232_vm0, %v1564_v48  ;;  %v268_v16 = vld [vmem:[#allocation2 + $0x18] sm:$0xff] }
  0x22   : > { %264 = vst.msk [vmem:[#allocation2 + $0xf8] sm:$0xff] %vm232_vm0, %v1564_v48  ;;  %v282_v61 = vld [vmem:[#allocation2 + $0x88] sm:$0xff]  ;;  %v283_v9 = vld [vmem:[#allocation2 + $0x90] sm:$0xff] }
  0x24   : > { %1338 = vmatpush3.bf16.msra.mxu0 %v1491_v17  ;;  %1450 = vmatpush3.bf16.msra.mxu1 %v1491_v17 }
  0x27   : > { %650 = vmatmul.mubr.bf16.vlgmr.msra.gmra.mrb[0].mxu0 %v1492_v18  ;;  %714 = vmatmul.mubr.bf16.vlgmr.msra.gmra.mrb[0].mxu1 %v1495_v19  ;;  %v284_v18 = vld [vmem:[#allocation2 + $0x98] sm:$0xff] }
  0x28   : > { %657 = vmatprep.mubr.bf16.mxu0 %v1498_v20  ;;  %721 = vmatprep.mubr.bf16.mxu1 %v1500_v21 }
  0x2f   : > { %658 = vmatmul.mubr.bf16.gmra.mrb[4].mxu0 %v1502_v22  ;;  %722 = vmatmul.mubr.bf16.gmra.mrb[4].mxu1 %v1503_v23 }
  0x30   : > { %665 = vmatprep.mubr.bf16.mxu0 %v1504_v24  ;;  %729 = vmatprep.mubr.bf16.mxu1 %v1506_v25 }
  0x37   : > { %666 = vmatmul.mubr.bf16.gmra.mrb[8].mxu0 %v1508_v26  ;;  %730 = vmatmul.mubr.bf16.gmra.mrb[8].mxu1 %v1509_v27 }
  0x38   : > { %673 = vmatprep.mubr.bf16.mxu0 %v1510_v28  ;;  %737 = vmatprep.mubr.bf16.mxu1 %v1512_v29 }
  0x3f   : > { %674 = vmatmul.mubr.bf16.gmra.mrb[12].mxu0 %v1514_v30  ;;  %738 = vmatmul.mubr.bf16.gmra.mrb[12].mxu1 %v1515_v31 }
  0x40   : > { %681 = vmatprep.mubr.bf16.mxu0 %v1516_v32  ;;  %745 = vmatprep.mubr.bf16.mxu1 %v1518_v33 }
  0x47   : > { %682 = vmatmul.mubr.bf16.gmra.mrb[16].mxu0 %v1520_v34  ;;  %746 = vmatmul.mubr.bf16.gmra.mrb[16].mxu1 %v1521_v35 }
  0x48   : > { %689 = vmatprep.mubr.bf16.mxu0 %v1522_v36  ;;  %753 = vmatprep.mubr.bf16.mxu1 %v1524_v37 }
  0x4f   : > { %690 = vmatmul.mubr.bf16.gmra.mrb[20].mxu0 %v1526_v38  ;;  %754 = vmatmul.mubr.bf16.gmra.mrb[20].mxu1 %v1527_v39 }
  0x50   : > { %697 = vmatprep.mubr.bf16.mxu0 %v1528_v40  ;;  %761 = vmatprep.mubr.bf16.mxu1 %v1530_v41 }
  0x57   : > { %698 = vmatmul.mubr.bf16.gmra.mrb[24].mxu0 %v1532_v42  ;;  %762 = vmatmul.mubr.bf16.gmra.mrb[24].mxu1 %v1533_v43 }
  0x58   : > { %705 = vmatprep.mubr.bf16.mxu0 %v1534_v44  ;;  %769 = vmatprep.mubr.bf16.mxu1 %v1536_v45  ;;  %v269_v44 = vld [vmem:[#allocation2 + $0x20] sm:$0xff] }
  0x59   : > { %v285_v45 = vld [vmem:[#allocation2 + $0xa0] sm:$0xff] }
  0x5f   : > { %706 = vmatmul.mubr.bf16.gmra.mrb[28].mxu0 %v1538_v46  ;;  %770 = vmatmul.mubr.bf16.gmra.mrb[28].mxu1 %v1539_v47 }
  0xfa   : > { %v1339_v49 = vpop.f32.mrb[0].mxu0  ;;  %v1387_v50 = vpop.f32.mrb[0].mxu1 }
  0xfb   : > { %v1340_v52 = vpop.f32.mrb[1].mxu0  ;;  %v1388_v54 = vpop.f32.mrb[1].mxu1 }
  0xfc   : > { %v1341_v55 = vadd.f32 %v1340_v52, %v1339_v49  ;;  %v1389_v56 = vadd.f32 %v1388_v54, %v1387_v50  ;;  %v1342_v57 = vpop.f32.mrb[2].mxu0  ;;  %v1390_v58 = vpop.f32.mrb[2].mxu1  ;;  %v270_v50 = vld [vmem:[#allocation2 + $0x28] sm:$0xff] }
  0xfd   : > { %v1343_v60 = vpop.f32.mrb[3].mxu0  ;;  %v1391_v62 = vpop.f32.mrb[3].mxu1  ;;  %v286_v52 = vld [vmem:[#allocation2 + $0xa8] sm:$0xff] }
  0xfe   : > { %v778_v63 = vadd.f32 %v1341_v55, %v265_v51  ;;  %v794_v0 = vadd.f32 %v1389_v56, %v281_v53  ;;  %v1344_v1 = vadd.f32 %v1343_v60, %v1342_v57  ;;  %v1392_v2 = vadd.f32 %v1391_v62, %v1390_v58 }
 0x100   : > { %811 = vst.msk [vmem:[#allocation2] sm:$0xff] %vm232_vm0, %v778_v63  ;;  %827 = vst.msk [vmem:[#allocation2 + $0x80] sm:$0xff] %vm232_vm0, %v794_v0  ;;  %v779_v3 = vadd.f32 %v1344_v1, %v266_v59  ;;  %v795_v4 = vadd.f32 %v1392_v2, %v282_v61 }
 0x102   : > { %812 = vst.msk [vmem:[#allocation2 + $0x8] sm:$0xff] %vm232_vm0, %v779_v3  ;;  %828 = vst.msk [vmem:[#allocation2 + $0x88] sm:$0xff] %vm232_vm0, %v795_v4  ;;  %v1345_v5 = vpop.f32.mrb[4].mxu0  ;;  %v1393_v6 = vpop.f32.mrb[4].mxu1 }
 0x103   : > { %v1346_v8 = vpop.f32.mrb[5].mxu0  ;;  %v1394_v10 = vpop.f32.mrb[5].mxu1 }
 0x104   : > { %v1347_v11 = vadd.f32 %v1346_v8, %v1345_v5  ;;  %v1395_v12 = vadd.f32 %v1394_v10, %v1393_v6  ;;  %v1348_v13 = vpop.f32.mrb[6].mxu0  ;;  %v1396_v14 = vpop.f32.mrb[6].mxu1 }
 0x105   : > { %v1349_v17 = vpop.f32.mrb[7].mxu0  ;;  %v1397_v19 = vpop.f32.mrb[7].mxu1 }
 0x106   : > { %v780_v20 = vadd.f32 %v1347_v11, %v267_v7  ;;  %v796_v21 = vadd.f32 %v1395_v12, %v283_v9  ;;  %v1350_v22 = vadd.f32 %v1349_v17, %v1348_v13  ;;  %v1398_v23 = vadd.f32 %v1397_v19, %v1396_v14  ;;  %v271_v17 = vld [vmem:[#allocation2 + $0x30] sm:$0xff] }
 0x107   : > { %v846_v24 = vld [vmem:[#allocation2] sm:$0xff] }
 0x108   : > { %v862_v25 = vld [vmem:[#allocation2 + $0x80] sm:$0xff]  ;;  %v885_v26 = vadd.f32 %v1730_v15, %v846_v24  ;;  %813 = vst.msk [vmem:[#allocation2 + $0x10] sm:$0xff] %vm232_vm0, %v780_v20  ;;  %829 = vst.msk [vmem:[#allocation2 + $0x90] sm:$0xff] %vm232_vm0, %v796_v21  ;;  %v781_v28 = vadd.f32 %v1350_v22, %v268_v16  ;;  %v797_v29 = vadd.f32 %v1398_v23, %v284_v18  ;;  %v287_v18 = vld [vmem:[#allocation2 + $0xb0] sm:$0xff] }
 0x109   : > { %v901_v27 = vadd.f32 %v1730_v15, %v862_v25  ;;  %v847_v30 = vld [vmem:[#allocation2 + $0x8] sm:$0xff]  ;;  %v272_v23 = vld [vmem:[#allocation2 + $0x38] sm:$0xff] }
 0x10a   : > { %v863_v31 = vld [vmem:[#allocation2 + $0x88] sm:$0xff]  ;;  %v917_v32 = vmax.f32 %v885_v26, 0.0  ;;  %v886_v34 = vadd.f32 %v1730_v15, %v847_v30  ;;  %814 = vst.msk [vmem:[#allocation2 + $0x18] sm:$0xff] %vm232_vm0, %v781_v28  ;;  %830 = vst.msk [vmem:[#allocation2 + $0x98] sm:$0xff] %vm232_vm0, %v797_v29  ;;  %v1351_v36 = vpop.f32.mrb[8].mxu0  ;;  %v1399_v37 = vpop.f32.mrb[8].mxu1 }
 0x10b   : > { %v933_v33 = vmax.f32 %v901_v27, 0.0  ;;  %v902_v35 = vadd.f32 %v1730_v15, %v863_v31  ;;  %v1352_v38 = vpop.f32.mrb[9].mxu0  ;;  %v1400_v39 = vpop.f32.mrb[9].mxu1  ;;  %v288_v25 = vld [vmem:[#allocation2 + $0xb8] sm:$0xff] }
 0x10c   : > { %v1291_v40 = vpack.c.bf16 %v917_v32, %v917_v32  ;;  %v918_v42 = vmax.f32 %v886_v34, 0.0  ;;  %v1354_v46 = vpop.f32.mrb[10].mxu0  ;;  %v1402_v47 = vpop.f32.mrb[10].mxu1  ;;  %v1353_v48 = vadd.f32 %v1352_v38, %v1351_v36  ;;  %v1401_v49 = vadd.f32 %v1400_v39, %v1399_v37 }
 0x10d   : > { %v1307_v41 = vpack.c.bf16 %v933_v33, %v933_v33  ;;  %v934_v43 = vmax.f32 %v902_v35, 0.0  ;;  %v1355_v51 = vpop.f32.mrb[11].mxu0  ;;  %v1403_v53 = vpop.f32.mrb[11].mxu1 }
 0x10e   : > { %1078 = vst.msk [vmem:[%s1744_s7] sm:$0xf] %vm1077_vm1, %v1291_v40  ;;  %v1292_v54 = vpack.c.bf16 %v918_v42, %v918_v42  ;;  %v1356_v56 = vadd.f32 %v1355_v51, %v1354_v46  ;;  %v1404_v57 = vadd.f32 %v1403_v53, %v1402_v47  ;;  %v782_v60 = vadd.f32 %v1353_v48, %v269_v44  ;;  %v273_v47 = vld [vmem:[#allocation2 + $0x40] sm:$0xff] }
 0x10f   : > { %1094 = vst.msk [vmem:[%s1744_s7 + $0x40] sm:$0xf] %vm1077_vm1, %v1307_v41  ;;  %v1308_v55 = vpack.c.bf16 %v934_v43, %v934_v43  ;;  %v848_v58 = vld [vmem:[#allocation2 + $0x10] sm:$0xff]  ;;  %v798_v61 = vadd.f32 %v1401_v49, %v285_v45  ;;  %v289_v49 = vld [vmem:[#allocation2 + $0xc0] sm:$0xff] }
 0x110   : > { %v864_v59 = vld [vmem:[#allocation2 + $0x90] sm:$0xff]  ;;  %1079 = vst.msk [vmem:[%s1744_s7 + $0x4] sm:$0xf] %vm1077_vm1, %v1292_v54  ;;  %v887_v62 = vadd.f32 %v1730_v15, %v848_v58  ;;  %v783_v0 = vadd.f32 %v1356_v56, %v270_v50  ;;  %v799_v1 = vadd.f32 %v1404_v57, %v286_v52 }
 0x111   : > { %1095 = vst.msk [vmem:[%s1744_s7 + $0x44] sm:$0xf] %vm1077_vm1, %v1308_v55  ;;  %v903_v63 = vadd.f32 %v1730_v15, %v864_v59  ;;  %v849_v2 = vld [vmem:[#allocation2 + $0x18] sm:$0xff] }
 0x112   : > { %v865_v3 = vld [vmem:[#allocation2 + $0x98] sm:$0xff]  ;;  %815 = vst.msk [vmem:[#allocation2 + $0x20] sm:$0xff] %vm232_vm0, %v782_v60  ;;  %831 = vst.msk [vmem:[#allocation2 + $0xa0] sm:$0xff] %vm232_vm0, %v798_v61  ;;  %v919_v4 = vmax.f32 %v887_v62, 0.0  ;;  %v888_v6 = vadd.f32 %v1730_v15, %v849_v2  ;;  %v1357_v8 = vpop.f32.mrb[12].mxu0  ;;  %v1405_v9 = vpop.f32.mrb[12].mxu1 }
 0x113   : > { %v935_v5 = vmax.f32 %v903_v63, 0.0  ;;  %v904_v7 = vadd.f32 %v1730_v15, %v865_v3  ;;  %816 = vst.msk [vmem:[#allocation2 + $0x28] sm:$0xff] %vm232_vm0, %v783_v0  ;;  %832 = vst.msk [vmem:[#allocation2 + $0xa8] sm:$0xff] %vm232_vm0, %v799_v1  ;;  %v1358_v10 = vpop.f32.mrb[13].mxu0  ;;  %v1406_v11 = vpop.f32.mrb[13].mxu1  ;;  %v274_v1 = vld [vmem:[#allocation2 + $0x48] sm:$0xff] }
 0x114   : > { %v1293_v12 = vpack.c.bf16 %v919_v4, %v919_v4  ;;  %v920_v14 = vmax.f32 %v888_v6, 0.0  ;;  %v1360_v19 = vpop.f32.mrb[14].mxu0  ;;  %v1408_v20 = vpop.f32.mrb[14].mxu1  ;;  %v1359_v21 = vadd.f32 %v1358_v10, %v1357_v8  ;;  %v1407_v22 = vadd.f32 %v1406_v11, %v1405_v9  ;;  %v290_v2 = vld [vmem:[#allocation2 + $0xc8] sm:$0xff] }
 0x115   : > { %v1309_v13 = vpack.c.bf16 %v935_v5, %v935_v5  ;;  %v936_v16 = vmax.f32 %v904_v7, 0.0  ;;  %v1361_v24 = vpop.f32.mrb[15].mxu0  ;;  %v1409_v26 = vpop.f32.mrb[15].mxu1 }
 0x116   : > { %1080 = vst.msk [vmem:[%s1744_s7 + $0x8] sm:$0xf] %vm1077_vm1, %v1293_v12  ;;  %v1294_v27 = vpack.c.bf16 %v920_v14, %v920_v14  ;;  %v1362_v29 = vadd.f32 %v1361_v24, %v1360_v19  ;;  %v1410_v30 = vadd.f32 %v1409_v26, %v1408_v20  ;;  %v784_v31 = vadd.f32 %v1359_v21, %v271_v17  ;;  %v275_v20 = vld [vmem:[#allocation2 + $0x50] sm:$0xff] }
 0x117   : > { %1096 = vst.msk [vmem:[%s1744_s7 + $0x48] sm:$0xf] %vm1077_vm1, %v1309_v13  ;;  %v1310_v28 = vpack.c.bf16 %v936_v16, %v936_v16  ;;  %v800_v32 = vadd.f32 %v1407_v22, %v287_v18  ;;  %v291_v22 = vld [vmem:[#allocation2 + $0xd0] sm:$0xff] }
 0x118   : > { %1081 = vst.msk [vmem:[%s1744_s7 + $0xc] sm:$0xf] %vm1077_vm1, %v1294_v27  ;;  %v785_v35 = vadd.f32 %v1362_v29, %v272_v23  ;;  %v801_v36 = vadd.f32 %v1410_v30, %v288_v25 }
 0x119   : > { %1097 = vst.msk [vmem:[%s1744_s7 + $0x4c] sm:$0xf] %vm1077_vm1, %v1310_v28  ;;  %v850_v33 = vld [vmem:[#allocation2 + $0x20] sm:$0xff] }
 0x11a   : > { %v866_v34 = vld [vmem:[#allocation2 + $0xa0] sm:$0xff]  ;;  %v889_v37 = vadd.f32 %v1730_v15, %v850_v33  ;;  %v851_v39 = vld [vmem:[#allocation2 + $0x28] sm:$0xff]  ;;  %817 = vst.msk [vmem:[#allocation2 + $0x30] sm:$0xff] %vm232_vm0, %v784_v31  ;;  %833 = vst.msk [vmem:[#allocation2 + $0xb0] sm:$0xff] %vm232_vm0, %v800_v32  ;;  %v1363_v43 = vpop.f32.mrb[16].mxu0  ;;  %v1411_v44 = vpop.f32.mrb[16].mxu1 }
 0x11b   : > { %v905_v38 = vadd.f32 %v1730_v15, %v866_v34  ;;  %v867_v40 = vld [vmem:[#allocation2 + $0xa8] sm:$0xff]  ;;  %v890_v41 = vadd.f32 %v1730_v15, %v851_v39  ;;  %818 = vst.msk [vmem:[#allocation2 + $0x38] sm:$0xff] %vm232_vm0, %v785_v35  ;;  %834 = vst.msk [vmem:[#allocation2 + $0xb8] sm:$0xff] %vm232_vm0, %v801_v36  ;;  %v1364_v48 = vpop.f32.mrb[17].mxu0  ;;  %v1412_v50 = vpop.f32.mrb[17].mxu1  ;;  %v292_v39 = vld [vmem:[#allocation2 + $0xd8] sm:$0xff] }
 0x11c   : > { %v906_v42 = vadd.f32 %v1730_v15, %v867_v40  ;;  %v921_v45 = vmax.f32 %v889_v37, 0.0  ;;  %v1365_v53 = vadd.f32 %v1364_v48, %v1363_v43  ;;  %v1413_v54 = vadd.f32 %v1412_v50, %v1411_v44  ;;  %v1366_v55 = vpop.f32.mrb[18].mxu0  ;;  %v1414_v56 = vpop.f32.mrb[18].mxu1 }
 0x11d   : > { %v937_v46 = vmax.f32 %v905_v38, 0.0  ;;  %v922_v51 = vmax.f32 %v890_v41, 0.0  ;;  %v1367_v59 = vpop.f32.mrb[19].mxu0  ;;  %v1415_v60 = vpop.f32.mrb[19].mxu1  ;;  %v276_v38 = vld [vmem:[#allocation2 + $0x58] sm:$0xff] }
 0x11e   : > { %v938_v52 = vmax.f32 %v906_v42, 0.0  ;;  %v1295_v57 = vpack.c.bf16 %v921_v45, %v921_v45  ;;  %v786_v63 = vadd.f32 %v1365_v53, %v273_v47  ;;  %v802_v0 = vadd.f32 %v1413_v54, %v289_v49 }
 0x11f   : > { %v1311_v58 = vpack.c.bf16 %v937_v46, %v937_v46  ;;  %v1296_v61 = vpack.c.bf16 %v922_v51, %v922_v51  ;;  %v1368_v3 = vadd.f32 %v1367_v59, %v1366_v55  ;;  %v1416_v4 = vadd.f32 %v1415_v60, %v1414_v56  ;;  %v277_v56 = vld [vmem:[#allocation2 + $0x60] sm:$0xff] }
 0x120   : > { %v1312_v62 = vpack.c.bf16 %v938_v52, %v938_v52  ;;  %1082 = vst.msk [vmem:[%s1744_s7 + $0x10] sm:$0xf] %vm1077_vm1, %v1295_v57 }
 0x121   : > { %1098 = vst.msk [vmem:[%s1744_s7 + $0x50] sm:$0xf] %vm1077_vm1, %v1311_v58  ;;  %1083 = vst.msk [vmem:[%s1744_s7 + $0x14] sm:$0xf] %vm1077_vm1, %v1296_v61  ;;  %v852_v5 = vld [vmem:[#allocation2 + $0x30] sm:$0xff]  ;;  %v787_v11 = vadd.f32 %v1368_v3, %v274_v1  ;;  %v803_v12 = vadd.f32 %v1416_v4, %v290_v2  ;;  %v293_v58 = vld [vmem:[#allocation2 + $0xe0] sm:$0xff] }
 0x122   : > { %1099 = vst.msk [vmem:[%s1744_s7 + $0x54] sm:$0xf] %vm1077_vm1, %v1312_v62  ;;  %v868_v6 = vld [vmem:[#allocation2 + $0xb0] sm:$0xff]  ;;  %v891_v7 = vadd.f32 %v1730_v15, %v852_v5  ;;  %v853_v9 = vld [vmem:[#allocation2 + $0x38] sm:$0xff]  ;;  %v1369_v16 = vpop.f32.mrb[20].mxu0  ;;  %v1417_v17 = vpop.f32.mrb[20].mxu1 }
 0x123   : > { %819 = vst.msk [vmem:[#allocation2 + $0x40] sm:$0xff] %vm232_vm0, %v786_v63  ;;  %835 = vst.msk [vmem:[#allocation2 + $0xc0] sm:$0xff] %vm232_vm0, %v802_v0  ;;  %v907_v8 = vadd.f32 %v1730_v15, %v868_v6  ;;  %v869_v10 = vld [vmem:[#allocation2 + $0xb8] sm:$0xff]  ;;  %v892_v13 = vadd.f32 %v1730_v15, %v853_v9  ;;  %v1370_v21 = vpop.f32.mrb[21].mxu0  ;;  %v1418_v23 = vpop.f32.mrb[21].mxu1  ;;  %v278_v4 = vld [vmem:[#allocation2 + $0x68] sm:$0xff] }
 0x124   : > { %v908_v14 = vadd.f32 %v1730_v15, %v869_v10  ;;  %v923_v18 = vmax.f32 %v891_v7, 0.0  ;;  %820 = vst.msk [vmem:[#allocation2 + $0x48] sm:$0xff] %vm232_vm0, %v787_v11  ;;  %836 = vst.msk [vmem:[#allocation2 + $0xc8] sm:$0xff] %vm232_vm0, %v803_v12  ;;  %v1371_v26 = vadd.f32 %v1370_v21, %v1369_v16  ;;  %v1419_v27 = vadd.f32 %v1418_v23, %v1417_v17  ;;  %v1372_v28 = vpop.f32.mrb[22].mxu0  ;;  %v1420_v29 = vpop.f32.mrb[22].mxu1  ;;  %v294_v6 = vld [vmem:[#allocation2 + $0xe8] sm:$0xff] }
 0x125   : > { %v939_v19 = vmax.f32 %v907_v8, 0.0  ;;  %v924_v24 = vmax.f32 %v892_v13, 0.0  ;;  %v1373_v32 = vpop.f32.mrb[23].mxu0  ;;  %v1421_v33 = vpop.f32.mrb[23].mxu1 }
 0x126   : > { %v940_v25 = vmax.f32 %v908_v14, 0.0  ;;  %v1297_v30 = vpack.c.bf16 %v923_v18, %v923_v18  ;;  %v788_v36 = vadd.f32 %v1371_v26, %v275_v20  ;;  %v804_v37 = vadd.f32 %v1419_v27, %v291_v22 }
 0x127   : > { %v1313_v31 = vpack.c.bf16 %v939_v19, %v939_v19  ;;  %v1298_v34 = vpack.c.bf16 %v924_v24, %v924_v24  ;;  %v1374_v42 = vadd.f32 %v1373_v32, %v1372_v28  ;;  %v1422_v43 = vadd.f32 %v1421_v33, %v1420_v29  ;;  %v279_v29 = vld [vmem:[#allocation2 + $0x70] sm:$0xff] }
 0x128   : > { %v1314_v35 = vpack.c.bf16 %v940_v25, %v940_v25  ;;  %1084 = vst.msk [vmem:[%s1744_s7 + $0x18] sm:$0xf] %vm1077_vm1, %v1297_v30 }
 0x129   : > { %1100 = vst.msk [vmem:[%s1744_s7 + $0x58] sm:$0xf] %vm1077_vm1, %v1313_v31  ;;  %1085 = vst.msk [vmem:[%s1744_s7 + $0x1c] sm:$0xf] %vm1077_vm1, %v1298_v34  ;;  %v789_v46 = vadd.f32 %v1374_v42, %v276_v38  ;;  %v805_v47 = vadd.f32 %v1422_v43, %v292_v39  ;;  %v295_v31 = vld [vmem:[#allocation2 + $0xf0] sm:$0xff]  ;;  %v296_v43 = vld [vmem:[#allocation2 + $0xf8] sm:$0xff] }
 0x12a   : > { %v854_v40 = vld [vmem:[#allocation2 + $0x40] sm:$0xff]  ;;  %1101 = vst.msk [vmem:[%s1744_s7 + $0x5c] sm:$0xf] %vm1077_vm1, %v1314_v35  ;;  %v1375_v52 = vpop.f32.mrb[24].mxu0  ;;  %v1423_v53 = vpop.f32.mrb[24].mxu1 }
 0x12b   : > { %v870_v41 = vld [vmem:[#allocation2 + $0xc0] sm:$0xff]  ;;  %v893_v44 = vadd.f32 %v1730_v15, %v854_v40  ;;  %821 = vst.msk [vmem:[#allocation2 + $0x50] sm:$0xff] %vm232_vm0, %v788_v36  ;;  %837 = vst.msk [vmem:[#allocation2 + $0xd0] sm:$0xff] %vm232_vm0, %v804_v37  ;;  %v855_v50 = vld [vmem:[#allocation2 + $0x48] sm:$0xff]  ;;  %v1376_v57 = vpop.f32.mrb[25].mxu0  ;;  %v1424_v59 = vpop.f32.mrb[25].mxu1 }
 0x12c   : > { %v909_v45 = vadd.f32 %v1730_v15, %v870_v41  ;;  %v871_v51 = vld [vmem:[#allocation2 + $0xc8] sm:$0xff]  ;;  %v894_v54 = vadd.f32 %v1730_v15, %v855_v50  ;;  %822 = vst.msk [vmem:[#allocation2 + $0x58] sm:$0xff] %vm232_vm0, %v789_v46  ;;  %838 = vst.msk [vmem:[#allocation2 + $0xd8] sm:$0xff] %vm232_vm0, %v805_v47  ;;  %v1377_v62 = vadd.f32 %v1376_v57, %v1375_v52  ;;  %v1378_v0 = vpop.f32.mrb[26].mxu0  ;;  %v1426_v1 = vpop.f32.mrb[26].mxu1  ;;  %v280_v41 = vld [vmem:[#allocation2 + $0x78] sm:$0xff] }
 0x12d   : > { %v925_v48 = vmax.f32 %v893_v44, 0.0  ;;  %v910_v55 = vadd.f32 %v1730_v15, %v871_v51  ;;  %v1425_v63 = vadd.f32 %v1424_v59, %v1423_v53  ;;  %v1379_v5 = vpop.f32.mrb[27].mxu0  ;;  %v1427_v7 = vpop.f32.mrb[27].mxu1 }
 0x12e   : > { %v941_v49 = vmax.f32 %v909_v45, 0.0  ;;  %v926_v2 = vmax.f32 %v894_v54, 0.0  ;;  %v790_v8 = vadd.f32 %v1377_v62, %v277_v56  ;;  %v1380_v10 = vadd.f32 %v1379_v5, %v1378_v0 }
 0x12f   : > { %v1299_v60 = vpack.c.bf16 %v925_v48, %v925_v48  ;;  %v942_v3 = vmax.f32 %v910_v55, 0.0  ;;  %v806_v9 = vadd.f32 %v1425_v63, %v293_v58  ;;  %v1428_v11 = vadd.f32 %v1427_v7, %v1426_v1 }
 0x130   : > { %v1315_v61 = vpack.c.bf16 %v941_v49, %v941_v49  ;;  %v1300_v12 = vpack.c.bf16 %v926_v2, %v926_v2  ;;  %823 = vst.msk [vmem:[#allocation2 + $0x60] sm:$0xff] %vm232_vm0, %v790_v8  ;;  %v791_v19 = vadd.f32 %v1380_v10, %v278_v4 }
 0x131   : > { %1086 = vst.msk [vmem:[%s1744_s7 + $0x20] sm:$0xf] %vm1077_vm1, %v1299_v60  ;;  %v1316_v13 = vpack.c.bf16 %v942_v3, %v942_v3  ;;  %v807_v20 = vadd.f32 %v1428_v11, %v294_v6 }
 0x132   : > { %1102 = vst.msk [vmem:[%s1744_s7 + $0x60] sm:$0xf] %vm1077_vm1, %v1315_v61  ;;  %v856_v14 = vld [vmem:[#allocation2 + $0x50] sm:$0xff]  ;;  %1087 = vst.msk [vmem:[%s1744_s7 + $0x24] sm:$0xf] %vm1077_vm1, %v1300_v12  ;;  %v1381_v25 = vpop.f32.mrb[28].mxu0 }
 0x133   : > { %v872_v16 = vld [vmem:[#allocation2 + $0xd0] sm:$0xff]  ;;  %v895_v17 = vadd.f32 %v1730_v15, %v856_v14  ;;  %839 = vst.msk [vmem:[#allocation2 + $0xe0] sm:$0xff] %vm232_vm0, %v806_v9  ;;  %v857_v23 = vld [vmem:[#allocation2 + $0x58] sm:$0xff]  ;;  %824 = vst.msk [vmem:[#allocation2 + $0x68] sm:$0xff] %vm232_vm0, %v791_v19  ;;  %v1429_v26 = vpop.f32.mrb[28].mxu1  ;;  %v1382_v30 = vpop.f32.mrb[29].mxu0 }
 0x134   : > { %v911_v18 = vadd.f32 %v1730_v15, %v872_v16  ;;  %1103 = vst.msk [vmem:[%s1744_s7 + $0x64] sm:$0xf] %vm1077_vm1, %v1316_v13  ;;  %v873_v24 = vld [vmem:[#allocation2 + $0xd8] sm:$0xff]  ;;  %v896_v27 = vadd.f32 %v1730_v15, %v857_v23  ;;  %v1430_v32 = vpop.f32.mrb[29].mxu1  ;;  %v1383_v35 = vadd.f32 %v1382_v30, %v1381_v25  ;;  %v1384_v37 = vpop.f32.mrb[30].mxu0 }
 0x135   : > { %v927_v21 = vmax.f32 %v895_v17, 0.0  ;;  %840 = vst.msk [vmem:[#allocation2 + $0xe8] sm:$0xff] %vm232_vm0, %v807_v20  ;;  %v912_v28 = vadd.f32 %v1730_v15, %v873_v24  ;;  %v1431_v36 = vadd.f32 %v1430_v32, %v1429_v26  ;;  %v1432_v38 = vpop.f32.mrb[30].mxu1  ;;  %v1385_v42 = vpop.f32.mrb[31].mxu0 }
 0x136   : > { %v943_v22 = vmax.f32 %v911_v18, 0.0  ;;  %v928_v39 = vmax.f32 %v896_v27, 0.0  ;;  %v1433_v44 = vpop.f32.mrb[31].mxu1  ;;  %v792_v45 = vadd.f32 %v1383_v35, %v279_v29  ;;  %v1386_v47 = vadd.f32 %v1385_v42, %v1384_v37 }
 0x137   : > { %v1301_v33 = vpack.c.bf16 %v927_v21, %v927_v21  ;;  %v944_v40 = vmax.f32 %v912_v28, 0.0  ;;  %v808_v46 = vadd.f32 %v1431_v36, %v295_v31  ;;  %v1434_v48 = vadd.f32 %v1433_v44, %v1432_v38  ;;  %v858_v51 = vld [vmem:[#allocation2 + $0x60] sm:$0xff] }
 0x138   : > { %v1317_v34 = vpack.c.bf16 %v943_v22, %v943_v22  ;;  %v1302_v49 = vpack.c.bf16 %v928_v39, %v928_v39  ;;  %v897_v53 = vadd.f32 %v1730_v15, %v858_v51  ;;  %825 = vst.msk [vmem:[#allocation2 + $0x70] sm:$0xff] %vm232_vm0, %v792_v45  ;;  %v793_v55 = vadd.f32 %v1386_v47, %v280_v41 }
 0x139   : > { %1088 = vst.msk [vmem:[%s1744_s7 + $0x28] sm:$0xf] %vm1077_vm1, %v1301_v33  ;;  %v1318_v50 = vpack.c.bf16 %v944_v40, %v944_v40  ;;  %v809_v56 = vadd.f32 %v1434_v48, %v296_v43 }
 0x13a   : > { %1104 = vst.msk [vmem:[%s1744_s7 + $0x68] sm:$0xf] %vm1077_vm1, %v1317_v34  ;;  %v874_v52 = vld [vmem:[#allocation2 + $0xe0] sm:$0xff]  ;;  %1089 = vst.msk [vmem:[%s1744_s7 + $0x2c] sm:$0xf] %vm1077_vm1, %v1302_v49  ;;  %v859_v57 = vld [vmem:[#allocation2 + $0x68] sm:$0xff] }
 0x13b   : > { %v913_v54 = vadd.f32 %v1730_v15, %v874_v52  ;;  %841 = vst.msk [vmem:[#allocation2 + $0xf0] sm:$0xff] %vm232_vm0, %v808_v46  ;;  %v929_v59 = vmax.f32 %v897_v53, 0.0  ;;  %v898_v61 = vadd.f32 %v1730_v15, %v859_v57  ;;  %826 = vst.msk [vmem:[#allocation2 + $0x78] sm:$0xff] %vm232_vm0, %v793_v55 }
 0x13c   : > { %1105 = vst.msk [vmem:[%s1744_s7 + $0x6c] sm:$0xf] %vm1077_vm1, %v1318_v50  ;;  %v875_v58 = vld [vmem:[#allocation2 + $0xe8] sm:$0xff] }
 0x13d   : > { %v945_v60 = vmax.f32 %v913_v54, 0.0  ;;  %v914_v62 = vadd.f32 %v1730_v15, %v875_v58  ;;  %842 = vst.msk [vmem:[#allocation2 + $0xf8] sm:$0xff] %vm232_vm0, %v809_v56  ;;  %v1303_v63 = vpack.c.bf16 %v929_v59, %v929_v59  ;;  %v930_v1 = vmax.f32 %v898_v61, 0.0 }
 0x13f   : > { %v1319_v0 = vpack.c.bf16 %v945_v60, %v945_v60  ;;  %v946_v2 = vmax.f32 %v914_v62, 0.0  ;;  %1090 = vst.msk [vmem:[%s1744_s7 + $0x30] sm:$0xf] %vm1077_vm1, %v1303_v63  ;;  %v1304_v3 = vpack.c.bf16 %v930_v1, %v930_v1  ;;  %v860_v5 = vld [vmem:[#allocation2 + $0x70] sm:$0xff] }
 0x140   : > { %v899_v7 = vadd.f32 %v1730_v15, %v860_v5 }
 0x141   : > { %1106 = vst.msk [vmem:[%s1744_s7 + $0x70] sm:$0xf] %vm1077_vm1, %v1319_v0  ;;  %v1320_v4 = vpack.c.bf16 %v946_v2, %v946_v2  ;;  %1091 = vst.msk [vmem:[%s1744_s7 + $0x34] sm:$0xf] %vm1077_vm1, %v1304_v3 }
 0x142   : > { %v876_v6 = vld [vmem:[#allocation2 + $0xf0] sm:$0xff]  ;;  %v861_v9 = vld [vmem:[#allocation2 + $0x78] sm:$0xff]  ;;  %v931_v11 = vmax.f32 %v899_v7, 0.0 }
 0x143   : > { %1107 = vst.msk [vmem:[%s1744_s7 + $0x74] sm:$0xf] %vm1077_vm1, %v1320_v4  ;;  %v915_v8 = vadd.f32 %v1730_v15, %v876_v6  ;;  %v900_v13 = vadd.f32 %v1730_v15, %v861_v9 }
 0x144   : > { %v877_v10 = vld [vmem:[#allocation2 + $0xf8] sm:$0xff]  ;;  %v1305_v16 = vpack.c.bf16 %v931_v11, %v931_v11 }
 0x145   : > { %v947_v12 = vmax.f32 %v915_v8, 0.0  ;;  %v916_v14 = vadd.f32 %v1730_v15, %v877_v10  ;;  %v932_v18 = vmax.f32 %v900_v13, 0.0 }
 0x146   : > { %1092 = vst.msk [vmem:[%s1744_s7 + $0x38] sm:$0xf] %vm1077_vm1, %v1305_v16 }
 0x147   : > { %v1321_v17 = vpack.c.bf16 %v947_v12, %v947_v12  ;;  %v948_v19 = vmax.f32 %v916_v14, 0.0  ;;  %v1306_v20 = vpack.c.bf16 %v932_v18, %v932_v18 }
 0x149   : > { %1108 = vst.msk [vmem:[%s1744_s7 + $0x78] sm:$0xf] %vm1077_vm1, %v1321_v17  ;;  %v1322_v21 = vpack.c.bf16 %v948_v19, %v948_v19  ;;  %1093 = vst.msk [vmem:[%s1744_s7 + $0x3c] sm:$0xf] %vm1077_vm1, %v1306_v20 }
 0x14b   : > { %1109 = vst.msk [vmem:[%s1744_s7 + $0x7c] sm:$0xf] %vm1077_vm1, %v1322_v21 }
 0x14c PF: > { %s13_s14 = sadd.s32 1, %s1562_s14   ;;  %s1875_s12 = smov %s1558_s13 }
 0x14d   : > { %p10_p5 = scmp.ge.s32.totalorder %s13_s14, 4   ;;  %s1876_s13 = smov %s1878_s15 }
 0x14f   :  { %12 = sbr.rel (!%p10_p5) target bundleno = 2 (0x2), region = 73 }

// kernel: _lambda_.15
= control target key start
LH: loop header
LB: loop body
LE: loop exit
PB: predicated region body
PF: predicated region fallthrough
CT: control target
= control target key end

     0   :  { %vm153_vm0 = vcmask 519168   ;;  %s1385_s0 = inlined_call_operand.vmem [shape: bf16[9,128,64], index: 0, kind: input, shape index: {}]   ;;  %s1386_s1 = inlined_call_operand.vmem [shape: bf16[128,64], index: 1, kind: output, shape index: {}]  }
   0x1   :  { %v9_v0 = vld [vmem:[%s1385_s0] sm:$0xf]  ;;  %v10_v12 = vld [vmem:[%s1385_s0 + $0x4] sm:$0xf]  ;;  %v11_v33 = vld [vmem:[%s1385_s0 + $0x8] sm:$0xf] }
   0x2   :  { %v25_v1 = vld [vmem:[%s1385_s0 + $0x40] sm:$0xf]  ;;  %v156_v4 = vsel %vm153_vm0, %v9_v0, 4286644096  ;;  %v26_v13 = vld [vmem:[%s1385_s0 + $0x44] sm:$0xf] }
   0x3   :  { %v41_v2 = vld [vmem:[%s1385_s0 + $0x80] sm:$0xf]  ;;  %v159_v5 = vsel %vm153_vm0, %v25_v1, 4286644096  ;;  %v42_v14 = vld [vmem:[%s1385_s0 + $0x84] sm:$0xf] }
   0x4   :  { %v57_v3 = vld [vmem:[%s1385_s0 + $0xc0] sm:$0xf]  ;;  %v163_v6 = vsel %vm153_vm0, %v41_v2, 4286644096  ;;  %v161_v8 = vmax.bf16 %v159_v5, %v156_v4  ;;  %v58_v19 = vld [vmem:[%s1385_s0 + $0xc4] sm:$0xf] }
   0x5   :  { %v73_v7 = vld [vmem:[%s1385_s0 + $0x100] sm:$0xf]  ;;  %v167_v10 = vsel %vm153_vm0, %v57_v3, 4286644096  ;;  %v191_v20 = vsel %vm153_vm0, %v10_v12, 4286644096 }
   0x6   :  { %v89_v9 = vld [vmem:[%s1385_s0 + $0x140] sm:$0xf]  ;;  %v165_v11 = vmax.bf16 %v163_v6, %v161_v8  ;;  %v171_v15 = vsel %vm153_vm0, %v73_v7, 4286644096  ;;  %v194_v21 = vsel %vm153_vm0, %v26_v13, 4286644096 }
   0x7   :  { %v105_v16 = vld [vmem:[%s1385_s0 + $0x180] sm:$0xf]  ;;  %v175_v18 = vsel %vm153_vm0, %v89_v9, 4286644096  ;;  %v198_v22 = vsel %vm153_vm0, %v42_v14, 4286644096  ;;  %v196_v27 = vmax.bf16 %v194_v21, %v191_v20 }
   0x8   :  { %v169_v17 = vmax.bf16 %v167_v10, %v165_v11  ;;  %v121_v23 = vld [vmem:[%s1385_s0 + $0x1c0] sm:$0xf]  ;;  %v74_v26 = vld [vmem:[%s1385_s0 + $0x104] sm:$0xf]  ;;  %v179_v28 = vsel %vm153_vm0, %v105_v16, 4286644096 }
   0x9   :  { %v137_v24 = vld [vmem:[%s1385_s0 + $0x200] sm:$0xf]  ;;  %v90_v29 = vld [vmem:[%s1385_s0 + $0x144] sm:$0xf]  ;;  %v202_v30 = vsel %vm153_vm0, %v58_v19, 4286644096  ;;  %v200_v32 = vmax.bf16 %v198_v22, %v196_v27 }
   0xa   :  { %v173_v25 = vmax.bf16 %v171_v15, %v169_v17  ;;  %v27_v34 = vld [vmem:[%s1385_s0 + $0x48] sm:$0xf]  ;;  %v183_v36 = vsel %vm153_vm0, %v121_v23, 4286644096  ;;  %v187_v37 = vsel %vm153_vm0, %v137_v24, 4286644096 }
   0xb   :  { %v43_v35 = vld [vmem:[%s1385_s0 + $0x88] sm:$0xf]  ;;  %v206_v38 = vsel %vm153_vm0, %v74_v26, 4286644096  ;;  %v106_v40 = vld [vmem:[%s1385_s0 + $0x184] sm:$0xf]  ;;  %v204_v41 = vmax.bf16 %v202_v30, %v200_v32 }
   0xc   :  { %v177_v31 = vmax.bf16 %v175_v18, %v173_v25  ;;  %v210_v42 = vsel %vm153_vm0, %v90_v29, 4286644096  ;;  %v59_v43 = vld [vmem:[%s1385_s0 + $0xc8] sm:$0xf]  ;;  %v226_v44 = vsel %vm153_vm0, %v11_v33, 4286644096 }
   0xd   :  { %v229_v45 = vsel %vm153_vm0, %v27_v34, 4286644096  ;;  %v233_v46 = vsel %vm153_vm0, %v43_v35, 4286644096  ;;  %v122_v48 = vld [vmem:[%s1385_s0 + $0x1c4] sm:$0xf]  ;;  %v208_v50 = vmax.bf16 %v206_v38, %v204_v41 }
   0xe   :  { %v181_v39 = vmax.bf16 %v179_v28, %v177_v31  ;;  %v138_v49 = vld [vmem:[%s1385_s0 + $0x204] sm:$0xf]  ;;  %v75_v51 = vld [vmem:[%s1385_s0 + $0x108] sm:$0xf]  ;;  %v231_v52 = vmax.bf16 %v229_v45, %v226_v44  ;;  %v214_v53 = vsel %vm153_vm0, %v106_v40, 4286644096 }
   0xf   :  { %v91_v54 = vld [vmem:[%s1385_s0 + $0x148] sm:$0xf]  ;;  %v237_v55 = vsel %vm153_vm0, %v59_v43, 4286644096  ;;  %v212_v57 = vmax.bf16 %v210_v42, %v208_v50  ;;  %v12_v59 = vld [vmem:[%s1385_s0 + $0xc] sm:$0xf] }
  0x10   :  { %v185_v47 = vmax.bf16 %v183_v36, %v181_v39  ;;  %v235_v58 = vmax.bf16 %v233_v46, %v231_v52  ;;  %v28_v60 = vld [vmem:[%s1385_s0 + $0x4c] sm:$0xf]  ;;  %v218_v62 = vsel %vm153_vm0, %v122_v48, 4286644096  ;;  %v222_v63 = vsel %vm153_vm0, %v138_v49, 4286644096 }
  0x11   :  { %v44_v61 = vld [vmem:[%s1385_s0 + $0x8c] sm:$0xf]  ;;  %v241_v0 = vsel %vm153_vm0, %v75_v51, 4286644096  ;;  %v216_v1 = vmax.bf16 %v214_v53, %v212_v57  ;;  %v107_v2 = vld [vmem:[%s1385_s0 + $0x188] sm:$0xf] }
  0x12   :  { %v189_v56 = vmax.bf16 %v187_v37, %v185_v47  ;;  %v239_v3 = vmax.bf16 %v237_v55, %v235_v58  ;;  %v245_v4 = vsel %vm153_vm0, %v91_v54, 4286644096  ;;  %v60_v5 = vld [vmem:[%s1385_s0 + $0xcc] sm:$0xf]  ;;  %v261_v6 = vsel %vm153_vm0, %v12_v59, 4286644096 }
  0x13   :  { %v264_v7 = vsel %vm153_vm0, %v28_v60, 4286644096  ;;  %v268_v8 = vsel %vm153_vm0, %v44_v61, 4286644096  ;;  %v220_v9 = vmax.bf16 %v218_v62, %v216_v1  ;;  %v123_v10 = vld [vmem:[%s1385_s0 + $0x1c8] sm:$0xf] }
  0x14   :  { %715 = vst.msk [vmem:[%s1386_s1] sm:$0xf] %vm153_vm0, %v189_v56  ;;  %v139_v11 = vld [vmem:[%s1385_s0 + $0x208] sm:$0xf]  ;;  %v243_v12 = vmax.bf16 %v241_v0, %v239_v3  ;;  %v76_v13 = vld [vmem:[%s1385_s0 + $0x10c] sm:$0xf]  ;;  %v266_v14 = vmax.bf16 %v264_v7, %v261_v6 }
  0x15   :  { %v249_v15 = vsel %vm153_vm0, %v107_v2, 4286644096  ;;  %v92_v16 = vld [vmem:[%s1385_s0 + $0x14c] sm:$0xf]  ;;  %v272_v17 = vsel %vm153_vm0, %v60_v5, 4286644096  ;;  %v224_v18 = vmax.bf16 %v222_v63, %v220_v9 }
  0x16   :  { %v247_v19 = vmax.bf16 %v245_v4, %v243_v12  ;;  %v270_v20 = vmax.bf16 %v268_v8, %v266_v14  ;;  %v13_v21 = vld [vmem:[%s1385_s0 + $0x10] sm:$0xf]  ;;  %v253_v24 = vsel %vm153_vm0, %v123_v10, 4286644096  ;;  %v257_v25 = vsel %vm153_vm0, %v139_v11, 4286644096 }
  0x17   :  { %v29_v22 = vld [vmem:[%s1385_s0 + $0x50] sm:$0xf]  ;;  %v276_v26 = vsel %vm153_vm0, %v76_v13, 4286644096  ;;  %716 = vst.msk [vmem:[%s1386_s1 + $0x4] sm:$0xf] %vm153_vm0, %v224_v18 }
  0x18   :  { %v45_v23 = vld [vmem:[%s1385_s0 + $0x90] sm:$0xf]  ;;  %v251_v27 = vmax.bf16 %v249_v15, %v247_v19  ;;  %v108_v28 = vld [vmem:[%s1385_s0 + $0x18c] sm:$0xf]  ;;  %v274_v29 = vmax.bf16 %v272_v17, %v270_v20  ;;  %v280_v30 = vsel %vm153_vm0, %v92_v16, 4286644096 }
  0x19   :  { %v61_v31 = vld [vmem:[%s1385_s0 + $0xd0] sm:$0xf]  ;;  %v296_v32 = vsel %vm153_vm0, %v13_v21, 4286644096  ;;  %v299_v33 = vsel %vm153_vm0, %v29_v22, 4286644096 }
  0x1a   :  { %v303_v34 = vsel %vm153_vm0, %v45_v23, 4286644096  ;;  %v255_v35 = vmax.bf16 %v253_v24, %v251_v27  ;;  %v124_v36 = vld [vmem:[%s1385_s0 + $0x1cc] sm:$0xf]  ;;  %v278_v38 = vmax.bf16 %v276_v26, %v274_v29  ;;  %v77_v39 = vld [vmem:[%s1385_s0 + $0x110] sm:$0xf]  ;;  %v301_v40 = vmax.bf16 %v299_v33, %v296_v32 }
  0x1b   :  { %v140_v37 = vld [vmem:[%s1385_s0 + $0x20c] sm:$0xf]  ;;  %v284_v41 = vsel %vm153_vm0, %v108_v28, 4286644096  ;;  %v93_v42 = vld [vmem:[%s1385_s0 + $0x150] sm:$0xf] }
  0x1c   :  { %v307_v43 = vsel %vm153_vm0, %v61_v31, 4286644096  ;;  %v259_v44 = vmax.bf16 %v257_v25, %v255_v35  ;;  %v282_v45 = vmax.bf16 %v280_v30, %v278_v38  ;;  %v305_v46 = vmax.bf16 %v303_v34, %v301_v40  ;;  %v14_v47 = vld [vmem:[%s1385_s0 + $0x14] sm:$0xf]  ;;  %v109_v54 = vld [vmem:[%s1385_s0 + $0x190] sm:$0xf] }
  0x1d   :  { %v30_v48 = vld [vmem:[%s1385_s0 + $0x54] sm:$0xf]  ;;  %v288_v50 = vsel %vm153_vm0, %v124_v36, 4286644096  ;;  %v292_v51 = vsel %vm153_vm0, %v140_v37, 4286644096 }
  0x1e   :  { %v46_v49 = vld [vmem:[%s1385_s0 + $0x94] sm:$0xf]  ;;  %v311_v52 = vsel %vm153_vm0, %v77_v39, 4286644096  ;;  %717 = vst.msk [vmem:[%s1386_s1 + $0x8] sm:$0xf] %vm153_vm0, %v259_v44  ;;  %v286_v53 = vmax.bf16 %v284_v41, %v282_v45  ;;  %v309_v55 = vmax.bf16 %v307_v43, %v305_v46 }
  0x1f   :  { %v315_v56 = vsel %vm153_vm0, %v93_v42, 4286644096  ;;  %v62_v57 = vld [vmem:[%s1385_s0 + $0xd4] sm:$0xf]  ;;  %v331_v58 = vsel %vm153_vm0, %v14_v47, 4286644096 }
  0x20   :  { %v334_v59 = vsel %vm153_vm0, %v30_v48, 4286644096  ;;  %v338_v60 = vsel %vm153_vm0, %v46_v49, 4286644096  ;;  %v290_v61 = vmax.bf16 %v288_v50, %v286_v53  ;;  %v125_v62 = vld [vmem:[%s1385_s0 + $0x1d0] sm:$0xf]  ;;  %v313_v0 = vmax.bf16 %v311_v52, %v309_v55 }
  0x21   :  { %v141_v63 = vld [vmem:[%s1385_s0 + $0x210] sm:$0xf]  ;;  %v78_v1 = vld [vmem:[%s1385_s0 + $0x114] sm:$0xf]  ;;  %v336_v2 = vmax.bf16 %v334_v59, %v331_v58  ;;  %v319_v3 = vsel %vm153_vm0, %v109_v54, 4286644096 }
  0x22   :  { %v94_v4 = vld [vmem:[%s1385_s0 + $0x154] sm:$0xf]  ;;  %v342_v5 = vsel %vm153_vm0, %v62_v57, 4286644096  ;;  %v294_v6 = vmax.bf16 %v292_v51, %v290_v61  ;;  %v317_v7 = vmax.bf16 %v315_v56, %v313_v0  ;;  %v15_v9 = vld [vmem:[%s1385_s0 + $0x18] sm:$0xf] }
  0x23   :  { %v340_v8 = vmax.bf16 %v338_v60, %v336_v2  ;;  %v31_v10 = vld [vmem:[%s1385_s0 + $0x58] sm:$0xf]  ;;  %v323_v12 = vsel %vm153_vm0, %v125_v62, 4286644096  ;;  %v327_v13 = vsel %vm153_vm0, %v141_v63, 4286644096 }
  0x24   :  { %v47_v11 = vld [vmem:[%s1385_s0 + $0x98] sm:$0xf]  ;;  %v346_v14 = vsel %vm153_vm0, %v78_v1, 4286644096  ;;  %718 = vst.msk [vmem:[%s1386_s1 + $0xc] sm:$0xf] %vm153_vm0, %v294_v6  ;;  %v321_v15 = vmax.bf16 %v319_v3, %v317_v7 }
  0x25   :  { %v110_v16 = vld [vmem:[%s1385_s0 + $0x194] sm:$0xf]  ;;  %v344_v17 = vmax.bf16 %v342_v5, %v340_v8  ;;  %v350_v18 = vsel %vm153_vm0, %v94_v4, 4286644096  ;;  %v63_v19 = vld [vmem:[%s1385_s0 + $0xd8] sm:$0xf] }
  0x26   :  { %v366_v20 = vsel %vm153_vm0, %v15_v9, 4286644096  ;;  %v369_v21 = vsel %vm153_vm0, %v31_v10, 4286644096  ;;  %v373_v22 = vsel %vm153_vm0, %v47_v11, 4286644096  ;;  %v325_v23 = vmax.bf16 %v323_v12, %v321_v15 }
  0x27   :  { %v126_v24 = vld [vmem:[%s1385_s0 + $0x1d4] sm:$0xf]  ;;  %v348_v26 = vmax.bf16 %v346_v14, %v344_v17  ;;  %v79_v27 = vld [vmem:[%s1385_s0 + $0x118] sm:$0xf]  ;;  %v371_v28 = vmax.bf16 %v369_v21, %v366_v20  ;;  %v354_v29 = vsel %vm153_vm0, %v110_v16, 4286644096 }
  0x28   :  { %v142_v25 = vld [vmem:[%s1385_s0 + $0x214] sm:$0xf]  ;;  %v95_v30 = vld [vmem:[%s1385_s0 + $0x158] sm:$0xf]  ;;  %v377_v31 = vsel %vm153_vm0, %v63_v19, 4286644096  ;;  %v329_v32 = vmax.bf16 %v327_v13, %v325_v23 }
  0x29   :  { %v352_v33 = vmax.bf16 %v350_v18, %v348_v26  ;;  %v375_v34 = vmax.bf16 %v373_v22, %v371_v28  ;;  %v16_v35 = vld [vmem:[%s1385_s0 + $0x1c] sm:$0xf]  ;;  %v358_v38 = vsel %vm153_vm0, %v126_v24, 4286644096  ;;  %v362_v39 = vsel %vm153_vm0, %v142_v25, 4286644096 }
  0x2a   :  { %v32_v36 = vld [vmem:[%s1385_s0 + $0x5c] sm:$0xf]  ;;  %v381_v40 = vsel %vm153_vm0, %v79_v27, 4286644096  ;;  %719 = vst.msk [vmem:[%s1386_s1 + $0x10] sm:$0xf] %vm153_vm0, %v329_v32 }
  0x2b   :  { %v48_v37 = vld [vmem:[%s1385_s0 + $0x9c] sm:$0xf]  ;;  %v356_v41 = vmax.bf16 %v354_v29, %v352_v33  ;;  %v111_v42 = vld [vmem:[%s1385_s0 + $0x198] sm:$0xf]  ;;  %v379_v43 = vmax.bf16 %v377_v31, %v375_v34  ;;  %v385_v44 = vsel %vm153_vm0, %v95_v30, 4286644096 }
  0x2c   :  { %v64_v45 = vld [vmem:[%s1385_s0 + $0xdc] sm:$0xf]  ;;  %v401_v46 = vsel %vm153_vm0, %v16_v35, 4286644096  ;;  %v404_v47 = vsel %vm153_vm0, %v32_v36, 4286644096 }
  0x2d   :  { %v408_v48 = vsel %vm153_vm0, %v48_v37, 4286644096  ;;  %v360_v49 = vmax.bf16 %v358_v38, %v356_v41  ;;  %v127_v50 = vld [vmem:[%s1385_s0 + $0x1d8] sm:$0xf]  ;;  %v383_v52 = vmax.bf16 %v381_v40, %v379_v43  ;;  %v80_v53 = vld [vmem:[%s1385_s0 + $0x11c] sm:$0xf]  ;;  %v406_v54 = vmax.bf16 %v404_v47, %v401_v46 }
  0x2e   :  { %v143_v51 = vld [vmem:[%s1385_s0 + $0x218] sm:$0xf]  ;;  %v389_v55 = vsel %vm153_vm0, %v111_v42, 4286644096  ;;  %v96_v56 = vld [vmem:[%s1385_s0 + $0x15c] sm:$0xf] }
  0x2f   :  { %v412_v57 = vsel %vm153_vm0, %v64_v45, 4286644096  ;;  %v364_v58 = vmax.bf16 %v362_v39, %v360_v49  ;;  %v387_v59 = vmax.bf16 %v385_v44, %v383_v52  ;;  %v410_v60 = vmax.bf16 %v408_v48, %v406_v54  ;;  %v17_v61 = vld [vmem:[%s1385_s0 + $0x20] sm:$0xf]  ;;  %v112_v4 = vld [vmem:[%s1385_s0 + $0x19c] sm:$0xf] }
  0x30   :  { %v33_v62 = vld [vmem:[%s1385_s0 + $0x60] sm:$0xf]  ;;  %v393_v0 = vsel %vm153_vm0, %v127_v50, 4286644096  ;;  %v397_v1 = vsel %vm153_vm0, %v143_v51, 4286644096 }
  0x31   :  { %v49_v63 = vld [vmem:[%s1385_s0 + $0xa0] sm:$0xf]  ;;  %v416_v2 = vsel %vm153_vm0, %v80_v53, 4286644096  ;;  %720 = vst.msk [vmem:[%s1386_s1 + $0x14] sm:$0xf] %vm153_vm0, %v364_v58  ;;  %v391_v3 = vmax.bf16 %v389_v55, %v387_v59  ;;  %v414_v5 = vmax.bf16 %v412_v57, %v410_v60 }
  0x32   :  { %v420_v6 = vsel %vm153_vm0, %v96_v56, 4286644096  ;;  %v65_v7 = vld [vmem:[%s1385_s0 + $0xe0] sm:$0xf]  ;;  %v436_v8 = vsel %vm153_vm0, %v17_v61, 4286644096 }
  0x33   :  { %v439_v9 = vsel %vm153_vm0, %v33_v62, 4286644096  ;;  %v443_v10 = vsel %vm153_vm0, %v49_v63, 4286644096  ;;  %v395_v11 = vmax.bf16 %v393_v0, %v391_v3  ;;  %v128_v12 = vld [vmem:[%s1385_s0 + $0x1dc] sm:$0xf]  ;;  %v418_v14 = vmax.bf16 %v416_v2, %v414_v5 }
  0x34   :  { %v144_v13 = vld [vmem:[%s1385_s0 + $0x21c] sm:$0xf]  ;;  %v81_v15 = vld [vmem:[%s1385_s0 + $0x120] sm:$0xf]  ;;  %v441_v16 = vmax.bf16 %v439_v9, %v436_v8  ;;  %v424_v17 = vsel %vm153_vm0, %v112_v4, 4286644096 }
  0x35   :  { %v97_v18 = vld [vmem:[%s1385_s0 + $0x160] sm:$0xf]  ;;  %v447_v19 = vsel %vm153_vm0, %v65_v7, 4286644096  ;;  %v399_v20 = vmax.bf16 %v397_v1, %v395_v11  ;;  %v422_v21 = vmax.bf16 %v420_v6, %v418_v14  ;;  %v18_v23 = vld [vmem:[%s1385_s0 + $0x24] sm:$0xf] }
  0x36   :  { %v445_v22 = vmax.bf16 %v443_v10, %v441_v16  ;;  %v34_v24 = vld [vmem:[%s1385_s0 + $0x64] sm:$0xf]  ;;  %v428_v26 = vsel %vm153_vm0, %v128_v12, 4286644096  ;;  %v432_v27 = vsel %vm153_vm0, %v144_v13, 4286644096 }
  0x37   :  { %v50_v25 = vld [vmem:[%s1385_s0 + $0xa4] sm:$0xf]  ;;  %v451_v28 = vsel %vm153_vm0, %v81_v15, 4286644096  ;;  %721 = vst.msk [vmem:[%s1386_s1 + $0x18] sm:$0xf] %vm153_vm0, %v399_v20  ;;  %v426_v29 = vmax.bf16 %v424_v17, %v422_v21 }
  0x38   :  { %v113_v30 = vld [vmem:[%s1385_s0 + $0x1a0] sm:$0xf]  ;;  %v449_v31 = vmax.bf16 %v447_v19, %v445_v22  ;;  %v455_v32 = vsel %vm153_vm0, %v97_v18, 4286644096  ;;  %v66_v33 = vld [vmem:[%s1385_s0 + $0xe4] sm:$0xf] }
  0x39   :  { %v471_v34 = vsel %vm153_vm0, %v18_v23, 4286644096  ;;  %v474_v35 = vsel %vm153_vm0, %v34_v24, 4286644096  ;;  %v478_v36 = vsel %vm153_vm0, %v50_v25, 4286644096  ;;  %v430_v37 = vmax.bf16 %v428_v26, %v426_v29 }
  0x3a   :  { %v129_v38 = vld [vmem:[%s1385_s0 + $0x1e0] sm:$0xf]  ;;  %v453_v40 = vmax.bf16 %v451_v28, %v449_v31  ;;  %v82_v41 = vld [vmem:[%s1385_s0 + $0x124] sm:$0xf]  ;;  %v476_v42 = vmax.bf16 %v474_v35, %v471_v34  ;;  %v459_v43 = vsel %vm153_vm0, %v113_v30, 4286644096 }
  0x3b   :  { %v145_v39 = vld [vmem:[%s1385_s0 + $0x220] sm:$0xf]  ;;  %v98_v44 = vld [vmem:[%s1385_s0 + $0x164] sm:$0xf]  ;;  %v482_v45 = vsel %vm153_vm0, %v66_v33, 4286644096  ;;  %v434_v46 = vmax.bf16 %v432_v27, %v430_v37 }
  0x3c   :  { %v457_v47 = vmax.bf16 %v455_v32, %v453_v40  ;;  %v480_v48 = vmax.bf16 %v478_v36, %v476_v42  ;;  %v19_v49 = vld [vmem:[%s1385_s0 + $0x28] sm:$0xf]  ;;  %v463_v52 = vsel %vm153_vm0, %v129_v38, 4286644096  ;;  %v467_v53 = vsel %vm153_vm0, %v145_v39, 4286644096 }
  0x3d   :  { %v35_v50 = vld [vmem:[%s1385_s0 + $0x68] sm:$0xf]  ;;  %v486_v54 = vsel %vm153_vm0, %v82_v41, 4286644096  ;;  %722 = vst.msk [vmem:[%s1386_s1 + $0x1c] sm:$0xf] %vm153_vm0, %v434_v46 }
  0x3e   :  { %v51_v51 = vld [vmem:[%s1385_s0 + $0xa8] sm:$0xf]  ;;  %v461_v55 = vmax.bf16 %v459_v43, %v457_v47  ;;  %v114_v56 = vld [vmem:[%s1385_s0 + $0x1a4] sm:$0xf]  ;;  %v484_v57 = vmax.bf16 %v482_v45, %v480_v48  ;;  %v490_v58 = vsel %vm153_vm0, %v98_v44, 4286644096 }
  0x3f   :  { %v67_v59 = vld [vmem:[%s1385_s0 + $0xe8] sm:$0xf]  ;;  %v506_v60 = vsel %vm153_vm0, %v19_v49, 4286644096  ;;  %v509_v61 = vsel %vm153_vm0, %v35_v50, 4286644096 }
  0x40   :  { %v513_v62 = vsel %vm153_vm0, %v51_v51, 4286644096  ;;  %v465_v63 = vmax.bf16 %v463_v52, %v461_v55  ;;  %v130_v0 = vld [vmem:[%s1385_s0 + $0x1e4] sm:$0xf]  ;;  %v488_v2 = vmax.bf16 %v486_v54, %v484_v57  ;;  %v83_v3 = vld [vmem:[%s1385_s0 + $0x128] sm:$0xf]  ;;  %v511_v4 = vmax.bf16 %v509_v61, %v506_v60 }
  0x41   :  { %v146_v1 = vld [vmem:[%s1385_s0 + $0x224] sm:$0xf]  ;;  %v494_v5 = vsel %vm153_vm0, %v114_v56, 4286644096  ;;  %v99_v6 = vld [vmem:[%s1385_s0 + $0x168] sm:$0xf] }
  0x42   :  { %v517_v7 = vsel %vm153_vm0, %v67_v59, 4286644096  ;;  %v469_v8 = vmax.bf16 %v467_v53, %v465_v63  ;;  %v492_v9 = vmax.bf16 %v490_v58, %v488_v2  ;;  %v515_v10 = vmax.bf16 %v513_v62, %v511_v4  ;;  %v20_v11 = vld [vmem:[%s1385_s0 + $0x2c] sm:$0xf]  ;;  %v115_v18 = vld [vmem:[%s1385_s0 + $0x1a8] sm:$0xf] }
  0x43   :  { %v36_v12 = vld [vmem:[%s1385_s0 + $0x6c] sm:$0xf]  ;;  %v498_v14 = vsel %vm153_vm0, %v130_v0, 4286644096  ;;  %v502_v15 = vsel %vm153_vm0, %v146_v1, 4286644096 }
  0x44   :  { %v52_v13 = vld [vmem:[%s1385_s0 + $0xac] sm:$0xf]  ;;  %v521_v16 = vsel %vm153_vm0, %v83_v3, 4286644096  ;;  %723 = vst.msk [vmem:[%s1386_s1 + $0x20] sm:$0xf] %vm153_vm0, %v469_v8  ;;  %v496_v17 = vmax.bf16 %v494_v5, %v492_v9  ;;  %v519_v19 = vmax.bf16 %v517_v7, %v515_v10 }
  0x45   :  { %v525_v20 = vsel %vm153_vm0, %v99_v6, 4286644096  ;;  %v68_v21 = vld [vmem:[%s1385_s0 + $0xec] sm:$0xf]  ;;  %v541_v22 = vsel %vm153_vm0, %v20_v11, 4286644096 }
  0x46   :  { %v544_v23 = vsel %vm153_vm0, %v36_v12, 4286644096  ;;  %v548_v24 = vsel %vm153_vm0, %v52_v13, 4286644096  ;;  %v500_v25 = vmax.bf16 %v498_v14, %v496_v17  ;;  %v131_v26 = vld [vmem:[%s1385_s0 + $0x1e8] sm:$0xf]  ;;  %v523_v28 = vmax.bf16 %v521_v16, %v519_v19 }
  0x47   :  { %v147_v27 = vld [vmem:[%s1385_s0 + $0x228] sm:$0xf]  ;;  %v84_v29 = vld [vmem:[%s1385_s0 + $0x12c] sm:$0xf]  ;;  %v546_v30 = vmax.bf16 %v544_v23, %v541_v22  ;;  %v529_v31 = vsel %vm153_vm0, %v115_v18, 4286644096 }
  0x48   :  { %v100_v32 = vld [vmem:[%s1385_s0 + $0x16c] sm:$0xf]  ;;  %v552_v33 = vsel %vm153_vm0, %v68_v21, 4286644096  ;;  %v504_v34 = vmax.bf16 %v502_v15, %v500_v25  ;;  %v527_v35 = vmax.bf16 %v525_v20, %v523_v28  ;;  %v21_v37 = vld [vmem:[%s1385_s0 + $0x30] sm:$0xf] }
  0x49   :  { %v550_v36 = vmax.bf16 %v548_v24, %v546_v30  ;;  %v37_v38 = vld [vmem:[%s1385_s0 + $0x70] sm:$0xf]  ;;  %v533_v40 = vsel %vm153_vm0, %v131_v26, 4286644096  ;;  %v537_v41 = vsel %vm153_vm0, %v147_v27, 4286644096 }
  0x4a   :  { %v53_v39 = vld [vmem:[%s1385_s0 + $0xb0] sm:$0xf]  ;;  %v556_v42 = vsel %vm153_vm0, %v84_v29, 4286644096  ;;  %724 = vst.msk [vmem:[%s1386_s1 + $0x24] sm:$0xf] %vm153_vm0, %v504_v34  ;;  %v531_v43 = vmax.bf16 %v529_v31, %v527_v35 }
  0x4b   :  { %v116_v44 = vld [vmem:[%s1385_s0 + $0x1ac] sm:$0xf]  ;;  %v554_v45 = vmax.bf16 %v552_v33, %v550_v36  ;;  %v560_v46 = vsel %vm153_vm0, %v100_v32, 4286644096  ;;  %v69_v47 = vld [vmem:[%s1385_s0 + $0xf0] sm:$0xf] }
  0x4c   :  { %v576_v48 = vsel %vm153_vm0, %v21_v37, 4286644096  ;;  %v579_v49 = vsel %vm153_vm0, %v37_v38, 4286644096  ;;  %v583_v50 = vsel %vm153_vm0, %v53_v39, 4286644096  ;;  %v535_v51 = vmax.bf16 %v533_v40, %v531_v43 }
  0x4d   :  { %v132_v52 = vld [vmem:[%s1385_s0 + $0x1ec] sm:$0xf]  ;;  %v558_v54 = vmax.bf16 %v556_v42, %v554_v45  ;;  %v85_v55 = vld [vmem:[%s1385_s0 + $0x130] sm:$0xf]  ;;  %v581_v56 = vmax.bf16 %v579_v49, %v576_v48  ;;  %v564_v57 = vsel %vm153_vm0, %v116_v44, 4286644096 }
  0x4e   :  { %v148_v53 = vld [vmem:[%s1385_s0 + $0x22c] sm:$0xf]  ;;  %v101_v58 = vld [vmem:[%s1385_s0 + $0x170] sm:$0xf]  ;;  %v587_v59 = vsel %vm153_vm0, %v69_v47, 4286644096  ;;  %v539_v60 = vmax.bf16 %v537_v41, %v535_v51 }
  0x4f   :  { %v562_v61 = vmax.bf16 %v560_v46, %v558_v54  ;;  %v585_v62 = vmax.bf16 %v583_v50, %v581_v56  ;;  %v22_v63 = vld [vmem:[%s1385_s0 + $0x34] sm:$0xf]  ;;  %v568_v2 = vsel %vm153_vm0, %v132_v52, 4286644096  ;;  %v572_v3 = vsel %vm153_vm0, %v148_v53, 4286644096 }
  0x50   :  { %v38_v0 = vld [vmem:[%s1385_s0 + $0x74] sm:$0xf]  ;;  %v591_v4 = vsel %vm153_vm0, %v85_v55, 4286644096  ;;  %725 = vst.msk [vmem:[%s1386_s1 + $0x28] sm:$0xf] %vm153_vm0, %v539_v60 }
  0x51   :  { %v54_v1 = vld [vmem:[%s1385_s0 + $0xb4] sm:$0xf]  ;;  %v566_v5 = vmax.bf16 %v564_v57, %v562_v61  ;;  %v117_v6 = vld [vmem:[%s1385_s0 + $0x1b0] sm:$0xf]  ;;  %v589_v7 = vmax.bf16 %v587_v59, %v585_v62  ;;  %v595_v8 = vsel %vm153_vm0, %v101_v58, 4286644096 }
  0x52   :  { %v70_v9 = vld [vmem:[%s1385_s0 + $0xf4] sm:$0xf]  ;;  %v611_v10 = vsel %vm153_vm0, %v22_v63, 4286644096  ;;  %v614_v11 = vsel %vm153_vm0, %v38_v0, 4286644096 }
  0x53   :  { %v618_v12 = vsel %vm153_vm0, %v54_v1, 4286644096  ;;  %v570_v13 = vmax.bf16 %v568_v2, %v566_v5  ;;  %v133_v14 = vld [vmem:[%s1385_s0 + $0x1f0] sm:$0xf]  ;;  %v593_v16 = vmax.bf16 %v591_v4, %v589_v7  ;;  %v86_v17 = vld [vmem:[%s1385_s0 + $0x134] sm:$0xf]  ;;  %v616_v18 = vmax.bf16 %v614_v11, %v611_v10 }
  0x54   :  { %v149_v15 = vld [vmem:[%s1385_s0 + $0x230] sm:$0xf]  ;;  %v599_v19 = vsel %vm153_vm0, %v117_v6, 4286644096  ;;  %v102_v20 = vld [vmem:[%s1385_s0 + $0x174] sm:$0xf] }
  0x55   :  { %v622_v21 = vsel %vm153_vm0, %v70_v9, 4286644096  ;;  %v574_v22 = vmax.bf16 %v572_v3, %v570_v13  ;;  %v597_v23 = vmax.bf16 %v595_v8, %v593_v16  ;;  %v620_v24 = vmax.bf16 %v618_v12, %v616_v18  ;;  %v23_v25 = vld [vmem:[%s1385_s0 + $0x38] sm:$0xf]  ;;  %v118_v32 = vld [vmem:[%s1385_s0 + $0x1b4] sm:$0xf] }
  0x56   :  { %v39_v26 = vld [vmem:[%s1385_s0 + $0x78] sm:$0xf]  ;;  %v603_v28 = vsel %vm153_vm0, %v133_v14, 4286644096  ;;  %v607_v29 = vsel %vm153_vm0, %v149_v15, 4286644096 }
  0x57   :  { %v55_v27 = vld [vmem:[%s1385_s0 + $0xb8] sm:$0xf]  ;;  %v626_v30 = vsel %vm153_vm0, %v86_v17, 4286644096  ;;  %726 = vst.msk [vmem:[%s1386_s1 + $0x2c] sm:$0xf] %vm153_vm0, %v574_v22  ;;  %v601_v31 = vmax.bf16 %v599_v19, %v597_v23  ;;  %v624_v33 = vmax.bf16 %v622_v21, %v620_v24 }
  0x58   :  { %v630_v34 = vsel %vm153_vm0, %v102_v20, 4286644096  ;;  %v71_v35 = vld [vmem:[%s1385_s0 + $0xf8] sm:$0xf]  ;;  %v646_v36 = vsel %vm153_vm0, %v23_v25, 4286644096 }
  0x59   :  { %v649_v37 = vsel %vm153_vm0, %v39_v26, 4286644096  ;;  %v653_v38 = vsel %vm153_vm0, %v55_v27, 4286644096  ;;  %v605_v39 = vmax.bf16 %v603_v28, %v601_v31  ;;  %v134_v40 = vld [vmem:[%s1385_s0 + $0x1f4] sm:$0xf]  ;;  %v628_v42 = vmax.bf16 %v626_v30, %v624_v33 }
  0x5a   :  { %v150_v41 = vld [vmem:[%s1385_s0 + $0x234] sm:$0xf]  ;;  %v87_v43 = vld [vmem:[%s1385_s0 + $0x138] sm:$0xf]  ;;  %v651_v44 = vmax.bf16 %v649_v37, %v646_v36  ;;  %v634_v45 = vsel %vm153_vm0, %v118_v32, 4286644096 }
  0x5b   :  { %v103_v46 = vld [vmem:[%s1385_s0 + $0x178] sm:$0xf]  ;;  %v657_v47 = vsel %vm153_vm0, %v71_v35, 4286644096  ;;  %v609_v48 = vmax.bf16 %v607_v29, %v605_v39  ;;  %v632_v49 = vmax.bf16 %v630_v34, %v628_v42  ;;  %v24_v51 = vld [vmem:[%s1385_s0 + $0x3c] sm:$0xf] }
  0x5c   :  { %v655_v50 = vmax.bf16 %v653_v38, %v651_v44  ;;  %v40_v52 = vld [vmem:[%s1385_s0 + $0x7c] sm:$0xf]  ;;  %v638_v54 = vsel %vm153_vm0, %v134_v40, 4286644096  ;;  %v642_v55 = vsel %vm153_vm0, %v150_v41, 4286644096 }
  0x5d   :  { %v56_v53 = vld [vmem:[%s1385_s0 + $0xbc] sm:$0xf]  ;;  %v661_v56 = vsel %vm153_vm0, %v87_v43, 4286644096  ;;  %727 = vst.msk [vmem:[%s1386_s1 + $0x30] sm:$0xf] %vm153_vm0, %v609_v48  ;;  %v636_v57 = vmax.bf16 %v634_v45, %v632_v49 }
  0x5e   :  { %v119_v58 = vld [vmem:[%s1385_s0 + $0x1b8] sm:$0xf]  ;;  %v659_v59 = vmax.bf16 %v657_v47, %v655_v50  ;;  %v665_v60 = vsel %vm153_vm0, %v103_v46, 4286644096  ;;  %v72_v61 = vld [vmem:[%s1385_s0 + $0xfc] sm:$0xf] }
  0x5f   :  { %v681_v62 = vsel %vm153_vm0, %v24_v51, 4286644096  ;;  %v684_v63 = vsel %vm153_vm0, %v40_v52, 4286644096  ;;  %v688_v0 = vsel %vm153_vm0, %v56_v53, 4286644096  ;;  %v640_v1 = vmax.bf16 %v638_v54, %v636_v57 }
  0x60   :  { %v135_v2 = vld [vmem:[%s1385_s0 + $0x1f8] sm:$0xf]  ;;  %v663_v3 = vmax.bf16 %v661_v56, %v659_v59  ;;  %v88_v4 = vld [vmem:[%s1385_s0 + $0x13c] sm:$0xf]  ;;  %v686_v5 = vmax.bf16 %v684_v63, %v681_v62  ;;  %v669_v6 = vsel %vm153_vm0, %v119_v58, 4286644096 }
  0x61   :  { %v692_v7 = vsel %vm153_vm0, %v72_v61, 4286644096  ;;  %v644_v8 = vmax.bf16 %v642_v55, %v640_v1  ;;  %v151_v9 = vld [vmem:[%s1385_s0 + $0x238] sm:$0xf]  ;;  %v104_v11 = vld [vmem:[%s1385_s0 + $0x17c] sm:$0xf] }
  0x62   :  { %v667_v10 = vmax.bf16 %v665_v60, %v663_v3  ;;  %v690_v12 = vmax.bf16 %v688_v0, %v686_v5  ;;  %v673_v13 = vsel %vm153_vm0, %v135_v2, 4286644096  ;;  %v696_v14 = vsel %vm153_vm0, %v88_v4, 4286644096  ;;  %v120_v16 = vld [vmem:[%s1385_s0 + $0x1bc] sm:$0xf] }
  0x63   :  { %728 = vst.msk [vmem:[%s1386_s1 + $0x34] sm:$0xf] %vm153_vm0, %v644_v8  ;;  %v677_v18 = vsel %vm153_vm0, %v151_v9, 4286644096  ;;  %v700_v19 = vsel %vm153_vm0, %v104_v11, 4286644096 }
  0x64   :  { %v671_v15 = vmax.bf16 %v669_v6, %v667_v10  ;;  %v694_v17 = vmax.bf16 %v692_v7, %v690_v12  ;;  %v136_v21 = vld [vmem:[%s1385_s0 + $0x1fc] sm:$0xf]  ;;  %v704_v23 = vsel %vm153_vm0, %v120_v16, 4286644096 }
  0x65   :  { %v152_v25 = vld [vmem:[%s1385_s0 + $0x23c] sm:$0xf]  ;;  %v708_v27 = vsel %vm153_vm0, %v136_v21, 4286644096 }
  0x66   :  { %v675_v20 = vmax.bf16 %v673_v13, %v671_v15  ;;  %v698_v22 = vmax.bf16 %v696_v14, %v694_v17  ;;  %v712_v29 = vsel %vm153_vm0, %v152_v25, 4286644096 }
  0x68   :  { %v679_v24 = vmax.bf16 %v677_v18, %v675_v20  ;;  %v702_v26 = vmax.bf16 %v700_v19, %v698_v22 }
  0x6a   :  { %729 = vst.msk [vmem:[%s1386_s1 + $0x38] sm:$0xf] %vm153_vm0, %v679_v24  ;;  %v706_v28 = vmax.bf16 %v704_v23, %v702_v26 }
  0x6c   :  { %v710_v30 = vmax.bf16 %v708_v27, %v706_v28 }
  0x6e   :  { %v714_v31 = vmax.bf16 %v712_v29, %v710_v30 }
  0x70   :  { %730 = vst.msk [vmem:[%s1386_s1 + $0x3c] sm:$0xf] %vm153_vm0, %v714_v31 }

// kernel: _lambda_.16
= control target key start
LH: loop header
LB: loop body
LE: loop exit
PB: predicated region body
PF: predicated region fallthrough
CT: control target
= control target key end

     0   :  { %vm19_vm0 = vcmask 523264   ;;  %vm1074_vm1 = vcmask 519168   ;;  %s1911_s1 = inlined_call_operand.vmem [shape: bf16[640,64], index: 1, kind: input, shape index: {}]   ;;  %s1912_s0 = inlined_call_operand.vmem [shape: bf16[128,640], index: 0, kind: input, shape index: {}]   ;;  %s1913_s2 = inlined_call_operand.vmem [shape: f32[1,64], index: 2, kind: input, shape index: {}]   ;;  %s1914_s3 = inlined_call_operand.vmem [shape: bf16[128,64], index: 3, kind: output, shape index: {}]  }
   0x1   :  { %v1401_v0 = vld [vmem:[%s1911_s1 + $0x40] sm:$0xff]   ;;  %v1405_v4 = vld [vmem:[%s1911_s1 + $0x48] sm:$0xff]   ;;  %v1409_v8 = vld [vmem:[%s1911_s1 + $0x50] sm:$0xff]  }
   0x2   :  { %v1402_v1 = vld [vmem:[%s1911_s1 + $0xc0] sm:$0xff]   ;;  %1208 = vmatprep.subr.bf16.mxu0 %v1401_v0  ;;  %v1406_v5 = vld [vmem:[%s1911_s1 + $0xc8] sm:$0xff]   ;;  %v1410_v9 = vld [vmem:[%s1911_s1 + $0xd0] sm:$0xff]  }
   0x3   :  { %v1403_v2 = vld [vmem:[%s1911_s1] sm:$0xff]   ;;  %1272 = vmatprep.subr.bf16.mxu1 %v1402_v1  ;;  %v1407_v6 = vld [vmem:[%s1911_s1 + $0x8] sm:$0xff]   ;;  %v1411_v10 = vld [vmem:[%s1911_s1 + $0x10] sm:$0xff]  }
   0x4   :  { %v1404_v3 = vld [vmem:[%s1911_s1 + $0x80] sm:$0xff]   ;;  %1209 = vmatpush3.bf16.msra.mxu0 %v1403_v2  ;;  %v1408_v7 = vld [vmem:[%s1911_s1 + $0x88] sm:$0xff]   ;;  %v1412_v11 = vld [vmem:[%s1911_s1 + $0x90] sm:$0xff]  }
   0x5   :  { %1273 = vmatpush3.bf16.msra.mxu1 %v1404_v3  ;;  %1210 = vmatprep.subr.bf16.mxu0 %v1405_v4  ;;  %v1413_v12 = vld [vmem:[%s1911_s1 + $0x58] sm:$0xff]   ;;  %v1417_v16 = vld [vmem:[%s1911_s1 + $0x60] sm:$0xff]   ;;  %v1421_v20 = vld [vmem:[%s1911_s1 + $0x68] sm:$0xff]  }
   0x6   :  { %1274 = vmatprep.subr.bf16.mxu1 %v1406_v5  ;;  %v1414_v13 = vld [vmem:[%s1911_s1 + $0xd8] sm:$0xff]   ;;  %v1418_v17 = vld [vmem:[%s1911_s1 + $0xe0] sm:$0xff]   ;;  %v1422_v21 = vld [vmem:[%s1911_s1 + $0xe8] sm:$0xff]  }
   0x7   :  { %v1415_v14 = vld [vmem:[%s1911_s1 + $0x18] sm:$0xff]   ;;  %v1419_v18 = vld [vmem:[%s1911_s1 + $0x20] sm:$0xff]   ;;  %v1423_v22 = vld [vmem:[%s1911_s1 + $0x28] sm:$0xff]  }
   0x8   :  { %1211 = vmatpush3.bf16.msra.mxu0 %v1407_v6  ;;  %v1416_v15 = vld [vmem:[%s1911_s1 + $0x98] sm:$0xff]   ;;  %v1420_v19 = vld [vmem:[%s1911_s1 + $0xa0] sm:$0xff]   ;;  %v1424_v23 = vld [vmem:[%s1911_s1 + $0xa8] sm:$0xff]  }
   0x9   :  { %1275 = vmatpush3.bf16.msra.mxu1 %v1408_v7  ;;  %1212 = vmatprep.subr.bf16.mxu0 %v1409_v8  ;;  %v1425_v24 = vld [vmem:[%s1911_s1 + $0x70] sm:$0xff]   ;;  %v1429_v28 = vld [vmem:[%s1911_s1 + $0x78] sm:$0xff]   ;;  %v1438_v35 = vld [vmem:[%s1912_s0 + $0xc] ss:$20 sps:$4 sm:$0xff]  }
   0xa   :  { %1276 = vmatprep.subr.bf16.mxu1 %v1410_v9  ;;  %v1426_v25 = vld [vmem:[%s1911_s1 + $0xf0] sm:$0xff]   ;;  %v1430_v29 = vld [vmem:[%s1911_s1 + $0xf8] sm:$0xff]   ;;  %v1439_v36 = vld [vmem:[%s1911_s1 + $0x100] sm:$0xff]   ;;  %757 = vmatprep.mubr.bf16.mxu1 %v1438_v35 }
   0xb   :  { %v1427_v26 = vld [vmem:[%s1911_s1 + $0x30] sm:$0xff]   ;;  %v1431_v30 = vld [vmem:[%s1911_s1 + $0x38] sm:$0xff]   ;;  %v1440_v37 = vld [vmem:[%s1912_s0 + $0x2c] ss:$20 sps:$4 sm:$0xff]  }
   0xc   :  { %1213 = vmatpush3.bf16.msra.mxu0 %v1411_v10  ;;  %v1428_v27 = vld [vmem:[%s1911_s1 + $0xb0] sm:$0xff]   ;;  %v1432_v31 = vld [vmem:[%s1911_s1 + $0xb8] sm:$0xff]   ;;  %v1446_v39 = vld [vmem:[%s1911_s1 + $0x108] sm:$0xff]  }
   0xd   :  { %1277 = vmatpush3.bf16.msra.mxu1 %v1412_v11  ;;  %1214 = vmatprep.subr.bf16.mxu0 %v1413_v12  ;;  %v1433_v32 = vld [vmem:[%s1912_s0] ss:$20 sps:$4 sm:$0xff]   ;;  %v1435_v33 = vld [vmem:[%s1912_s0 + $0x4] ss:$20 sps:$4 sm:$0xff]   ;;  %v1436_v34 = vld [vmem:[%s1912_s0 + $0x8] ss:$20 sps:$4 sm:$0xff]  }
   0xe   :  { %1278 = vmatprep.subr.bf16.mxu1 %v1414_v13  ;;  %660 = vmatprep.mubr.bf16.mxu0 %v1435_v33  ;;  %v1442_v38 = vld [vmem:[%s1912_s0 + $0x34] ss:$20 sps:$4 sm:$0xff]   ;;  %v1445_v41 = vld [vmem:[%s1912_s0 + $0x30] ss:$20 sps:$4 sm:$0xff]   ;;  %v1460_v45 = vld [vmem:[%s1911_s1 + $0x118] sm:$0xff]  }
   0xf   :  { %v1444_v40 = vld [vmem:[%s1912_s0 + $0x28] ss:$20 sps:$4 sm:$0xff]   ;;  %v1453_v44 = vld [vmem:[%s1911_s1 + $0x110] sm:$0xff]   ;;  %v1452_v47 = vld [vmem:[%s1912_s0 + $0x58] ss:$20 sps:$4 sm:$0xff]  }
  0x10   :  { %1215 = vmatpush3.bf16.msra.mxu0 %v1415_v14  ;;  %v1447_v42 = vld [vmem:[%s1912_s0 + $0x54] ss:$20 sps:$4 sm:$0xff]   ;;  %v1449_v43 = vld [vmem:[%s1912_s0 + $0x5c] ss:$20 sps:$4 sm:$0xff]   ;;  %v1456_v49 = vld [vmem:[%s1912_s0 + $0x84] ss:$20 sps:$4 sm:$0xff]  }
  0x11   :  { %1279 = vmatpush3.bf16.msra.mxu1 %v1416_v15  ;;  %1216 = vmatprep.subr.bf16.mxu0 %v1417_v16  ;;  %v1451_v46 = vld [vmem:[%s1912_s0 + $0x50] ss:$20 sps:$4 sm:$0xff]   ;;  %v1474_v51 = vld [vmem:[%s1911_s1 + $0x128] sm:$0xff]   ;;  %v1459_v53 = vld [vmem:[%s1912_s0 + $0x80] ss:$20 sps:$4 sm:$0xff]   ;;  %v1497_v16 = vmov 0.0  }
  0x12   :  { %1280 = vmatprep.subr.bf16.mxu1 %v1418_v17  ;;  %v1454_v48 = vld [vmem:[%s1912_s0 + $0x7c] ss:$20 sps:$4 sm:$0xff]   ;;  %v1467_v50 = vld [vmem:[%s1911_s1 + $0x120] sm:$0xff]   ;;  %v1458_v52 = vld [vmem:[%s1912_s0 + $0x78] ss:$20 sps:$4 sm:$0xff]   ;;  %22 = vst.msk [vmem:[#allocation2 + $0x10] sm:$0xff] %vm19_vm0, %v1497_v16 }
  0x13   :  { %v1461_v54 = vld [vmem:[%s1912_s0 + $0xa4] ss:$20 sps:$4 sm:$0xff]   ;;  %v1481_v55 = vld [vmem:[%s1911_s1 + $0x130] sm:$0xff]   ;;  %v1463_v56 = vld [vmem:[%s1912_s0 + $0xac] ss:$20 sps:$4 sm:$0xff]   ;;  %20 = vst.msk [vmem:[#allocation2] sm:$0xff] %vm19_vm0, %v1497_v16 }
  0x14   :  { %1217 = vmatpush3.bf16.msra.mxu0 %v1419_v18  ;;  %v1488_v57 = vld [vmem:[%s1911_s1 + $0x138] sm:$0xff]   ;;  %v1465_v58 = vld [vmem:[%s1912_s0 + $0xa0] ss:$20 sps:$4 sm:$0xff]   ;;  %v1473_v63 = vld [vmem:[%s1912_s0 + $0xd0] ss:$20 sps:$4 sm:$0xff]   ;;  %21 = vst.msk [vmem:[#allocation2 + $0x8] sm:$0xff] %vm19_vm0, %v1497_v16 }
  0x15   :  { %1281 = vmatpush3.bf16.msra.mxu1 %v1420_v19  ;;  %1218 = vmatprep.subr.bf16.mxu0 %v1421_v20  ;;  %v1466_v59 = vld [vmem:[%s1912_s0 + $0xa8] ss:$20 sps:$4 sm:$0xff]   ;;  %v1468_v60 = vld [vmem:[%s1912_s0 + $0xcc] ss:$20 sps:$4 sm:$0xff]   ;;  %v1479_v2 = vld [vmem:[%s1912_s0 + $0xf0] ss:$20 sps:$4 sm:$0xff]  }
  0x16   :  { %1282 = vmatprep.subr.bf16.mxu1 %v1422_v21  ;;  %v1470_v61 = vld [vmem:[%s1912_s0 + $0xd4] ss:$20 sps:$4 sm:$0xff]   ;;  %v1477_v1 = vld [vmem:[%s1912_s0 + $0xfc] ss:$20 sps:$4 sm:$0xff]   ;;  %v1480_v3 = vld [vmem:[%s1912_s0 + $0xf8] ss:$20 sps:$4 sm:$0xff]  }
  0x17   :  { %v1472_v62 = vld [vmem:[%s1912_s0 + $0xc8] ss:$20 sps:$4 sm:$0xff]   ;;  %v1484_v5 = vld [vmem:[%s1912_s0 + $0x124] ss:$20 sps:$4 sm:$0xff]   ;;  %v1487_v7 = vld [vmem:[%s1912_s0 + $0x120] ss:$20 sps:$4 sm:$0xff]  }
  0x18   :  { %1219 = vmatpush3.bf16.msra.mxu0 %v1423_v22  ;;  %v1475_v0 = vld [vmem:[%s1912_s0 + $0xf4] ss:$20 sps:$4 sm:$0xff]   ;;  %v1482_v4 = vld [vmem:[%s1912_s0 + $0x11c] ss:$20 sps:$4 sm:$0xff]   ;;  %v1486_v6 = vld [vmem:[%s1912_s0 + $0x118] ss:$20 sps:$4 sm:$0xff]  }
  0x19   :  { %1283 = vmatpush3.bf16.msra.mxu1 %v1424_v23  ;;  %1220 = vmatprep.subr.bf16.mxu0 %v1425_v24  ;;  %v1489_v8 = vld [vmem:[%s1912_s0 + $0x10] ss:$20 sps:$4 sm:$0xff]   ;;  %v1491_v10 = vld [vmem:[%s1912_s0 + $0x38] ss:$20 sps:$4 sm:$0xff]   ;;  %v1493_v12 = vld [vmem:[%s1912_s0 + $0x60] ss:$20 sps:$4 sm:$0xff]  }
  0x1a   :  { %1284 = vmatprep.subr.bf16.mxu1 %v1426_v25  ;;  %v1490_v9 = vld [vmem:[%s1912_s0 + $0xb0] ss:$20 sps:$4 sm:$0xff]   ;;  %v1492_v11 = vld [vmem:[%s1912_s0 + $0xd8] ss:$20 sps:$4 sm:$0xff]   ;;  %v1494_v13 = vld [vmem:[%s1912_s0 + $0x100] ss:$20 sps:$4 sm:$0xff]  }
  0x1b   :  { %v1495_v14 = vld [vmem:[%s1912_s0 + $0x88] ss:$20 sps:$4 sm:$0xff]   ;;  %23 = vst.msk [vmem:[#allocation2 + $0x18] sm:$0xff] %vm19_vm0, %v1497_v16  ;;  %24 = vst.msk [vmem:[#allocation2 + $0x20] sm:$0xff] %vm19_vm0, %v1497_v16 }
  0x1c   :  { %1221 = vmatpush3.bf16.msra.mxu0 %v1427_v26  ;;  %v1496_v15 = vld [vmem:[%s1912_s0 + $0x128] ss:$20 sps:$4 sm:$0xff]   ;;  %25 = vst.msk [vmem:[#allocation2 + $0x28] sm:$0xff] %vm19_vm0, %v1497_v16  ;;  %26 = vst.msk [vmem:[#allocation2 + $0x30] sm:$0xff] %vm19_vm0, %v1497_v16 }
  0x1d   :  { %1285 = vmatpush3.bf16.msra.mxu1 %v1428_v27  ;;  %1222 = vmatprep.subr.bf16.mxu0 %v1429_v28  ;;  %27 = vst.msk [vmem:[#allocation2 + $0x38] sm:$0xff] %vm19_vm0, %v1497_v16  ;;  %28 = vst.msk [vmem:[#allocation2 + $0x40] sm:$0xff] %vm19_vm0, %v1497_v16 }
  0x1e   :  { %1286 = vmatprep.subr.bf16.mxu1 %v1430_v29  ;;  %29 = vst.msk [vmem:[#allocation2 + $0x48] sm:$0xff] %vm19_vm0, %v1497_v16  ;;  %30 = vst.msk [vmem:[#allocation2 + $0x50] sm:$0xff] %vm19_vm0, %v1497_v16 }
  0x1f   :  { %31 = vst.msk [vmem:[#allocation2 + $0x58] sm:$0xff] %vm19_vm0, %v1497_v16  ;;  %32 = vst.msk [vmem:[#allocation2 + $0x60] sm:$0xff] %vm19_vm0, %v1497_v16 }
  0x20   :  { %1223 = vmatpush3.bf16.msra.mxu0 %v1431_v30  ;;  %33 = vst.msk [vmem:[#allocation2 + $0x68] sm:$0xff] %vm19_vm0, %v1497_v16  ;;  %34 = vst.msk [vmem:[#allocation2 + $0x70] sm:$0xff] %vm19_vm0, %v1497_v16 }
  0x21   :  { %1287 = vmatpush3.bf16.msra.mxu1 %v1432_v31  ;;  %1352 = vmatprep.subr.bf16.mxu0 %v1439_v36  ;;  %35 = vst.msk [vmem:[#allocation2 + $0x78] sm:$0xff] %vm19_vm0, %v1497_v16 }
  0x22   :  { %1384 = vmatprep.subr.bf16.mxu1 %v1439_v36 }
  0x23   :  { %661 = vmatmul.mubr.bf16.vlgmr.msra.gmra.mrb[0].mxu0 %v1433_v32 }
  0x24   :  { %758 = vmatmul.mubr.bf16.vlgmr.msra.gmra.mrb[0].mxu1 %v1436_v34  ;;  %1353 = vmatpush3.bf16.msra.mxu0 %v1439_v36 }
  0x25   :  { %1392 = vmatpush3.bf16.msra.mxu1 %v1439_v36  ;;  %668 = vmatprep.mubr.bf16.mxu0 %v1440_v37 }
  0x26   :  { %765 = vmatprep.mubr.bf16.mxu1 %v1442_v38  ;;  %1354 = vmatprep.subr.bf16.mxu0 %v1446_v39 }
  0x27   :  { %1385 = vmatprep.subr.bf16.mxu1 %v1446_v39 }
  0x28   :  { %1355 = vmatpush3.bf16.msra.mxu0 %v1446_v39 }
  0x29   :  { %1393 = vmatpush3.bf16.msra.mxu1 %v1446_v39  ;;  %1356 = vmatprep.subr.bf16.mxu0 %v1453_v44 }
  0x2a   :  { %1386 = vmatprep.subr.bf16.mxu1 %v1453_v44 }
  0x2b   :  { %669 = vmatmul.mubr.bf16.gmra.mrb[4].mxu0 %v1444_v40 }
  0x2c   :  { %766 = vmatmul.mubr.bf16.gmra.mrb[4].mxu1 %v1445_v41  ;;  %676 = vmatprep.mubr.bf16.mxu0 %v1447_v42 }
  0x2d   :  { %773 = vmatprep.mubr.bf16.mxu1 %v1449_v43  ;;  %1357 = vmatpush3.bf16.msra.mxu0 %v1453_v44 }
  0x2e   :  { %1394 = vmatpush3.bf16.msra.mxu1 %v1453_v44  ;;  %1358 = vmatprep.subr.bf16.mxu0 %v1460_v45 }
  0x2f   :  { %1387 = vmatprep.subr.bf16.mxu1 %v1460_v45 }
  0x31   :  { %1359 = vmatpush3.bf16.msra.mxu0 %v1460_v45 }
  0x32   :  { %1395 = vmatpush3.bf16.msra.mxu1 %v1460_v45  ;;  %1360 = vmatprep.subr.bf16.mxu0 %v1467_v50 }
  0x33   :  { %677 = vmatmul.mubr.bf16.gmra.mrb[8].mxu0 %v1451_v46  ;;  %1388 = vmatprep.subr.bf16.mxu1 %v1467_v50 }
  0x34   :  { %774 = vmatmul.mubr.bf16.gmra.mrb[8].mxu1 %v1452_v47  ;;  %684 = vmatprep.mubr.bf16.mxu0 %v1454_v48 }
  0x35   :  { %781 = vmatprep.mubr.bf16.mxu1 %v1456_v49  ;;  %1361 = vmatpush3.bf16.msra.mxu0 %v1467_v50 }
  0x36   :  { %1396 = vmatpush3.bf16.msra.mxu1 %v1467_v50  ;;  %1362 = vmatprep.subr.bf16.mxu0 %v1474_v51 }
  0x37   :  { %1389 = vmatprep.subr.bf16.mxu1 %v1474_v51 }
  0x39   :  { %1363 = vmatpush3.bf16.msra.mxu0 %v1474_v51 }
  0x3a   :  { %1397 = vmatpush3.bf16.msra.mxu1 %v1474_v51  ;;  %1364 = vmatprep.subr.bf16.mxu0 %v1481_v55 }
  0x3b   :  { %685 = vmatmul.mubr.bf16.gmra.mrb[12].mxu0 %v1458_v52  ;;  %1390 = vmatprep.subr.bf16.mxu1 %v1481_v55 }
  0x3c   :  { %782 = vmatmul.mubr.bf16.gmra.mrb[12].mxu1 %v1459_v53  ;;  %692 = vmatprep.mubr.bf16.mxu0 %v1461_v54 }
  0x3d   :  { %789 = vmatprep.mubr.bf16.mxu1 %v1463_v56  ;;  %1365 = vmatpush3.bf16.msra.mxu0 %v1481_v55 }
  0x3e   :  { %1398 = vmatpush3.bf16.msra.mxu1 %v1481_v55  ;;  %1366 = vmatprep.subr.bf16.mxu0 %v1488_v57 }
  0x3f   :  { %1391 = vmatprep.subr.bf16.mxu1 %v1488_v57 }
  0x41   :  { %1367 = vmatpush3.bf16.msra.mxu0 %v1488_v57 }
  0x42   :  { %1399 = vmatpush3.bf16.msra.mxu1 %v1488_v57 }
  0x43   :  { %693 = vmatmul.mubr.bf16.gmra.mrb[16].mxu0 %v1465_v58 }
  0x44   :  { %790 = vmatmul.mubr.bf16.gmra.mrb[16].mxu1 %v1466_v59  ;;  %700 = vmatprep.mubr.bf16.mxu0 %v1468_v60 }
  0x45   :  { %797 = vmatprep.mubr.bf16.mxu1 %v1470_v61 }
  0x4b   :  { %701 = vmatmul.mubr.bf16.gmra.mrb[20].mxu0 %v1472_v62 }
  0x4c   :  { %798 = vmatmul.mubr.bf16.gmra.mrb[20].mxu1 %v1473_v63  ;;  %708 = vmatprep.mubr.bf16.mxu0 %v1475_v0 }
  0x4d   :  { %805 = vmatprep.mubr.bf16.mxu1 %v1477_v1 }
  0x53   :  { %709 = vmatmul.mubr.bf16.gmra.mrb[24].mxu0 %v1479_v2 }
  0x54   :  { %806 = vmatmul.mubr.bf16.gmra.mrb[24].mxu1 %v1480_v3  ;;  %716 = vmatprep.mubr.bf16.mxu0 %v1482_v4 }
  0x55   :  { %813 = vmatprep.mubr.bf16.mxu1 %v1484_v5 }
  0x5b   :  { %717 = vmatmul.mubr.bf16.gmra.mrb[28].mxu0 %v1486_v6 }
  0x5c   :  { %814 = vmatmul.mubr.bf16.gmra.mrb[28].mxu1 %v1487_v7  ;;  %1368 = vmatprep.mubr.bf16.mxu0 %v1489_v8 }
  0x5d   :  { %1376 = vmatprep.mubr.bf16.mxu1 %v1490_v9 }
  0x63   :  { %1369 = vmatmul.mubr.bf16.vlgmr.msra.gmra.mrb[32].mxu0 %v1491_v10 }
  0x64   :  { %1377 = vmatmul.mubr.bf16.vlgmr.msra.gmra.mrb[32].mxu1 %v1492_v11  ;;  %1372 = vmatprep.mubr.bf16.mxu0 %v1493_v12 }
  0x65   :  { %1380 = vmatprep.mubr.bf16.mxu1 %v1494_v13 }
  0x6b   :  { %1373 = vmatmul.mubr.bf16.gmra.mrb[36].mxu0 %v1495_v14 }
  0x6c   :  { %1381 = vmatmul.mubr.bf16.gmra.mrb[36].mxu1 %v1496_v15 }
  0xf6   :  { %v1224_v17 = vpop.f32.mrb[0].mxu0 }
  0xf7   :  { %v1288_v18 = vpop.f32.mrb[0].mxu1  ;;  %v1225_v19 = vpop.f32.mrb[1].mxu0 }
  0xf8   :  { %v1226_v20 = vadd.f32 %v1225_v19, %v1224_v17  ;;  %v1289_v21 = vpop.f32.mrb[1].mxu1  ;;  %v1227_v22 = vpop.f32.mrb[2].mxu0 }
  0xf9   :  { %v1290_v23 = vadd.f32 %v1289_v21, %v1288_v18  ;;  %v1291_v24 = vpop.f32.mrb[2].mxu1  ;;  %v1228_v25 = vpop.f32.mrb[3].mxu0 }
  0xfa   :  { %v1229_v26 = vadd.f32 %v1228_v25, %v1227_v22  ;;  %v1292_v27 = vpop.f32.mrb[3].mxu1 }
  0xfb   :  { %v1293_v28 = vadd.f32 %v1292_v27, %v1291_v24  ;;  %v1774_v29 = vadd.f32 %v1290_v23, %v1226_v20 }
  0xfd   :  { %v1776_v30 = vadd.f32 %v1293_v28, %v1229_v26 }
  0xfe   :  { %v1230_v31 = vpop.f32.mrb[4].mxu0 }
  0xff   :  { %v1294_v32 = vpop.f32.mrb[4].mxu1  ;;  %v1231_v33 = vpop.f32.mrb[5].mxu0 }
 0x100   :  { %v1232_v34 = vadd.f32 %v1231_v33, %v1230_v31  ;;  %v1295_v35 = vpop.f32.mrb[5].mxu1  ;;  %v1233_v36 = vpop.f32.mrb[6].mxu0 }
 0x101   :  { %v1296_v37 = vadd.f32 %v1295_v35, %v1294_v32  ;;  %v1297_v38 = vpop.f32.mrb[6].mxu1  ;;  %v1234_v39 = vpop.f32.mrb[7].mxu0 }
 0x102   :  { %v1235_v40 = vadd.f32 %v1234_v39, %v1233_v36  ;;  %v1298_v41 = vpop.f32.mrb[7].mxu1 }
 0x103   :  { %v1299_v42 = vadd.f32 %v1298_v41, %v1297_v38  ;;  %v1778_v43 = vadd.f32 %v1296_v37, %v1232_v34 }
 0x105   :  { %v1780_v44 = vadd.f32 %v1299_v42, %v1235_v40 }
 0x106   :  { %v1236_v45 = vpop.f32.mrb[8].mxu0 }
 0x107   :  { %v1300_v46 = vpop.f32.mrb[8].mxu1  ;;  %v1237_v47 = vpop.f32.mrb[9].mxu0 }
 0x108   :  { %v1238_v48 = vadd.f32 %v1237_v47, %v1236_v45  ;;  %v1301_v49 = vpop.f32.mrb[9].mxu1  ;;  %v1239_v50 = vpop.f32.mrb[10].mxu0 }
 0x109   :  { %v1302_v51 = vadd.f32 %v1301_v49, %v1300_v46  ;;  %v1303_v52 = vpop.f32.mrb[10].mxu1  ;;  %v1240_v53 = vpop.f32.mrb[11].mxu0 }
 0x10a   :  { %v1241_v54 = vadd.f32 %v1240_v53, %v1239_v50  ;;  %v1304_v55 = vpop.f32.mrb[11].mxu1 }
 0x10b   :  { %v1305_v56 = vadd.f32 %v1304_v55, %v1303_v52  ;;  %v1782_v57 = vadd.f32 %v1302_v51, %v1238_v48 }
 0x10d   :  { %v1784_v58 = vadd.f32 %v1305_v56, %v1241_v54 }
 0x10e   :  { %v1242_v59 = vpop.f32.mrb[12].mxu0 }
 0x10f   :  { %v1306_v60 = vpop.f32.mrb[12].mxu1  ;;  %v1243_v61 = vpop.f32.mrb[13].mxu0 }
 0x110   :  { %v1244_v62 = vadd.f32 %v1243_v61, %v1242_v59  ;;  %v1307_v63 = vpop.f32.mrb[13].mxu1  ;;  %v1245_v0 = vpop.f32.mrb[14].mxu0 }
 0x111   :  { %v1308_v1 = vadd.f32 %v1307_v63, %v1306_v60  ;;  %v1309_v2 = vpop.f32.mrb[14].mxu1  ;;  %v1246_v3 = vpop.f32.mrb[15].mxu0 }
 0x112   :  { %v1247_v4 = vadd.f32 %v1246_v3, %v1245_v0  ;;  %v1310_v5 = vpop.f32.mrb[15].mxu1 }
 0x113   :  { %v1311_v6 = vadd.f32 %v1310_v5, %v1309_v2  ;;  %v1786_v7 = vadd.f32 %v1308_v1, %v1244_v62 }
 0x115   :  { %v1788_v8 = vadd.f32 %v1311_v6, %v1247_v4 }
 0x116   :  { %v1248_v9 = vpop.f32.mrb[16].mxu0 }
 0x117   :  { %v1312_v10 = vpop.f32.mrb[16].mxu1  ;;  %v1249_v11 = vpop.f32.mrb[17].mxu0 }
 0x118   :  { %v1250_v12 = vadd.f32 %v1249_v11, %v1248_v9  ;;  %v1313_v13 = vpop.f32.mrb[17].mxu1  ;;  %v1251_v14 = vpop.f32.mrb[18].mxu0  ;;  %v38_v9 = vld [vmem:[#allocation2 + $0x10] sm:$0xff] }
 0x119   :  { %v1314_v15 = vadd.f32 %v1313_v13, %v1312_v10  ;;  %v1315_v16 = vpop.f32.mrb[18].mxu1  ;;  %v1252_v17 = vpop.f32.mrb[19].mxu0 }
 0x11a   :  { %v1253_v18 = vadd.f32 %v1252_v17, %v1251_v14  ;;  %v1316_v19 = vpop.f32.mrb[19].mxu1  ;;  %v36_v14 = vld [vmem:[#allocation2] sm:$0xff] }
 0x11b   :  { %v1317_v20 = vadd.f32 %v1316_v19, %v1315_v16  ;;  %v792_v21 = vadd.f32 %v1314_v15, %v1250_v12  ;;  %v46_v12 = vld [vmem:[#allocation2 + $0x50] sm:$0xff] }
 0x11d   :  { %v1790_v22 = vadd.f32 %v1317_v20, %v1253_v18  ;;  %v44_v18 = vld [vmem:[#allocation2 + $0x40] sm:$0xff]  ;;  %v39_v20 = vld [vmem:[#allocation2 + $0x18] sm:$0xff] }
 0x11e   :  { %v1254_v23 = vpop.f32.mrb[20].mxu0 }
 0x11f   :  { %v1318_v24 = vpop.f32.mrb[20].mxu1  ;;  %v1255_v25 = vpop.f32.mrb[21].mxu0 }
 0x120   :  { %v1256_v26 = vadd.f32 %v1255_v25, %v1254_v23  ;;  %v1319_v27 = vpop.f32.mrb[21].mxu1  ;;  %v1257_v28 = vpop.f32.mrb[22].mxu0 }
 0x121   :  { %v1320_v31 = vadd.f32 %v1319_v27, %v1318_v24  ;;  %v1321_v32 = vpop.f32.mrb[22].mxu1  ;;  %v1258_v33 = vpop.f32.mrb[23].mxu0  ;;  %v47_v27 = vld [vmem:[#allocation2 + $0x58] sm:$0xff] }
 0x122   :  { %v1259_v34 = vadd.f32 %v1258_v33, %v1257_v28  ;;  %v1322_v35 = vpop.f32.mrb[23].mxu1 }
 0x123   :  { %v1323_v36 = vadd.f32 %v1322_v35, %v1321_v32  ;;  %v800_v37 = vadd.f32 %v1320_v31, %v1256_v26  ;;  %v37_v31 = vld [vmem:[#allocation2 + $0x8] sm:$0xff] }
 0x125   :  { %v803_v38 = vadd.f32 %v1323_v36, %v1259_v34  ;;  %v45_v36 = vld [vmem:[#allocation2 + $0x48] sm:$0xff] }
 0x126   :  { %v1260_v39 = vpop.f32.mrb[24].mxu0 }
 0x127   :  { %v1324_v40 = vpop.f32.mrb[24].mxu1  ;;  %v1261_v41 = vpop.f32.mrb[25].mxu0 }
 0x128   :  { %v1262_v42 = vadd.f32 %v1261_v41, %v1260_v39  ;;  %v1325_v45 = vpop.f32.mrb[25].mxu1  ;;  %v1263_v46 = vpop.f32.mrb[26].mxu0 }
 0x129   :  { %v1326_v47 = vadd.f32 %v1325_v45, %v1324_v40  ;;  %v1327_v48 = vpop.f32.mrb[26].mxu1  ;;  %v1264_v49 = vpop.f32.mrb[27].mxu0 }
 0x12a   :  { %v1265_v50 = vadd.f32 %v1264_v49, %v1263_v46  ;;  %v1328_v51 = vpop.f32.mrb[27].mxu1  ;;  %v40_v46 = vld [vmem:[#allocation2 + $0x20] sm:$0xff] }
 0x12b   :  { %v1329_v52 = vadd.f32 %v1328_v51, %v1327_v48  ;;  %v1792_v53 = vadd.f32 %v1326_v47, %v1262_v42  ;;  %v50_v42 = vld [vmem:[#allocation2 + $0x70] sm:$0xff]  ;;  %v1815_v48 = vld [vmem:[%s1913_s2] ss:$0 sm:$0xff] }
 0x12c   :  { %v48_v51 = vld [vmem:[#allocation2 + $0x60] sm:$0xff] }
 0x12d   :  { %v1794_v54 = vadd.f32 %v1329_v52, %v1265_v50 }
 0x12e   :  { %v1266_v55 = vpop.f32.mrb[28].mxu0 }
 0x12f   :  { %v1330_v56 = vpop.f32.mrb[28].mxu1  ;;  %v1267_v59 = vpop.f32.mrb[29].mxu0 }
 0x130   :  { %v1268_v60 = vadd.f32 %v1267_v59, %v1266_v55  ;;  %v1331_v61 = vpop.f32.mrb[29].mxu1  ;;  %v1269_v62 = vpop.f32.mrb[30].mxu0  ;;  %v43_v55 = vld [vmem:[#allocation2 + $0x38] sm:$0xff] }
 0x131   :  { %v1332_v63 = vadd.f32 %v1331_v61, %v1330_v56  ;;  %v1333_v0 = vpop.f32.mrb[30].mxu1  ;;  %v1270_v1 = vpop.f32.mrb[31].mxu0  ;;  %v51_v61 = vld [vmem:[#allocation2 + $0x78] sm:$0xff] }
 0x132   :  { %v1271_v2 = vadd.f32 %v1270_v1, %v1269_v62  ;;  %v1334_v3 = vpop.f32.mrb[31].mxu1 }
 0x133   :  { %v1335_v4 = vadd.f32 %v1334_v3, %v1333_v0  ;;  %v816_v5 = vadd.f32 %v1332_v63, %v1268_v60  ;;  %v41_v63 = vld [vmem:[#allocation2 + $0x28] sm:$0xff] }
 0x135   :  { %v1796_v6 = vadd.f32 %v1335_v4, %v1271_v2 }
 0x136   :  { %v1370_v10 = vpop.f32.mrb[32].mxu0 }
 0x137   :  { %v865_v11 = vadd.f32 %v1370_v10, %v1778_v43  ;;  %v1378_v13 = vpop.f32.mrb[32].mxu1  ;;  %v856_v15 = vpop.f32.mrb[33].mxu0 }
 0x138   :  { %v897_v16 = vadd.f32 %v1378_v13, %v800_v37  ;;  %v857_v17 = vadd.f32 %v856_v15, %v1774_v29  ;;  %v888_v19 = vpop.f32.mrb[33].mxu1  ;;  %v1371_v23 = vpop.f32.mrb[34].mxu0 }
 0x139   :  { %v921_v24 = vadd.f32 %v865_v11, %v38_v9  ;;  %v889_v25 = vadd.f32 %v888_v19, %v792_v21  ;;  %v868_v26 = vadd.f32 %v1371_v23, %v1780_v44  ;;  %v1379_v28 = vpop.f32.mrb[34].mxu1  ;;  %v859_v32 = vpop.f32.mrb[35].mxu0 }
 0x13a   :  { %v929_v43 = vadd.f32 %v897_v16, %v46_v12  ;;  %v919_v33 = vadd.f32 %v857_v17, %v36_v14  ;;  %v900_v34 = vadd.f32 %v1379_v28, %v803_v38  ;;  %v860_v35 = vadd.f32 %v859_v32, %v1776_v30  ;;  %v891_v37 = vpop.f32.mrb[35].mxu1  ;;  %v42_v30 = vld [vmem:[#allocation2 + $0x30] sm:$0xff] }
 0x13b   :  { %938 = vst.msk [vmem:[#allocation2 + $0x10] sm:$0xff] %vm19_vm0, %v921_v24  ;;  %v927_v29 = vadd.f32 %v889_v25, %v44_v18  ;;  %v922_v39 = vadd.f32 %v868_v26, %v39_v20  ;;  %v892_v40 = vadd.f32 %v891_v37, %v1790_v22 }
 0x13c   :  { %946 = vst.msk [vmem:[#allocation2 + $0x50] sm:$0xff] %vm19_vm0, %v929_v43  ;;  %936 = vst.msk [vmem:[#allocation2] sm:$0xff] %vm19_vm0, %v919_v33  ;;  %v930_v44 = vadd.f32 %v900_v34, %v47_v27  ;;  %v920_v21 = vadd.f32 %v860_v35, %v37_v31 }
 0x13d   :  { %944 = vst.msk [vmem:[#allocation2 + $0x40] sm:$0xff] %vm19_vm0, %v927_v29  ;;  %939 = vst.msk [vmem:[#allocation2 + $0x18] sm:$0xff] %vm19_vm0, %v922_v39  ;;  %v928_v38 = vadd.f32 %v892_v40, %v45_v36 }
 0x13e   :  { %947 = vst.msk [vmem:[#allocation2 + $0x58] sm:$0xff] %vm19_vm0, %v930_v44  ;;  %937 = vst.msk [vmem:[#allocation2 + $0x8] sm:$0xff] %vm19_vm0, %v920_v21  ;;  %v1374_v41 = vpop.f32.mrb[36].mxu0 }
 0x13f   :  { %945 = vst.msk [vmem:[#allocation2 + $0x48] sm:$0xff] %vm19_vm0, %v928_v38  ;;  %v881_v22 = vadd.f32 %v1374_v41, %v1786_v7  ;;  %v1382_v45 = vpop.f32.mrb[36].mxu1  ;;  %v872_v47 = vpop.f32.mrb[37].mxu0 }
 0x140   :  { %v913_v49 = vadd.f32 %v1382_v45, %v816_v5  ;;  %v873_v50 = vadd.f32 %v872_v47, %v1782_v57  ;;  %v904_v52 = vpop.f32.mrb[37].mxu1  ;;  %v1375_v56 = vpop.f32.mrb[38].mxu0  ;;  %v49_v5 = vld [vmem:[#allocation2 + $0x68] sm:$0xff] }
 0x141   :  { %v925_v59 = vadd.f32 %v881_v22, %v42_v30  ;;  %v905_v7 = vadd.f32 %v904_v52, %v1792_v53  ;;  %v884_v60 = vadd.f32 %v1375_v56, %v1788_v8  ;;  %v1383_v62 = vpop.f32.mrb[38].mxu1  ;;  %v875_v0 = vpop.f32.mrb[39].mxu0 }
 0x142   :  { %v957_v1 = vld [vmem:[#allocation2 + $0x10] sm:$0xff]  ;;  %v933_v2 = vadd.f32 %v913_v49, %v50_v42  ;;  %v923_v3 = vadd.f32 %v873_v50, %v40_v46  ;;  %v916_v4 = vadd.f32 %v1383_v62, %v1796_v6  ;;  %v876_v57 = vadd.f32 %v875_v0, %v1784_v58  ;;  %v907_v9 = vpop.f32.mrb[39].mxu1 }
 0x143   :  { %v980_v10 = vadd.f32 %v1815_v48, %v957_v1  ;;  %v965_v11 = vld [vmem:[#allocation2 + $0x50] sm:$0xff]  ;;  %v955_v12 = vld [vmem:[#allocation2] sm:$0xff]  ;;  %942 = vst.msk [vmem:[#allocation2 + $0x30] sm:$0xff] %vm19_vm0, %v925_v59  ;;  %v931_v8 = vadd.f32 %v905_v7, %v48_v51  ;;  %v926_v53 = vadd.f32 %v884_v60, %v43_v55  ;;  %v908_v13 = vadd.f32 %v907_v9, %v1794_v54 }
 0x144   :  { %v988_v14 = vadd.f32 %v1815_v48, %v965_v11  ;;  %v978_v15 = vadd.f32 %v1815_v48, %v955_v12  ;;  %v963_v16 = vld [vmem:[#allocation2 + $0x40] sm:$0xff]  ;;  %v958_v6 = vld [vmem:[#allocation2 + $0x18] sm:$0xff]  ;;  %950 = vst.msk [vmem:[#allocation2 + $0x70] sm:$0xff] %vm19_vm0, %v933_v2  ;;  %940 = vst.msk [vmem:[#allocation2 + $0x20] sm:$0xff] %vm19_vm0, %v923_v3  ;;  %v934_v58 = vadd.f32 %v916_v4, %v51_v61 }
 0x145   :  { %v924_v17 = vadd.f32 %v876_v57, %v41_v63  ;;  %v996_v18 = vmax.f32 %v980_v10, 0.0  ;;  %v986_v19 = vadd.f32 %v1815_v48, %v963_v16  ;;  %v981_v20 = vadd.f32 %v1815_v48, %v958_v6  ;;  %v966_v23 = vld [vmem:[#allocation2 + $0x58] sm:$0xff]  ;;  %v956_v24 = vld [vmem:[#allocation2 + $0x8] sm:$0xff]  ;;  %948 = vst.msk [vmem:[#allocation2 + $0x60] sm:$0xff] %vm19_vm0, %v931_v8  ;;  %943 = vst.msk [vmem:[#allocation2 + $0x38] sm:$0xff] %vm19_vm0, %v926_v53 }
 0x146   :  { %v932_v54 = vadd.f32 %v908_v13, %v49_v5  ;;  %v1004_v25 = vmax.f32 %v988_v14, 0.0  ;;  %v994_v26 = vmax.f32 %v978_v15, 0.0  ;;  %v989_v27 = vadd.f32 %v1815_v48, %v966_v23  ;;  %v964_v31 = vld [vmem:[#allocation2 + $0x48] sm:$0xff]  ;;  %951 = vst.msk [vmem:[#allocation2 + $0x78] sm:$0xff] %vm19_vm0, %v934_v58 }
 0x147   :  { %v979_v28 = vadd.f32 %v1815_v48, %v956_v24  ;;  %941 = vst.msk [vmem:[#allocation2 + $0x28] sm:$0xff] %vm19_vm0, %v924_v17  ;;  %v1194_v32 = vpack.c.bf16 %v996_v18, %v996_v18  ;;  %v1002_v43 = vmax.f32 %v986_v19, 0.0  ;;  %v997_v33 = vmax.f32 %v981_v20, 0.0 }
 0x148   :  { %v987_v34 = vadd.f32 %v1815_v48, %v964_v31  ;;  %949 = vst.msk [vmem:[#allocation2 + $0x68] sm:$0xff] %vm19_vm0, %v932_v54  ;;  %v1202_v35 = vpack.c.bf16 %v1004_v25, %v1004_v25  ;;  %v1192_v36 = vpack.c.bf16 %v994_v26, %v994_v26  ;;  %v1005_v37 = vmax.f32 %v989_v27, 0.0 }
 0x149   :  { %v995_v29 = vmax.f32 %v979_v28, 0.0  ;;  %1077 = vst.msk [vmem:[%s1914_s3 + $0x8] sm:$0xf] %vm1074_vm1, %v1194_v32  ;;  %v1200_v39 = vpack.c.bf16 %v1002_v43, %v1002_v43  ;;  %v1195_v40 = vpack.c.bf16 %v997_v33, %v997_v33 }
 0x14a   :  { %v1003_v44 = vmax.f32 %v987_v34, 0.0  ;;  %1085 = vst.msk [vmem:[%s1914_s3 + $0x28] sm:$0xf] %vm1074_vm1, %v1202_v35  ;;  %1075 = vst.msk [vmem:[%s1914_s3] sm:$0xf] %vm1074_vm1, %v1192_v36  ;;  %v1203_v21 = vpack.c.bf16 %v1005_v37, %v1005_v37  ;;  %v961_v30 = vld [vmem:[#allocation2 + $0x30] sm:$0xff] }
 0x14b   :  { %v1193_v38 = vpack.c.bf16 %v995_v29, %v995_v29  ;;  %1083 = vst.msk [vmem:[%s1914_s3 + $0x20] sm:$0xf] %vm1074_vm1, %v1200_v39  ;;  %1078 = vst.msk [vmem:[%s1914_s3 + $0xc] sm:$0xf] %vm1074_vm1, %v1195_v40  ;;  %v984_v22 = vadd.f32 %v1815_v48, %v961_v30  ;;  %v969_v42 = vld [vmem:[#allocation2 + $0x70] sm:$0xff]  ;;  %v959_v45 = vld [vmem:[#allocation2 + $0x20] sm:$0xff] }
 0x14c   :  { %v1201_v41 = vpack.c.bf16 %v1003_v44, %v1003_v44  ;;  %1086 = vst.msk [vmem:[%s1914_s3 + $0x2c] sm:$0xf] %vm1074_vm1, %v1203_v21  ;;  %v992_v46 = vadd.f32 %v1815_v48, %v969_v42  ;;  %v982_v47 = vadd.f32 %v1815_v48, %v959_v45  ;;  %v967_v49 = vld [vmem:[#allocation2 + $0x60] sm:$0xff]  ;;  %v962_v50 = vld [vmem:[#allocation2 + $0x38] sm:$0xff] }
 0x14d   :  { %1076 = vst.msk [vmem:[%s1914_s3 + $0x4] sm:$0xf] %vm1074_vm1, %v1193_v38  ;;  %v1000_v51 = vmax.f32 %v984_v22, 0.0  ;;  %v990_v52 = vadd.f32 %v1815_v48, %v967_v49  ;;  %v985_v55 = vadd.f32 %v1815_v48, %v962_v50  ;;  %v970_v56 = vld [vmem:[#allocation2 + $0x78] sm:$0xff] }
 0x14e   :  { %1084 = vst.msk [vmem:[%s1914_s3 + $0x24] sm:$0xf] %vm1074_vm1, %v1201_v41  ;;  %v960_v59 = vld [vmem:[#allocation2 + $0x28] sm:$0xff]  ;;  %v1008_v7 = vmax.f32 %v992_v46, 0.0  ;;  %v998_v60 = vmax.f32 %v982_v47, 0.0  ;;  %v993_v61 = vadd.f32 %v1815_v48, %v970_v56 }
 0x14f   :  { %v983_v62 = vadd.f32 %v1815_v48, %v960_v59  ;;  %v968_v63 = vld [vmem:[#allocation2 + $0x68] sm:$0xff]  ;;  %v1198_v0 = vpack.c.bf16 %v1000_v51, %v1000_v51  ;;  %v1006_v1 = vmax.f32 %v990_v52, 0.0  ;;  %v1001_v2 = vmax.f32 %v985_v55, 0.0 }
 0x150   :  { %v991_v3 = vadd.f32 %v1815_v48, %v968_v63  ;;  %v1206_v4 = vpack.c.bf16 %v1008_v7, %v1008_v7  ;;  %v1196_v57 = vpack.c.bf16 %v998_v60, %v998_v60  ;;  %v1009_v5 = vmax.f32 %v993_v61, 0.0 }
 0x151   :  { %v999_v9 = vmax.f32 %v983_v62, 0.0  ;;  %1081 = vst.msk [vmem:[%s1914_s3 + $0x18] sm:$0xf] %vm1074_vm1, %v1198_v0  ;;  %v1204_v10 = vpack.c.bf16 %v1006_v1, %v1006_v1  ;;  %v1199_v11 = vpack.c.bf16 %v1001_v2, %v1001_v2 }
 0x152   :  { %v1007_v12 = vmax.f32 %v991_v3, 0.0  ;;  %1089 = vst.msk [vmem:[%s1914_s3 + $0x38] sm:$0xf] %vm1074_vm1, %v1206_v4  ;;  %1079 = vst.msk [vmem:[%s1914_s3 + $0x10] sm:$0xf] %vm1074_vm1, %v1196_v57  ;;  %v1207_v48 = vpack.c.bf16 %v1009_v5, %v1009_v5 }
 0x153   :  { %v1197_v8 = vpack.c.bf16 %v999_v9, %v999_v9  ;;  %1087 = vst.msk [vmem:[%s1914_s3 + $0x30] sm:$0xf] %vm1074_vm1, %v1204_v10  ;;  %1082 = vst.msk [vmem:[%s1914_s3 + $0x1c] sm:$0xf] %vm1074_vm1, %v1199_v11 }
 0x154   :  { %v1205_v53 = vpack.c.bf16 %v1007_v12, %v1007_v12  ;;  %1090 = vst.msk [vmem:[%s1914_s3 + $0x3c] sm:$0xf] %vm1074_vm1, %v1207_v48 }
 0x155   :  { %1080 = vst.msk [vmem:[%s1914_s3 + $0x14] sm:$0xf] %vm1074_vm1, %v1197_v8 }
 0x156   :  { %1088 = vst.msk [vmem:[%s1914_s3 + $0x34] sm:$0xf] %vm1074_vm1, %v1205_v53 }

// kernel: _lambda_.17
= control target key start
LH: loop header
LB: loop body
LE: loop exit
PB: predicated region body
PF: predicated region fallthrough
CT: control target
= control target key end

     0   :  { %vm22_vm0 = vcmask 523264   ;;  %vm1125_vm1 = vcmask 519168   ;;  %s2100_s1 = inlined_call_operand.vmem [shape: bf16[640,64], index: 1, kind: input, shape index: {}]   ;;  %s2101_s0 = inlined_call_operand.vmem [shape: bf16[128,640], index: 0, kind: input, shape index: {}]   ;;  %s2102_s3 = inlined_call_operand.vmem [shape: bf16[128,64], index: 3, kind: input, shape index: {}]   ;;  %s2103_s2 = inlined_call_operand.vmem [shape: f32[1,64], index: 2, kind: input, shape index: {}]   ;;  %s2104_s4 = inlined_call_operand.vmem [shape: bf16[128,64], index: 4, kind: output, shape index: {}]  }
   0x1   :  { %v1491_v0 = vld [vmem:[%s2100_s1 + $0x40] sm:$0xff]   ;;  %v1495_v4 = vld [vmem:[%s2100_s1 + $0x48] sm:$0xff]   ;;  %v1499_v8 = vld [vmem:[%s2100_s1 + $0x50] sm:$0xff]  }
   0x2   :  { %v1492_v1 = vld [vmem:[%s2100_s1 + $0xc0] sm:$0xff]   ;;  %1298 = vmatprep.subr.bf16.mxu0 %v1491_v0  ;;  %v1496_v5 = vld [vmem:[%s2100_s1 + $0xc8] sm:$0xff]   ;;  %v1500_v9 = vld [vmem:[%s2100_s1 + $0xd0] sm:$0xff]  }
   0x3   :  { %v1493_v2 = vld [vmem:[%s2100_s1] sm:$0xff]   ;;  %1362 = vmatprep.subr.bf16.mxu1 %v1492_v1  ;;  %v1497_v6 = vld [vmem:[%s2100_s1 + $0x8] sm:$0xff]   ;;  %v1501_v10 = vld [vmem:[%s2100_s1 + $0x10] sm:$0xff]  }
   0x4   :  { %v1494_v3 = vld [vmem:[%s2100_s1 + $0x80] sm:$0xff]   ;;  %1299 = vmatpush3.bf16.msra.mxu0 %v1493_v2  ;;  %v1498_v7 = vld [vmem:[%s2100_s1 + $0x88] sm:$0xff]   ;;  %v1502_v11 = vld [vmem:[%s2100_s1 + $0x90] sm:$0xff]  }
   0x5   :  { %1363 = vmatpush3.bf16.msra.mxu1 %v1494_v3  ;;  %1300 = vmatprep.subr.bf16.mxu0 %v1495_v4  ;;  %v1503_v12 = vld [vmem:[%s2100_s1 + $0x58] sm:$0xff]   ;;  %v1507_v16 = vld [vmem:[%s2100_s1 + $0x60] sm:$0xff]   ;;  %v1511_v20 = vld [vmem:[%s2100_s1 + $0x68] sm:$0xff]  }
   0x6   :  { %1364 = vmatprep.subr.bf16.mxu1 %v1496_v5  ;;  %v1504_v13 = vld [vmem:[%s2100_s1 + $0xd8] sm:$0xff]   ;;  %v1508_v17 = vld [vmem:[%s2100_s1 + $0xe0] sm:$0xff]   ;;  %v1512_v21 = vld [vmem:[%s2100_s1 + $0xe8] sm:$0xff]  }
   0x7   :  { %v1505_v14 = vld [vmem:[%s2100_s1 + $0x18] sm:$0xff]   ;;  %v1509_v18 = vld [vmem:[%s2100_s1 + $0x20] sm:$0xff]   ;;  %v1513_v22 = vld [vmem:[%s2100_s1 + $0x28] sm:$0xff]  }
   0x8   :  { %1301 = vmatpush3.bf16.msra.mxu0 %v1497_v6  ;;  %v1506_v15 = vld [vmem:[%s2100_s1 + $0x98] sm:$0xff]   ;;  %v1510_v19 = vld [vmem:[%s2100_s1 + $0xa0] sm:$0xff]   ;;  %v1514_v23 = vld [vmem:[%s2100_s1 + $0xa8] sm:$0xff]  }
   0x9   :  { %1365 = vmatpush3.bf16.msra.mxu1 %v1498_v7  ;;  %1302 = vmatprep.subr.bf16.mxu0 %v1499_v8  ;;  %v1515_v24 = vld [vmem:[%s2100_s1 + $0x70] sm:$0xff]   ;;  %v1519_v28 = vld [vmem:[%s2100_s1 + $0x78] sm:$0xff]   ;;  %v1528_v35 = vld [vmem:[%s2101_s0 + $0xc] ss:$20 sps:$4 sm:$0xff]  }
   0xa   :  { %1366 = vmatprep.subr.bf16.mxu1 %v1500_v9  ;;  %v1516_v25 = vld [vmem:[%s2100_s1 + $0xf0] sm:$0xff]   ;;  %v1520_v29 = vld [vmem:[%s2100_s1 + $0xf8] sm:$0xff]   ;;  %v1529_v36 = vld [vmem:[%s2100_s1 + $0x100] sm:$0xff]   ;;  %760 = vmatprep.mubr.bf16.mxu1 %v1528_v35 }
   0xb   :  { %v1517_v26 = vld [vmem:[%s2100_s1 + $0x30] sm:$0xff]   ;;  %v1521_v30 = vld [vmem:[%s2100_s1 + $0x38] sm:$0xff]   ;;  %v1530_v37 = vld [vmem:[%s2101_s0 + $0x2c] ss:$20 sps:$4 sm:$0xff]  }
   0xc   :  { %1303 = vmatpush3.bf16.msra.mxu0 %v1501_v10  ;;  %v1518_v27 = vld [vmem:[%s2100_s1 + $0xb0] sm:$0xff]   ;;  %v1522_v31 = vld [vmem:[%s2100_s1 + $0xb8] sm:$0xff]   ;;  %v1536_v39 = vld [vmem:[%s2100_s1 + $0x108] sm:$0xff]  }
   0xd   :  { %1367 = vmatpush3.bf16.msra.mxu1 %v1502_v11  ;;  %1304 = vmatprep.subr.bf16.mxu0 %v1503_v12  ;;  %v1523_v32 = vld [vmem:[%s2101_s0] ss:$20 sps:$4 sm:$0xff]   ;;  %v1525_v33 = vld [vmem:[%s2101_s0 + $0x4] ss:$20 sps:$4 sm:$0xff]   ;;  %v1526_v34 = vld [vmem:[%s2101_s0 + $0x8] ss:$20 sps:$4 sm:$0xff]  }
   0xe   :  { %1368 = vmatprep.subr.bf16.mxu1 %v1504_v13  ;;  %663 = vmatprep.mubr.bf16.mxu0 %v1525_v33  ;;  %v1532_v38 = vld [vmem:[%s2101_s0 + $0x34] ss:$20 sps:$4 sm:$0xff]   ;;  %v1535_v41 = vld [vmem:[%s2101_s0 + $0x30] ss:$20 sps:$4 sm:$0xff]   ;;  %v1550_v45 = vld [vmem:[%s2100_s1 + $0x118] sm:$0xff]  }
   0xf   :  { %v1534_v40 = vld [vmem:[%s2101_s0 + $0x28] ss:$20 sps:$4 sm:$0xff]   ;;  %v1543_v44 = vld [vmem:[%s2100_s1 + $0x110] sm:$0xff]   ;;  %v1542_v47 = vld [vmem:[%s2101_s0 + $0x58] ss:$20 sps:$4 sm:$0xff]  }
  0x10   :  { %1305 = vmatpush3.bf16.msra.mxu0 %v1505_v14  ;;  %v1537_v42 = vld [vmem:[%s2101_s0 + $0x54] ss:$20 sps:$4 sm:$0xff]   ;;  %v1539_v43 = vld [vmem:[%s2101_s0 + $0x5c] ss:$20 sps:$4 sm:$0xff]   ;;  %v1546_v49 = vld [vmem:[%s2101_s0 + $0x84] ss:$20 sps:$4 sm:$0xff]  }
  0x11   :  { %1369 = vmatpush3.bf16.msra.mxu1 %v1506_v15  ;;  %1306 = vmatprep.subr.bf16.mxu0 %v1507_v16  ;;  %v1541_v46 = vld [vmem:[%s2101_s0 + $0x50] ss:$20 sps:$4 sm:$0xff]   ;;  %v1564_v51 = vld [vmem:[%s2100_s1 + $0x128] sm:$0xff]   ;;  %v1549_v53 = vld [vmem:[%s2101_s0 + $0x80] ss:$20 sps:$4 sm:$0xff]   ;;  %v1587_v16 = vmov 0.0  }
  0x12   :  { %1370 = vmatprep.subr.bf16.mxu1 %v1508_v17  ;;  %v1544_v48 = vld [vmem:[%s2101_s0 + $0x7c] ss:$20 sps:$4 sm:$0xff]   ;;  %v1557_v50 = vld [vmem:[%s2100_s1 + $0x120] sm:$0xff]   ;;  %v1548_v52 = vld [vmem:[%s2101_s0 + $0x78] ss:$20 sps:$4 sm:$0xff]   ;;  %25 = vst.msk [vmem:[#allocation2 + $0x10] sm:$0xff] %vm22_vm0, %v1587_v16 }
  0x13   :  { %v1551_v54 = vld [vmem:[%s2101_s0 + $0xa4] ss:$20 sps:$4 sm:$0xff]   ;;  %v1571_v55 = vld [vmem:[%s2100_s1 + $0x130] sm:$0xff]   ;;  %v1553_v56 = vld [vmem:[%s2101_s0 + $0xac] ss:$20 sps:$4 sm:$0xff]   ;;  %23 = vst.msk [vmem:[#allocation2] sm:$0xff] %vm22_vm0, %v1587_v16 }
  0x14   :  { %1307 = vmatpush3.bf16.msra.mxu0 %v1509_v18  ;;  %v1578_v57 = vld [vmem:[%s2100_s1 + $0x138] sm:$0xff]   ;;  %v1555_v58 = vld [vmem:[%s2101_s0 + $0xa0] ss:$20 sps:$4 sm:$0xff]   ;;  %v1563_v63 = vld [vmem:[%s2101_s0 + $0xd0] ss:$20 sps:$4 sm:$0xff]   ;;  %24 = vst.msk [vmem:[#allocation2 + $0x8] sm:$0xff] %vm22_vm0, %v1587_v16 }
  0x15   :  { %1371 = vmatpush3.bf16.msra.mxu1 %v1510_v19  ;;  %1308 = vmatprep.subr.bf16.mxu0 %v1511_v20  ;;  %v1556_v59 = vld [vmem:[%s2101_s0 + $0xa8] ss:$20 sps:$4 sm:$0xff]   ;;  %v1558_v60 = vld [vmem:[%s2101_s0 + $0xcc] ss:$20 sps:$4 sm:$0xff]   ;;  %v1569_v2 = vld [vmem:[%s2101_s0 + $0xf0] ss:$20 sps:$4 sm:$0xff]  }
  0x16   :  { %1372 = vmatprep.subr.bf16.mxu1 %v1512_v21  ;;  %v1560_v61 = vld [vmem:[%s2101_s0 + $0xd4] ss:$20 sps:$4 sm:$0xff]   ;;  %v1567_v1 = vld [vmem:[%s2101_s0 + $0xfc] ss:$20 sps:$4 sm:$0xff]   ;;  %v1570_v3 = vld [vmem:[%s2101_s0 + $0xf8] ss:$20 sps:$4 sm:$0xff]  }
  0x17   :  { %v1562_v62 = vld [vmem:[%s2101_s0 + $0xc8] ss:$20 sps:$4 sm:$0xff]   ;;  %v1574_v5 = vld [vmem:[%s2101_s0 + $0x124] ss:$20 sps:$4 sm:$0xff]   ;;  %v1577_v7 = vld [vmem:[%s2101_s0 + $0x120] ss:$20 sps:$4 sm:$0xff]  }
  0x18   :  { %1309 = vmatpush3.bf16.msra.mxu0 %v1513_v22  ;;  %v1565_v0 = vld [vmem:[%s2101_s0 + $0xf4] ss:$20 sps:$4 sm:$0xff]   ;;  %v1572_v4 = vld [vmem:[%s2101_s0 + $0x11c] ss:$20 sps:$4 sm:$0xff]   ;;  %v1576_v6 = vld [vmem:[%s2101_s0 + $0x118] ss:$20 sps:$4 sm:$0xff]  }
  0x19   :  { %1373 = vmatpush3.bf16.msra.mxu1 %v1514_v23  ;;  %1310 = vmatprep.subr.bf16.mxu0 %v1515_v24  ;;  %v1579_v8 = vld [vmem:[%s2101_s0 + $0x10] ss:$20 sps:$4 sm:$0xff]   ;;  %v1581_v10 = vld [vmem:[%s2101_s0 + $0x38] ss:$20 sps:$4 sm:$0xff]   ;;  %v1583_v12 = vld [vmem:[%s2101_s0 + $0x60] ss:$20 sps:$4 sm:$0xff]  }
  0x1a   :  { %1374 = vmatprep.subr.bf16.mxu1 %v1516_v25  ;;  %v1580_v9 = vld [vmem:[%s2101_s0 + $0xb0] ss:$20 sps:$4 sm:$0xff]   ;;  %v1582_v11 = vld [vmem:[%s2101_s0 + $0xd8] ss:$20 sps:$4 sm:$0xff]   ;;  %v1584_v13 = vld [vmem:[%s2101_s0 + $0x100] ss:$20 sps:$4 sm:$0xff]  }
  0x1b   :  { %v1585_v14 = vld [vmem:[%s2101_s0 + $0x88] ss:$20 sps:$4 sm:$0xff]   ;;  %26 = vst.msk [vmem:[#allocation2 + $0x18] sm:$0xff] %vm22_vm0, %v1587_v16  ;;  %27 = vst.msk [vmem:[#allocation2 + $0x20] sm:$0xff] %vm22_vm0, %v1587_v16 }
  0x1c   :  { %1311 = vmatpush3.bf16.msra.mxu0 %v1517_v26  ;;  %v1586_v15 = vld [vmem:[%s2101_s0 + $0x128] ss:$20 sps:$4 sm:$0xff]   ;;  %28 = vst.msk [vmem:[#allocation2 + $0x28] sm:$0xff] %vm22_vm0, %v1587_v16  ;;  %29 = vst.msk [vmem:[#allocation2 + $0x30] sm:$0xff] %vm22_vm0, %v1587_v16 }
  0x1d   :  { %1375 = vmatpush3.bf16.msra.mxu1 %v1518_v27  ;;  %1312 = vmatprep.subr.bf16.mxu0 %v1519_v28  ;;  %30 = vst.msk [vmem:[#allocation2 + $0x38] sm:$0xff] %vm22_vm0, %v1587_v16  ;;  %31 = vst.msk [vmem:[#allocation2 + $0x40] sm:$0xff] %vm22_vm0, %v1587_v16 }
  0x1e   :  { %1376 = vmatprep.subr.bf16.mxu1 %v1520_v29  ;;  %32 = vst.msk [vmem:[#allocation2 + $0x48] sm:$0xff] %vm22_vm0, %v1587_v16  ;;  %33 = vst.msk [vmem:[#allocation2 + $0x50] sm:$0xff] %vm22_vm0, %v1587_v16 }
  0x1f   :  { %34 = vst.msk [vmem:[#allocation2 + $0x58] sm:$0xff] %vm22_vm0, %v1587_v16  ;;  %35 = vst.msk [vmem:[#allocation2 + $0x60] sm:$0xff] %vm22_vm0, %v1587_v16 }
  0x20   :  { %1313 = vmatpush3.bf16.msra.mxu0 %v1521_v30  ;;  %36 = vst.msk [vmem:[#allocation2 + $0x68] sm:$0xff] %vm22_vm0, %v1587_v16  ;;  %37 = vst.msk [vmem:[#allocation2 + $0x70] sm:$0xff] %vm22_vm0, %v1587_v16 }
  0x21   :  { %1377 = vmatpush3.bf16.msra.mxu1 %v1522_v31  ;;  %1442 = vmatprep.subr.bf16.mxu0 %v1529_v36  ;;  %38 = vst.msk [vmem:[#allocation2 + $0x78] sm:$0xff] %vm22_vm0, %v1587_v16 }
  0x22   :  { %1474 = vmatprep.subr.bf16.mxu1 %v1529_v36 }
  0x23   :  { %664 = vmatmul.mubr.bf16.vlgmr.msra.gmra.mrb[0].mxu0 %v1523_v32 }
  0x24   :  { %761 = vmatmul.mubr.bf16.vlgmr.msra.gmra.mrb[0].mxu1 %v1526_v34  ;;  %1443 = vmatpush3.bf16.msra.mxu0 %v1529_v36 }
  0x25   :  { %1482 = vmatpush3.bf16.msra.mxu1 %v1529_v36  ;;  %671 = vmatprep.mubr.bf16.mxu0 %v1530_v37 }
  0x26   :  { %768 = vmatprep.mubr.bf16.mxu1 %v1532_v38  ;;  %1444 = vmatprep.subr.bf16.mxu0 %v1536_v39 }
  0x27   :  { %1475 = vmatprep.subr.bf16.mxu1 %v1536_v39 }
  0x28   :  { %1445 = vmatpush3.bf16.msra.mxu0 %v1536_v39 }
  0x29   :  { %1483 = vmatpush3.bf16.msra.mxu1 %v1536_v39  ;;  %1446 = vmatprep.subr.bf16.mxu0 %v1543_v44 }
  0x2a   :  { %1476 = vmatprep.subr.bf16.mxu1 %v1543_v44 }
  0x2b   :  { %672 = vmatmul.mubr.bf16.gmra.mrb[4].mxu0 %v1534_v40 }
  0x2c   :  { %769 = vmatmul.mubr.bf16.gmra.mrb[4].mxu1 %v1535_v41  ;;  %679 = vmatprep.mubr.bf16.mxu0 %v1537_v42 }
  0x2d   :  { %776 = vmatprep.mubr.bf16.mxu1 %v1539_v43  ;;  %1447 = vmatpush3.bf16.msra.mxu0 %v1543_v44 }
  0x2e   :  { %1484 = vmatpush3.bf16.msra.mxu1 %v1543_v44  ;;  %1448 = vmatprep.subr.bf16.mxu0 %v1550_v45 }
  0x2f   :  { %1477 = vmatprep.subr.bf16.mxu1 %v1550_v45 }
  0x31   :  { %1449 = vmatpush3.bf16.msra.mxu0 %v1550_v45 }
  0x32   :  { %1485 = vmatpush3.bf16.msra.mxu1 %v1550_v45  ;;  %1450 = vmatprep.subr.bf16.mxu0 %v1557_v50 }
  0x33   :  { %680 = vmatmul.mubr.bf16.gmra.mrb[8].mxu0 %v1541_v46  ;;  %1478 = vmatprep.subr.bf16.mxu1 %v1557_v50 }
  0x34   :  { %777 = vmatmul.mubr.bf16.gmra.mrb[8].mxu1 %v1542_v47  ;;  %687 = vmatprep.mubr.bf16.mxu0 %v1544_v48 }
  0x35   :  { %784 = vmatprep.mubr.bf16.mxu1 %v1546_v49  ;;  %1451 = vmatpush3.bf16.msra.mxu0 %v1557_v50 }
  0x36   :  { %1486 = vmatpush3.bf16.msra.mxu1 %v1557_v50  ;;  %1452 = vmatprep.subr.bf16.mxu0 %v1564_v51 }
  0x37   :  { %1479 = vmatprep.subr.bf16.mxu1 %v1564_v51 }
  0x39   :  { %1453 = vmatpush3.bf16.msra.mxu0 %v1564_v51 }
  0x3a   :  { %1487 = vmatpush3.bf16.msra.mxu1 %v1564_v51  ;;  %1454 = vmatprep.subr.bf16.mxu0 %v1571_v55 }
  0x3b   :  { %688 = vmatmul.mubr.bf16.gmra.mrb[12].mxu0 %v1548_v52  ;;  %1480 = vmatprep.subr.bf16.mxu1 %v1571_v55 }
  0x3c   :  { %785 = vmatmul.mubr.bf16.gmra.mrb[12].mxu1 %v1549_v53  ;;  %695 = vmatprep.mubr.bf16.mxu0 %v1551_v54 }
  0x3d   :  { %792 = vmatprep.mubr.bf16.mxu1 %v1553_v56  ;;  %1455 = vmatpush3.bf16.msra.mxu0 %v1571_v55 }
  0x3e   :  { %1488 = vmatpush3.bf16.msra.mxu1 %v1571_v55  ;;  %1456 = vmatprep.subr.bf16.mxu0 %v1578_v57 }
  0x3f   :  { %1481 = vmatprep.subr.bf16.mxu1 %v1578_v57 }
  0x41   :  { %1457 = vmatpush3.bf16.msra.mxu0 %v1578_v57 }
  0x42   :  { %1489 = vmatpush3.bf16.msra.mxu1 %v1578_v57 }
  0x43   :  { %696 = vmatmul.mubr.bf16.gmra.mrb[16].mxu0 %v1555_v58 }
  0x44   :  { %793 = vmatmul.mubr.bf16.gmra.mrb[16].mxu1 %v1556_v59  ;;  %703 = vmatprep.mubr.bf16.mxu0 %v1558_v60 }
  0x45   :  { %800 = vmatprep.mubr.bf16.mxu1 %v1560_v61 }
  0x4b   :  { %704 = vmatmul.mubr.bf16.gmra.mrb[20].mxu0 %v1562_v62 }
  0x4c   :  { %801 = vmatmul.mubr.bf16.gmra.mrb[20].mxu1 %v1563_v63  ;;  %711 = vmatprep.mubr.bf16.mxu0 %v1565_v0 }
  0x4d   :  { %808 = vmatprep.mubr.bf16.mxu1 %v1567_v1 }
  0x53   :  { %712 = vmatmul.mubr.bf16.gmra.mrb[24].mxu0 %v1569_v2 }
  0x54   :  { %809 = vmatmul.mubr.bf16.gmra.mrb[24].mxu1 %v1570_v3  ;;  %719 = vmatprep.mubr.bf16.mxu0 %v1572_v4 }
  0x55   :  { %816 = vmatprep.mubr.bf16.mxu1 %v1574_v5 }
  0x5b   :  { %720 = vmatmul.mubr.bf16.gmra.mrb[28].mxu0 %v1576_v6 }
  0x5c   :  { %817 = vmatmul.mubr.bf16.gmra.mrb[28].mxu1 %v1577_v7  ;;  %1458 = vmatprep.mubr.bf16.mxu0 %v1579_v8 }
  0x5d   :  { %1466 = vmatprep.mubr.bf16.mxu1 %v1580_v9 }
  0x63   :  { %1459 = vmatmul.mubr.bf16.vlgmr.msra.gmra.mrb[32].mxu0 %v1581_v10 }
  0x64   :  { %1467 = vmatmul.mubr.bf16.vlgmr.msra.gmra.mrb[32].mxu1 %v1582_v11  ;;  %1462 = vmatprep.mubr.bf16.mxu0 %v1583_v12 }
  0x65   :  { %1470 = vmatprep.mubr.bf16.mxu1 %v1584_v13 }
  0x6b   :  { %1463 = vmatmul.mubr.bf16.gmra.mrb[36].mxu0 %v1585_v14 }
  0x6c   :  { %1471 = vmatmul.mubr.bf16.gmra.mrb[36].mxu1 %v1586_v15 }
  0xf6   :  { %v1314_v17 = vpop.f32.mrb[0].mxu0 }
  0xf7   :  { %v1378_v18 = vpop.f32.mrb[0].mxu1  ;;  %v1315_v19 = vpop.f32.mrb[1].mxu0 }
  0xf8   :  { %v1316_v20 = vadd.f32 %v1315_v19, %v1314_v17  ;;  %v1379_v21 = vpop.f32.mrb[1].mxu1  ;;  %v1317_v22 = vpop.f32.mrb[2].mxu0 }
  0xf9   :  { %v1380_v23 = vadd.f32 %v1379_v21, %v1378_v18  ;;  %v1381_v24 = vpop.f32.mrb[2].mxu1  ;;  %v1318_v25 = vpop.f32.mrb[3].mxu0 }
  0xfa   :  { %v1319_v26 = vadd.f32 %v1318_v25, %v1317_v22  ;;  %v1382_v27 = vpop.f32.mrb[3].mxu1 }
  0xfb   :  { %v1383_v28 = vadd.f32 %v1382_v27, %v1381_v24  ;;  %v1869_v29 = vadd.f32 %v1380_v23, %v1316_v20 }
  0xfd   :  { %v1871_v30 = vadd.f32 %v1383_v28, %v1319_v26 }
  0xfe   :  { %v1320_v31 = vpop.f32.mrb[4].mxu0 }
  0xff   :  { %v1384_v32 = vpop.f32.mrb[4].mxu1  ;;  %v1321_v33 = vpop.f32.mrb[5].mxu0 }
 0x100   :  { %v1322_v34 = vadd.f32 %v1321_v33, %v1320_v31  ;;  %v1385_v35 = vpop.f32.mrb[5].mxu1  ;;  %v1323_v36 = vpop.f32.mrb[6].mxu0 }
 0x101   :  { %v1386_v37 = vadd.f32 %v1385_v35, %v1384_v32  ;;  %v1387_v38 = vpop.f32.mrb[6].mxu1  ;;  %v1324_v39 = vpop.f32.mrb[7].mxu0 }
 0x102   :  { %v1325_v40 = vadd.f32 %v1324_v39, %v1323_v36  ;;  %v1388_v41 = vpop.f32.mrb[7].mxu1 }
 0x103   :  { %v1389_v42 = vadd.f32 %v1388_v41, %v1387_v38  ;;  %v1873_v43 = vadd.f32 %v1386_v37, %v1322_v34 }
 0x105   :  { %v1875_v44 = vadd.f32 %v1389_v42, %v1325_v40 }
 0x106   :  { %v1326_v45 = vpop.f32.mrb[8].mxu0 }
 0x107   :  { %v1390_v46 = vpop.f32.mrb[8].mxu1  ;;  %v1327_v47 = vpop.f32.mrb[9].mxu0 }
 0x108   :  { %v1328_v48 = vadd.f32 %v1327_v47, %v1326_v45  ;;  %v1391_v49 = vpop.f32.mrb[9].mxu1  ;;  %v1329_v50 = vpop.f32.mrb[10].mxu0 }
 0x109   :  { %v1392_v51 = vadd.f32 %v1391_v49, %v1390_v46  ;;  %v1393_v52 = vpop.f32.mrb[10].mxu1  ;;  %v1330_v53 = vpop.f32.mrb[11].mxu0 }
 0x10a   :  { %v1331_v54 = vadd.f32 %v1330_v53, %v1329_v50  ;;  %v1394_v55 = vpop.f32.mrb[11].mxu1 }
 0x10b   :  { %v1395_v56 = vadd.f32 %v1394_v55, %v1393_v52  ;;  %v1877_v57 = vadd.f32 %v1392_v51, %v1328_v48 }
 0x10d   :  { %v1879_v58 = vadd.f32 %v1395_v56, %v1331_v54 }
 0x10e   :  { %v1332_v59 = vpop.f32.mrb[12].mxu0 }
 0x10f   :  { %v1396_v60 = vpop.f32.mrb[12].mxu1  ;;  %v1333_v61 = vpop.f32.mrb[13].mxu0 }
 0x110   :  { %v1334_v62 = vadd.f32 %v1333_v61, %v1332_v59  ;;  %v1397_v63 = vpop.f32.mrb[13].mxu1  ;;  %v1335_v0 = vpop.f32.mrb[14].mxu0 }
 0x111   :  { %v1398_v1 = vadd.f32 %v1397_v63, %v1396_v60  ;;  %v1399_v2 = vpop.f32.mrb[14].mxu1  ;;  %v1336_v3 = vpop.f32.mrb[15].mxu0 }
 0x112   :  { %v1337_v4 = vadd.f32 %v1336_v3, %v1335_v0  ;;  %v1400_v5 = vpop.f32.mrb[15].mxu1 }
 0x113   :  { %v1401_v6 = vadd.f32 %v1400_v5, %v1399_v2  ;;  %v1881_v7 = vadd.f32 %v1398_v1, %v1334_v62 }
 0x115   :  { %v1883_v8 = vadd.f32 %v1401_v6, %v1337_v4 }
 0x116   :  { %v1338_v9 = vpop.f32.mrb[16].mxu0 }
 0x117   :  { %v1402_v10 = vpop.f32.mrb[16].mxu1  ;;  %v1339_v11 = vpop.f32.mrb[17].mxu0 }
 0x118   :  { %v1340_v12 = vadd.f32 %v1339_v11, %v1338_v9  ;;  %v1403_v13 = vpop.f32.mrb[17].mxu1  ;;  %v1341_v14 = vpop.f32.mrb[18].mxu0  ;;  %v41_v9 = vld [vmem:[#allocation2 + $0x10] sm:$0xff] }
 0x119   :  { %v1404_v15 = vadd.f32 %v1403_v13, %v1402_v10  ;;  %v1405_v16 = vpop.f32.mrb[18].mxu1  ;;  %v1342_v17 = vpop.f32.mrb[19].mxu0 }
 0x11a   :  { %v1343_v18 = vadd.f32 %v1342_v17, %v1341_v14  ;;  %v1406_v19 = vpop.f32.mrb[19].mxu1  ;;  %v39_v14 = vld [vmem:[#allocation2] sm:$0xff]  ;;  %v1901_v17 = vld [vmem:[%s2102_s3 + $0x8] sm:$0xff]  }
 0x11b   :  { %v1407_v20 = vadd.f32 %v1406_v19, %v1405_v16  ;;  %v1885_v21 = vadd.f32 %v1404_v15, %v1340_v12  ;;  %v49_v12 = vld [vmem:[#allocation2 + $0x50] sm:$0xff]  ;;  %v47_v16 = vld [vmem:[#allocation2 + $0x40] sm:$0xff] }
 0x11d   :  { %v1887_v22 = vadd.f32 %v1407_v20, %v1343_v18 }
 0x11e   :  { %v1344_v23 = vpop.f32.mrb[20].mxu0 }
 0x11f   :  { %v1408_v24 = vpop.f32.mrb[20].mxu1  ;;  %v1345_v25 = vpop.f32.mrb[21].mxu0 }
 0x120   :  { %v1346_v26 = vadd.f32 %v1345_v25, %v1344_v23  ;;  %v1409_v27 = vpop.f32.mrb[21].mxu1  ;;  %v1347_v28 = vpop.f32.mrb[22].mxu0  ;;  %v42_v23 = vld [vmem:[#allocation2 + $0x18] sm:$0xff] }
 0x121   :  { %v1410_v31 = vadd.f32 %v1409_v27, %v1408_v24  ;;  %v1411_v32 = vpop.f32.mrb[22].mxu1  ;;  %v1348_v33 = vpop.f32.mrb[23].mxu0  ;;  %v50_v25 = vld [vmem:[#allocation2 + $0x58] sm:$0xff]  ;;  %v1912_v27 = vld [vmem:[%s2102_s3] sm:$0xff]  }
 0x122   :  { %v1349_v34 = vadd.f32 %v1348_v33, %v1347_v28  ;;  %v1412_v35 = vpop.f32.mrb[23].mxu1 }
 0x123   :  { %v1413_v36 = vadd.f32 %v1412_v35, %v1411_v32  ;;  %v803_v37 = vadd.f32 %v1410_v31, %v1346_v26  ;;  %v40_v32 = vld [vmem:[#allocation2 + $0x8] sm:$0xff] }
 0x125   :  { %v806_v38 = vadd.f32 %v1413_v36, %v1349_v34  ;;  %v1919_v36 = vld [vmem:[%s2102_s3 + $0x20] sm:$0xff]  }
 0x126   :  { %v1350_v39 = vpop.f32.mrb[24].mxu0 }
 0x127   :  { %v1414_v40 = vpop.f32.mrb[24].mxu1  ;;  %v1351_v41 = vpop.f32.mrb[25].mxu0 }
 0x128   :  { %v1352_v42 = vadd.f32 %v1351_v41, %v1350_v39  ;;  %v1415_v45 = vpop.f32.mrb[25].mxu1  ;;  %v1353_v46 = vpop.f32.mrb[26].mxu0 }
 0x129   :  { %v1416_v47 = vadd.f32 %v1415_v45, %v1414_v40  ;;  %v1417_v48 = vpop.f32.mrb[26].mxu1  ;;  %v1354_v49 = vpop.f32.mrb[27].mxu0  ;;  %v48_v40 = vld [vmem:[#allocation2 + $0x48] sm:$0xff] }
 0x12a   :  { %v1355_v50 = vadd.f32 %v1354_v49, %v1353_v46  ;;  %v1418_v51 = vpop.f32.mrb[27].mxu1  ;;  %v1928_v46 = vld [vmem:[%s2102_s3 + $0x18] sm:$0xff]   ;;  %v1942_v49 = vld [vmem:[%s2102_s3 + $0x10] sm:$0xff]  }
 0x12b   :  { %v1419_v52 = vadd.f32 %v1418_v51, %v1417_v48  ;;  %v1889_v53 = vadd.f32 %v1416_v47, %v1352_v42  ;;  %v1261_v47 = vunpack.c.l.bf16 %v1912_v27  ;;  %v1277_v51 = vunpack.c.l.bf16 %v1919_v36 }
 0x12d   :  { %v1891_v54 = vadd.f32 %v1419_v52, %v1355_v50  ;;  %v1947_v50 = vld [vmem:[%s2102_s3 + $0x30] sm:$0xff]   ;;  %v1266_v52 = vunpack.c.h.bf16 %v1901_v17 }
 0x12e   :  { %v1356_v55 = vpop.f32.mrb[28].mxu0 }
 0x12f   :  { %v1420_v56 = vpop.f32.mrb[28].mxu1  ;;  %v1357_v59 = vpop.f32.mrb[29].mxu0 }
 0x130   :  { %v1358_v60 = vadd.f32 %v1357_v59, %v1356_v55  ;;  %v1421_v61 = vpop.f32.mrb[29].mxu1  ;;  %v1359_v62 = vpop.f32.mrb[30].mxu0  ;;  %v1262_v59 = vunpack.c.h.bf16 %v1912_v27 }
 0x131   :  { %v1422_v63 = vadd.f32 %v1421_v61, %v1420_v56  ;;  %v1423_v0 = vpop.f32.mrb[30].mxu1  ;;  %v1360_v1 = vpop.f32.mrb[31].mxu0  ;;  %v45_v61 = vld [vmem:[#allocation2 + $0x30] sm:$0xff] }
 0x132   :  { %v1361_v2 = vadd.f32 %v1360_v1, %v1359_v62  ;;  %v1424_v3 = vpop.f32.mrb[31].mxu1 }
 0x133   :  { %v1425_v4 = vadd.f32 %v1424_v3, %v1423_v0  ;;  %v1893_v5 = vadd.f32 %v1422_v63, %v1358_v60  ;;  %v1278_v60 = vunpack.c.h.bf16 %v1919_v36  ;;  %v1273_v63 = vunpack.c.l.bf16 %v1928_v46 }
 0x135   :  { %v1895_v6 = vadd.f32 %v1425_v4, %v1361_v2  ;;  %v53_v2 = vld [vmem:[#allocation2 + $0x70] sm:$0xff]  ;;  %v43_v4 = vld [vmem:[#allocation2 + $0x20] sm:$0xff] }
 0x136   :  { %v1460_v10 = vpop.f32.mrb[32].mxu0 }
 0x137   :  { %v868_v11 = vadd.f32 %v1460_v10, %v1873_v43  ;;  %v1468_v13 = vpop.f32.mrb[32].mxu1  ;;  %v859_v15 = vpop.f32.mrb[33].mxu0  ;;  %v1907_v43 = vld [vmem:[%s2102_s3 + $0x28] sm:$0xff]   ;;  %v1269_v10 = vunpack.c.l.bf16 %v1942_v49 }
 0x138   :  { %v900_v18 = vadd.f32 %v1468_v13, %v803_v37  ;;  %v860_v19 = vadd.f32 %v859_v15, %v1869_v29  ;;  %v891_v20 = vpop.f32.mrb[33].mxu1  ;;  %v1461_v24 = vpop.f32.mrb[34].mxu0  ;;  %v1282_v55 = vunpack.c.h.bf16 %v1907_v43  ;;  %v1968_v13 = vld [vmem:[%s2103_s2] ss:$0 sm:$0xff] }
 0x139   :  { %v924_v26 = vadd.f32 %v868_v11, %v41_v9  ;;  %v892_v28 = vadd.f32 %v891_v20, %v1885_v21  ;;  %v871_v31 = vadd.f32 %v1461_v24, %v1875_v44  ;;  %v1469_v29 = vpop.f32.mrb[34].mxu1  ;;  %v862_v33 = vpop.f32.mrb[35].mxu0  ;;  %v1265_v21 = vunpack.c.l.bf16 %v1901_v17  ;;  %v51_v15 = vld [vmem:[#allocation2 + $0x60] sm:$0xff] }
 0x13a   :  { %v932_v34 = vadd.f32 %v900_v18, %v49_v12  ;;  %v922_v35 = vadd.f32 %v860_v19, %v39_v14  ;;  %v903_v37 = vadd.f32 %v1469_v29, %v806_v38  ;;  %v863_v39 = vadd.f32 %v862_v33, %v1871_v30  ;;  %v894_v41 = vpop.f32.mrb[35].mxu1  ;;  %v1933_v38 = vld [vmem:[%s2102_s3 + $0x38] sm:$0xff]   ;;  %v44_v29 = vld [vmem:[#allocation2 + $0x28] sm:$0xff] }
 0x13b   :  { %941 = vst.msk [vmem:[#allocation2 + $0x10] sm:$0xff] %vm22_vm0, %v924_v26  ;;  %v930_v44 = vadd.f32 %v892_v28, %v47_v16  ;;  %v925_v42 = vadd.f32 %v871_v31, %v42_v23  ;;  %v895_v45 = vadd.f32 %v894_v41, %v1887_v22  ;;  %v1281_v30 = vunpack.c.l.bf16 %v1907_v43  ;;  %v46_v18 = vld [vmem:[#allocation2 + $0x38] sm:$0xff] }
 0x13c   :  { %949 = vst.msk [vmem:[#allocation2 + $0x50] sm:$0xff] %vm22_vm0, %v932_v34  ;;  %939 = vst.msk [vmem:[#allocation2] sm:$0xff] %vm22_vm0, %v922_v35  ;;  %v933_v48 = vadd.f32 %v903_v37, %v50_v25  ;;  %v923_v22 = vadd.f32 %v863_v39, %v40_v32  ;;  %v1289_v0 = vunpack.c.l.bf16 %v1933_v38  ;;  %v1285_v11 = vunpack.c.l.bf16 %v1947_v50  ;;  %v54_v28 = vld [vmem:[#allocation2 + $0x78] sm:$0xff]  ;;  %v52_v39 = vld [vmem:[#allocation2 + $0x68] sm:$0xff] }
 0x13d   :  { %947 = vst.msk [vmem:[#allocation2 + $0x40] sm:$0xff] %vm22_vm0, %v930_v44  ;;  %942 = vst.msk [vmem:[#allocation2 + $0x18] sm:$0xff] %vm22_vm0, %v925_v42  ;;  %v931_v56 = vadd.f32 %v895_v45, %v48_v40  ;;  %v1274_v12 = vunpack.c.h.bf16 %v1928_v46  ;;  %v1290_v20 = vunpack.c.h.bf16 %v1933_v38  ;;  %v1270_v23 = vunpack.c.h.bf16 %v1942_v49 }
 0x13e   :  { %950 = vst.msk [vmem:[#allocation2 + $0x58] sm:$0xff] %vm22_vm0, %v933_v48  ;;  %940 = vst.msk [vmem:[#allocation2 + $0x8] sm:$0xff] %vm22_vm0, %v923_v22  ;;  %v1464_v62 = vpop.f32.mrb[36].mxu0 }
 0x13f   :  { %948 = vst.msk [vmem:[#allocation2 + $0x48] sm:$0xff] %vm22_vm0, %v931_v56  ;;  %v884_v1 = vadd.f32 %v1464_v62, %v1881_v7  ;;  %v1472_v3 = vpop.f32.mrb[36].mxu1  ;;  %v875_v9 = vpop.f32.mrb[37].mxu0 }
 0x140   :  { %v916_v14 = vadd.f32 %v1472_v3, %v1893_v5  ;;  %v876_v7 = vadd.f32 %v875_v9, %v1877_v57  ;;  %v907_v16 = vpop.f32.mrb[37].mxu1  ;;  %v1465_v19 = vpop.f32.mrb[38].mxu0  ;;  %v1286_v5 = vunpack.c.h.bf16 %v1947_v50 }
 0x141   :  { %v928_v24 = vadd.f32 %v884_v1, %v45_v61  ;;  %v908_v25 = vadd.f32 %v907_v16, %v1889_v53  ;;  %v887_v26 = vadd.f32 %v1465_v19, %v1883_v8  ;;  %v1473_v31 = vpop.f32.mrb[38].mxu1  ;;  %v878_v32 = vpop.f32.mrb[39].mxu0 }
 0x142   :  { %v960_v57 = vld [vmem:[#allocation2 + $0x10] sm:$0xff]  ;;  %v936_v33 = vadd.f32 %v916_v14, %v53_v2  ;;  %v926_v34 = vadd.f32 %v876_v7, %v43_v4  ;;  %v919_v35 = vadd.f32 %v1473_v31, %v1895_v6  ;;  %v879_v37 = vadd.f32 %v878_v32, %v1879_v58  ;;  %v910_v40 = vpop.f32.mrb[39].mxu1 }
 0x143   :  { %v983_v41 = vadd.f32 %v1968_v13, %v960_v57  ;;  %v968_v53 = vld [vmem:[#allocation2 + $0x50] sm:$0xff]  ;;  %v958_v44 = vld [vmem:[#allocation2] sm:$0xff]  ;;  %945 = vst.msk [vmem:[#allocation2 + $0x30] sm:$0xff] %vm22_vm0, %v928_v24  ;;  %v934_v8 = vadd.f32 %v908_v25, %v51_v15  ;;  %v929_v42 = vadd.f32 %v887_v26, %v46_v18  ;;  %v911_v45 = vadd.f32 %v910_v40, %v1891_v54 }
 0x144   :  { %v991_v48 = vadd.f32 %v1968_v13, %v968_v53  ;;  %v981_v22 = vadd.f32 %v1968_v13, %v958_v44  ;;  %v966_v56 = vld [vmem:[#allocation2 + $0x40] sm:$0xff]  ;;  %v961_v6 = vld [vmem:[#allocation2 + $0x18] sm:$0xff]  ;;  %953 = vst.msk [vmem:[#allocation2 + $0x70] sm:$0xff] %vm22_vm0, %v936_v33  ;;  %943 = vst.msk [vmem:[#allocation2 + $0x20] sm:$0xff] %vm22_vm0, %v926_v34  ;;  %v937_v58 = vadd.f32 %v919_v35, %v54_v28 }
 0x145   :  { %v927_v61 = vadd.f32 %v879_v37, %v44_v29  ;;  %v1031_v62 = vadd.f32 %v1265_v21, %v983_v41  ;;  %v989_v1 = vadd.f32 %v1968_v13, %v966_v56  ;;  %v984_v2 = vadd.f32 %v1968_v13, %v961_v6  ;;  %v969_v54 = vld [vmem:[#allocation2 + $0x58] sm:$0xff]  ;;  %v959_v3 = vld [vmem:[#allocation2 + $0x8] sm:$0xff]  ;;  %951 = vst.msk [vmem:[#allocation2 + $0x60] sm:$0xff] %vm22_vm0, %v934_v8 }
 0x146   :  { %946 = vst.msk [vmem:[#allocation2 + $0x38] sm:$0xff] %vm22_vm0, %v929_v42  ;;  %v935_v4 = vadd.f32 %v911_v45, %v52_v39  ;;  %v1039_v9 = vadd.f32 %v1281_v30, %v991_v48  ;;  %v1029_v14 = vadd.f32 %v1261_v47, %v981_v22  ;;  %v992_v7 = vadd.f32 %v1968_v13, %v969_v54  ;;  %v967_v15 = vld [vmem:[#allocation2 + $0x48] sm:$0xff] }
 0x147   :  { %v982_v21 = vadd.f32 %v1968_v13, %v959_v3  ;;  %954 = vst.msk [vmem:[#allocation2 + $0x78] sm:$0xff] %vm22_vm0, %v937_v58  ;;  %944 = vst.msk [vmem:[#allocation2 + $0x28] sm:$0xff] %vm22_vm0, %v927_v61  ;;  %v1047_v16 = vmax.f32 %v1031_v62, 0.0  ;;  %v1037_v18 = vadd.f32 %v1277_v51, %v989_v1  ;;  %v1032_v19 = vadd.f32 %v1266_v52, %v984_v2 }
 0x148   :  { %v990_v30 = vadd.f32 %v1968_v13, %v967_v15  ;;  %952 = vst.msk [vmem:[#allocation2 + $0x68] sm:$0xff] %vm22_vm0, %v935_v4  ;;  %v1055_v47 = vmax.f32 %v1039_v9, 0.0  ;;  %v1045_v24 = vmax.f32 %v1029_v14, 0.0  ;;  %v1040_v25 = vadd.f32 %v1282_v55, %v992_v7 }
 0x149   :  { %v1030_v26 = vadd.f32 %v1262_v59, %v982_v21  ;;  %v1245_v28 = vpack.c.bf16 %v1047_v16, %v1047_v16  ;;  %v1053_v31 = vmax.f32 %v1037_v18, 0.0  ;;  %v1048_v29 = vmax.f32 %v1032_v19, 0.0 }
 0x14a   :  { %v1038_v51 = vadd.f32 %v1278_v60, %v990_v30  ;;  %v1253_v17 = vpack.c.bf16 %v1055_v47, %v1055_v47  ;;  %v1243_v52 = vpack.c.bf16 %v1045_v24, %v1045_v24  ;;  %v1056_v32 = vmax.f32 %v1040_v25, 0.0  ;;  %v964_v33 = vld [vmem:[#allocation2 + $0x30] sm:$0xff] }
 0x14b   :  { %v1046_v57 = vmax.f32 %v1030_v26, 0.0  ;;  %1128 = vst.msk [vmem:[%s2104_s4 + $0x8] sm:$0xf] %vm1125_vm1, %v1245_v28  ;;  %v1251_v43 = vpack.c.bf16 %v1053_v31, %v1053_v31  ;;  %v1246_v55 = vpack.c.bf16 %v1048_v29, %v1048_v29  ;;  %v987_v59 = vadd.f32 %v1968_v13, %v964_v33  ;;  %v972_v34 = vld [vmem:[#allocation2 + $0x70] sm:$0xff]  ;;  %v962_v35 = vld [vmem:[#allocation2 + $0x20] sm:$0xff] }
 0x14c   :  { %v1054_v27 = vmax.f32 %v1038_v51, 0.0  ;;  %1136 = vst.msk [vmem:[%s2104_s4 + $0x28] sm:$0xf] %vm1125_vm1, %v1253_v17  ;;  %1126 = vst.msk [vmem:[%s2104_s4] sm:$0xf] %vm1125_vm1, %v1243_v52  ;;  %v1254_v36 = vpack.c.bf16 %v1056_v32, %v1056_v32  ;;  %v995_v37 = vadd.f32 %v1968_v13, %v972_v34  ;;  %v985_v39 = vadd.f32 %v1968_v13, %v962_v35  ;;  %v970_v40 = vld [vmem:[#allocation2 + $0x60] sm:$0xff] }
 0x14d   :  { %v1244_v60 = vpack.c.bf16 %v1046_v57, %v1046_v57  ;;  %v965_v41 = vld [vmem:[#allocation2 + $0x38] sm:$0xff]  ;;  %1134 = vst.msk [vmem:[%s2104_s4 + $0x20] sm:$0xf] %vm1125_vm1, %v1251_v43  ;;  %1129 = vst.msk [vmem:[%s2104_s4 + $0xc] sm:$0xf] %vm1125_vm1, %v1246_v55  ;;  %v1035_v44 = vadd.f32 %v1273_v63, %v987_v59  ;;  %v993_v8 = vadd.f32 %v1968_v13, %v970_v40 }
 0x14e   :  { %v1252_v53 = vpack.c.bf16 %v1054_v27, %v1054_v27  ;;  %v988_v42 = vadd.f32 %v1968_v13, %v965_v41  ;;  %v973_v45 = vld [vmem:[#allocation2 + $0x78] sm:$0xff]  ;;  %v963_v48 = vld [vmem:[#allocation2 + $0x28] sm:$0xff]  ;;  %1137 = vst.msk [vmem:[%s2104_s4 + $0x2c] sm:$0xf] %vm1125_vm1, %v1254_v36  ;;  %v1043_v22 = vadd.f32 %v1289_v0, %v995_v37  ;;  %v1033_v63 = vadd.f32 %v1269_v10, %v985_v39 }
 0x14f   :  { %1127 = vst.msk [vmem:[%s2104_s4 + $0x4] sm:$0xf] %vm1125_vm1, %v1244_v60  ;;  %v996_v56 = vadd.f32 %v1968_v13, %v973_v45  ;;  %v986_v6 = vadd.f32 %v1968_v13, %v963_v48  ;;  %v971_v58 = vld [vmem:[#allocation2 + $0x68] sm:$0xff]  ;;  %v1051_v61 = vmax.f32 %v1035_v44, 0.0  ;;  %v1041_v62 = vadd.f32 %v1285_v11, %v993_v8 }
 0x150   :  { %1135 = vst.msk [vmem:[%s2104_s4 + $0x24] sm:$0xf] %vm1125_vm1, %v1252_v53  ;;  %v1036_v0 = vadd.f32 %v1274_v12, %v988_v42  ;;  %v994_v1 = vadd.f32 %v1968_v13, %v971_v58  ;;  %v1059_v10 = vmax.f32 %v1043_v22, 0.0  ;;  %v1049_v2 = vmax.f32 %v1033_v63, 0.0 }
 0x151   :  { %v1044_v54 = vadd.f32 %v1290_v20, %v996_v56  ;;  %v1034_v3 = vadd.f32 %v1270_v23, %v986_v6  ;;  %v1249_v4 = vpack.c.bf16 %v1051_v61, %v1051_v61  ;;  %v1057_v9 = vmax.f32 %v1041_v62, 0.0 }
 0x152   :  { %v1052_v14 = vmax.f32 %v1036_v0, 0.0  ;;  %v1042_v7 = vadd.f32 %v1286_v5, %v994_v1  ;;  %v1257_v11 = vpack.c.bf16 %v1059_v10, %v1059_v10  ;;  %v1247_v21 = vpack.c.bf16 %v1049_v2, %v1049_v2 }
 0x153   :  { %v1060_v46 = vmax.f32 %v1044_v54, 0.0  ;;  %v1050_v12 = vmax.f32 %v1034_v3, 0.0  ;;  %1132 = vst.msk [vmem:[%s2104_s4 + $0x18] sm:$0xf] %vm1125_vm1, %v1249_v4  ;;  %v1255_v38 = vpack.c.bf16 %v1057_v9, %v1057_v9 }
 0x154   :  { %v1250_v13 = vpack.c.bf16 %v1052_v14, %v1052_v14  ;;  %v1058_v20 = vmax.f32 %v1042_v7, 0.0  ;;  %1140 = vst.msk [vmem:[%s2104_s4 + $0x38] sm:$0xf] %vm1125_vm1, %v1257_v11  ;;  %1130 = vst.msk [vmem:[%s2104_s4 + $0x10] sm:$0xf] %vm1125_vm1, %v1247_v21 }
 0x155   :  { %v1258_v49 = vpack.c.bf16 %v1060_v46, %v1060_v46  ;;  %v1248_v50 = vpack.c.bf16 %v1050_v12, %v1050_v12  ;;  %1138 = vst.msk [vmem:[%s2104_s4 + $0x30] sm:$0xf] %vm1125_vm1, %v1255_v38 }
 0x156   :  { %1133 = vst.msk [vmem:[%s2104_s4 + $0x1c] sm:$0xf] %vm1125_vm1, %v1250_v13  ;;  %v1256_v23 = vpack.c.bf16 %v1058_v20, %v1058_v20 }
 0x157   :  { %1141 = vst.msk [vmem:[%s2104_s4 + $0x3c] sm:$0xf] %vm1125_vm1, %v1258_v49  ;;  %1131 = vst.msk [vmem:[%s2104_s4 + $0x14] sm:$0xf] %vm1125_vm1, %v1248_v50 }
 0x158   :  { %1139 = vst.msk [vmem:[%s2104_s4 + $0x34] sm:$0xf] %vm1125_vm1, %v1256_v23 }

// kernel: _lambda_.18
= control target key start
LH: loop header
LB: loop body
LE: loop exit
PB: predicated region body
PF: predicated region fallthrough
CT: control target
= control target key end

     0   :  { %s335_s1 = inlined_call_operand.vmem [shape: bf16[128,128], index: 1, kind: input, shape index: {}]   ;;  %s336_s0 = inlined_call_operand.vmem [shape: bf16[32,128], index: 0, kind: input, shape index: {}]   ;;  %s337_s2 = inlined_call_operand.vmem [shape: f32[1,128], index: 2, kind: input, shape index: {}]   ;;  %s338_s3 = inlined_call_operand.vmem [shape: bf16[32,128], index: 3, kind: output, shape index: {}]  }
   0x1   :  { %v266_v0 = vld [vmem:[%s335_s1] sm:$0xff]   ;;  %v267_v1 = vld [vmem:[%s335_s1 + $0x8] sm:$0xff]   ;;  %v268_v2 = vld [vmem:[%s335_s1 + $0x10] sm:$0xff]  }
   0x2   :  { %246 = vmatprep.subr.bf16.mxu0 %v266_v0  ;;  %v269_v3 = vld [vmem:[%s335_s1 + $0x18] sm:$0xff]   ;;  %v274_v4 = vld [vmem:[%s336_s0] sm:$0xff]   ;;  %v271_v6 = vld [vmem:[%s335_s1 + $0x28] sm:$0xff]  }
   0x3   :  { %247 = vmatpush3.bf16.msra.mxu0 %v266_v0  ;;  %262 = vmatprep.mubr.bf16.mxu0 %v274_v4  ;;  %v270_v5 = vld [vmem:[%s335_s1 + $0x20] sm:$0xff]   ;;  %v272_v7 = vld [vmem:[%s335_s1 + $0x30] sm:$0xff]   ;;  %v273_v8 = vld [vmem:[%s335_s1 + $0x38] sm:$0xff]  }
   0x4   :  { %248 = vmatprep.subr.bf16.mxu0 %v267_v1  ;;  %v275_v9 = vld [vmem:[%s336_s0 + $0x8] sm:$0xff]   ;;  %v216_v11 = vld [vmem:[%s337_s2] ss:$0 sm:$0xff] }
   0x7   :  { %249 = vmatpush3.bf16.msra.mxu0 %v267_v1 }
   0x8   :  { %250 = vmatprep.subr.bf16.mxu0 %v268_v2 }
   0xb   :  { %251 = vmatpush3.bf16.msra.mxu0 %v268_v2 }
   0xc   :  { %252 = vmatprep.subr.bf16.mxu0 %v269_v3 }
   0xf   :  { %253 = vmatpush3.bf16.msra.mxu0 %v269_v3 }
  0x10   :  { %254 = vmatprep.subr.bf16.mxu0 %v270_v5 }
  0x13   :  { %255 = vmatpush3.bf16.msra.mxu0 %v270_v5 }
  0x14   :  { %256 = vmatprep.subr.bf16.mxu0 %v271_v6 }
  0x17   :  { %257 = vmatpush3.bf16.msra.mxu0 %v271_v6 }
  0x18   :  { %258 = vmatprep.subr.bf16.mxu0 %v272_v7 }
  0x1b   :  { %259 = vmatpush3.bf16.msra.mxu0 %v272_v7 }
  0x1c   :  { %260 = vmatprep.subr.bf16.mxu0 %v273_v8 }
  0x1f   :  { %261 = vmatpush3.bf16.msra.mxu0 %v273_v8 }
  0x22   :  { %263 = vmatmul.mubr.bf16.vlgmr.msra.gmra.mrb[0].mxu0 %v275_v9 }
  0xf5   :  { %v264_v10 = vpop.f32.mrb[0].mxu0 }
  0xf6   :  { %v141_v12 = vpop.f32.mrb[1].mxu0  ;;  %v180_v14 = vadd.f32 %v264_v10, %v216_v11 }
  0xf7   :  { %v265_v13 = vpop.f32.mrb[2].mxu0  ;;  %v178_v17 = vadd.f32 %v216_v11, %v141_v12 }
  0xf8   :  { %v181_v15 = vadd.f32 %v265_v13, %v216_v11  ;;  %v144_v16 = vpop.f32.mrb[3].mxu0 }
  0xf9   :  { %v179_v18 = vadd.f32 %v216_v11, %v144_v16 }
  0xfa   :  { %v233_v19 = vpack.c.bf16 %v181_v15, %v180_v14 }
  0xfb   :  { %v228_v20 = vpack.c.bf16 %v179_v18, %v178_v17 }
  0xfc   :  { %235 = vst [vmem:[%s338_s3 + $0x8] sm:$0xff] %v233_v19  }
  0xfd   :  { %229 = vst [vmem:[%s338_s3] sm:$0xff] %v228_v20  }

// kernel: _lambda_.19
= control target key start
LH: loop header
LB: loop body
LE: loop exit
PB: predicated region body
PF: predicated region fallthrough
CT: control target
= control target key end

     0   :  { %s1001_s1 = inlined_call_operand.vmem [shape: bf16[640,128], index: 1, kind: input, shape index: {}]   ;;  %s1002_s0 = inlined_call_operand.vmem [shape: bf16[32,640], index: 0, kind: input, shape index: {}]   ;;  %s1003_s2 = inlined_call_operand.vmem [shape: f32[1,128], index: 2, kind: input, shape index: {}]   ;;  %s1004_s3 = inlined_call_operand.vmem [shape: bf16[32,128], index: 3, kind: output, shape index: {}]  }
   0x1   :  { %v768_v0 = vld [vmem:[%s1001_s1 + $0x40] sm:$0xff]   ;;  %v772_v4 = vld [vmem:[%s1001_s1 + $0x48] sm:$0xff]   ;;  %v776_v8 = vld [vmem:[%s1001_s1 + $0x50] sm:$0xff]  }
   0x2   :  { %v769_v1 = vld [vmem:[%s1001_s1 + $0xc0] sm:$0xff]   ;;  %682 = vmatprep.subr.bf16.mxu0 %v768_v0  ;;  %v773_v5 = vld [vmem:[%s1001_s1 + $0xc8] sm:$0xff]   ;;  %v777_v9 = vld [vmem:[%s1001_s1 + $0xd0] sm:$0xff]  }
   0x3   :  { %v770_v2 = vld [vmem:[%s1001_s1] sm:$0xff]   ;;  %710 = vmatprep.subr.bf16.mxu1 %v769_v1  ;;  %v774_v6 = vld [vmem:[%s1001_s1 + $0x8] sm:$0xff]   ;;  %v778_v10 = vld [vmem:[%s1001_s1 + $0x10] sm:$0xff]  }
   0x4   :  { %v771_v3 = vld [vmem:[%s1001_s1 + $0x80] sm:$0xff]   ;;  %683 = vmatpush3.bf16.msra.mxu0 %v770_v2  ;;  %v775_v7 = vld [vmem:[%s1001_s1 + $0x88] sm:$0xff]   ;;  %v779_v11 = vld [vmem:[%s1001_s1 + $0x90] sm:$0xff]  }
   0x5   :  { %711 = vmatpush3.bf16.msra.mxu1 %v771_v3  ;;  %684 = vmatprep.subr.bf16.mxu0 %v772_v4  ;;  %v780_v12 = vld [vmem:[%s1001_s1 + $0x58] sm:$0xff]   ;;  %v784_v16 = vld [vmem:[%s1001_s1 + $0x60] sm:$0xff]   ;;  %v788_v20 = vld [vmem:[%s1001_s1 + $0x68] sm:$0xff]  }
   0x6   :  { %712 = vmatprep.subr.bf16.mxu1 %v773_v5  ;;  %v781_v13 = vld [vmem:[%s1001_s1 + $0xd8] sm:$0xff]   ;;  %v785_v17 = vld [vmem:[%s1001_s1 + $0xe0] sm:$0xff]   ;;  %v789_v21 = vld [vmem:[%s1001_s1 + $0xe8] sm:$0xff]  }
   0x7   :  { %v782_v14 = vld [vmem:[%s1001_s1 + $0x18] sm:$0xff]   ;;  %v786_v18 = vld [vmem:[%s1001_s1 + $0x20] sm:$0xff]   ;;  %v790_v22 = vld [vmem:[%s1001_s1 + $0x28] sm:$0xff]  }
   0x8   :  { %685 = vmatpush3.bf16.msra.mxu0 %v774_v6  ;;  %v783_v15 = vld [vmem:[%s1001_s1 + $0x98] sm:$0xff]   ;;  %v787_v19 = vld [vmem:[%s1001_s1 + $0xa0] sm:$0xff]   ;;  %v791_v23 = vld [vmem:[%s1001_s1 + $0xa8] sm:$0xff]  }
   0x9   :  { %713 = vmatpush3.bf16.msra.mxu1 %v775_v7  ;;  %686 = vmatprep.subr.bf16.mxu0 %v776_v8  ;;  %v792_v24 = vld [vmem:[%s1001_s1 + $0x70] sm:$0xff]   ;;  %v796_v28 = vld [vmem:[%s1001_s1 + $0x78] sm:$0xff]   ;;  %v805_v35 = vld [vmem:[%s1002_s0 + $0xc] ss:$20 sps:$4 sm:$0xff]  }
   0xa   :  { %714 = vmatprep.subr.bf16.mxu1 %v777_v9  ;;  %v793_v25 = vld [vmem:[%s1001_s1 + $0xf0] sm:$0xff]   ;;  %v797_v29 = vld [vmem:[%s1001_s1 + $0xf8] sm:$0xff]   ;;  %v806_v36 = vld [vmem:[%s1001_s1 + $0x100] sm:$0xff]   ;;  %492 = vmatprep.mubr.bf16.mxu1 %v805_v35 }
   0xb   :  { %v794_v26 = vld [vmem:[%s1001_s1 + $0x30] sm:$0xff]   ;;  %v798_v30 = vld [vmem:[%s1001_s1 + $0x38] sm:$0xff]   ;;  %v807_v37 = vld [vmem:[%s1001_s1 + $0x108] sm:$0xff]  }
   0xc   :  { %687 = vmatpush3.bf16.msra.mxu0 %v778_v10  ;;  %v795_v27 = vld [vmem:[%s1001_s1 + $0xb0] sm:$0xff]   ;;  %v799_v31 = vld [vmem:[%s1001_s1 + $0xb8] sm:$0xff]   ;;  %v811_v39 = vld [vmem:[%s1002_s0 + $0x2c] ss:$20 sps:$4 sm:$0xff]  }
   0xd   :  { %715 = vmatpush3.bf16.msra.mxu1 %v779_v11  ;;  %688 = vmatprep.subr.bf16.mxu0 %v780_v12  ;;  %v800_v32 = vld [vmem:[%s1002_s0] ss:$20 sps:$4 sm:$0xff]   ;;  %v802_v33 = vld [vmem:[%s1002_s0 + $0x4] ss:$20 sps:$4 sm:$0xff]   ;;  %v803_v34 = vld [vmem:[%s1002_s0 + $0x8] ss:$20 sps:$4 sm:$0xff]  }
   0xe   :  { %716 = vmatprep.subr.bf16.mxu1 %v781_v13  ;;  %443 = vmatprep.mubr.bf16.mxu0 %v802_v33  ;;  %v808_v38 = vld [vmem:[%s1001_s1 + $0x110] sm:$0xff]   ;;  %v809_v41 = vld [vmem:[%s1001_s1 + $0x118] sm:$0xff]   ;;  %v810_v45 = vld [vmem:[%s1001_s1 + $0x120] sm:$0xff]  }
   0xf   :  { %v813_v40 = vld [vmem:[%s1002_s0 + $0x34] ss:$20 sps:$4 sm:$0xff]   ;;  %v817_v43 = vld [vmem:[%s1002_s0 + $0x30] ss:$20 sps:$4 sm:$0xff]   ;;  %v819_v48 = vld [vmem:[%s1001_s1 + $0x138] sm:$0xff]  }
  0x10   :  { %689 = vmatpush3.bf16.msra.mxu0 %v782_v14  ;;  %v816_v42 = vld [vmem:[%s1002_s0 + $0x28] ss:$20 sps:$4 sm:$0xff]   ;;  %v820_v44 = vld [vmem:[%s1002_s0 + $0x10] ss:$20 sps:$4 sm:$0xff]   ;;  %v821_v49 = vld [vmem:[%s1002_s0 + $0x38] ss:$20 sps:$4 sm:$0xff]  }
  0x11   :  { %717 = vmatpush3.bf16.msra.mxu1 %v783_v15  ;;  %690 = vmatprep.subr.bf16.mxu0 %v784_v16  ;;  %v815_v46 = vld [vmem:[%s1001_s1 + $0x128] sm:$0xff]   ;;  %v818_v47 = vld [vmem:[%s1001_s1 + $0x130] sm:$0xff]   ;;  %v662_v15 = vld [vmem:[%s1003_s2] ss:$0 sm:$0xff] }
  0x12   :  { %718 = vmatprep.subr.bf16.mxu1 %v785_v17 }
  0x14   :  { %691 = vmatpush3.bf16.msra.mxu0 %v786_v18 }
  0x15   :  { %719 = vmatpush3.bf16.msra.mxu1 %v787_v19  ;;  %692 = vmatprep.subr.bf16.mxu0 %v788_v20 }
  0x16   :  { %720 = vmatprep.subr.bf16.mxu1 %v789_v21 }
  0x18   :  { %693 = vmatpush3.bf16.msra.mxu0 %v790_v22 }
  0x19   :  { %721 = vmatpush3.bf16.msra.mxu1 %v791_v23  ;;  %694 = vmatprep.subr.bf16.mxu0 %v792_v24 }
  0x1a   :  { %722 = vmatprep.subr.bf16.mxu1 %v793_v25 }
  0x1c   :  { %695 = vmatpush3.bf16.msra.mxu0 %v794_v26 }
  0x1d   :  { %723 = vmatpush3.bf16.msra.mxu1 %v795_v27  ;;  %696 = vmatprep.subr.bf16.mxu0 %v796_v28 }
  0x1e   :  { %724 = vmatprep.subr.bf16.mxu1 %v797_v29 }
  0x20   :  { %697 = vmatpush3.bf16.msra.mxu0 %v798_v30 }
  0x21   :  { %725 = vmatpush3.bf16.msra.mxu1 %v799_v31  ;;  %748 = vmatprep.subr.bf16.mxu0 %v806_v36 }
  0x23   :  { %444 = vmatmul.mubr.bf16.vlgmr.msra.gmra.mrb[0].mxu0 %v800_v32 }
  0x24   :  { %493 = vmatmul.mubr.bf16.vlgmr.msra.gmra.mrb[0].mxu1 %v803_v34  ;;  %749 = vmatpush3.bf16.msra.mxu0 %v806_v36 }
  0x25   :  { %750 = vmatprep.subr.bf16.mxu0 %v807_v37  ;;  %451 = vmatprep.mubr.bf16.mxu0 %v811_v39 }
  0x26   :  { %500 = vmatprep.mubr.bf16.mxu1 %v813_v40 }
  0x28   :  { %751 = vmatpush3.bf16.msra.mxu0 %v807_v37 }
  0x29   :  { %752 = vmatprep.subr.bf16.mxu0 %v808_v38 }
  0x2b   :  { %452 = vmatmul.mubr.bf16.gmra.mrb[4].mxu0 %v816_v42 }
  0x2c   :  { %501 = vmatmul.mubr.bf16.gmra.mrb[4].mxu1 %v817_v43  ;;  %753 = vmatpush3.bf16.msra.mxu0 %v808_v38 }
  0x2d   :  { %754 = vmatprep.subr.bf16.mxu0 %v809_v41  ;;  %764 = vmatprep.mubr.bf16.mxu0 %v820_v44 }
  0x30   :  { %755 = vmatpush3.bf16.msra.mxu0 %v809_v41 }
  0x31   :  { %756 = vmatprep.subr.bf16.mxu0 %v810_v45 }
  0x34   :  { %757 = vmatpush3.bf16.msra.mxu0 %v810_v45 }
  0x35   :  { %758 = vmatprep.subr.bf16.mxu0 %v815_v46 }
  0x38   :  { %759 = vmatpush3.bf16.msra.mxu0 %v815_v46 }
  0x39   :  { %760 = vmatprep.subr.bf16.mxu0 %v818_v47 }
  0x3c   :  { %761 = vmatpush3.bf16.msra.mxu0 %v818_v47 }
  0x3d   :  { %762 = vmatprep.subr.bf16.mxu0 %v819_v48 }
  0x40   :  { %763 = vmatpush3.bf16.msra.mxu0 %v819_v48 }
  0x43   :  { %765 = vmatmul.mubr.bf16.vlgmr.msra.gmra.mrb[8].mxu0 %v821_v49 }
  0xf6   :  { %v698_v50 = vpop.f32.mrb[0].mxu0 }
  0xf7   :  { %v726_v51 = vpop.f32.mrb[0].mxu1  ;;  %v699_v52 = vpop.f32.mrb[1].mxu0 }
  0xf8   :  { %v700_v53 = vadd.f32 %v699_v52, %v698_v50  ;;  %v727_v54 = vpop.f32.mrb[1].mxu1  ;;  %v701_v55 = vpop.f32.mrb[2].mxu0 }
  0xf9   :  { %v728_v56 = vadd.f32 %v727_v54, %v726_v51  ;;  %v729_v57 = vpop.f32.mrb[2].mxu1  ;;  %v702_v58 = vpop.f32.mrb[3].mxu0 }
  0xfa   :  { %v703_v59 = vadd.f32 %v702_v58, %v701_v55  ;;  %v730_v60 = vpop.f32.mrb[3].mxu1 }
  0xfb   :  { %v731_v61 = vadd.f32 %v730_v60, %v729_v57  ;;  %v495_v62 = vadd.f32 %v728_v56, %v700_v53 }
  0xfd   :  { %v498_v63 = vadd.f32 %v731_v61, %v703_v59 }
  0xfe   :  { %v704_v0 = vpop.f32.mrb[4].mxu0 }
  0xff   :  { %v732_v1 = vpop.f32.mrb[4].mxu1  ;;  %v705_v2 = vpop.f32.mrb[5].mxu0 }
 0x100   :  { %v706_v3 = vadd.f32 %v705_v2, %v704_v0  ;;  %v733_v4 = vpop.f32.mrb[5].mxu1  ;;  %v707_v5 = vpop.f32.mrb[6].mxu0 }
 0x101   :  { %v734_v6 = vadd.f32 %v733_v4, %v732_v1  ;;  %v735_v7 = vpop.f32.mrb[6].mxu1  ;;  %v708_v8 = vpop.f32.mrb[7].mxu0 }
 0x102   :  { %v709_v9 = vadd.f32 %v708_v8, %v707_v5  ;;  %v736_v10 = vpop.f32.mrb[7].mxu1 }
 0x103   :  { %v737_v11 = vadd.f32 %v736_v10, %v735_v7  ;;  %v503_v12 = vadd.f32 %v734_v6, %v706_v3 }
 0x105   :  { %v506_v13 = vadd.f32 %v737_v11, %v709_v9 }
 0x116   :  { %v766_v14 = vpop.f32.mrb[8].mxu0 }
 0x117   :  { %v552_v16 = vadd.f32 %v766_v14, %v503_v12  ;;  %v543_v17 = vpop.f32.mrb[9].mxu0 }
 0x118   :  { %v544_v18 = vadd.f32 %v543_v17, %v495_v62  ;;  %v767_v19 = vpop.f32.mrb[10].mxu0 }
 0x119   :  { %v582_v20 = vadd.f32 %v662_v15, %v552_v16  ;;  %v555_v21 = vadd.f32 %v767_v19, %v506_v13  ;;  %v546_v22 = vpop.f32.mrb[11].mxu0 }
 0x11a   :  { %v580_v23 = vadd.f32 %v662_v15, %v544_v18  ;;  %v547_v24 = vadd.f32 %v546_v22, %v498_v63 }
 0x11b   :  { %v583_v25 = vadd.f32 %v662_v15, %v555_v21  ;;  %v586_v27 = vmax.f32 %v582_v20, 0.0 }
 0x11c   :  { %v581_v26 = vadd.f32 %v662_v15, %v547_v24  ;;  %v584_v29 = vmax.f32 %v580_v23, 0.0 }
 0x11d   :  { %v587_v28 = vmax.f32 %v583_v25, 0.0 }
 0x11e   :  { %v585_v30 = vmax.f32 %v581_v26, 0.0 }
 0x11f   :  { %v679_v31 = vpack.c.bf16 %v587_v28, %v586_v27 }
 0x120   :  { %v674_v32 = vpack.c.bf16 %v585_v30, %v584_v29 }
 0x121   :  { %681 = vst [vmem:[%s1004_s3 + $0x8] sm:$0xff] %v679_v31  }
 0x122   :  { %675 = vst [vmem:[%s1004_s3] sm:$0xff] %v674_v32  }

// kernel: _lambda_.20
= control target key start
LH: loop header
LB: loop body
LE: loop exit
PB: predicated region body
PF: predicated region fallthrough
CT: control target
= control target key end

     0   :  { %s1093_s15 = smov 0   ;;  %s1095_s16 = smov 0   ;;  %s1209_s0 = inlined_call_operand.vmem [shape: bf16[32,1152], index: 0, kind: input, shape index: {}]   ;;  %s1210_s1 = inlined_call_operand.vmem [shape: bf16[1152,128], index: 1, kind: input, shape index: {}]   ;;  %s1211_s2 = inlined_call_operand.vmem [shape: f32[1,128], index: 2, kind: input, shape index: {}]   ;;  %s1212_s3 = inlined_call_operand.vmem [shape: bf16[32,128], index: 3, kind: input, shape index: {}]   ;;  %s1213_s4 = inlined_call_operand.vmem [shape: bf16[32,128], index: 4, kind: output, shape index: {}]  }
   0x1   :  { %s1097_s17 = smov 0   ;;  %s1099_s18 = smov 0  }
   0x2   :  { %s1101_s19 = smov 0  }
   0x3 LB: > { %s23_s20 = sadd.s32 1, %s1061_s18  ;;  %p42_p1 = scmp.ne.s32.totalorder %s1053_s16, %s1049_s15  ;;  %s1065_s19 = sphi %s1101_s19, %s14_s19   ;;  %s1061_s18 = sphi %s1099_s18, %s1217_s18   ;;  %s1057_s17 = sphi %s1097_s17, %s1216_s17   ;;  %s1053_s16 = sphi %s1095_s16, %s1215_s16   ;;  %s1049_s15 = sphi %s1093_s15, %s1214_s15  }
   0x4   : > { %p24_p0 = scmp.ge.s32.totalorder %s23_s20, 3  ;;  %p43_p2 = scmp.eq.s32.totalorder %s1065_s19, 0 }
   0x5   : > { %s35_s22 = sadd.s32 1, %s1053_s16  ;;  %p816_p5 = scmp.ge.s32.totalorder %s1065_s19, 3 }
   0x6   : > { %s1219_s20 = smov (%p24_p0, %s23_s20), 0  ;;  %p44_p3 = por %p43_p2, %p42_p1 }
   0x7   : > { %s31_s21 = ssub.s32 %s1061_s18, %s1219_s20  ;;  %179 = sbr.rel (%p816_p5) target bundleno = 23 (0x17), region = 24 }
   0x8   : > { %p33_p4 = scmp.eq.s32.totalorder %s31_s21, 0 }
   0xa   : > { %s1128_s23 = scalar_select %p33_p4, %s1053_s16, %s35_s22  }
   0xe   : > { %182 = sbr.rel (!%p44_p3) target bundleno = 23 (0x17), region = 28  ;;  %s184_s24 = sand.u32 (%p44_p3), 1, %s1053_s16  }
   0xf   : > { %s869_s25 = smul.u32 (%p44_p3), 12, %s1061_s18 }
  0x10   : > { %s952_s26 = smul.u32 (%p44_p3), 48, %s184_s24 }
  0x11   : > { %s192_s29 = scalar_lea.vmem (%p44_p3), %s1209_s0, %s869_s25 }
  0x12   : > { %v207_v0 = vld [vmem:[%s192_s29] sm:$0xff] (%p44_p3)  ;;  %v211_v2 = vld [vmem:[%s192_s29 + $0x48] sm:$0xff] (%p44_p3)  ;;  %s186_s30 = scalar_lea.vmem (%p44_p3), [#allocation3], %s952_s26  ;;  %v822_v6 = vld [vmem:[%s192_s29 + $0x50] sm:$0xf] (%p44_p3) }
  0x13   : > { %v209_v1 = vld [vmem:[%s192_s29 + $0x24] sm:$0xff] (%p44_p3)  ;;  %208 = vst [vmem:[%s186_s30] sm:$0xff] (%p44_p3), %v207_v0  ;;  %212 = vst [vmem:[%s186_s30 + $0x18] sm:$0xff] (%p44_p3), %v211_v2  ;;  %v213_v3 = vld [vmem:[%s192_s29 + $0x6c] sm:$0xff] (%p44_p3) }
  0x14   : > { %210 = vst [vmem:[%s186_s30 + $0xc] sm:$0xff] (%p44_p3), %v209_v1  ;;  %v818_v4 = vld [vmem:[%s192_s29 + $0x8] sm:$0xf] (%p44_p3)  ;;  %v820_v5 = vld [vmem:[%s192_s29 + $0x2c] sm:$0xf] (%p44_p3)  ;;  %214 = vst [vmem:[%s186_s30 + $0x24] sm:$0xff] (%p44_p3), %v213_v3 }
  0x15   : > { %819 = vst [vmem:[%s186_s30 + $0x8] sm:$0xf] %v818_v4  ;;  %821 = vst [vmem:[%s186_s30 + $0x14] sm:$0xf] %v820_v5  ;;  %v824_v7 = vld [vmem:[%s192_s29 + $0x74] sm:$0xf] }
  0x16   : > { %823 = vst [vmem:[%s186_s30 + $0x20] sm:$0xf] %v822_v6  ;;  %825 = vst [vmem:[%s186_s30 + $0x2c] sm:$0xf] %v824_v7 }
  0x17 PF: > { %p826_p6 = scmp.ge.s32.totalorder %s1065_s19, 1  ;;  %p243_p7 = scmp.lt.s32.totalorder %s1065_s19, 4 }
  0x19   : > { %p244_p8 = pnand %p826_p6, %p243_p7 }
  0x1a   : > { %s250_s5 = sand.u32 (!%p244_p8), 1, %s1049_s15   ;;  %s287_s6 = smul.u32 (!%p244_p8), 48, %s1057_s17 }
  0x1b   : > { %247 = sbr.rel (%p244_p8) target bundleno = 320 (0x140), region = 58  ;;  %p828_p10 = scmp.ne.s32.totalorder (!%p244_p8), %s1057_s17, 0 }
  0x1c   : > { %s953_s7 = smul.u32 (!%p244_p8), 48, %s250_s5  ;;  %p288_p9 = scmp.lt.s32.totalorder (!%p244_p8), %s287_s6, 143 }
  0x1e   : > { %s1145_s12 = scalar_lea.vmem (!%p244_p8), [#allocation3], %s953_s7 }
  0x22   : > { %s1221_s6 = smov (!%p288_p9, %s287_s6), 143  ;;  %309 = sbr.rel (%p828_p10) target bundleno = 41 (0x29), region = 66 }
  0x23   : > { %s827_s8 = sshll.u32 %s1221_s6, 2  ;;  %v1067_v8 = vmov (!%p828_p10), 0.0  }
  0x24   : > { %s1143_s11 = scalar_lea.vmem %s1210_s1, %s827_s8  ;;  %310 = vst [vmem:[#allocation2] sm:$0xff] (!%p828_p10), %v1067_v8  ;;  %311 = vst [vmem:[#allocation2 + $0x8] sm:$0xff] (!%p828_p10), %v1067_v8 }
  0x25   : > { %312 = vst [vmem:[#allocation2 + $0x10] sm:$0xff] (!%p828_p10), %v1067_v8  ;;  %313 = vst [vmem:[#allocation2 + $0x18] sm:$0xff] (!%p828_p10), %v1067_v8 }
  0x29 PF: > { %v995_v9 = vld [vmem:[%s1143_s11 + $0x40] sm:$0xff]   ;;  %v998_v12 = vld [vmem:[%s1143_s11 + $0x48] sm:$0xff]   ;;  %v1001_v15 = vld [vmem:[%s1143_s11 + $0x50] sm:$0xff]   ;;  %p859_p11 = scmp.ne.s32.totalorder %s1057_s17, 2 }
  0x2a   : > { %v996_v10 = vld [vmem:[%s1143_s11] sm:$0xff]   ;;  %894 = vmatprep.subr.bf16.mxu0 %v995_v9  ;;  %v999_v13 = vld [vmem:[%s1143_s11 + $0x8] sm:$0xff]   ;;  %v1002_v16 = vld [vmem:[%s1143_s11 + $0x10] sm:$0xff]  }
  0x2b   : > { %v997_v11 = vld [vmem:[%s1143_s11 + $0x80] sm:$0xff]   ;;  %895 = vmatpush3.bf16.msra.mxu0 %v996_v10  ;;  %v1000_v14 = vld [vmem:[%s1143_s11 + $0x88] sm:$0xff]   ;;  %v1003_v17 = vld [vmem:[%s1143_s11 + $0x90] sm:$0xff]  }
  0x2c   : > { %932 = vmatprep.subr.bf16.mxu1 %v997_v11  ;;  %896 = vmatprep.subr.bf16.mxu0 %v998_v12  ;;  %v1004_v18 = vld [vmem:[%s1143_s11 + $0x58] sm:$0xff]   ;;  %v1007_v21 = vld [vmem:[%s1143_s11 + $0x60] sm:$0xff]   ;;  %v1010_v24 = vld [vmem:[%s1143_s11 + $0x68] sm:$0xff]  }
  0x2d   : > { %933 = vmatpush3.bf16.msra.mxu1 %v997_v11  ;;  %v1005_v19 = vld [vmem:[%s1143_s11 + $0x18] sm:$0xff]   ;;  %v1009_v22 = vld [vmem:[%s1143_s11 + $0xa0] sm:$0xff]   ;;  %v1012_v25 = vld [vmem:[%s1143_s11 + $0xa8] sm:$0xff]  }
  0x2e   : > { %934 = vmatprep.subr.bf16.mxu1 %v1000_v14  ;;  %v1006_v20 = vld [vmem:[%s1143_s11 + $0x98] sm:$0xff]   ;;  %v1008_v23 = vld [vmem:[%s1143_s11 + $0x20] sm:$0xff]   ;;  %v1011_v26 = vld [vmem:[%s1143_s11 + $0x28] sm:$0xff]  }
  0x2f   : > { %897 = vmatpush3.bf16.msra.mxu0 %v999_v13  ;;  %v1013_v27 = vld [vmem:[%s1143_s11 + $0x70] sm:$0xff]   ;;  %v1016_v30 = vld [vmem:[%s1143_s11 + $0x78] sm:$0xff]   ;;  %v314_v45 = vld [vmem:[#allocation2] sm:$0xff] }
  0x30   : > { %898 = vmatprep.subr.bf16.mxu0 %v1001_v15  ;;  %v1014_v28 = vld [vmem:[%s1143_s11 + $0x30] sm:$0xff]   ;;  %v1018_v31 = vld [vmem:[%s1143_s11 + $0xb8] sm:$0xff]   ;;  %v315_v50 = vld [vmem:[#allocation2 + $0x8] sm:$0xff] }
  0x31   : > { %935 = vmatpush3.bf16.msra.mxu1 %v1000_v14  ;;  %v1015_v29 = vld [vmem:[%s1143_s11 + $0xb0] sm:$0xff]   ;;  %v1017_v34 = vld [vmem:[%s1143_s11 + $0x38] sm:$0xff]   ;;  %v860_v5 = vld [vmem:[%s1211_s2] ss:$0 sm:$0xff] (!%p859_p11) }
  0x32   : > { %936 = vmatprep.subr.bf16.mxu1 %v1003_v17  ;;  %v1021_v32 = vld [vmem:[%s1145_s12 + $0x4] ss:$12 sps:$4 sm:$0xff]   ;;  %v1022_v33 = vld [vmem:[%s1145_s12 + $0x8] ss:$12 sps:$4 sm:$0xff]   ;;  %v1019_v35 = vld [vmem:[%s1145_s12] ss:$12 sps:$4 sm:$0xff]  }
  0x33   : > { %899 = vmatpush3.bf16.msra.mxu0 %v1002_v16  ;;  %582 = vmatprep.mubr.bf16.mxu0 %v1021_v32  ;;  %v1024_v36 = vld [vmem:[%s1145_s12 + $0x1c] ss:$12 sps:$4 sm:$0xff]   ;;  %v1023_v37 = vld [vmem:[%s1145_s12 + $0x20] ss:$12 sps:$4 sm:$0xff]   ;;  %v1026_v38 = vld [vmem:[%s1145_s12 + $0x18] ss:$12 sps:$4 sm:$0xff]  }
  0x34   : > { %900 = vmatprep.subr.bf16.mxu0 %v1004_v18  ;;  %948 = vmatprep.mubr.bf16.mxu1 %v1022_v33  ;;  %v316_v59 = vld [vmem:[#allocation2 + $0x10] sm:$0xff]  ;;  %v317_v63 = vld [vmem:[#allocation2 + $0x18] sm:$0xff]  ;;  %v875_v8 = vld [vmem:[%s1212_s3] sm:$0xff] (!%p859_p11)  }
  0x35   : > { %937 = vmatpush3.bf16.msra.mxu1 %v1003_v17  ;;  %v876_v11 = vunpack.c.l.bf16 (!%p859_p11), %v875_v8  ;;  %v877_v12 = vunpack.c.h.bf16 (!%p859_p11), %v875_v8  ;;  %v892_v15 = vld [vmem:[%s1212_s3 + $0x8] sm:$0xff] (!%p859_p11)  }
  0x36   : > { %938 = vmatprep.subr.bf16.mxu1 %v1006_v20  ;;  %v880_v16 = vunpack.c.l.bf16 (!%p859_p11), %v892_v15  ;;  %v881_v17 = vunpack.c.h.bf16 (!%p859_p11), %v892_v15 }
  0x37   : > { %901 = vmatpush3.bf16.msra.mxu0 %v1005_v19 }
  0x38   : > { %902 = vmatprep.subr.bf16.mxu0 %v1007_v21 }
  0x39   : > { %939 = vmatpush3.bf16.msra.mxu1 %v1006_v20 }
  0x3a   : > { %940 = vmatprep.subr.bf16.mxu1 %v1009_v22 }
  0x3b   : > { %903 = vmatpush3.bf16.msra.mxu0 %v1008_v23 }
  0x3c   : > { %904 = vmatprep.subr.bf16.mxu0 %v1010_v24 }
  0x3d   : > { %941 = vmatpush3.bf16.msra.mxu1 %v1009_v22 }
  0x3e   : > { %942 = vmatprep.subr.bf16.mxu1 %v1012_v25 }
  0x3f   : > { %905 = vmatpush3.bf16.msra.mxu0 %v1011_v26 }
  0x40   : > { %906 = vmatprep.subr.bf16.mxu0 %v1013_v27 }
  0x41   : > { %943 = vmatpush3.bf16.msra.mxu1 %v1012_v25 }
  0x42   : > { %944 = vmatprep.subr.bf16.mxu1 %v1015_v29 }
  0x43   : > { %907 = vmatpush3.bf16.msra.mxu0 %v1014_v28 }
  0x44   : > { %908 = vmatprep.subr.bf16.mxu0 %v1016_v30 }
  0x45   : > { %945 = vmatpush3.bf16.msra.mxu1 %v1015_v29 }
  0x46   : > { %946 = vmatprep.subr.bf16.mxu1 %v1018_v31 }
  0x47   : > { %909 = vmatpush3.bf16.msra.mxu0 %v1017_v34 }
  0x49   : > { %947 = vmatpush3.bf16.msra.mxu1 %v1018_v31 }
  0x4a   : > { %583 = vmatmul.mubr.bf16.vlgmr.msra.gmra.mrb[0].mxu0 %v1019_v35 }
  0x4b   : > { %590 = vmatprep.mubr.bf16.mxu0 %v1024_v36 }
  0x4c   : > { %949 = vmatmul.mubr.bf16.vlgmr.msra.gmra.mrb[0].mxu1 %v1023_v37 }
  0x52   : > { %591 = vmatmul.mubr.bf16.gmra.mrb[4].mxu0 %v1026_v38 }
 0x11d   : > { %v910_v39 = vpop.f32.mrb[0].mxu0 }
 0x11e   : > { %v911_v40 = vpop.f32.mrb[1].mxu0 }
 0x11f   : > { %v912_v41 = vadd.f32 %v911_v40, %v910_v39  ;;  %v913_v42 = vpop.f32.mrb[2].mxu0  ;;  %v950_v43 = vpop.f32.mrb[0].mxu1 }
 0x120   : > { %v914_v44 = vpop.f32.mrb[3].mxu0  ;;  %v633_v46 = vpop.f32.mrb[1].mxu1 }
 0x121   : > { %v915_v47 = vadd.f32 %v914_v44, %v913_v42  ;;  %v634_v48 = vadd.f32 %v912_v41, %v633_v46  ;;  %v951_v49 = vpop.f32.mrb[2].mxu1 }
 0x122   : > { %v636_v51 = vpop.f32.mrb[3].mxu1 }
 0x123   : > { %v648_v52 = vadd.f32 %v634_v48, %v314_v45  ;;  %v637_v53 = vadd.f32 %v915_v47, %v636_v51 }
 0x125   : > { %652 = vst [vmem:[#allocation2] sm:$0xff] %v648_v52  ;;  %v649_v54 = vadd.f32 %v637_v53, %v315_v50  ;;  %v916_v55 = vpop.f32.mrb[4].mxu0 }
 0x126   : > { %v917_v56 = vpop.f32.mrb[5].mxu0 }
 0x127   : > { %653 = vst [vmem:[#allocation2 + $0x8] sm:$0xff] %v649_v54  ;;  %v918_v57 = vadd.f32 %v917_v56, %v916_v55  ;;  %v919_v58 = vpop.f32.mrb[6].mxu0 }
 0x128   : > { %v920_v60 = vpop.f32.mrb[7].mxu0 }
 0x129   : > { %v642_v61 = vadd.f32 %v950_v43, %v918_v57  ;;  %v921_v62 = vadd.f32 %v920_v60, %v919_v58  ;;  %659 = sbr.rel (%p859_p11) target bundleno = 320 (0x140), region = 70 }
 0x12b   : > { %v650_v0 = vadd.f32 %v642_v61, %v316_v59  ;;  %v645_v1 = vadd.f32 %v951_v49, %v921_v62 }
 0x12c   : > { %v660_v3 = vld [vmem:[#allocation2] sm:$0xff] (!%p859_p11) }
 0x12d   : > { %654 = vst [vmem:[#allocation2 + $0x10] sm:$0xff] %v650_v0  ;;  %v651_v2 = vadd.f32 %v645_v1, %v317_v63  ;;  %v671_v6 = vadd.f32 (!%p859_p11), %v860_v5, %v660_v3 }
 0x12e   : > { %v661_v4 = vld [vmem:[#allocation2 + $0x8] sm:$0xff] (!%p859_p11) }
 0x12f   : > { %655 = vst [vmem:[#allocation2 + $0x18] sm:$0xff] %v651_v2  ;;  %v672_v7 = vadd.f32 (!%p859_p11), %v860_v5, %v661_v4  ;;  %v683_v18 = vadd.f32 (!%p859_p11), %v876_v11, %v671_v6 }
 0x131   : > { %v684_v19 = vadd.f32 %v877_v12, %v672_v7  ;;  %v687_v22 = vmax.f32 %v683_v18, 0.0 }
 0x133   : > { %v688_v23 = vmax.f32 %v684_v19, 0.0 }
 0x134   : > { %v662_v9 = vld [vmem:[#allocation2 + $0x10] sm:$0xff] }
 0x135   : > { %v673_v13 = vadd.f32 %v860_v5, %v662_v9  ;;  %v885_v26 = vpack.c.bf16 %v688_v23, %v687_v22 }
 0x136   : > { %v663_v10 = vld [vmem:[#allocation2 + $0x18] sm:$0xff] }
 0x137   : > { %v674_v14 = vadd.f32 %v860_v5, %v663_v10  ;;  %v685_v20 = vadd.f32 %v880_v16, %v673_v13  ;;  %886 = vst [vmem:[%s1213_s4] sm:$0xff] %v885_v26  }
 0x139   : > { %v686_v21 = vadd.f32 %v881_v17, %v674_v14  ;;  %v689_v24 = vmax.f32 %v685_v20, 0.0 }
 0x13b   : > { %v690_v25 = vmax.f32 %v686_v21, 0.0 }
 0x13d   : > { %v890_v27 = vpack.c.bf16 %v690_v25, %v689_v24 }
 0x13f   : > { %893 = vst [vmem:[%s1213_s4 + $0x8] sm:$0xff] %v890_v27  }
 0x140 PF: > { %s14_s19 = sadd.s32 1, %s1065_s19   ;;  %s1214_s15 = smov %s1053_s16 }
 0x141   : > { %p11_p12 = scmp.ge.s32.totalorder %s14_s19, 5   ;;  %s1215_s16 = smov %s1128_s23 }
 0x142   : > { %s1216_s17 = smov %s1061_s18  ;;  %s1217_s18 = smov %s1219_s20 }
 0x143   :  { %13 = sbr.rel (!%p11_p12) target bundleno = 3 (0x3), region = 117 }

// kernel: _lambda_.21
= control target key start
LH: loop header
LB: loop body
LE: loop exit
PB: predicated region body
PF: predicated region fallthrough
CT: control target
= control target key end

     0   :  { %v240_v1 = vmov 0   ;;  %v172_v18 = vlaneseq  ;;  %s318_s1 = inlined_call_operand.vmem [shape: bf16[128,256], index: 1, kind: input, shape index: {}]   ;;  %s319_s0 = inlined_call_operand.vmem [shape: bf16[8,128], index: 0, kind: input, shape index: {}]   ;;  %s320_s2 = inlined_call_operand.vmem [shape: f32[1,256], index: 2, kind: input, shape index: {}]   ;;  %s321_s3 = inlined_call_operand.vmem [shape: bf16[8,256], index: 3, kind: output, shape index: {}]  }
   0x1   :  { %v216_v0 = vld [vmem:[%s318_s1 + $0x4] ss:$8 sps:$4 sm:$0xff]   ;;  %152 = vmatprep.mubr.bf16.mxu0 %v240_v1  ;;  %v218_v2 = vld [vmem:[%s318_s1] ss:$8 sps:$4 sm:$0xff]   ;;  %v219_v3 = vld [vmem:[%s318_s1 + $0x14] ss:$8 sps:$4 sm:$0xff]  }
   0x2   :  { %120 = vmatprep.subr.bf16.mxu0 %v216_v0  ;;  %v221_v4 = vld [vmem:[%s318_s1 + $0x10] ss:$8 sps:$4 sm:$0xff]   ;;  %v222_v5 = vld [vmem:[%s318_s1 + $0x24] ss:$8 sps:$4 sm:$0xff]   ;;  %v224_v6 = vld [vmem:[%s318_s1 + $0x20] ss:$8 sps:$4 sm:$0xff]  }
   0x3   :  { %121 = vmatpush1.bf16.msra.mxu0 %v218_v2  ;;  %v225_v7 = vld [vmem:[%s318_s1 + $0x34] ss:$8 sps:$4 sm:$0xff]   ;;  %v227_v8 = vld [vmem:[%s318_s1 + $0x30] ss:$8 sps:$4 sm:$0xff]   ;;  %v228_v9 = vld [vmem:[%s318_s1 + $0x44] ss:$8 sps:$4 sm:$0xff]  }
   0x4   :  { %122 = vmatprep.subr.bf16.mxu0 %v219_v3  ;;  %v230_v10 = vld [vmem:[%s318_s1 + $0x40] ss:$8 sps:$4 sm:$0xff]   ;;  %v231_v11 = vld [vmem:[%s318_s1 + $0x54] ss:$8 sps:$4 sm:$0xff]   ;;  %v233_v12 = vld [vmem:[%s318_s1 + $0x50] ss:$8 sps:$4 sm:$0xff]  }
   0x5   :  { %v234_v13 = vld [vmem:[%s318_s1 + $0x64] ss:$8 sps:$4 sm:$0xff]   ;;  %v236_v14 = vld [vmem:[%s318_s1 + $0x60] ss:$8 sps:$4 sm:$0xff]   ;;  %v237_v15 = vld [vmem:[%s318_s1 + $0x74] ss:$8 sps:$4 sm:$0xff]  }
   0x6   :  { %v239_v16 = vld [vmem:[%s318_s1 + $0x70] ss:$8 sps:$4 sm:$0xff]   ;;  %v23_v17 = vld [vmem:[%s319_s0] sm:$0xf]  ;;  %v173_v19 = vshrl.u32 %v172_v18, 7 }
   0x7   :  { %123 = vmatpush1.bf16.msra.mxu0 %v221_v4  ;;  %v170_v21 = vld [vmem:[%s320_s2] sm:$0x3] }
   0x8   :  { %124 = vmatprep.subr.bf16.mxu0 %v222_v5  ;;  %v174_v20 = vsub.s32 0, %v173_v19  ;;  %v178_v22 = vsub.s32 1, %v173_v19 }
   0xa   :  { %v175_v23 = vrot.slane %v170_v21, %v174_v20  ;;  %v179_v24 = vrot.slane %v170_v21, %v178_v22 }
   0xb   :  { %125 = vmatpush1.bf16.msra.mxu0 %v224_v6 }
   0xc   :  { %126 = vmatprep.subr.bf16.mxu0 %v225_v7 }
   0xf   :  { %127 = vmatpush1.bf16.msra.mxu0 %v227_v8 }
  0x10   :  { %128 = vmatprep.subr.bf16.mxu0 %v228_v9 }
  0x13   :  { %129 = vmatpush1.bf16.msra.mxu0 %v230_v10 }
  0x14   :  { %130 = vmatprep.subr.bf16.mxu0 %v231_v11 }
  0x17   :  { %131 = vmatpush1.bf16.msra.mxu0 %v233_v12 }
  0x18   :  { %132 = vmatprep.subr.bf16.mxu0 %v234_v13 }
  0x1b   :  { %133 = vmatpush1.bf16.msra.mxu0 %v236_v14 }
  0x1c   :  { %134 = vmatprep.subr.bf16.mxu0 %v237_v15 }
  0x1f   :  { %135 = vmatpush1.bf16.msra.mxu0 %v239_v16 }
  0x22   :  { %153 = vmatmul.mubr.bf16.vlgmr.msra.gmra.mrb[0].mxu0 %v23_v17 }
  0xf5   :  { %v154_v25 = vpop.f32.mrb[0].mxu0 }
  0xf6   :  { %v182_v26 = vadd.f32 %v175_v23, %v154_v25  ;;  %v156_v27 = vpop.f32.mrb[1].mxu0 }
  0xf7   :  { %v183_v28 = vadd.f32 %v179_v24, %v156_v27  ;;  %v158_v29 = vpop.f32.mrb[2].mxu0 }
  0xf8   :  { %v159_v30 = vpop.f32.mrb[3].mxu0 }
  0xf9   :  { %v214_v31 = vpack.c.bf16 %v183_v28, %v182_v26 }
  0xfb   :  { %192 = vst [vmem:[%s321_s3] sm:$0xff] %v214_v31 }

// kernel: _lambda_.22
= control target key start
LH: loop header
LB: loop body
LE: loop exit
PB: predicated region body
PF: predicated region fallthrough
CT: control target
= control target key end

     0   :  { %s943_s12 = smov 0   ;;  %s945_s13 = smov 0   ;;  %s1042_s0 = inlined_call_operand.vmem [shape: bf16[8,1152], index: 0, kind: input, shape index: {}]   ;;  %s1043_s1 = inlined_call_operand.vmem [shape: bf16[1152,256], index: 1, kind: input, shape index: {}]   ;;  %s1044_s2 = inlined_call_operand.vmem [shape: f32[1,256], index: 2, kind: input, shape index: {}]   ;;  %s1045_s3 = inlined_call_operand.vmem [shape: bf16[8,256], index: 3, kind: output, shape index: {}]  }
   0x1   :  { %s947_s14 = smov 0  }
   0x2 LB: > { %s22_s15 = sadd.s32 1, %s915_s13  ;;  %p733_p0 = scmp.ge.s32.totalorder %s919_s14, 1  ;;  %s919_s14 = sphi %s947_s14, %s13_s14   ;;  %s915_s13 = sphi %s945_s13, %s1047_s13   ;;  %s911_s12 = sphi %s943_s12, %s1046_s12  }
   0x3   : > { %p23_p1 = scmp.ge.s32.totalorder %s22_s15, 3  ;;  %p168_p2 = scmp.lt.s32.totalorder %s919_s14, 4 }
   0x5   : > { %s1049_s15 = smov (%p23_p1, %s22_s15), 0  ;;  %p169_p3 = pnand %p733_p0, %p168_p2 }
   0x6   : > { %s202_s16 = smul.u32 (!%p169_p3), 3, %s911_s12  ;;  %p737_p6 = scmp.ne.s32.totalorder (!%p169_p3), %s911_s12, 0 }
   0x7   : > { %172 = sbr.rel (%p169_p3) target bundleno = 321 (0x141), region = 32 }
   0x8   : > { %s212_s17 = smul.u32 (!%p169_p3), 48, %s911_s12  ;;  %p205_p4 = scmp.lt.s32.totalorder (!%p169_p3), %s202_s16, 8 }
   0xa   : > { %p213_p5 = scmp.lt.s32.totalorder (!%p169_p3), %s212_s17, 143 }
   0xe   : > { %s1051_s16 = smov (!%p205_p4, %s202_s16), 8  ;;  %s1053_s17 = smov (!%p213_p5, %s212_s17), 143 }
   0xf   : > { %s734_s18 = sshll.u32 %s1051_s16, 2  ;;  %s794_s22 = sshll.u32 %s1053_s17, 3  ;;  %v921_v0 = vmov (!%p737_p6), 0.0  }
  0x10   : > { %s968_s21 = scalar_lea.vmem %s1042_s0, %s734_s18  ;;  %s973_s25 = scalar_lea.vmem %s1043_s1, %s794_s22  ;;  %229 = vst [vmem:[#allocation2] sm:$0xff] (!%p737_p6), %v921_v0  ;;  %230 = vst [vmem:[#allocation2 + $0x8] sm:$0xff] (!%p737_p6), %v921_v0 }
  0x11   : > { %228 = sbr.rel (%p737_p6) target bundleno = 24 (0x18), region = 36 }
  0x18 PF: > { %v822_v1 = vld [vmem:[%s973_s25 + $0x4] ss:$8 sps:$4 sm:$0xff]   ;;  %v824_v2 = vld [vmem:[%s973_s25] ss:$8 sps:$4 sm:$0xff]   ;;  %v922_v3 = vmov 0   ;;  %p789_p7 = scmp.ne.s32.totalorder %s911_s12, 2 }
  0x19   : > { %607 = vmatprep.mubr.bf16.mxu1 %v922_v3  ;;  %534 = vmatprep.subr.bf16.mxu0 %v822_v1  ;;  %v825_v4 = vld [vmem:[%s973_s25 + $0x14] ss:$8 sps:$4 sm:$0xff]   ;;  %v827_v5 = vld [vmem:[%s973_s25 + $0x10] ss:$8 sps:$4 sm:$0xff]   ;;  %v828_v6 = vld [vmem:[%s973_s25 + $0x24] ss:$8 sps:$4 sm:$0xff]  }
  0x1a   : > { %535 = vmatpush1.bf16.msra.mxu0 %v824_v2  ;;  %v830_v7 = vld [vmem:[%s973_s25 + $0x20] ss:$8 sps:$4 sm:$0xff]   ;;  %v831_v8 = vld [vmem:[%s973_s25 + $0x34] ss:$8 sps:$4 sm:$0xff]   ;;  %v833_v9 = vld [vmem:[%s973_s25 + $0x30] ss:$8 sps:$4 sm:$0xff]  }
  0x1b   : > { %536 = vmatprep.subr.bf16.mxu0 %v825_v4  ;;  %v846_v10 = vld [vmem:[%s973_s25 + $0x104] ss:$8 sps:$4 sm:$0xff]   ;;  %v848_v11 = vld [vmem:[%s973_s25 + $0x100] ss:$8 sps:$4 sm:$0xff]   ;;  %v852_v13 = vld [vmem:[%s973_s25 + $0x114] ss:$8 sps:$4 sm:$0xff]   ;;  %v628_v4 = vlaneseq (!%p789_p7) }
  0x1c   : > { %v834_v12 = vld [vmem:[%s973_s25 + $0x44] ss:$8 sps:$4 sm:$0xff]   ;;  %575 = vmatprep.subr.bf16.mxu1 %v846_v10  ;;  %v854_v14 = vld [vmem:[%s973_s25 + $0x110] ss:$8 sps:$4 sm:$0xff]   ;;  %v836_v15 = vld [vmem:[%s973_s25 + $0x40] ss:$8 sps:$4 sm:$0xff]  }
  0x1d   : > { %576 = vmatpush1.bf16.msra.mxu1 %v848_v11  ;;  %v837_v16 = vld [vmem:[%s973_s25 + $0x54] ss:$8 sps:$4 sm:$0xff]   ;;  %v858_v17 = vld [vmem:[%s973_s25 + $0x124] ss:$8 sps:$4 sm:$0xff]   ;;  %v860_v18 = vld [vmem:[%s973_s25 + $0x120] ss:$8 sps:$4 sm:$0xff]  }
  0x1e   : > { %537 = vmatpush1.bf16.msra.mxu0 %v827_v5  ;;  %577 = vmatprep.subr.bf16.mxu1 %v852_v13  ;;  %v839_v19 = vld [vmem:[%s973_s25 + $0x50] ss:$8 sps:$4 sm:$0xff]   ;;  %v864_v20 = vld [vmem:[%s973_s25 + $0x134] ss:$8 sps:$4 sm:$0xff]   ;;  %v840_v21 = vld [vmem:[%s973_s25 + $0x64] ss:$8 sps:$4 sm:$0xff]  }
  0x1f   : > { %538 = vmatprep.subr.bf16.mxu0 %v828_v6  ;;  %v866_v22 = vld [vmem:[%s973_s25 + $0x130] ss:$8 sps:$4 sm:$0xff]   ;;  %v842_v23 = vld [vmem:[%s973_s25 + $0x60] ss:$8 sps:$4 sm:$0xff]   ;;  %v870_v24 = vld [vmem:[%s973_s25 + $0x144] ss:$8 sps:$4 sm:$0xff]  }
  0x20   : > { %v843_v25 = vld [vmem:[%s973_s25 + $0x74] ss:$8 sps:$4 sm:$0xff]   ;;  %v872_v26 = vld [vmem:[%s973_s25 + $0x140] ss:$8 sps:$4 sm:$0xff]   ;;  %v845_v27 = vld [vmem:[%s973_s25 + $0x70] ss:$8 sps:$4 sm:$0xff]  }
  0x21   : > { %578 = vmatpush1.bf16.msra.mxu1 %v854_v14  ;;  %v876_v28 = vld [vmem:[%s973_s25 + $0x154] ss:$8 sps:$4 sm:$0xff]   ;;  %v849_v29 = vld [vmem:[%s973_s25 + $0x84] ss:$8 sps:$4 sm:$0xff]   ;;  %v878_v30 = vld [vmem:[%s973_s25 + $0x150] ss:$8 sps:$4 sm:$0xff]  }
  0x22   : > { %539 = vmatpush1.bf16.msra.mxu0 %v830_v7  ;;  %579 = vmatprep.subr.bf16.mxu1 %v858_v17  ;;  %v851_v31 = vld [vmem:[%s973_s25 + $0x80] ss:$8 sps:$4 sm:$0xff]   ;;  %v882_v32 = vld [vmem:[%s973_s25 + $0x164] ss:$8 sps:$4 sm:$0xff]   ;;  %v855_v33 = vld [vmem:[%s973_s25 + $0x94] ss:$8 sps:$4 sm:$0xff]  }
  0x23   : > { %540 = vmatprep.subr.bf16.mxu0 %v831_v8  ;;  %v233_v34 = vld [vmem:[%s968_s21] sm:$0xff]  ;;  %v857_v37 = vld [vmem:[%s973_s25 + $0x90] ss:$8 sps:$4 sm:$0xff]   ;;  %v888_v38 = vld [vmem:[%s973_s25 + $0x174] ss:$8 sps:$4 sm:$0xff]   ;;  %v629_v5 = vshrl.u32 (!%p789_p7), %v628_v4, 7 }
  0x24   : > { %v739_v35 = vcombine.high %v233_v34, %v233_v34  ;;  %v884_v36 = vld [vmem:[%s973_s25 + $0x160] ss:$8 sps:$4 sm:$0xff]   ;;  %v861_v39 = vld [vmem:[%s973_s25 + $0xa4] ss:$8 sps:$4 sm:$0xff]   ;;  %v890_v40 = vld [vmem:[%s973_s25 + $0x170] ss:$8 sps:$4 sm:$0xff]   ;;  %v738_v53 = vcombine.low %v233_v34, %v233_v34 }
  0x25   : > { %580 = vmatpush1.bf16.msra.mxu1 %v860_v18  ;;  %v863_v41 = vld [vmem:[%s973_s25 + $0xa0] ss:$8 sps:$4 sm:$0xff]   ;;  %v867_v42 = vld [vmem:[%s973_s25 + $0xb4] ss:$8 sps:$4 sm:$0xff]   ;;  %v869_v44 = vld [vmem:[%s973_s25 + $0xb0] ss:$8 sps:$4 sm:$0xff]  }
  0x26   : > { %541 = vmatpush1.bf16.msra.mxu0 %v833_v9  ;;  %581 = vmatprep.subr.bf16.mxu1 %v864_v20  ;;  %v894_v43 = vld [vmem:[%s968_s21 + $0x8] ss:$0 sps:$4 sm:$0xff]   ;;  %v873_v45 = vld [vmem:[%s973_s25 + $0xc4] ss:$8 sps:$4 sm:$0xff]   ;;  %v879_v47 = vld [vmem:[%s973_s25 + $0xd4] ss:$8 sps:$4 sm:$0xff]  }
  0x27   : > { %542 = vmatprep.subr.bf16.mxu0 %v834_v12  ;;  %566 = vmatprep.mubr.bf16.mxu0 %v739_v35  ;;  %v875_v46 = vld [vmem:[%s973_s25 + $0xc0] ss:$8 sps:$4 sm:$0xff]   ;;  %v881_v48 = vld [vmem:[%s973_s25 + $0xd0] ss:$8 sps:$4 sm:$0xff]   ;;  %v885_v49 = vld [vmem:[%s973_s25 + $0xe4] ss:$8 sps:$4 sm:$0xff]  }
  0x28   : > { %v887_v50 = vld [vmem:[%s973_s25 + $0xe0] ss:$8 sps:$4 sm:$0xff]   ;;  %v891_v51 = vld [vmem:[%s973_s25 + $0xf4] ss:$8 sps:$4 sm:$0xff]   ;;  %v893_v52 = vld [vmem:[%s973_s25 + $0xf0] ss:$8 sps:$4 sm:$0xff]  }
  0x29   : > { %582 = vmatpush1.bf16.msra.mxu1 %v866_v22  ;;  %v231_v58 = vld [vmem:[#allocation2] sm:$0xff]  ;;  %v232_v61 = vld [vmem:[#allocation2 + $0x8] sm:$0xff]  ;;  %v630_v7 = vsub.s32 (!%p789_p7), 0, %v629_v5  ;;  %v634_v8 = vsub.s32 (!%p789_p7), 1, %v629_v5 }
  0x2a   : > { %543 = vmatpush1.bf16.msra.mxu0 %v836_v15  ;;  %583 = vmatprep.subr.bf16.mxu1 %v870_v24  ;;  %v626_v6 = vld [vmem:[%s1044_s2] sm:$0x3] (!%p789_p7) }
  0x2b   : > { %544 = vmatprep.subr.bf16.mxu0 %v837_v16  ;;  %v631_v11 = vrot.slane (!%p789_p7), %v626_v6, %v630_v7  ;;  %v635_v12 = vrot.slane (!%p789_p7), %v626_v6, %v634_v8 }
  0x2d   : > { %584 = vmatpush1.bf16.msra.mxu1 %v872_v26 }
  0x2e   : > { %545 = vmatpush1.bf16.msra.mxu0 %v839_v19  ;;  %585 = vmatprep.subr.bf16.mxu1 %v876_v28 }
  0x2f   : > { %546 = vmatprep.subr.bf16.mxu0 %v840_v21 }
  0x31   : > { %586 = vmatpush1.bf16.msra.mxu1 %v878_v30 }
  0x32   : > { %547 = vmatpush1.bf16.msra.mxu0 %v842_v23  ;;  %587 = vmatprep.subr.bf16.mxu1 %v882_v32 }
  0x33   : > { %548 = vmatprep.subr.bf16.mxu0 %v843_v25 }
  0x35   : > { %588 = vmatpush1.bf16.msra.mxu1 %v884_v36 }
  0x36   : > { %549 = vmatpush1.bf16.msra.mxu0 %v845_v27  ;;  %589 = vmatprep.subr.bf16.mxu1 %v888_v38 }
  0x37   : > { %550 = vmatprep.subr.bf16.mxu0 %v849_v29 }
  0x39   : > { %590 = vmatpush1.bf16.msra.mxu1 %v890_v40 }
  0x3a   : > { %551 = vmatpush1.bf16.msra.mxu0 %v851_v31 }
  0x3b   : > { %552 = vmatprep.subr.bf16.mxu0 %v855_v33 }
  0x3c   : > { %608 = vmatmul.mubr.bf16.vlgmr.msra.gmra.mrb[0].mxu1 %v894_v43 }
  0x3e   : > { %553 = vmatpush1.bf16.msra.mxu0 %v857_v37 }
  0x3f   : > { %554 = vmatprep.subr.bf16.mxu0 %v861_v39 }
  0x42   : > { %555 = vmatpush1.bf16.msra.mxu0 %v863_v41 }
  0x43   : > { %556 = vmatprep.subr.bf16.mxu0 %v867_v42 }
  0x46   : > { %557 = vmatpush1.bf16.msra.mxu0 %v869_v44 }
  0x47   : > { %558 = vmatprep.subr.bf16.mxu0 %v873_v45 }
  0x4a   : > { %559 = vmatpush1.bf16.msra.mxu0 %v875_v46 }
  0x4b   : > { %560 = vmatprep.subr.bf16.mxu0 %v879_v47 }
  0x4e   : > { %561 = vmatpush1.bf16.msra.mxu0 %v881_v48 }
  0x4f   : > { %562 = vmatprep.subr.bf16.mxu0 %v885_v49 }
  0x52   : > { %563 = vmatpush1.bf16.msra.mxu0 %v887_v50 }
  0x53   : > { %564 = vmatprep.subr.bf16.mxu0 %v891_v51 }
  0x56   : > { %565 = vmatpush1.bf16.msra.mxu0 %v893_v52 }
  0x59   : > { %567 = vmatmul.mubr.bf16.vlgmr.msra.gmra.mrb[0].mxu0 %v738_v53 }
 0x10f   : > { %v609_v54 = vpop.f32.mrb[0].mxu1 }
 0x110   : > { %v611_v55 = vpop.f32.mrb[1].mxu1 }
 0x111   : > { %v613_v56 = vpop.f32.mrb[2].mxu1 }
 0x112   : > { %v614_v57 = vpop.f32.mrb[3].mxu1 }
 0x12c   : > { %v568_v59 = vpop.f32.mrb[0].mxu0  ;;  %623 = sbr.rel (%p789_p7) target bundleno = 321 (0x141), region = 40 }
 0x12d   : > { %v610_v60 = vadd.f32 %v609_v54, %v568_v59  ;;  %v570_v62 = vpop.f32.mrb[1].mxu0 }
 0x12e   : > { %v612_v63 = vadd.f32 %v611_v55, %v570_v62  ;;  %v572_v0 = vpop.f32.mrb[2].mxu0 }
 0x12f   : > { %v616_v1 = vadd.f32 %v610_v60, %v231_v58  ;;  %v573_v2 = vpop.f32.mrb[3].mxu0 }
 0x130   : > { %v617_v3 = vadd.f32 %v612_v63, %v232_v61 }
 0x131   : > { %618 = vst [vmem:[#allocation2] sm:$0xff] %v616_v1 }
 0x132   : > { %619 = vst [vmem:[#allocation2 + $0x8] sm:$0xff] %v617_v3 }
 0x138   : > { %v624_v9 = vld [vmem:[#allocation2] sm:$0xff] }
 0x139   : > { %v625_v10 = vld [vmem:[#allocation2 + $0x8] sm:$0xff]  ;;  %v638_v13 = vadd.f32 %v631_v11, %v624_v9 }
 0x13a   : > { %v639_v14 = vadd.f32 %v635_v12, %v625_v10 }
 0x13b   : > { %v640_v15 = vmax.f32 %v638_v13, 0.0 }
 0x13c   : > { %v641_v16 = vmax.f32 %v639_v14, 0.0 }
 0x13e   : > { %v795_v17 = vpack.c.bf16 %v641_v16, %v640_v15 }
 0x140   : > { %650 = vst [vmem:[%s1045_s3] sm:$0xff] %v795_v17 }
 0x141 PF: > { %s13_s14 = sadd.s32 1, %s919_s14   ;;  %s1046_s12 = smov %s915_s13 }
 0x142   : > { %p10_p8 = scmp.ge.s32.totalorder %s13_s14, 5   ;;  %s1047_s13 = smov %s1049_s15 }
 0x144   :  { %12 = sbr.rel (!%p10_p8) target bundleno = 2 (0x2), region = 73 }

// kernel: _lambda_.23
= control target key start
LH: loop header
LB: loop body
LE: loop exit
PB: predicated region body
PF: predicated region fallthrough
CT: control target
= control target key end

     0   :  { %s1016_s15 = smov 0   ;;  %s1018_s16 = smov 0   ;;  %s1118_s0 = inlined_call_operand.vmem [shape: bf16[8,2304], index: 0, kind: input, shape index: {}]   ;;  %s1119_s1 = inlined_call_operand.vmem [shape: bf16[2304,256], index: 1, kind: input, shape index: {}]   ;;  %s1120_s2 = inlined_call_operand.vmem [shape: f32[1,256], index: 2, kind: input, shape index: {}]   ;;  %s1121_s3 = inlined_call_operand.vmem [shape: bf16[8,256], index: 3, kind: input, shape index: {}]   ;;  %s1122_s4 = inlined_call_operand.vmem [shape: bf16[8,256], index: 4, kind: output, shape index: {}]  }
   0x1   :  { %s1020_s17 = smov 0  }
   0x2 LB: > { %s23_s18 = sadd.s32 1, %s983_s16  ;;  %p801_p0 = scmp.ge.s32.totalorder %s987_s17, 1  ;;  %s987_s17 = sphi %s1020_s17, %s14_s17   ;;  %s983_s16 = sphi %s1018_s16, %s1124_s16   ;;  %s979_s15 = sphi %s1016_s15, %s1123_s15  }
   0x3   : > { %p24_p1 = scmp.ge.s32.totalorder %s23_s18, 6  ;;  %p203_p2 = scmp.lt.s32.totalorder %s987_s17, 7 }
   0x5   : > { %s1126_s18 = smov (%p24_p1, %s23_s18), 0  ;;  %p204_p3 = pnand %p801_p0, %p203_p2 }
   0x6   : > { %s244_s19 = smul.u32 (!%p204_p3), 3, %s979_s15  ;;  %p805_p6 = scmp.ne.s32.totalorder (!%p204_p3), %s979_s15, 0 }
   0x7   : > { %207 = sbr.rel (%p204_p3) target bundleno = 323 (0x143), region = 36 }
   0x8   : > { %s254_s20 = smul.u32 (!%p204_p3), 48, %s979_s15  ;;  %p247_p4 = scmp.lt.s32.totalorder (!%p204_p3), %s244_s19, 17 }
   0xa   : > { %p255_p5 = scmp.lt.s32.totalorder (!%p204_p3), %s254_s20, 287 }
   0xe   : > { %s1128_s19 = smov (!%p247_p4, %s244_s19), 17  ;;  %s1130_s20 = smov (!%p255_p5, %s254_s20), 287 }
   0xf   : > { %s802_s21 = sshll.u32 %s1128_s19, 2  ;;  %s862_s25 = sshll.u32 %s1130_s20, 3  ;;  %v989_v0 = vmov (!%p805_p6), 0.0  }
  0x10   : > { %s1041_s24 = scalar_lea.vmem %s1118_s0, %s802_s21  ;;  %s1046_s28 = scalar_lea.vmem %s1119_s1, %s862_s25  ;;  %276 = vst [vmem:[#allocation2] sm:$0xff] (!%p805_p6), %v989_v0  ;;  %277 = vst [vmem:[#allocation2 + $0x8] sm:$0xff] (!%p805_p6), %v989_v0 }
  0x11   : > { %275 = sbr.rel (%p805_p6) target bundleno = 24 (0x18), region = 40 }
  0x18 PF: > { %v890_v1 = vld [vmem:[%s1046_s28 + $0x4] ss:$8 sps:$4 sm:$0xff]   ;;  %v892_v2 = vld [vmem:[%s1046_s28] ss:$8 sps:$4 sm:$0xff]   ;;  %v990_v3 = vmov 0   ;;  %p857_p7 = scmp.ne.s32.totalorder %s979_s15, 5 }
  0x19   : > { %654 = vmatprep.mubr.bf16.mxu1 %v990_v3  ;;  %581 = vmatprep.subr.bf16.mxu0 %v890_v1  ;;  %v893_v4 = vld [vmem:[%s1046_s28 + $0x14] ss:$8 sps:$4 sm:$0xff]   ;;  %v895_v5 = vld [vmem:[%s1046_s28 + $0x10] ss:$8 sps:$4 sm:$0xff]   ;;  %v896_v6 = vld [vmem:[%s1046_s28 + $0x24] ss:$8 sps:$4 sm:$0xff]  }
  0x1a   : > { %582 = vmatpush1.bf16.msra.mxu0 %v892_v2  ;;  %v898_v7 = vld [vmem:[%s1046_s28 + $0x20] ss:$8 sps:$4 sm:$0xff]   ;;  %v899_v8 = vld [vmem:[%s1046_s28 + $0x34] ss:$8 sps:$4 sm:$0xff]   ;;  %v901_v9 = vld [vmem:[%s1046_s28 + $0x30] ss:$8 sps:$4 sm:$0xff]  }
  0x1b   : > { %583 = vmatprep.subr.bf16.mxu0 %v893_v4  ;;  %v914_v10 = vld [vmem:[%s1046_s28 + $0x104] ss:$8 sps:$4 sm:$0xff]   ;;  %v916_v11 = vld [vmem:[%s1046_s28 + $0x100] ss:$8 sps:$4 sm:$0xff]   ;;  %v920_v13 = vld [vmem:[%s1046_s28 + $0x114] ss:$8 sps:$4 sm:$0xff]   ;;  %v675_v4 = vlaneseq (!%p857_p7) }
  0x1c   : > { %v902_v12 = vld [vmem:[%s1046_s28 + $0x44] ss:$8 sps:$4 sm:$0xff]   ;;  %622 = vmatprep.subr.bf16.mxu1 %v914_v10  ;;  %v922_v14 = vld [vmem:[%s1046_s28 + $0x110] ss:$8 sps:$4 sm:$0xff]   ;;  %v904_v15 = vld [vmem:[%s1046_s28 + $0x40] ss:$8 sps:$4 sm:$0xff]  }
  0x1d   : > { %623 = vmatpush1.bf16.msra.mxu1 %v916_v11  ;;  %v905_v16 = vld [vmem:[%s1046_s28 + $0x54] ss:$8 sps:$4 sm:$0xff]   ;;  %v926_v17 = vld [vmem:[%s1046_s28 + $0x124] ss:$8 sps:$4 sm:$0xff]   ;;  %v928_v18 = vld [vmem:[%s1046_s28 + $0x120] ss:$8 sps:$4 sm:$0xff]  }
  0x1e   : > { %584 = vmatpush1.bf16.msra.mxu0 %v895_v5  ;;  %624 = vmatprep.subr.bf16.mxu1 %v920_v13  ;;  %v907_v19 = vld [vmem:[%s1046_s28 + $0x50] ss:$8 sps:$4 sm:$0xff]   ;;  %v932_v20 = vld [vmem:[%s1046_s28 + $0x134] ss:$8 sps:$4 sm:$0xff]   ;;  %v908_v21 = vld [vmem:[%s1046_s28 + $0x64] ss:$8 sps:$4 sm:$0xff]  }
  0x1f   : > { %585 = vmatprep.subr.bf16.mxu0 %v896_v6  ;;  %v934_v22 = vld [vmem:[%s1046_s28 + $0x130] ss:$8 sps:$4 sm:$0xff]   ;;  %v910_v23 = vld [vmem:[%s1046_s28 + $0x60] ss:$8 sps:$4 sm:$0xff]   ;;  %v938_v24 = vld [vmem:[%s1046_s28 + $0x144] ss:$8 sps:$4 sm:$0xff]  }
  0x20   : > { %v911_v25 = vld [vmem:[%s1046_s28 + $0x74] ss:$8 sps:$4 sm:$0xff]   ;;  %v940_v26 = vld [vmem:[%s1046_s28 + $0x140] ss:$8 sps:$4 sm:$0xff]   ;;  %v913_v27 = vld [vmem:[%s1046_s28 + $0x70] ss:$8 sps:$4 sm:$0xff]  }
  0x21   : > { %625 = vmatpush1.bf16.msra.mxu1 %v922_v14  ;;  %v944_v28 = vld [vmem:[%s1046_s28 + $0x154] ss:$8 sps:$4 sm:$0xff]   ;;  %v917_v29 = vld [vmem:[%s1046_s28 + $0x84] ss:$8 sps:$4 sm:$0xff]   ;;  %v946_v30 = vld [vmem:[%s1046_s28 + $0x150] ss:$8 sps:$4 sm:$0xff]  }
  0x22   : > { %586 = vmatpush1.bf16.msra.mxu0 %v898_v7  ;;  %626 = vmatprep.subr.bf16.mxu1 %v926_v17  ;;  %v919_v31 = vld [vmem:[%s1046_s28 + $0x80] ss:$8 sps:$4 sm:$0xff]   ;;  %v950_v32 = vld [vmem:[%s1046_s28 + $0x164] ss:$8 sps:$4 sm:$0xff]   ;;  %v923_v33 = vld [vmem:[%s1046_s28 + $0x94] ss:$8 sps:$4 sm:$0xff]  }
  0x23   : > { %587 = vmatprep.subr.bf16.mxu0 %v899_v8  ;;  %v280_v34 = vld [vmem:[%s1041_s24] sm:$0xff]  ;;  %v925_v37 = vld [vmem:[%s1046_s28 + $0x90] ss:$8 sps:$4 sm:$0xff]   ;;  %v956_v38 = vld [vmem:[%s1046_s28 + $0x174] ss:$8 sps:$4 sm:$0xff]   ;;  %v676_v5 = vshrl.u32 (!%p857_p7), %v675_v4, 7 }
  0x24   : > { %v807_v35 = vcombine.high %v280_v34, %v280_v34  ;;  %v952_v36 = vld [vmem:[%s1046_s28 + $0x160] ss:$8 sps:$4 sm:$0xff]   ;;  %v929_v39 = vld [vmem:[%s1046_s28 + $0xa4] ss:$8 sps:$4 sm:$0xff]   ;;  %v958_v40 = vld [vmem:[%s1046_s28 + $0x170] ss:$8 sps:$4 sm:$0xff]   ;;  %v806_v53 = vcombine.low %v280_v34, %v280_v34 }
  0x25   : > { %627 = vmatpush1.bf16.msra.mxu1 %v928_v18  ;;  %v931_v41 = vld [vmem:[%s1046_s28 + $0xa0] ss:$8 sps:$4 sm:$0xff]   ;;  %v935_v42 = vld [vmem:[%s1046_s28 + $0xb4] ss:$8 sps:$4 sm:$0xff]   ;;  %v937_v44 = vld [vmem:[%s1046_s28 + $0xb0] ss:$8 sps:$4 sm:$0xff]  }
  0x26   : > { %588 = vmatpush1.bf16.msra.mxu0 %v901_v9  ;;  %628 = vmatprep.subr.bf16.mxu1 %v932_v20  ;;  %v962_v43 = vld [vmem:[%s1041_s24 + $0x8] ss:$0 sps:$4 sm:$0xff]   ;;  %v941_v45 = vld [vmem:[%s1046_s28 + $0xc4] ss:$8 sps:$4 sm:$0xff]   ;;  %v947_v47 = vld [vmem:[%s1046_s28 + $0xd4] ss:$8 sps:$4 sm:$0xff]  }
  0x27   : > { %589 = vmatprep.subr.bf16.mxu0 %v902_v12  ;;  %613 = vmatprep.mubr.bf16.mxu0 %v807_v35  ;;  %v943_v46 = vld [vmem:[%s1046_s28 + $0xc0] ss:$8 sps:$4 sm:$0xff]   ;;  %v949_v48 = vld [vmem:[%s1046_s28 + $0xd0] ss:$8 sps:$4 sm:$0xff]   ;;  %v953_v49 = vld [vmem:[%s1046_s28 + $0xe4] ss:$8 sps:$4 sm:$0xff]  }
  0x28   : > { %v955_v50 = vld [vmem:[%s1046_s28 + $0xe0] ss:$8 sps:$4 sm:$0xff]   ;;  %v959_v51 = vld [vmem:[%s1046_s28 + $0xf4] ss:$8 sps:$4 sm:$0xff]   ;;  %v961_v52 = vld [vmem:[%s1046_s28 + $0xf0] ss:$8 sps:$4 sm:$0xff]  }
  0x29   : > { %629 = vmatpush1.bf16.msra.mxu1 %v934_v22  ;;  %v278_v58 = vld [vmem:[#allocation2] sm:$0xff]  ;;  %v279_v61 = vld [vmem:[#allocation2 + $0x8] sm:$0xff]  ;;  %v677_v8 = vsub.s32 (!%p857_p7), 0, %v676_v5  ;;  %v681_v9 = vsub.s32 (!%p857_p7), 1, %v676_v5 }
  0x2a   : > { %590 = vmatpush1.bf16.msra.mxu0 %v904_v15  ;;  %630 = vmatprep.subr.bf16.mxu1 %v938_v24  ;;  %v673_v6 = vld [vmem:[%s1120_s2] sm:$0x3] (!%p857_p7) }
  0x2b   : > { %591 = vmatprep.subr.bf16.mxu0 %v905_v16  ;;  %v687_v7 = vld [vmem:[%s1121_s3] sm:$0xff] (!%p857_p7)  ;;  %v678_v12 = vrot.slane (!%p857_p7), %v673_v6, %v677_v8  ;;  %v682_v13 = vrot.slane (!%p857_p7), %v673_v6, %v681_v9 }
  0x2c   : > { %v688_v14 = vunpack.c.l.bf16 (!%p857_p7), %v687_v7  ;;  %v689_v15 = vunpack.c.h.bf16 (!%p857_p7), %v687_v7 }
  0x2d   : > { %631 = vmatpush1.bf16.msra.mxu1 %v940_v26 }
  0x2e   : > { %592 = vmatpush1.bf16.msra.mxu0 %v907_v19  ;;  %632 = vmatprep.subr.bf16.mxu1 %v944_v28 }
  0x2f   : > { %593 = vmatprep.subr.bf16.mxu0 %v908_v21 }
  0x31   : > { %633 = vmatpush1.bf16.msra.mxu1 %v946_v30 }
  0x32   : > { %594 = vmatpush1.bf16.msra.mxu0 %v910_v23  ;;  %634 = vmatprep.subr.bf16.mxu1 %v950_v32 }
  0x33   : > { %595 = vmatprep.subr.bf16.mxu0 %v911_v25 }
  0x35   : > { %635 = vmatpush1.bf16.msra.mxu1 %v952_v36 }
  0x36   : > { %596 = vmatpush1.bf16.msra.mxu0 %v913_v27  ;;  %636 = vmatprep.subr.bf16.mxu1 %v956_v38 }
  0x37   : > { %597 = vmatprep.subr.bf16.mxu0 %v917_v29 }
  0x39   : > { %637 = vmatpush1.bf16.msra.mxu1 %v958_v40 }
  0x3a   : > { %598 = vmatpush1.bf16.msra.mxu0 %v919_v31 }
  0x3b   : > { %599 = vmatprep.subr.bf16.mxu0 %v923_v33 }
  0x3c   : > { %655 = vmatmul.mubr.bf16.vlgmr.msra.gmra.mrb[0].mxu1 %v962_v43 }
  0x3e   : > { %600 = vmatpush1.bf16.msra.mxu0 %v925_v37 }
  0x3f   : > { %601 = vmatprep.subr.bf16.mxu0 %v929_v39 }
  0x42   : > { %602 = vmatpush1.bf16.msra.mxu0 %v931_v41 }
  0x43   : > { %603 = vmatprep.subr.bf16.mxu0 %v935_v42 }
  0x46   : > { %604 = vmatpush1.bf16.msra.mxu0 %v937_v44 }
  0x47   : > { %605 = vmatprep.subr.bf16.mxu0 %v941_v45 }
  0x4a   : > { %606 = vmatpush1.bf16.msra.mxu0 %v943_v46 }
  0x4b   : > { %607 = vmatprep.subr.bf16.mxu0 %v947_v47 }
  0x4e   : > { %608 = vmatpush1.bf16.msra.mxu0 %v949_v48 }
  0x4f   : > { %609 = vmatprep.subr.bf16.mxu0 %v953_v49 }
  0x52   : > { %610 = vmatpush1.bf16.msra.mxu0 %v955_v50 }
  0x53   : > { %611 = vmatprep.subr.bf16.mxu0 %v959_v51 }
  0x56   : > { %612 = vmatpush1.bf16.msra.mxu0 %v961_v52 }
  0x59   : > { %614 = vmatmul.mubr.bf16.vlgmr.msra.gmra.mrb[0].mxu0 %v806_v53 }
 0x10f   : > { %v656_v54 = vpop.f32.mrb[0].mxu1 }
 0x110   : > { %v658_v55 = vpop.f32.mrb[1].mxu1 }
 0x111   : > { %v660_v56 = vpop.f32.mrb[2].mxu1 }
 0x112   : > { %v661_v57 = vpop.f32.mrb[3].mxu1 }
 0x12c   : > { %v615_v59 = vpop.f32.mrb[0].mxu0  ;;  %670 = sbr.rel (%p857_p7) target bundleno = 323 (0x143), region = 44 }
 0x12d   : > { %v657_v60 = vadd.f32 %v656_v54, %v615_v59  ;;  %v617_v62 = vpop.f32.mrb[1].mxu0 }
 0x12e   : > { %v659_v63 = vadd.f32 %v658_v55, %v617_v62  ;;  %v619_v0 = vpop.f32.mrb[2].mxu0 }
 0x12f   : > { %v663_v1 = vadd.f32 %v657_v60, %v278_v58  ;;  %v620_v2 = vpop.f32.mrb[3].mxu0 }
 0x130   : > { %v664_v3 = vadd.f32 %v659_v63, %v279_v61 }
 0x131   : > { %665 = vst [vmem:[#allocation2] sm:$0xff] %v663_v1 }
 0x132   : > { %666 = vst [vmem:[#allocation2 + $0x8] sm:$0xff] %v664_v3 }
 0x138   : > { %v671_v10 = vld [vmem:[#allocation2] sm:$0xff] }
 0x139   : > { %v672_v11 = vld [vmem:[#allocation2 + $0x8] sm:$0xff]  ;;  %v685_v16 = vadd.f32 %v678_v12, %v671_v10 }
 0x13a   : > { %v686_v17 = vadd.f32 %v682_v13, %v672_v11 }
 0x13b   : > { %v690_v18 = vadd.f32 %v688_v14, %v685_v16 }
 0x13c   : > { %v691_v19 = vadd.f32 %v689_v15, %v686_v17 }
 0x13d   : > { %v692_v20 = vmax.f32 %v690_v18, 0.0 }
 0x13e   : > { %v693_v21 = vmax.f32 %v691_v19, 0.0 }
 0x140   : > { %v863_v22 = vpack.c.bf16 %v693_v21, %v692_v20 }
 0x142   : > { %702 = vst [vmem:[%s1122_s4] sm:$0xff] %v863_v22 }
 0x143 PF: > { %s14_s17 = sadd.s32 1, %s987_s17   ;;  %s1123_s15 = smov %s983_s16 }
 0x144   : > { %p11_p8 = scmp.ge.s32.totalorder %s14_s17, 8   ;;  %s1124_s16 = smov %s1126_s18 }
 0x146   :  { %13 = sbr.rel (!%p11_p8) target bundleno = 2 (0x2), region = 80 }

// kernel: _lambda_.24
= control target key start
LH: loop header
LB: loop body
LE: loop exit
PB: predicated region body
PF: predicated region fallthrough
CT: control target
= control target key end

     0   :  { %s955_s1 = inlined_call_operand.vmem [shape: bf16[256,512], index: 1, kind: input, shape index: {}]   ;;  %s956_s0 = inlined_call_operand.vmem [shape: bf16[8,256], index: 0, kind: input, shape index: {}]   ;;  %s957_s2 = inlined_call_operand.vmem [shape: f32[1,512], index: 2, kind: input, shape index: {}]   ;;  %s958_s3 = inlined_call_operand.vmem [shape: bf16[8,512], index: 3, kind: output, shape index: {}]  }
   0x1   :  { %v633_v0 = vld [vmem:[%s955_s1 + $0x4] ss:$16 sps:$4 sm:$0xff]   ;;  %v635_v1 = vld [vmem:[%s955_s1 + $0xc] ss:$16 sps:$4 sm:$0xff]   ;;  %v637_v2 = vld [vmem:[%s955_s1] ss:$16 sps:$4 sm:$0xff]  }
   0x2   :  { %418 = vmatprep.subr.bf16.mxu0 %v633_v0  ;;  %v638_v3 = vld [vmem:[%s955_s1 + $0x8] ss:$16 sps:$4 sm:$0xff]   ;;  %459 = vmatprep.subr.bf16.mxu1 %v635_v1  ;;  %v639_v4 = vld [vmem:[%s955_s1 + $0x24] ss:$16 sps:$4 sm:$0xff]   ;;  %v641_v5 = vld [vmem:[%s955_s1 + $0x2c] ss:$16 sps:$4 sm:$0xff]  }
   0x3   :  { %419 = vmatpush1.bf16.msra.mxu0 %v637_v2  ;;  %460 = vmatpush1.bf16.msra.mxu1 %v638_v3  ;;  %v643_v6 = vld [vmem:[%s955_s1 + $0x20] ss:$16 sps:$4 sm:$0xff]   ;;  %v644_v7 = vld [vmem:[%s955_s1 + $0x28] ss:$16 sps:$4 sm:$0xff]   ;;  %v645_v8 = vld [vmem:[%s955_s1 + $0x44] ss:$16 sps:$4 sm:$0xff]   ;;  %v517_v3 = vlaneseq }
   0x4   :  { %420 = vmatprep.subr.bf16.mxu0 %v639_v4  ;;  %461 = vmatprep.subr.bf16.mxu1 %v641_v5  ;;  %v647_v9 = vld [vmem:[%s955_s1 + $0x4c] ss:$16 sps:$4 sm:$0xff]   ;;  %v649_v10 = vld [vmem:[%s955_s1 + $0x40] ss:$16 sps:$4 sm:$0xff]   ;;  %v650_v11 = vld [vmem:[%s955_s1 + $0x48] ss:$16 sps:$4 sm:$0xff]  }
   0x5   :  { %v651_v12 = vld [vmem:[%s955_s1 + $0x64] ss:$16 sps:$4 sm:$0xff]   ;;  %v653_v13 = vld [vmem:[%s955_s1 + $0x6c] ss:$16 sps:$4 sm:$0xff]   ;;  %v655_v14 = vld [vmem:[%s955_s1 + $0x60] ss:$16 sps:$4 sm:$0xff]  }
   0x6   :  { %v656_v15 = vld [vmem:[%s955_s1 + $0x68] ss:$16 sps:$4 sm:$0xff]   ;;  %v657_v16 = vld [vmem:[%s955_s1 + $0x84] ss:$16 sps:$4 sm:$0xff]   ;;  %v659_v17 = vld [vmem:[%s955_s1 + $0x8c] ss:$16 sps:$4 sm:$0xff]  }
   0x7   :  { %421 = vmatpush1.bf16.msra.mxu0 %v643_v6  ;;  %462 = vmatpush1.bf16.msra.mxu1 %v644_v7  ;;  %v661_v18 = vld [vmem:[%s955_s1 + $0x80] ss:$16 sps:$4 sm:$0xff]   ;;  %v662_v19 = vld [vmem:[%s955_s1 + $0x88] ss:$16 sps:$4 sm:$0xff]   ;;  %v663_v20 = vld [vmem:[%s955_s1 + $0xa4] ss:$16 sps:$4 sm:$0xff]  }
   0x8   :  { %422 = vmatprep.subr.bf16.mxu0 %v645_v8  ;;  %463 = vmatprep.subr.bf16.mxu1 %v647_v9  ;;  %v665_v21 = vld [vmem:[%s955_s1 + $0xac] ss:$16 sps:$4 sm:$0xff]   ;;  %v667_v22 = vld [vmem:[%s955_s1 + $0xa0] ss:$16 sps:$4 sm:$0xff]   ;;  %v668_v23 = vld [vmem:[%s955_s1 + $0xa8] ss:$16 sps:$4 sm:$0xff]  }
   0x9   :  { %v669_v24 = vld [vmem:[%s955_s1 + $0xc4] ss:$16 sps:$4 sm:$0xff]   ;;  %v671_v25 = vld [vmem:[%s955_s1 + $0xcc] ss:$16 sps:$4 sm:$0xff]   ;;  %v673_v26 = vld [vmem:[%s955_s1 + $0xc0] ss:$16 sps:$4 sm:$0xff]  }
   0xa   :  { %v674_v27 = vld [vmem:[%s955_s1 + $0xc8] ss:$16 sps:$4 sm:$0xff]   ;;  %v675_v28 = vld [vmem:[%s955_s1 + $0xe4] ss:$16 sps:$4 sm:$0xff]   ;;  %v677_v29 = vld [vmem:[%s955_s1 + $0xec] ss:$16 sps:$4 sm:$0xff]  }
   0xb   :  { %423 = vmatpush1.bf16.msra.mxu0 %v649_v10  ;;  %464 = vmatpush1.bf16.msra.mxu1 %v650_v11  ;;  %v679_v30 = vld [vmem:[%s955_s1 + $0xe0] ss:$16 sps:$4 sm:$0xff]   ;;  %v680_v31 = vld [vmem:[%s955_s1 + $0xe8] ss:$16 sps:$4 sm:$0xff]   ;;  %v681_v32 = vld [vmem:[%s955_s1 + $0x104] ss:$16 sps:$4 sm:$0xff]  }
   0xc   :  { %424 = vmatprep.subr.bf16.mxu0 %v651_v12  ;;  %465 = vmatprep.subr.bf16.mxu1 %v653_v13  ;;  %v683_v33 = vld [vmem:[%s955_s1 + $0x10c] ss:$16 sps:$4 sm:$0xff]   ;;  %v685_v34 = vld [vmem:[%s955_s1 + $0x100] ss:$16 sps:$4 sm:$0xff]   ;;  %v686_v35 = vld [vmem:[%s955_s1 + $0x108] ss:$16 sps:$4 sm:$0xff]  }
   0xd   :  { %v687_v36 = vld [vmem:[%s955_s1 + $0x124] ss:$16 sps:$4 sm:$0xff]   ;;  %v689_v37 = vld [vmem:[%s955_s1 + $0x12c] ss:$16 sps:$4 sm:$0xff]   ;;  %v691_v38 = vld [vmem:[%s955_s1 + $0x120] ss:$16 sps:$4 sm:$0xff]  }
   0xe   :  { %v692_v39 = vld [vmem:[%s955_s1 + $0x128] ss:$16 sps:$4 sm:$0xff]   ;;  %v693_v40 = vld [vmem:[%s955_s1 + $0x144] ss:$16 sps:$4 sm:$0xff]   ;;  %v695_v41 = vld [vmem:[%s955_s1 + $0x14c] ss:$16 sps:$4 sm:$0xff]  }
   0xf   :  { %425 = vmatpush1.bf16.msra.mxu0 %v655_v14  ;;  %466 = vmatpush1.bf16.msra.mxu1 %v656_v15  ;;  %v697_v42 = vld [vmem:[%s955_s1 + $0x140] ss:$16 sps:$4 sm:$0xff]   ;;  %v698_v43 = vld [vmem:[%s955_s1 + $0x148] ss:$16 sps:$4 sm:$0xff]   ;;  %v699_v44 = vld [vmem:[%s955_s1 + $0x164] ss:$16 sps:$4 sm:$0xff]  }
  0x10   :  { %426 = vmatprep.subr.bf16.mxu0 %v657_v16  ;;  %467 = vmatprep.subr.bf16.mxu1 %v659_v17  ;;  %v701_v45 = vld [vmem:[%s955_s1 + $0x16c] ss:$16 sps:$4 sm:$0xff]   ;;  %v26_v46 = vld [vmem:[%s956_s0] sm:$0xff]  ;;  %v704_v49 = vld [vmem:[%s955_s1 + $0x168] ss:$16 sps:$4 sm:$0xff]   ;;  %v518_v4 = vshrl.u32 %v517_v3, 7 }
  0x11   :  { %v564_v47 = vcombine.high %v26_v46, %v26_v46  ;;  %v703_v48 = vld [vmem:[%s955_s1 + $0x160] ss:$16 sps:$4 sm:$0xff]   ;;  %v705_v50 = vld [vmem:[%s955_s1 + $0x184] ss:$16 sps:$4 sm:$0xff]   ;;  %v707_v51 = vld [vmem:[%s955_s1 + $0x18c] ss:$16 sps:$4 sm:$0xff]   ;;  %v563_v2 = vcombine.low %v26_v46, %v26_v46 }
  0x12   :  { %v709_v52 = vld [vmem:[%s955_s1 + $0x180] ss:$16 sps:$4 sm:$0xff]   ;;  %v710_v53 = vld [vmem:[%s955_s1 + $0x188] ss:$16 sps:$4 sm:$0xff]   ;;  %v711_v54 = vld [vmem:[%s955_s1 + $0x1a4] ss:$16 sps:$4 sm:$0xff]  }
  0x13   :  { %427 = vmatpush1.bf16.msra.mxu0 %v661_v18  ;;  %468 = vmatpush1.bf16.msra.mxu1 %v662_v19  ;;  %v713_v55 = vld [vmem:[%s955_s1 + $0x1ac] ss:$16 sps:$4 sm:$0xff]   ;;  %v715_v56 = vld [vmem:[%s955_s1 + $0x1a0] ss:$16 sps:$4 sm:$0xff]   ;;  %v716_v57 = vld [vmem:[%s955_s1 + $0x1a8] ss:$16 sps:$4 sm:$0xff]  }
  0x14   :  { %428 = vmatprep.subr.bf16.mxu0 %v663_v20  ;;  %469 = vmatprep.subr.bf16.mxu1 %v665_v21  ;;  %v717_v58 = vld [vmem:[%s955_s1 + $0x1c4] ss:$16 sps:$4 sm:$0xff]   ;;  %v719_v59 = vld [vmem:[%s955_s1 + $0x1cc] ss:$16 sps:$4 sm:$0xff]   ;;  %v721_v60 = vld [vmem:[%s955_s1 + $0x1c0] ss:$16 sps:$4 sm:$0xff]  }
  0x15   :  { %450 = vmatprep.mubr.bf16.mxu0 %v564_v47  ;;  %491 = vmatprep.mubr.bf16.mxu1 %v564_v47  ;;  %v722_v61 = vld [vmem:[%s955_s1 + $0x1c8] ss:$16 sps:$4 sm:$0xff]   ;;  %v723_v62 = vld [vmem:[%s955_s1 + $0x1e4] ss:$16 sps:$4 sm:$0xff]   ;;  %v725_v63 = vld [vmem:[%s955_s1 + $0x1ec] ss:$16 sps:$4 sm:$0xff]  }
  0x16   :  { %v727_v0 = vld [vmem:[%s955_s1 + $0x1e0] ss:$16 sps:$4 sm:$0xff]   ;;  %v728_v1 = vld [vmem:[%s955_s1 + $0x1e8] ss:$16 sps:$4 sm:$0xff]   ;;  %v519_v5 = vsub.s32 0, %v518_v4  ;;  %v527_v6 = vsub.s32 2, %v518_v4 }
  0x17   :  { %429 = vmatpush1.bf16.msra.mxu0 %v667_v22  ;;  %470 = vmatpush1.bf16.msra.mxu1 %v668_v23  ;;  %v515_v7 = vld [vmem:[%s957_s2] sm:$0xf]  ;;  %v523_v8 = vsub.s32 1, %v518_v4  ;;  %v531_v9 = vsub.s32 3, %v518_v4 }
  0x18   :  { %430 = vmatprep.subr.bf16.mxu0 %v669_v24  ;;  %471 = vmatprep.subr.bf16.mxu1 %v671_v25  ;;  %v520_v10 = vrot.slane %v515_v7, %v519_v5  ;;  %v528_v11 = vrot.slane %v515_v7, %v527_v6 }
  0x19   :  { %v524_v12 = vrot.slane %v515_v7, %v523_v8  ;;  %v532_v13 = vrot.slane %v515_v7, %v531_v9 }
  0x1b   :  { %431 = vmatpush1.bf16.msra.mxu0 %v673_v26  ;;  %472 = vmatpush1.bf16.msra.mxu1 %v674_v27 }
  0x1c   :  { %432 = vmatprep.subr.bf16.mxu0 %v675_v28  ;;  %473 = vmatprep.subr.bf16.mxu1 %v677_v29 }
  0x1f   :  { %433 = vmatpush1.bf16.msra.mxu0 %v679_v30  ;;  %474 = vmatpush1.bf16.msra.mxu1 %v680_v31 }
  0x20   :  { %434 = vmatprep.subr.bf16.mxu0 %v681_v32  ;;  %475 = vmatprep.subr.bf16.mxu1 %v683_v33 }
  0x23   :  { %435 = vmatpush1.bf16.msra.mxu0 %v685_v34  ;;  %476 = vmatpush1.bf16.msra.mxu1 %v686_v35 }
  0x24   :  { %436 = vmatprep.subr.bf16.mxu0 %v687_v36  ;;  %477 = vmatprep.subr.bf16.mxu1 %v689_v37 }
  0x27   :  { %437 = vmatpush1.bf16.msra.mxu0 %v691_v38  ;;  %478 = vmatpush1.bf16.msra.mxu1 %v692_v39 }
  0x28   :  { %438 = vmatprep.subr.bf16.mxu0 %v693_v40  ;;  %479 = vmatprep.subr.bf16.mxu1 %v695_v41 }
  0x2b   :  { %439 = vmatpush1.bf16.msra.mxu0 %v697_v42  ;;  %480 = vmatpush1.bf16.msra.mxu1 %v698_v43 }
  0x2c   :  { %440 = vmatprep.subr.bf16.mxu0 %v699_v44  ;;  %481 = vmatprep.subr.bf16.mxu1 %v701_v45 }
  0x2f   :  { %441 = vmatpush1.bf16.msra.mxu0 %v703_v48  ;;  %482 = vmatpush1.bf16.msra.mxu1 %v704_v49 }
  0x30   :  { %442 = vmatprep.subr.bf16.mxu0 %v705_v50  ;;  %483 = vmatprep.subr.bf16.mxu1 %v707_v51 }
  0x33   :  { %443 = vmatpush1.bf16.msra.mxu0 %v709_v52  ;;  %484 = vmatpush1.bf16.msra.mxu1 %v710_v53 }
  0x34   :  { %444 = vmatprep.subr.bf16.mxu0 %v711_v54  ;;  %485 = vmatprep.subr.bf16.mxu1 %v713_v55 }
  0x37   :  { %445 = vmatpush1.bf16.msra.mxu0 %v715_v56  ;;  %486 = vmatpush1.bf16.msra.mxu1 %v716_v57 }
  0x38   :  { %446 = vmatprep.subr.bf16.mxu0 %v717_v58  ;;  %487 = vmatprep.subr.bf16.mxu1 %v719_v59 }
  0x3b   :  { %447 = vmatpush1.bf16.msra.mxu0 %v721_v60  ;;  %488 = vmatpush1.bf16.msra.mxu1 %v722_v61 }
  0x3c   :  { %448 = vmatprep.subr.bf16.mxu0 %v723_v62  ;;  %489 = vmatprep.subr.bf16.mxu1 %v725_v63 }
  0x3f   :  { %449 = vmatpush1.bf16.msra.mxu0 %v727_v0  ;;  %490 = vmatpush1.bf16.msra.mxu1 %v728_v1 }
  0x42   :  { %451 = vmatmul.mubr.bf16.vlgmr.msra.gmra.mrb[0].mxu0 %v563_v2  ;;  %492 = vmatmul.mubr.bf16.vlgmr.msra.gmra.mrb[0].mxu1 %v563_v2 }
 0x115   :  { %v452_v14 = vpop.f32.mrb[0].mxu0  ;;  %v493_v15 = vpop.f32.mrb[0].mxu1 }
 0x116   :  { %v537_v16 = vadd.f32 %v520_v10, %v452_v14  ;;  %v539_v17 = vadd.f32 %v528_v11, %v493_v15  ;;  %v454_v18 = vpop.f32.mrb[1].mxu0  ;;  %v495_v19 = vpop.f32.mrb[1].mxu1 }
 0x117   :  { %v538_v20 = vadd.f32 %v524_v12, %v454_v18  ;;  %v540_v21 = vadd.f32 %v532_v13, %v495_v19  ;;  %v456_v22 = vpop.f32.mrb[2].mxu0  ;;  %v497_v23 = vpop.f32.mrb[2].mxu1 }
 0x118   :  { %v457_v24 = vpop.f32.mrb[3].mxu0  ;;  %v498_v25 = vpop.f32.mrb[3].mxu1 }
 0x119   :  { %v631_v26 = vpack.c.bf16 %v538_v20, %v537_v16  ;;  %v632_v27 = vpack.c.bf16 %v540_v21, %v539_v17 }
 0x11b   :  { %557 = vst [vmem:[%s958_s3] sm:$0xff] %v631_v26  ;;  %558 = vst [vmem:[%s958_s3 + $0x8] sm:$0xff] %v632_v27 }

// kernel: _lambda_.25
= control target key start
LH: loop header
LB: loop body
LE: loop exit
PB: predicated region body
PF: predicated region fallthrough
CT: control target
= control target key end

     0   :  { %s1468_s12 = smov 0   ;;  %s1470_s13 = smov 0   ;;  %s1628_s0 = inlined_call_operand.vmem [shape: bf16[8,2304], index: 0, kind: input, shape index: {}]   ;;  %s1629_s1 = inlined_call_operand.vmem [shape: bf16[2304,512], index: 1, kind: input, shape index: {}]   ;;  %s1630_s2 = inlined_call_operand.vmem [shape: f32[1,512], index: 2, kind: input, shape index: {}]   ;;  %s1631_s3 = inlined_call_operand.vmem [shape: bf16[8,512], index: 3, kind: output, shape index: {}]  }
   0x1   :  { %s1472_s14 = smov 0  }
   0x2 LB: > { %s22_s15 = sadd.s32 1, %s1440_s13  ;;  %p1136_p0 = scmp.ge.s32.totalorder %s1444_s14, 1  ;;  %s1444_s14 = sphi %s1472_s14, %s13_s14   ;;  %s1440_s13 = sphi %s1470_s13, %s1633_s13   ;;  %s1436_s12 = sphi %s1468_s12, %s1632_s12  }
   0x3   : > { %p23_p1 = scmp.ge.s32.totalorder %s22_s15, 6  ;;  %p168_p2 = scmp.lt.s32.totalorder %s1444_s14, 7 }
   0x5   : > { %s1635_s15 = smov (%p23_p1, %s22_s15), 0  ;;  %p169_p3 = pnand %p1136_p0, %p168_p2 }
   0x6   : > { %s202_s16 = smul.u32 (!%p169_p3), 3, %s1436_s12  ;;  %p1140_p6 = scmp.ne.s32.totalorder (!%p169_p3), %s1436_s12, 0 }
   0x7   : > { %172 = sbr.rel (%p169_p3) target bundleno = 354 (0x162), region = 32 }
   0x8   : > { %s212_s17 = smul.u32 (!%p169_p3), 48, %s1436_s12  ;;  %p205_p4 = scmp.lt.s32.totalorder (!%p169_p3), %s202_s16, 17 }
   0xa   : > { %p213_p5 = scmp.lt.s32.totalorder (!%p169_p3), %s212_s17, 287 }
   0xe   : > { %s1637_s16 = smov (!%p205_p4, %s202_s16), 17  ;;  %s1639_s17 = smov (!%p213_p5, %s212_s17), 287 }
   0xf   : > { %s1137_s18 = sshll.u32 %s1637_s16, 2  ;;  %s1246_s22 = sshll.u32 %s1639_s17, 4  ;;  %v1446_v0 = vmov (!%p1140_p6), 0.0  }
  0x10   : > { %s1493_s21 = scalar_lea.vmem %s1628_s0, %s1137_s18  ;;  %s1498_s25 = scalar_lea.vmem %s1629_s1, %s1246_s22  ;;  %229 = vst [vmem:[#allocation2] sm:$0xff] (!%p1140_p6), %v1446_v0  ;;  %230 = vst [vmem:[#allocation2 + $0x8] sm:$0xff] (!%p1140_p6), %v1446_v0 }
  0x11   : > { %228 = sbr.rel (%p1140_p6) target bundleno = 24 (0x18), region = 36  ;;  %231 = vst [vmem:[#allocation2 + $0x10] sm:$0xff] (!%p1140_p6), %v1446_v0  ;;  %232 = vst [vmem:[#allocation2 + $0x18] sm:$0xff] (!%p1140_p6), %v1446_v0 }
  0x18 PF: > { %v1275_v1 = vld [vmem:[%s1498_s25 + $0x4] ss:$16 sps:$4 sm:$0xff]   ;;  %v1447_v3 = vmov 0   ;;  %v1279_v4 = vld [vmem:[%s1498_s25] ss:$16 sps:$4 sm:$0xff]   ;;  %p1240_p7 = scmp.ne.s32.totalorder %s1436_s12, 5 }
  0x19   : > { %v1277_v2 = vld [vmem:[%s1498_s25 + $0x204] ss:$16 sps:$4 sm:$0xff]   ;;  %899 = vmatprep.mubr.bf16.mxu1 %v1447_v3  ;;  %826 = vmatprep.subr.bf16.mxu0 %v1275_v1  ;;  %v1280_v5 = vld [vmem:[%s1498_s25 + $0x200] ss:$16 sps:$4 sm:$0xff]   ;;  %v1328_v35 = vld [vmem:[%s1498_s25 + $0xc] ss:$16 sps:$4 sm:$0xff]  }
  0x1a   : > { %867 = vmatprep.subr.bf16.mxu1 %v1277_v2  ;;  %v1281_v6 = vld [vmem:[%s1498_s25 + $0x24] ss:$16 sps:$4 sm:$0xff]   ;;  %827 = vmatpush1.bf16.msra.mxu0 %v1279_v4  ;;  %v1285_v8 = vld [vmem:[%s1498_s25 + $0x20] ss:$16 sps:$4 sm:$0xff]   ;;  %v1537_v36 = vld [vmem:[%s1493_s21 + $0x8] ss:$0 sps:$4 sm:$0xff]  }
  0x1b   : > { %868 = vmatpush1.bf16.msra.mxu1 %v1280_v5  ;;  %v1283_v7 = vld [vmem:[%s1498_s25 + $0x224] ss:$16 sps:$4 sm:$0xff]   ;;  %828 = vmatprep.subr.bf16.mxu0 %v1281_v6  ;;  %v1286_v9 = vld [vmem:[%s1498_s25 + $0x220] ss:$16 sps:$4 sm:$0xff]   ;;  %v1326_v37 = vld [vmem:[%s1498_s25 + $0x8] ss:$16 sps:$4 sm:$0xff]  }
  0x1c   : > { %869 = vmatprep.subr.bf16.mxu1 %v1283_v7  ;;  %v1287_v10 = vld [vmem:[%s1498_s25 + $0x44] ss:$16 sps:$4 sm:$0xff]   ;;  %v1291_v12 = vld [vmem:[%s1498_s25 + $0x40] ss:$16 sps:$4 sm:$0xff]   ;;  %v1334_v40 = vld [vmem:[%s1498_s25 + $0x2c] ss:$16 sps:$4 sm:$0xff]  }
  0x1d   : > { %v1289_v11 = vld [vmem:[%s1498_s25 + $0x244] ss:$16 sps:$4 sm:$0xff]   ;;  %v1292_v13 = vld [vmem:[%s1498_s25 + $0x240] ss:$16 sps:$4 sm:$0xff]   ;;  %v1332_v41 = vld [vmem:[%s1498_s25 + $0x28] ss:$16 sps:$4 sm:$0xff]  }
  0x1e   : > { %829 = vmatpush1.bf16.msra.mxu0 %v1285_v8  ;;  %v1293_v14 = vld [vmem:[%s1498_s25 + $0x64] ss:$16 sps:$4 sm:$0xff]   ;;  %v1297_v16 = vld [vmem:[%s1498_s25 + $0x60] ss:$16 sps:$4 sm:$0xff]   ;;  %v1340_v44 = vld [vmem:[%s1498_s25 + $0x4c] ss:$16 sps:$4 sm:$0xff]  }
  0x1f   : > { %870 = vmatpush1.bf16.msra.mxu1 %v1286_v9  ;;  %830 = vmatprep.subr.bf16.mxu0 %v1287_v10  ;;  %v1295_v15 = vld [vmem:[%s1498_s25 + $0x264] ss:$16 sps:$4 sm:$0xff]   ;;  %v1298_v17 = vld [vmem:[%s1498_s25 + $0x260] ss:$16 sps:$4 sm:$0xff]   ;;  %v1338_v45 = vld [vmem:[%s1498_s25 + $0x48] ss:$16 sps:$4 sm:$0xff]  }
  0x20   : > { %871 = vmatprep.subr.bf16.mxu1 %v1289_v11  ;;  %v1299_v18 = vld [vmem:[%s1498_s25 + $0x84] ss:$16 sps:$4 sm:$0xff]   ;;  %v1303_v20 = vld [vmem:[%s1498_s25 + $0x80] ss:$16 sps:$4 sm:$0xff]   ;;  %v1346_v48 = vld [vmem:[%s1498_s25 + $0x6c] ss:$16 sps:$4 sm:$0xff]  }
  0x21   : > { %v1301_v19 = vld [vmem:[%s1498_s25 + $0x284] ss:$16 sps:$4 sm:$0xff]   ;;  %v1304_v21 = vld [vmem:[%s1498_s25 + $0x280] ss:$16 sps:$4 sm:$0xff]   ;;  %v1344_v49 = vld [vmem:[%s1498_s25 + $0x68] ss:$16 sps:$4 sm:$0xff]  }
  0x22   : > { %831 = vmatpush1.bf16.msra.mxu0 %v1291_v12  ;;  %v1305_v22 = vld [vmem:[%s1498_s25 + $0xa4] ss:$16 sps:$4 sm:$0xff]   ;;  %v1309_v24 = vld [vmem:[%s1498_s25 + $0xa0] ss:$16 sps:$4 sm:$0xff]   ;;  %v1352_v54 = vld [vmem:[%s1498_s25 + $0x8c] ss:$16 sps:$4 sm:$0xff]  }
  0x23   : > { %872 = vmatpush1.bf16.msra.mxu1 %v1292_v13  ;;  %832 = vmatprep.subr.bf16.mxu0 %v1293_v14  ;;  %v1307_v23 = vld [vmem:[%s1498_s25 + $0x2a4] ss:$16 sps:$4 sm:$0xff]   ;;  %v1310_v25 = vld [vmem:[%s1498_s25 + $0x2a0] ss:$16 sps:$4 sm:$0xff]   ;;  %v1350_v55 = vld [vmem:[%s1498_s25 + $0x88] ss:$16 sps:$4 sm:$0xff]  }
  0x24   : > { %873 = vmatprep.subr.bf16.mxu1 %v1295_v15  ;;  %v1311_v26 = vld [vmem:[%s1498_s25 + $0xc4] ss:$16 sps:$4 sm:$0xff]   ;;  %v1315_v28 = vld [vmem:[%s1498_s25 + $0xc0] ss:$16 sps:$4 sm:$0xff]   ;;  %v1358_v58 = vld [vmem:[%s1498_s25 + $0xac] ss:$16 sps:$4 sm:$0xff]  }
  0x25   : > { %v1313_v27 = vld [vmem:[%s1498_s25 + $0x2c4] ss:$16 sps:$4 sm:$0xff]   ;;  %v1316_v29 = vld [vmem:[%s1498_s25 + $0x2c0] ss:$16 sps:$4 sm:$0xff]   ;;  %v1356_v59 = vld [vmem:[%s1498_s25 + $0xa8] ss:$16 sps:$4 sm:$0xff]  }
  0x26   : > { %833 = vmatpush1.bf16.msra.mxu0 %v1297_v16  ;;  %v1317_v30 = vld [vmem:[%s1498_s25 + $0xe4] ss:$16 sps:$4 sm:$0xff]   ;;  %v1321_v32 = vld [vmem:[%s1498_s25 + $0xe0] ss:$16 sps:$4 sm:$0xff]   ;;  %v1364_v62 = vld [vmem:[%s1498_s25 + $0xcc] ss:$16 sps:$4 sm:$0xff]  }
  0x27   : > { %874 = vmatpush1.bf16.msra.mxu1 %v1298_v17  ;;  %834 = vmatprep.subr.bf16.mxu0 %v1299_v18  ;;  %v1319_v31 = vld [vmem:[%s1498_s25 + $0x2e4] ss:$16 sps:$4 sm:$0xff]   ;;  %v1322_v33 = vld [vmem:[%s1498_s25 + $0x2e0] ss:$16 sps:$4 sm:$0xff]   ;;  %v1362_v63 = vld [vmem:[%s1498_s25 + $0xc8] ss:$16 sps:$4 sm:$0xff]  }
  0x28   : > { %875 = vmatprep.subr.bf16.mxu1 %v1301_v19  ;;  %v1323_v34 = vld [vmem:[%s1498_s25 + $0x104] ss:$16 sps:$4 sm:$0xff]   ;;  %v1329_v38 = vld [vmem:[%s1498_s25 + $0x100] ss:$16 sps:$4 sm:$0xff]   ;;  %v1370_v2 = vld [vmem:[%s1498_s25 + $0xec] ss:$16 sps:$4 sm:$0xff]  }
  0x29   : > { %v1330_v39 = vld [vmem:[%s1498_s25 + $0x124] ss:$16 sps:$4 sm:$0xff]   ;;  %v1335_v42 = vld [vmem:[%s1498_s25 + $0x120] ss:$16 sps:$4 sm:$0xff]   ;;  %v1368_v4 = vld [vmem:[%s1498_s25 + $0xe8] ss:$16 sps:$4 sm:$0xff]  }
  0x2a   : > { %835 = vmatpush1.bf16.msra.mxu0 %v1303_v20  ;;  %v1336_v43 = vld [vmem:[%s1498_s25 + $0x144] ss:$16 sps:$4 sm:$0xff]   ;;  %v1341_v46 = vld [vmem:[%s1498_s25 + $0x140] ss:$16 sps:$4 sm:$0xff]   ;;  %v1376_v6 = vld [vmem:[%s1498_s25 + $0x10c] ss:$16 sps:$4 sm:$0xff]  }
  0x2b   : > { %876 = vmatpush1.bf16.msra.mxu1 %v1304_v21  ;;  %836 = vmatprep.subr.bf16.mxu0 %v1305_v22  ;;  %v1342_v47 = vld [vmem:[%s1498_s25 + $0x164] ss:$16 sps:$4 sm:$0xff]   ;;  %v1347_v51 = vld [vmem:[%s1498_s25 + $0x160] ss:$16 sps:$4 sm:$0xff]   ;;  %v1379_v7 = vld [vmem:[%s1498_s25 + $0x20c] ss:$16 sps:$4 sm:$0xff]  }
  0x2c   : > { %877 = vmatprep.subr.bf16.mxu1 %v1307_v23  ;;  %v237_v50 = vld [vmem:[%s1493_s21] sm:$0xff]  ;;  %v1374_v9 = vld [vmem:[%s1498_s25 + $0x108] ss:$16 sps:$4 sm:$0xff]   ;;  %v1382_v11 = vld [vmem:[%s1498_s25 + $0x12c] ss:$16 sps:$4 sm:$0xff]  }
  0x2d   : > { %v1348_v52 = vld [vmem:[%s1498_s25 + $0x184] ss:$16 sps:$4 sm:$0xff]   ;;  %v1142_v53 = vcombine.high %v237_v50, %v237_v50  ;;  %v1353_v56 = vld [vmem:[%s1498_s25 + $0x180] ss:$16 sps:$4 sm:$0xff]   ;;  %v1573_v8 = vcombine.low %v237_v50, %v237_v50  ;;  %v1377_v10 = vld [vmem:[%s1498_s25 + $0x208] ss:$16 sps:$4 sm:$0xff]  }
  0x2e   : > { %837 = vmatpush1.bf16.msra.mxu0 %v1309_v24  ;;  %v1354_v57 = vld [vmem:[%s1498_s25 + $0x1a4] ss:$16 sps:$4 sm:$0xff]   ;;  %v1359_v60 = vld [vmem:[%s1498_s25 + $0x1a0] ss:$16 sps:$4 sm:$0xff]   ;;  %v1385_v12 = vld [vmem:[%s1498_s25 + $0x22c] ss:$16 sps:$4 sm:$0xff]  }
  0x2f   : > { %878 = vmatpush1.bf16.msra.mxu1 %v1310_v25  ;;  %838 = vmatprep.subr.bf16.mxu0 %v1311_v26  ;;  %v1360_v61 = vld [vmem:[%s1498_s25 + $0x1c4] ss:$16 sps:$4 sm:$0xff]   ;;  %v1365_v0 = vld [vmem:[%s1498_s25 + $0x1c0] ss:$16 sps:$4 sm:$0xff]   ;;  %v1380_v13 = vld [vmem:[%s1498_s25 + $0x128] ss:$16 sps:$4 sm:$0xff]  }
  0x30   : > { %879 = vmatprep.subr.bf16.mxu1 %v1313_v27  ;;  %858 = vmatprep.mubr.bf16.mxu0 %v1142_v53  ;;  %v1366_v1 = vld [vmem:[%s1498_s25 + $0x1e4] ss:$16 sps:$4 sm:$0xff]   ;;  %v1371_v5 = vld [vmem:[%s1498_s25 + $0x1e0] ss:$16 sps:$4 sm:$0xff]   ;;  %v1383_v14 = vld [vmem:[%s1498_s25 + $0x228] ss:$16 sps:$4 sm:$0xff]  }
  0x31   : > { %v1388_v15 = vld [vmem:[%s1498_s25 + $0x14c] ss:$16 sps:$4 sm:$0xff]   ;;  %v1386_v17 = vld [vmem:[%s1498_s25 + $0x148] ss:$16 sps:$4 sm:$0xff]  }
  0x32   : > { %839 = vmatpush1.bf16.msra.mxu0 %v1315_v28  ;;  %v1391_v16 = vld [vmem:[%s1498_s25 + $0x24c] ss:$16 sps:$4 sm:$0xff]   ;;  %v1389_v18 = vld [vmem:[%s1498_s25 + $0x248] ss:$16 sps:$4 sm:$0xff]  }
  0x33   : > { %880 = vmatpush1.bf16.msra.mxu1 %v1316_v29  ;;  %840 = vmatprep.subr.bf16.mxu0 %v1317_v30  ;;  %v1394_v19 = vld [vmem:[%s1498_s25 + $0x16c] ss:$16 sps:$4 sm:$0xff]   ;;  %v1392_v21 = vld [vmem:[%s1498_s25 + $0x168] ss:$16 sps:$4 sm:$0xff]  }
  0x34   : > { %881 = vmatprep.subr.bf16.mxu1 %v1319_v31  ;;  %v1397_v20 = vld [vmem:[%s1498_s25 + $0x26c] ss:$16 sps:$4 sm:$0xff]   ;;  %v1395_v22 = vld [vmem:[%s1498_s25 + $0x268] ss:$16 sps:$4 sm:$0xff]  }
  0x35   : > { %v1403_v23 = vld [vmem:[%s1498_s25 + $0x28c] ss:$16 sps:$4 sm:$0xff]   ;;  %v1398_v24 = vld [vmem:[%s1498_s25 + $0x188] ss:$16 sps:$4 sm:$0xff]  }
  0x36   : > { %841 = vmatpush1.bf16.msra.mxu0 %v1321_v32  ;;  %v1401_v25 = vld [vmem:[%s1498_s25 + $0x288] ss:$16 sps:$4 sm:$0xff]   ;;  %v1406_v26 = vld [vmem:[%s1498_s25 + $0x1ac] ss:$16 sps:$4 sm:$0xff]  }
  0x37   : > { %882 = vmatpush1.bf16.msra.mxu1 %v1322_v33  ;;  %842 = vmatprep.subr.bf16.mxu0 %v1323_v34  ;;  %v1409_v27 = vld [vmem:[%s1498_s25 + $0x2ac] ss:$16 sps:$4 sm:$0xff]   ;;  %v1404_v28 = vld [vmem:[%s1498_s25 + $0x1a8] ss:$16 sps:$4 sm:$0xff]  }
  0x38   : > { %908 = vmatprep.subr.bf16.mxu1 %v1328_v35  ;;  %v1407_v29 = vld [vmem:[%s1498_s25 + $0x2a8] ss:$16 sps:$4 sm:$0xff]   ;;  %v1412_v30 = vld [vmem:[%s1498_s25 + $0x1cc] ss:$16 sps:$4 sm:$0xff]  }
  0x39   : > { %v1415_v31 = vld [vmem:[%s1498_s25 + $0x2cc] ss:$16 sps:$4 sm:$0xff]   ;;  %v1410_v32 = vld [vmem:[%s1498_s25 + $0x1c8] ss:$16 sps:$4 sm:$0xff]  }
  0x3a   : > { %900 = vmatmul.mubr.bf16.vlgmr.msra.gmra.mrb[0].mxu1 %v1537_v36  ;;  %843 = vmatpush1.bf16.msra.mxu0 %v1329_v38  ;;  %v1413_v33 = vld [vmem:[%s1498_s25 + $0x2c8] ss:$16 sps:$4 sm:$0xff]   ;;  %v1418_v34 = vld [vmem:[%s1498_s25 + $0x1ec] ss:$16 sps:$4 sm:$0xff]  }
  0x3b   : > { %909 = vmatpush1.bf16.msra.mxu1 %v1326_v37  ;;  %844 = vmatprep.subr.bf16.mxu0 %v1330_v39  ;;  %v1421_v35 = vld [vmem:[%s1498_s25 + $0x2ec] ss:$16 sps:$4 sm:$0xff]   ;;  %v1416_v37 = vld [vmem:[%s1498_s25 + $0x1e8] ss:$16 sps:$4 sm:$0xff]  }
  0x3c   : > { %910 = vmatprep.subr.bf16.mxu1 %v1334_v40  ;;  %940 = vmatprep.mubr.bf16.mxu1 %v1142_v53  ;;  %v1419_v38 = vld [vmem:[%s1498_s25 + $0x2e8] ss:$16 sps:$4 sm:$0xff]  }
  0x3e   : > { %845 = vmatpush1.bf16.msra.mxu0 %v1335_v42 }
  0x3f   : > { %911 = vmatpush1.bf16.msra.mxu1 %v1332_v41  ;;  %846 = vmatprep.subr.bf16.mxu0 %v1336_v43  ;;  %v233_v43 = vld [vmem:[#allocation2] sm:$0xff] }
  0x40   : > { %912 = vmatprep.subr.bf16.mxu1 %v1340_v44 }
  0x42   : > { %847 = vmatpush1.bf16.msra.mxu0 %v1341_v46  ;;  %v234_v46 = vld [vmem:[#allocation2 + $0x8] sm:$0xff] }
  0x43   : > { %913 = vmatpush1.bf16.msra.mxu1 %v1338_v45  ;;  %848 = vmatprep.subr.bf16.mxu0 %v1342_v47 }
  0x44   : > { %914 = vmatprep.subr.bf16.mxu1 %v1346_v48 }
  0x46   : > { %849 = vmatpush1.bf16.msra.mxu0 %v1347_v51 }
  0x47   : > { %915 = vmatpush1.bf16.msra.mxu1 %v1344_v49  ;;  %850 = vmatprep.subr.bf16.mxu0 %v1348_v52 }
  0x48   : > { %916 = vmatprep.subr.bf16.mxu1 %v1352_v54  ;;  %v235_v54 = vld [vmem:[#allocation2 + $0x10] sm:$0xff] }
  0x4a   : > { %851 = vmatpush1.bf16.msra.mxu0 %v1353_v56 }
  0x4b   : > { %917 = vmatpush1.bf16.msra.mxu1 %v1350_v55  ;;  %852 = vmatprep.subr.bf16.mxu0 %v1354_v57  ;;  %v236_v57 = vld [vmem:[#allocation2 + $0x18] sm:$0xff] }
  0x4c   : > { %918 = vmatprep.subr.bf16.mxu1 %v1358_v58 }
  0x4e   : > { %853 = vmatpush1.bf16.msra.mxu0 %v1359_v60 }
  0x4f   : > { %919 = vmatpush1.bf16.msra.mxu1 %v1356_v59  ;;  %854 = vmatprep.subr.bf16.mxu0 %v1360_v61 }
  0x50   : > { %920 = vmatprep.subr.bf16.mxu1 %v1364_v62 }
  0x52   : > { %855 = vmatpush1.bf16.msra.mxu0 %v1365_v0 }
  0x53   : > { %921 = vmatpush1.bf16.msra.mxu1 %v1362_v63  ;;  %856 = vmatprep.subr.bf16.mxu0 %v1366_v1 }
  0x54   : > { %922 = vmatprep.subr.bf16.mxu1 %v1370_v2  ;;  %v1008_v2 = vlaneseq (!%p1240_p7) }
  0x56   : > { %857 = vmatpush1.bf16.msra.mxu0 %v1371_v5  ;;  %v1006_v5 = vld [vmem:[%s1630_s2] sm:$0xf] (!%p1240_p7) }
  0x57   : > { %923 = vmatpush1.bf16.msra.mxu1 %v1368_v4  ;;  %949 = vmatprep.subr.bf16.mxu0 %v1379_v7  ;;  %v1009_v4 = vshrl.u32 (!%p1240_p7), %v1008_v2, 7 }
  0x58   : > { %924 = vmatprep.subr.bf16.mxu1 %v1376_v6 }
  0x59   : > { %859 = vmatmul.mubr.bf16.vlgmr.msra.gmra.mrb[0].mxu0 %v1573_v8  ;;  %v1010_v7 = vsub.s32 (!%p1240_p7), 0, %v1009_v4 }
  0x5a   : > { %950 = vmatpush1.bf16.msra.mxu0 %v1377_v10  ;;  %981 = vmatprep.mubr.bf16.mxu0 %v1447_v3  ;;  %v1400_v3 = vld [vmem:[%s1498_s25 + $0x18c] ss:$16 sps:$4 sm:$0xff]   ;;  %v1022_v10 = vsub.s32 (!%p1240_p7), 3, %v1009_v4 }
  0x5b   : > { %925 = vmatpush1.bf16.msra.mxu1 %v1374_v9  ;;  %951 = vmatprep.subr.bf16.mxu0 %v1385_v12  ;;  %v1018_v9 = vsub.s32 (!%p1240_p7), 2, %v1009_v4 }
  0x5c   : > { %926 = vmatprep.subr.bf16.mxu1 %v1382_v11 }
  0x5e   : > { %952 = vmatpush1.bf16.msra.mxu0 %v1383_v14  ;;  %v1011_v14 = vrot.slane (!%p1240_p7), %v1006_v5, %v1010_v7 }
  0x5f   : > { %927 = vmatpush1.bf16.msra.mxu1 %v1380_v13  ;;  %953 = vmatprep.subr.bf16.mxu0 %v1391_v16  ;;  %v1019_v16 = vrot.slane (!%p1240_p7), %v1006_v5, %v1018_v9 }
  0x60   : > { %928 = vmatprep.subr.bf16.mxu1 %v1388_v15 }
  0x62   : > { %954 = vmatpush1.bf16.msra.mxu0 %v1389_v18 }
  0x63   : > { %929 = vmatpush1.bf16.msra.mxu1 %v1386_v17  ;;  %955 = vmatprep.subr.bf16.mxu0 %v1397_v20  ;;  %v1023_v17 = vrot.slane (!%p1240_p7), %v1006_v5, %v1022_v10 }
  0x64   : > { %930 = vmatprep.subr.bf16.mxu1 %v1394_v19 }
  0x66   : > { %956 = vmatpush1.bf16.msra.mxu0 %v1395_v22 }
  0x67   : > { %931 = vmatpush1.bf16.msra.mxu1 %v1392_v21  ;;  %957 = vmatprep.subr.bf16.mxu0 %v1403_v23 }
  0x68   : > { %932 = vmatprep.subr.bf16.mxu1 %v1400_v3 }
  0x6a   : > { %958 = vmatpush1.bf16.msra.mxu0 %v1401_v25 }
  0x6b   : > { %933 = vmatpush1.bf16.msra.mxu1 %v1398_v24  ;;  %959 = vmatprep.subr.bf16.mxu0 %v1409_v27 }
  0x6c   : > { %934 = vmatprep.subr.bf16.mxu1 %v1406_v26 }
  0x6e   : > { %960 = vmatpush1.bf16.msra.mxu0 %v1407_v29 }
  0x6f   : > { %935 = vmatpush1.bf16.msra.mxu1 %v1404_v28  ;;  %961 = vmatprep.subr.bf16.mxu0 %v1415_v31 }
  0x70   : > { %936 = vmatprep.subr.bf16.mxu1 %v1412_v30 }
  0x72   : > { %962 = vmatpush1.bf16.msra.mxu0 %v1413_v33 }
  0x73   : > { %937 = vmatpush1.bf16.msra.mxu1 %v1410_v32  ;;  %963 = vmatprep.subr.bf16.mxu0 %v1421_v35 }
  0x74   : > { %938 = vmatprep.subr.bf16.mxu1 %v1418_v34 }
  0x76   : > { %964 = vmatpush1.bf16.msra.mxu0 %v1419_v38 }
  0x77   : > { %939 = vmatpush1.bf16.msra.mxu1 %v1416_v37 }
  0x79   : > { %982 = vmatmul.mubr.bf16.vlgmr.msra.gmra.mrb[4].mxu0 %v1537_v36 }
  0x7a   : > { %941 = vmatmul.mubr.bf16.vlgmr.msra.gmra.mrb[4].mxu1 %v1573_v8  ;;  %v1014_v8 = vsub.s32 (!%p1240_p7), 1, %v1009_v4 }
  0x7c   : > { %v1015_v15 = vrot.slane (!%p1240_p7), %v1006_v5, %v1014_v8 }
 0x10d   : > { %v901_v39 = vpop.f32.mrb[0].mxu1 }
 0x10e   : > { %v903_v40 = vpop.f32.mrb[1].mxu1 }
 0x10f   : > { %v905_v41 = vpop.f32.mrb[2].mxu1 }
 0x110   : > { %v906_v42 = vpop.f32.mrb[3].mxu1 }
 0x12c   : > { %v860_v44 = vpop.f32.mrb[0].mxu0 }
 0x12d   : > { %v902_v45 = vadd.f32 %v901_v39, %v860_v44  ;;  %v862_v47 = vpop.f32.mrb[1].mxu0 }
 0x12e   : > { %v904_v48 = vadd.f32 %v903_v40, %v862_v47  ;;  %v864_v49 = vpop.f32.mrb[2].mxu0 }
 0x12f   : > { %v990_v50 = vadd.f32 %v902_v45, %v233_v43  ;;  %v865_v51 = vpop.f32.mrb[3].mxu0 }
 0x130   : > { %v991_v52 = vadd.f32 %v904_v48, %v234_v46 }
 0x131   : > { %994 = vst [vmem:[#allocation2] sm:$0xff] %v990_v50 }
 0x132   : > { %995 = vst [vmem:[#allocation2 + $0x8] sm:$0xff] %v991_v52 }
 0x138   : > { %v1002_v6 = vld [vmem:[#allocation2] sm:$0xff] (!%p1240_p7) }
 0x139   : > { %v1003_v11 = vld [vmem:[#allocation2 + $0x8] sm:$0xff] (!%p1240_p7)  ;;  %v1028_v18 = vadd.f32 (!%p1240_p7), %v1011_v14, %v1002_v6 }
 0x13a   : > { %v1029_v19 = vadd.f32 (!%p1240_p7), %v1015_v15, %v1003_v11 }
 0x13b   : > { %v1032_v22 = vmax.f32 (!%p1240_p7), %v1028_v18, 0.0 }
 0x13c   : > { %v1033_v3 = vmax.f32 (!%p1240_p7), %v1029_v19, 0.0 }
 0x13e   : > { %v1247_v25 = vpack.c.bf16 (!%p1240_p7), %v1033_v3, %v1032_v22 }
 0x140   : > { %1052 = vst [vmem:[%s1631_s3] sm:$0xff] (!%p1240_p7), %v1247_v25 }
 0x14c   : > { %v983_v55 = vpop.f32.mrb[4].mxu0 }
 0x14d   : > { %v942_v53 = vpop.f32.mrb[4].mxu1  ;;  %v985_v58 = vpop.f32.mrb[5].mxu0  ;;  %1001 = sbr.rel (%p1240_p7) target bundleno = 354 (0x162), region = 40 }
 0x14e   : > { %v984_v36 = vadd.f32 %v983_v55, %v942_v53  ;;  %v944_v56 = vpop.f32.mrb[5].mxu1  ;;  %v987_v61 = vpop.f32.mrb[6].mxu0 }
 0x14f   : > { %v986_v59 = vadd.f32 %v985_v58, %v944_v56  ;;  %v946_v60 = vpop.f32.mrb[6].mxu1  ;;  %v988_v0 = vpop.f32.mrb[7].mxu0 }
 0x150   : > { %v992_v62 = vadd.f32 %v984_v36, %v235_v54  ;;  %v947_v63 = vpop.f32.mrb[7].mxu1 }
 0x151   : > { %v993_v1 = vadd.f32 %v986_v59, %v236_v57 }
 0x152   : > { %996 = vst [vmem:[#allocation2 + $0x10] sm:$0xff] %v992_v62 }
 0x153   : > { %997 = vst [vmem:[#allocation2 + $0x18] sm:$0xff] %v993_v1 }
 0x159   : > { %v1004_v12 = vld [vmem:[#allocation2 + $0x10] sm:$0xff] }
 0x15a   : > { %v1005_v13 = vld [vmem:[#allocation2 + $0x18] sm:$0xff]  ;;  %v1030_v20 = vadd.f32 %v1019_v16, %v1004_v12 }
 0x15b   : > { %v1031_v21 = vadd.f32 %v1023_v17, %v1005_v13 }
 0x15c   : > { %v1034_v23 = vmax.f32 %v1030_v20, 0.0 }
 0x15d   : > { %v1035_v24 = vmax.f32 %v1031_v21, 0.0 }
 0x15f   : > { %v1248_v26 = vpack.c.bf16 %v1035_v24, %v1034_v23 }
 0x161   : > { %1053 = vst [vmem:[%s1631_s3 + $0x8] sm:$0xff] %v1248_v26 }
 0x162 PF: > { %s13_s14 = sadd.s32 1, %s1444_s14   ;;  %s1632_s12 = smov %s1440_s13 }
 0x163   : > { %p10_p8 = scmp.ge.s32.totalorder %s13_s14, 8   ;;  %s1633_s13 = smov %s1635_s15 }
 0x165   :  { %12 = sbr.rel (!%p10_p8) target bundleno = 2 (0x2), region = 73 }

// kernel: _lambda_.26
= control target key start
LH: loop header
LB: loop body
LE: loop exit
PB: predicated region body
PF: predicated region fallthrough
CT: control target
= control target key end

     0   :  { %s1822_s15 = smov 0   ;;  %s1824_s16 = smov 0   ;;  %s2022_s0 = inlined_call_operand.vmem [shape: bf16[8,4608], index: 0, kind: input, shape index: {}]   ;;  %s2023_s1 = inlined_call_operand.vmem [shape: bf16[4608,512], index: 1, kind: input, shape index: {}]   ;;  %s2024_s2 = inlined_call_operand.vmem [shape: f32[1,512], index: 2, kind: input, shape index: {}]   ;;  %s2025_s3 = inlined_call_operand.vmem [shape: bf16[8,512], index: 3, kind: input, shape index: {}]   ;;  %s2026_s4 = inlined_call_operand.vmem [shape: bf16[8,512], index: 4, kind: output, shape index: {}]  }
   0x1   :  { %s1826_s17 = smov 0  }
   0x2 LB: > { %s23_s18 = sadd.s32 1, %s1790_s16  ;;  %p1403_p0 = scmp.ge.s32.totalorder %s1794_s17, 1  ;;  %s1794_s17 = sphi %s1826_s17, %s14_s17   ;;  %s1790_s16 = sphi %s1824_s16, %s2028_s16   ;;  %s1786_s15 = sphi %s1822_s15, %s2027_s15  }
   0x3   : > { %p24_p1 = scmp.ge.s32.totalorder %s23_s18, 9  ;;  %p203_p2 = scmp.lt.s32.totalorder %s1794_s17, 10 }
   0x5   : > { %s2030_s18 = smov (%p24_p1, %s23_s18), 0  ;;  %p204_p3 = pnand %p1403_p0, %p203_p2 }
   0x6   : > { %s1404_s19 = sshll.u32 (!%p204_p3), %s1786_s15, 2  ;;  %s1406_s20 = sshll.u32 (!%p204_p3), %s1786_s15, 6 }
   0x7   : > { %207 = sbr.rel (%p204_p3) target bundleno = 388 (0x184), region = 36  ;;  %p247_p4 = scmp.lt.s32.totalorder (!%p204_p3), %s1404_s19, 35 }
   0x8   : > { %p255_p5 = scmp.lt.s32.totalorder (!%p204_p3), %s1406_s20, 575  ;;  %p1409_p6 = scmp.ne.s32.totalorder (!%p204_p3), %s1786_s15, 0 }
   0xe   : > { %s2032_s19 = smov (!%p247_p4, %s1404_s19), 35  ;;  %s2034_s20 = smov (!%p255_p5, %s1406_s20), 575 }
   0xf   : > { %s1405_s21 = sshll.u32 %s2032_s19, 2  ;;  %s1548_s25 = sshll.u32 %s2034_s20, 4  ;;  %v1796_v0 = vmov (!%p1409_p6), 0.0  }
  0x10   : > { %s1847_s24 = scalar_lea.vmem %s2022_s0, %s1405_s21  ;;  %s1852_s28 = scalar_lea.vmem %s2023_s1, %s1548_s25  ;;  %275 = vst [vmem:[#allocation2] sm:$0xff] (!%p1409_p6), %v1796_v0  ;;  %276 = vst [vmem:[#allocation2 + $0x8] sm:$0xff] (!%p1409_p6), %v1796_v0 }
  0x11   : > { %274 = sbr.rel (%p1409_p6) target bundleno = 24 (0x18), region = 40  ;;  %277 = vst [vmem:[#allocation2 + $0x10] sm:$0xff] (!%p1409_p6), %v1796_v0  ;;  %278 = vst [vmem:[#allocation2 + $0x18] sm:$0xff] (!%p1409_p6), %v1796_v0 }
  0x18 PF: > { %v1576_v1 = vld [vmem:[%s1852_s28 + $0x4] ss:$16 sps:$4 sm:$0xff]   ;;  %v1580_v3 = vld [vmem:[%s1852_s28] ss:$16 sps:$4 sm:$0xff]   ;;  %v284_v49 = vld [vmem:[%s1847_s24 + $0x8] sm:$0xff]  ;;  %p1542_p7 = scmp.ne.s32.totalorder %s1786_s15, 8 }
  0x19   : > { %v1578_v2 = vld [vmem:[%s1852_s28 + $0x204] ss:$16 sps:$4 sm:$0xff]   ;;  %1067 = vmatprep.subr.bf16.mxu0 %v1576_v1  ;;  %v1581_v4 = vld [vmem:[%s1852_s28 + $0x200] ss:$16 sps:$4 sm:$0xff]   ;;  %v1413_v52 = vcombine.high %v284_v49, %v284_v49 }
  0x1a   : > { %1108 = vmatprep.subr.bf16.mxu1 %v1578_v2  ;;  %v1582_v5 = vld [vmem:[%s1852_s28 + $0x24] ss:$16 sps:$4 sm:$0xff]   ;;  %1068 = vmatpush1.bf16.msra.mxu0 %v1580_v3  ;;  %v1586_v7 = vld [vmem:[%s1852_s28 + $0x20] ss:$16 sps:$4 sm:$0xff]  }
  0x1b   : > { %1109 = vmatpush1.bf16.msra.mxu1 %v1581_v4  ;;  %v1584_v6 = vld [vmem:[%s1852_s28 + $0x224] ss:$16 sps:$4 sm:$0xff]   ;;  %1069 = vmatprep.subr.bf16.mxu0 %v1582_v5  ;;  %v1587_v8 = vld [vmem:[%s1852_s28 + $0x220] ss:$16 sps:$4 sm:$0xff]   ;;  %v1678_v5 = vld [vmem:[%s1852_s28 + $0xc] ss:$16 sps:$4 sm:$0xff]  }
  0x1c   : > { %1110 = vmatprep.subr.bf16.mxu1 %v1584_v6  ;;  %v1588_v9 = vld [vmem:[%s1852_s28 + $0x44] ss:$16 sps:$4 sm:$0xff]   ;;  %v1592_v11 = vld [vmem:[%s1852_s28 + $0x40] ss:$16 sps:$4 sm:$0xff]   ;;  %1140 = vmatprep.mubr.bf16.mxu1 %v1413_v52  ;;  %v1681_v6 = vld [vmem:[%s1852_s28 + $0x20c] ss:$16 sps:$4 sm:$0xff]  }
  0x1d   : > { %v1590_v10 = vld [vmem:[%s1852_s28 + $0x244] ss:$16 sps:$4 sm:$0xff]   ;;  %v1593_v12 = vld [vmem:[%s1852_s28 + $0x240] ss:$16 sps:$4 sm:$0xff]  }
  0x1e   : > { %1070 = vmatpush1.bf16.msra.mxu0 %v1586_v7  ;;  %v1594_v13 = vld [vmem:[%s1852_s28 + $0x64] ss:$16 sps:$4 sm:$0xff]   ;;  %v1598_v15 = vld [vmem:[%s1852_s28 + $0x60] ss:$16 sps:$4 sm:$0xff]  }
  0x1f   : > { %1111 = vmatpush1.bf16.msra.mxu1 %v1587_v8  ;;  %1071 = vmatprep.subr.bf16.mxu0 %v1588_v9  ;;  %v1596_v14 = vld [vmem:[%s1852_s28 + $0x264] ss:$16 sps:$4 sm:$0xff]   ;;  %v1599_v16 = vld [vmem:[%s1852_s28 + $0x260] ss:$16 sps:$4 sm:$0xff]   ;;  %v1928_v8 = vcombine.low %v284_v49, %v284_v49  ;;  %v1676_v9 = vld [vmem:[%s1852_s28 + $0x8] ss:$16 sps:$4 sm:$0xff]  }
  0x20   : > { %1112 = vmatprep.subr.bf16.mxu1 %v1590_v10  ;;  %v1600_v17 = vld [vmem:[%s1852_s28 + $0x84] ss:$16 sps:$4 sm:$0xff]   ;;  %v1604_v19 = vld [vmem:[%s1852_s28 + $0x80] ss:$16 sps:$4 sm:$0xff]   ;;  %v1679_v10 = vld [vmem:[%s1852_s28 + $0x208] ss:$16 sps:$4 sm:$0xff]  }
  0x21   : > { %v1602_v18 = vld [vmem:[%s1852_s28 + $0x284] ss:$16 sps:$4 sm:$0xff]   ;;  %v1605_v20 = vld [vmem:[%s1852_s28 + $0x280] ss:$16 sps:$4 sm:$0xff]   ;;  %v1736_v49 = vld [vmem:[%s1852_s28 + $0x148] ss:$16 sps:$4 sm:$0xff]  }
  0x22   : > { %1072 = vmatpush1.bf16.msra.mxu0 %v1592_v11  ;;  %v1606_v21 = vld [vmem:[%s1852_s28 + $0xa4] ss:$16 sps:$4 sm:$0xff]   ;;  %v1610_v23 = vld [vmem:[%s1852_s28 + $0xa0] ss:$16 sps:$4 sm:$0xff]   ;;  %v1684_v11 = vld [vmem:[%s1852_s28 + $0x2c] ss:$16 sps:$4 sm:$0xff]  }
  0x23   : > { %1113 = vmatpush1.bf16.msra.mxu1 %v1593_v12  ;;  %1073 = vmatprep.subr.bf16.mxu0 %v1594_v13  ;;  %v1608_v22 = vld [vmem:[%s1852_s28 + $0x2a4] ss:$16 sps:$4 sm:$0xff]   ;;  %v1611_v24 = vld [vmem:[%s1852_s28 + $0x2a0] ss:$16 sps:$4 sm:$0xff]   ;;  %v1687_v12 = vld [vmem:[%s1852_s28 + $0x22c] ss:$16 sps:$4 sm:$0xff]  }
  0x24   : > { %1114 = vmatprep.subr.bf16.mxu1 %v1596_v14  ;;  %v1612_v25 = vld [vmem:[%s1852_s28 + $0xc4] ss:$16 sps:$4 sm:$0xff]   ;;  %v1616_v27 = vld [vmem:[%s1852_s28 + $0xc0] ss:$16 sps:$4 sm:$0xff]   ;;  %v1682_v13 = vld [vmem:[%s1852_s28 + $0x28] ss:$16 sps:$4 sm:$0xff]  }
  0x25   : > { %v1614_v26 = vld [vmem:[%s1852_s28 + $0x2c4] ss:$16 sps:$4 sm:$0xff]   ;;  %v1617_v28 = vld [vmem:[%s1852_s28 + $0x2c0] ss:$16 sps:$4 sm:$0xff]   ;;  %v1685_v14 = vld [vmem:[%s1852_s28 + $0x228] ss:$16 sps:$4 sm:$0xff]  }
  0x26   : > { %1074 = vmatpush1.bf16.msra.mxu0 %v1598_v15  ;;  %v1618_v29 = vld [vmem:[%s1852_s28 + $0xe4] ss:$16 sps:$4 sm:$0xff]   ;;  %v1622_v31 = vld [vmem:[%s1852_s28 + $0xe0] ss:$16 sps:$4 sm:$0xff]   ;;  %v1690_v15 = vld [vmem:[%s1852_s28 + $0x4c] ss:$16 sps:$4 sm:$0xff]  }
  0x27   : > { %1115 = vmatpush1.bf16.msra.mxu1 %v1599_v16  ;;  %1075 = vmatprep.subr.bf16.mxu0 %v1600_v17  ;;  %v1620_v30 = vld [vmem:[%s1852_s28 + $0x2e4] ss:$16 sps:$4 sm:$0xff]   ;;  %v1623_v32 = vld [vmem:[%s1852_s28 + $0x2e0] ss:$16 sps:$4 sm:$0xff]   ;;  %v1693_v16 = vld [vmem:[%s1852_s28 + $0x24c] ss:$16 sps:$4 sm:$0xff]  }
  0x28   : > { %1116 = vmatprep.subr.bf16.mxu1 %v1602_v18  ;;  %v1624_v33 = vld [vmem:[%s1852_s28 + $0x104] ss:$16 sps:$4 sm:$0xff]   ;;  %v1628_v35 = vld [vmem:[%s1852_s28 + $0x100] ss:$16 sps:$4 sm:$0xff]   ;;  %v1688_v17 = vld [vmem:[%s1852_s28 + $0x48] ss:$16 sps:$4 sm:$0xff]  }
  0x29   : > { %v1626_v34 = vld [vmem:[%s1852_s28 + $0x304] ss:$16 sps:$4 sm:$0xff]   ;;  %v1629_v36 = vld [vmem:[%s1852_s28 + $0x300] ss:$16 sps:$4 sm:$0xff]   ;;  %v1691_v18 = vld [vmem:[%s1852_s28 + $0x248] ss:$16 sps:$4 sm:$0xff]  }
  0x2a   : > { %1076 = vmatpush1.bf16.msra.mxu0 %v1604_v19  ;;  %v1630_v37 = vld [vmem:[%s1852_s28 + $0x124] ss:$16 sps:$4 sm:$0xff]   ;;  %v1634_v39 = vld [vmem:[%s1852_s28 + $0x120] ss:$16 sps:$4 sm:$0xff]   ;;  %v1696_v19 = vld [vmem:[%s1852_s28 + $0x6c] ss:$16 sps:$4 sm:$0xff]  }
  0x2b   : > { %1117 = vmatpush1.bf16.msra.mxu1 %v1605_v20  ;;  %1077 = vmatprep.subr.bf16.mxu0 %v1606_v21  ;;  %v1632_v38 = vld [vmem:[%s1852_s28 + $0x324] ss:$16 sps:$4 sm:$0xff]   ;;  %v1635_v40 = vld [vmem:[%s1852_s28 + $0x320] ss:$16 sps:$4 sm:$0xff]   ;;  %v1699_v20 = vld [vmem:[%s1852_s28 + $0x26c] ss:$16 sps:$4 sm:$0xff]  }
  0x2c   : > { %1118 = vmatprep.subr.bf16.mxu1 %v1608_v22  ;;  %v1636_v41 = vld [vmem:[%s1852_s28 + $0x144] ss:$16 sps:$4 sm:$0xff]   ;;  %v1640_v43 = vld [vmem:[%s1852_s28 + $0x140] ss:$16 sps:$4 sm:$0xff]   ;;  %v1694_v21 = vld [vmem:[%s1852_s28 + $0x68] ss:$16 sps:$4 sm:$0xff]  }
  0x2d   : > { %v1638_v42 = vld [vmem:[%s1852_s28 + $0x344] ss:$16 sps:$4 sm:$0xff]   ;;  %v1641_v44 = vld [vmem:[%s1852_s28 + $0x340] ss:$16 sps:$4 sm:$0xff]   ;;  %v1697_v22 = vld [vmem:[%s1852_s28 + $0x268] ss:$16 sps:$4 sm:$0xff]  }
  0x2e   : > { %1078 = vmatpush1.bf16.msra.mxu0 %v1610_v23  ;;  %v1642_v45 = vld [vmem:[%s1852_s28 + $0x164] ss:$16 sps:$4 sm:$0xff]   ;;  %v1646_v50 = vld [vmem:[%s1852_s28 + $0x160] ss:$16 sps:$4 sm:$0xff]   ;;  %v1702_v23 = vld [vmem:[%s1852_s28 + $0x8c] ss:$16 sps:$4 sm:$0xff]  }
  0x2f   : > { %1119 = vmatpush1.bf16.msra.mxu1 %v1611_v24  ;;  %1079 = vmatprep.subr.bf16.mxu0 %v1612_v25  ;;  %v1644_v46 = vld [vmem:[%s1852_s28 + $0x364] ss:$16 sps:$4 sm:$0xff]   ;;  %v1647_v51 = vld [vmem:[%s1852_s28 + $0x360] ss:$16 sps:$4 sm:$0xff]   ;;  %v1705_v24 = vld [vmem:[%s1852_s28 + $0x28c] ss:$16 sps:$4 sm:$0xff]  }
  0x30   : > { %1120 = vmatprep.subr.bf16.mxu1 %v1614_v26  ;;  %v283_v47 = vld [vmem:[%s1847_s24] sm:$0xff]  ;;  %v1700_v25 = vld [vmem:[%s1852_s28 + $0x88] ss:$16 sps:$4 sm:$0xff]  }
  0x31   : > { %v1902_v48 = vcombine.high %v283_v47, %v283_v47  ;;  %v1648_v53 = vld [vmem:[%s1852_s28 + $0x184] ss:$16 sps:$4 sm:$0xff]   ;;  %v1652_v55 = vld [vmem:[%s1852_s28 + $0x180] ss:$16 sps:$4 sm:$0xff]   ;;  %v1926_v7 = vcombine.low %v283_v47, %v283_v47  ;;  %v1703_v26 = vld [vmem:[%s1852_s28 + $0x288] ss:$16 sps:$4 sm:$0xff]  }
  0x32   : > { %1080 = vmatpush1.bf16.msra.mxu0 %v1616_v27  ;;  %v1650_v54 = vld [vmem:[%s1852_s28 + $0x384] ss:$16 sps:$4 sm:$0xff]   ;;  %v1653_v56 = vld [vmem:[%s1852_s28 + $0x380] ss:$16 sps:$4 sm:$0xff]   ;;  %v1708_v27 = vld [vmem:[%s1852_s28 + $0xac] ss:$16 sps:$4 sm:$0xff]  }
  0x33   : > { %1121 = vmatpush1.bf16.msra.mxu1 %v1617_v28  ;;  %1081 = vmatprep.subr.bf16.mxu0 %v1618_v29  ;;  %v1654_v57 = vld [vmem:[%s1852_s28 + $0x1a4] ss:$16 sps:$4 sm:$0xff]   ;;  %v1658_v59 = vld [vmem:[%s1852_s28 + $0x1a0] ss:$16 sps:$4 sm:$0xff]   ;;  %v1711_v28 = vld [vmem:[%s1852_s28 + $0x2ac] ss:$16 sps:$4 sm:$0xff]  }
  0x34   : > { %1122 = vmatprep.subr.bf16.mxu1 %v1620_v30  ;;  %1099 = vmatprep.mubr.bf16.mxu0 %v1902_v48  ;;  %v1656_v58 = vld [vmem:[%s1852_s28 + $0x3a4] ss:$16 sps:$4 sm:$0xff]   ;;  %v1659_v60 = vld [vmem:[%s1852_s28 + $0x3a0] ss:$16 sps:$4 sm:$0xff]   ;;  %v1706_v29 = vld [vmem:[%s1852_s28 + $0xa8] ss:$16 sps:$4 sm:$0xff]  }
  0x35   : > { %v1660_v61 = vld [vmem:[%s1852_s28 + $0x1c4] ss:$16 sps:$4 sm:$0xff]   ;;  %v1664_v63 = vld [vmem:[%s1852_s28 + $0x1c0] ss:$16 sps:$4 sm:$0xff]   ;;  %v1709_v30 = vld [vmem:[%s1852_s28 + $0x2a8] ss:$16 sps:$4 sm:$0xff]  }
  0x36   : > { %1082 = vmatpush1.bf16.msra.mxu0 %v1622_v31  ;;  %v1662_v62 = vld [vmem:[%s1852_s28 + $0x3c4] ss:$16 sps:$4 sm:$0xff]   ;;  %v1665_v0 = vld [vmem:[%s1852_s28 + $0x3c0] ss:$16 sps:$4 sm:$0xff]   ;;  %v1714_v31 = vld [vmem:[%s1852_s28 + $0xcc] ss:$16 sps:$4 sm:$0xff]  }
  0x37   : > { %1123 = vmatpush1.bf16.msra.mxu1 %v1623_v32  ;;  %1083 = vmatprep.subr.bf16.mxu0 %v1624_v33  ;;  %v1666_v1 = vld [vmem:[%s1852_s28 + $0x1e4] ss:$16 sps:$4 sm:$0xff]   ;;  %v1670_v3 = vld [vmem:[%s1852_s28 + $0x1e0] ss:$16 sps:$4 sm:$0xff]   ;;  %v1717_v32 = vld [vmem:[%s1852_s28 + $0x2cc] ss:$16 sps:$4 sm:$0xff]  }
  0x38   : > { %1124 = vmatprep.subr.bf16.mxu1 %v1626_v34  ;;  %v1668_v2 = vld [vmem:[%s1852_s28 + $0x3e4] ss:$16 sps:$4 sm:$0xff]   ;;  %v1671_v4 = vld [vmem:[%s1852_s28 + $0x3e0] ss:$16 sps:$4 sm:$0xff]   ;;  %v1712_v33 = vld [vmem:[%s1852_s28 + $0xc8] ss:$16 sps:$4 sm:$0xff]  }
  0x39   : > { %v1715_v34 = vld [vmem:[%s1852_s28 + $0x2c8] ss:$16 sps:$4 sm:$0xff]   ;;  %v1738_v47 = vld [vmem:[%s1852_s28 + $0x14c] ss:$16 sps:$4 sm:$0xff]  }
  0x3a   : > { %1084 = vmatpush1.bf16.msra.mxu0 %v1628_v35  ;;  %v1720_v35 = vld [vmem:[%s1852_s28 + $0xec] ss:$16 sps:$4 sm:$0xff]  }
  0x3b   : > { %1125 = vmatpush1.bf16.msra.mxu1 %v1629_v36  ;;  %1085 = vmatprep.subr.bf16.mxu0 %v1630_v37  ;;  %v1723_v36 = vld [vmem:[%s1852_s28 + $0x2ec] ss:$16 sps:$4 sm:$0xff]   ;;  %v1718_v37 = vld [vmem:[%s1852_s28 + $0xe8] ss:$16 sps:$4 sm:$0xff]  }
  0x3c   : > { %1126 = vmatprep.subr.bf16.mxu1 %v1632_v38  ;;  %v1721_v38 = vld [vmem:[%s1852_s28 + $0x2e8] ss:$16 sps:$4 sm:$0xff]  }
  0x3e   : > { %1086 = vmatpush1.bf16.msra.mxu0 %v1634_v39  ;;  %v1726_v39 = vld [vmem:[%s1852_s28 + $0x10c] ss:$16 sps:$4 sm:$0xff]  }
  0x3f   : > { %1127 = vmatpush1.bf16.msra.mxu1 %v1635_v40  ;;  %1087 = vmatprep.subr.bf16.mxu0 %v1636_v41  ;;  %v1729_v40 = vld [vmem:[%s1852_s28 + $0x30c] ss:$16 sps:$4 sm:$0xff]   ;;  %v1724_v41 = vld [vmem:[%s1852_s28 + $0x108] ss:$16 sps:$4 sm:$0xff]  }
  0x40   : > { %1128 = vmatprep.subr.bf16.mxu1 %v1638_v42  ;;  %v1727_v42 = vld [vmem:[%s1852_s28 + $0x308] ss:$16 sps:$4 sm:$0xff]  }
  0x42   : > { %1088 = vmatpush1.bf16.msra.mxu0 %v1640_v43  ;;  %v1732_v43 = vld [vmem:[%s1852_s28 + $0x12c] ss:$16 sps:$4 sm:$0xff]  }
  0x43   : > { %1129 = vmatpush1.bf16.msra.mxu1 %v1641_v44  ;;  %1089 = vmatprep.subr.bf16.mxu0 %v1642_v45  ;;  %v1735_v44 = vld [vmem:[%s1852_s28 + $0x32c] ss:$16 sps:$4 sm:$0xff]   ;;  %v1730_v45 = vld [vmem:[%s1852_s28 + $0x128] ss:$16 sps:$4 sm:$0xff]  }
  0x44   : > { %1130 = vmatprep.subr.bf16.mxu1 %v1644_v46  ;;  %v1733_v46 = vld [vmem:[%s1852_s28 + $0x328] ss:$16 sps:$4 sm:$0xff]  }
  0x46   : > { %1090 = vmatpush1.bf16.msra.mxu0 %v1646_v50  ;;  %v1739_v50 = vld [vmem:[%s1852_s28 + $0x348] ss:$16 sps:$4 sm:$0xff]  }
  0x47   : > { %1131 = vmatpush1.bf16.msra.mxu1 %v1647_v51  ;;  %1091 = vmatprep.subr.bf16.mxu0 %v1648_v53  ;;  %v1744_v51 = vld [vmem:[%s1852_s28 + $0x16c] ss:$16 sps:$4 sm:$0xff]   ;;  %v1742_v53 = vld [vmem:[%s1852_s28 + $0x168] ss:$16 sps:$4 sm:$0xff]  }
  0x48   : > { %1132 = vmatprep.subr.bf16.mxu1 %v1650_v54  ;;  %v1745_v54 = vld [vmem:[%s1852_s28 + $0x368] ss:$16 sps:$4 sm:$0xff]  }
  0x4a   : > { %1092 = vmatpush1.bf16.msra.mxu0 %v1652_v55  ;;  %v1750_v55 = vld [vmem:[%s1852_s28 + $0x18c] ss:$16 sps:$4 sm:$0xff]  }
  0x4b   : > { %1133 = vmatpush1.bf16.msra.mxu1 %v1653_v56  ;;  %1093 = vmatprep.subr.bf16.mxu0 %v1654_v57  ;;  %v1753_v56 = vld [vmem:[%s1852_s28 + $0x38c] ss:$16 sps:$4 sm:$0xff]   ;;  %v1748_v57 = vld [vmem:[%s1852_s28 + $0x188] ss:$16 sps:$4 sm:$0xff]  }
  0x4c   : > { %1134 = vmatprep.subr.bf16.mxu1 %v1656_v58  ;;  %v1751_v58 = vld [vmem:[%s1852_s28 + $0x388] ss:$16 sps:$4 sm:$0xff]  }
  0x4e   : > { %1094 = vmatpush1.bf16.msra.mxu0 %v1658_v59  ;;  %v1756_v59 = vld [vmem:[%s1852_s28 + $0x1ac] ss:$16 sps:$4 sm:$0xff]  }
  0x4f   : > { %1135 = vmatpush1.bf16.msra.mxu1 %v1659_v60  ;;  %1095 = vmatprep.subr.bf16.mxu0 %v1660_v61  ;;  %v1759_v60 = vld [vmem:[%s1852_s28 + $0x3ac] ss:$16 sps:$4 sm:$0xff]   ;;  %v1754_v61 = vld [vmem:[%s1852_s28 + $0x1a8] ss:$16 sps:$4 sm:$0xff]  }
  0x50   : > { %1136 = vmatprep.subr.bf16.mxu1 %v1662_v62  ;;  %v1757_v62 = vld [vmem:[%s1852_s28 + $0x3a8] ss:$16 sps:$4 sm:$0xff]  }
  0x52   : > { %1096 = vmatpush1.bf16.msra.mxu0 %v1664_v63  ;;  %v1762_v63 = vld [vmem:[%s1852_s28 + $0x1cc] ss:$16 sps:$4 sm:$0xff]  }
  0x53   : > { %1137 = vmatpush1.bf16.msra.mxu1 %v1665_v0  ;;  %1097 = vmatprep.subr.bf16.mxu0 %v1666_v1  ;;  %v1765_v0 = vld [vmem:[%s1852_s28 + $0x3cc] ss:$16 sps:$4 sm:$0xff]   ;;  %v1760_v1 = vld [vmem:[%s1852_s28 + $0x1c8] ss:$16 sps:$4 sm:$0xff]  }
  0x54   : > { %1138 = vmatprep.subr.bf16.mxu1 %v1668_v2  ;;  %v1763_v2 = vld [vmem:[%s1852_s28 + $0x3c8] ss:$16 sps:$4 sm:$0xff]  }
  0x56   : > { %1098 = vmatpush1.bf16.msra.mxu0 %v1670_v3  ;;  %v1768_v3 = vld [vmem:[%s1852_s28 + $0x1ec] ss:$16 sps:$4 sm:$0xff]  }
  0x57   : > { %1139 = vmatpush1.bf16.msra.mxu1 %v1671_v4  ;;  %1149 = vmatprep.subr.bf16.mxu0 %v1678_v5  ;;  %v1771_v4 = vld [vmem:[%s1852_s28 + $0x3ec] ss:$16 sps:$4 sm:$0xff]   ;;  %v1766_v5 = vld [vmem:[%s1852_s28 + $0x1e8] ss:$16 sps:$4 sm:$0xff]  }
  0x58   : > { %1190 = vmatprep.subr.bf16.mxu1 %v1681_v6  ;;  %v1769_v6 = vld [vmem:[%s1852_s28 + $0x3e8] ss:$16 sps:$4 sm:$0xff]  }
  0x59   : > { %1100 = vmatmul.mubr.bf16.vlgmr.msra.gmra.mrb[0].mxu0 %v1926_v7 }
  0x5a   : > { %1141 = vmatmul.mubr.bf16.vlgmr.msra.gmra.mrb[0].mxu1 %v1928_v8  ;;  %1150 = vmatpush1.bf16.msra.mxu0 %v1676_v9 }
  0x5b   : > { %1191 = vmatpush1.bf16.msra.mxu1 %v1679_v10  ;;  %1151 = vmatprep.subr.bf16.mxu0 %v1684_v11  ;;  %v279_v10 = vld [vmem:[#allocation2] sm:$0xff] }
  0x5c   : > { %1192 = vmatprep.subr.bf16.mxu1 %v1687_v12  ;;  %1181 = vmatprep.mubr.bf16.mxu0 %v1902_v48  ;;  %v1741_v48 = vld [vmem:[%s1852_s28 + $0x34c] ss:$16 sps:$4 sm:$0xff]  }
  0x5d   : > { %1222 = vmatprep.mubr.bf16.mxu1 %v1413_v52  ;;  %v1747_v52 = vld [vmem:[%s1852_s28 + $0x36c] ss:$16 sps:$4 sm:$0xff]  }
  0x5e   : > { %1152 = vmatpush1.bf16.msra.mxu0 %v1682_v13 }
  0x5f   : > { %1193 = vmatpush1.bf16.msra.mxu1 %v1685_v14  ;;  %1153 = vmatprep.subr.bf16.mxu0 %v1690_v15  ;;  %v280_v14 = vld [vmem:[#allocation2 + $0x8] sm:$0xff] }
  0x60   : > { %1194 = vmatprep.subr.bf16.mxu1 %v1693_v16 }
  0x62   : > { %1154 = vmatpush1.bf16.msra.mxu0 %v1688_v17 }
  0x63   : > { %1195 = vmatpush1.bf16.msra.mxu1 %v1691_v18  ;;  %1155 = vmatprep.subr.bf16.mxu0 %v1696_v19 }
  0x64   : > { %1196 = vmatprep.subr.bf16.mxu1 %v1699_v20 }
  0x66   : > { %1156 = vmatpush1.bf16.msra.mxu0 %v1694_v21 }
  0x67   : > { %1197 = vmatpush1.bf16.msra.mxu1 %v1697_v22  ;;  %1157 = vmatprep.subr.bf16.mxu0 %v1702_v23 }
  0x68   : > { %1198 = vmatprep.subr.bf16.mxu1 %v1705_v24 }
  0x6a   : > { %1158 = vmatpush1.bf16.msra.mxu0 %v1700_v25 }
  0x6b   : > { %1199 = vmatpush1.bf16.msra.mxu1 %v1703_v26  ;;  %1159 = vmatprep.subr.bf16.mxu0 %v1708_v27  ;;  %v282_v26 = vld [vmem:[#allocation2 + $0x18] sm:$0xff] }
  0x6c   : > { %1200 = vmatprep.subr.bf16.mxu1 %v1711_v28 }
  0x6e   : > { %1160 = vmatpush1.bf16.msra.mxu0 %v1706_v29 }
  0x6f   : > { %1201 = vmatpush1.bf16.msra.mxu1 %v1709_v30  ;;  %1161 = vmatprep.subr.bf16.mxu0 %v1714_v31 }
  0x70   : > { %1202 = vmatprep.subr.bf16.mxu1 %v1717_v32 }
  0x72   : > { %1162 = vmatpush1.bf16.msra.mxu0 %v1712_v33 }
  0x73   : > { %1203 = vmatpush1.bf16.msra.mxu1 %v1715_v34  ;;  %1163 = vmatprep.subr.bf16.mxu0 %v1720_v35  ;;  %v1249_v35 = vlaneseq (!%p1542_p7) }
  0x74   : > { %1204 = vmatprep.subr.bf16.mxu1 %v1723_v36 }
  0x75   : > { %v1250_v36 = vshrl.u32 (!%p1542_p7), %v1249_v35, 7 }
  0x76   : > { %1164 = vmatpush1.bf16.msra.mxu0 %v1718_v37  ;;  %v1273_v37 = vld [vmem:[%s2025_s3] sm:$0xff] (!%p1542_p7) }
  0x77   : > { %1205 = vmatpush1.bf16.msra.mxu1 %v1721_v38  ;;  %1165 = vmatprep.subr.bf16.mxu0 %v1726_v39  ;;  %v1274_v38 = vld [vmem:[%s2025_s3 + $0x8] sm:$0xff] (!%p1542_p7)  ;;  %v1247_v39 = vld [vmem:[%s2024_s2] sm:$0xf] (!%p1542_p7) }
  0x78   : > { %1206 = vmatprep.subr.bf16.mxu1 %v1729_v40 }
  0x7a   : > { %1166 = vmatpush1.bf16.msra.mxu0 %v1724_v41  ;;  %v1251_v41 = vsub.s32 (!%p1542_p7), 0, %v1250_v36 }
  0x7b   : > { %1207 = vmatpush1.bf16.msra.mxu1 %v1727_v42  ;;  %1167 = vmatprep.subr.bf16.mxu0 %v1732_v43  ;;  %v1255_v42 = vsub.s32 (!%p1542_p7), 1, %v1250_v36  ;;  %v1259_v43 = vsub.s32 (!%p1542_p7), 2, %v1250_v36 }
  0x7c   : > { %1208 = vmatprep.subr.bf16.mxu1 %v1735_v44  ;;  %v1263_v44 = vsub.s32 (!%p1542_p7), 3, %v1250_v36 }
  0x7e   : > { %1168 = vmatpush1.bf16.msra.mxu0 %v1730_v45 }
  0x7f   : > { %1209 = vmatpush1.bf16.msra.mxu1 %v1733_v46  ;;  %1169 = vmatprep.subr.bf16.mxu0 %v1738_v47  ;;  %v1275_v46 = vunpack.c.l.bf16 (!%p1542_p7), %v1273_v37  ;;  %v1276_v47 = vunpack.c.h.bf16 (!%p1542_p7), %v1273_v37 }
  0x80   : > { %1210 = vmatprep.subr.bf16.mxu1 %v1741_v48 }
  0x82   : > { %1170 = vmatpush1.bf16.msra.mxu0 %v1736_v49 }
  0x83   : > { %1211 = vmatpush1.bf16.msra.mxu1 %v1739_v50  ;;  %1171 = vmatprep.subr.bf16.mxu0 %v1744_v51  ;;  %v1277_v50 = vunpack.c.l.bf16 (!%p1542_p7), %v1274_v38  ;;  %v1278_v51 = vunpack.c.h.bf16 (!%p1542_p7), %v1274_v38 }
  0x84   : > { %1212 = vmatprep.subr.bf16.mxu1 %v1747_v52  ;;  %v1252_v52 = vrot.slane (!%p1542_p7), %v1247_v39, %v1251_v41 }
  0x86   : > { %1172 = vmatpush1.bf16.msra.mxu0 %v1742_v53  ;;  %v1256_v53 = vrot.slane (!%p1542_p7), %v1247_v39, %v1255_v42 }
  0x87   : > { %1213 = vmatpush1.bf16.msra.mxu1 %v1745_v54  ;;  %1173 = vmatprep.subr.bf16.mxu0 %v1750_v55  ;;  %v1260_v54 = vrot.slane (!%p1542_p7), %v1247_v39, %v1259_v43  ;;  %v1264_v55 = vrot.slane (!%p1542_p7), %v1247_v39, %v1263_v44 }
  0x88   : > { %1214 = vmatprep.subr.bf16.mxu1 %v1753_v56 }
  0x8a   : > { %1174 = vmatpush1.bf16.msra.mxu0 %v1748_v57 }
  0x8b   : > { %1215 = vmatpush1.bf16.msra.mxu1 %v1751_v58  ;;  %1175 = vmatprep.subr.bf16.mxu0 %v1756_v59 }
  0x8c   : > { %1216 = vmatprep.subr.bf16.mxu1 %v1759_v60 }
  0x8e   : > { %1176 = vmatpush1.bf16.msra.mxu0 %v1754_v61 }
  0x8f   : > { %1217 = vmatpush1.bf16.msra.mxu1 %v1757_v62  ;;  %1177 = vmatprep.subr.bf16.mxu0 %v1762_v63 }
  0x90   : > { %1218 = vmatprep.subr.bf16.mxu1 %v1765_v0 }
  0x92   : > { %1178 = vmatpush1.bf16.msra.mxu0 %v1760_v1 }
  0x93   : > { %1219 = vmatpush1.bf16.msra.mxu1 %v1763_v2  ;;  %1179 = vmatprep.subr.bf16.mxu0 %v1768_v3 }
  0x94   : > { %1220 = vmatprep.subr.bf16.mxu1 %v1771_v4 }
  0x96   : > { %1180 = vmatpush1.bf16.msra.mxu0 %v1766_v5 }
  0x97   : > { %1221 = vmatpush1.bf16.msra.mxu1 %v1769_v6 }
  0x99   : > { %1182 = vmatmul.mubr.bf16.vlgmr.msra.gmra.mrb[4].mxu0 %v1926_v7  ;;  %v281_v7 = vld [vmem:[#allocation2 + $0x10] sm:$0xff] }
  0x9a   : > { %1223 = vmatmul.mubr.bf16.vlgmr.msra.gmra.mrb[4].mxu1 %v1928_v8 }
 0x12c   : > { %v1101_v9 = vpop.f32.mrb[0].mxu0 }
 0x12d   : > { %v1142_v11 = vpop.f32.mrb[0].mxu1  ;;  %v1103_v13 = vpop.f32.mrb[1].mxu0 }
 0x12e   : > { %v1143_v12 = vadd.f32 %v1142_v11, %v1101_v9  ;;  %v1144_v15 = vpop.f32.mrb[1].mxu1  ;;  %v1105_v17 = vpop.f32.mrb[2].mxu0 }
 0x12f   : > { %v1145_v16 = vadd.f32 %v1144_v15, %v1103_v13  ;;  %v1146_v18 = vpop.f32.mrb[2].mxu1  ;;  %v1106_v20 = vpop.f32.mrb[3].mxu0 }
 0x130   : > { %v1231_v19 = vadd.f32 %v1143_v12, %v279_v10  ;;  %v1147_v21 = vpop.f32.mrb[3].mxu1 }
 0x131   : > { %v1232_v22 = vadd.f32 %v1145_v16, %v280_v14 }
 0x132   : > { %1235 = vst [vmem:[#allocation2] sm:$0xff] %v1231_v19 }
 0x133   : > { %1236 = vst [vmem:[#allocation2 + $0x8] sm:$0xff] %v1232_v22 }
 0x139   : > { %v1243_v40 = vld [vmem:[#allocation2] sm:$0xff] (!%p1542_p7) }
 0x13a   : > { %v1244_v45 = vld [vmem:[#allocation2 + $0x8] sm:$0xff] (!%p1542_p7)  ;;  %v1269_v56 = vadd.f32 (!%p1542_p7), %v1252_v52, %v1243_v40 }
 0x13b   : > { %v1270_v57 = vadd.f32 (!%p1542_p7), %v1256_v53, %v1244_v45 }
 0x13c   : > { %v1279_v60 = vadd.f32 (!%p1542_p7), %v1275_v46, %v1269_v56 }
 0x13d   : > { %v1280_v61 = vadd.f32 (!%p1542_p7), %v1276_v47, %v1270_v57 }
 0x13e   : > { %v1283_v0 = vmax.f32 (!%p1542_p7), %v1279_v60, 0.0 }
 0x13f   : > { %v1284_v1 = vmax.f32 (!%p1542_p7), %v1280_v61, 0.0 }
 0x141   : > { %v1549_v4 = vpack.c.bf16 (!%p1542_p7), %v1284_v1, %v1283_v0 }
 0x143   : > { %1303 = vst [vmem:[%s2026_s4] sm:$0xff] (!%p1542_p7), %v1549_v4 }
 0x16c   : > { %v1183_v23 = vpop.f32.mrb[4].mxu0 }
 0x16d   : > { %v1224_v24 = vpop.f32.mrb[4].mxu1  ;;  %v1185_v25 = vpop.f32.mrb[5].mxu0  ;;  %1242 = sbr.rel (%p1542_p7) target bundleno = 388 (0x184), region = 44 }
 0x16e   : > { %v1225_v8 = vadd.f32 %v1224_v24, %v1183_v23  ;;  %v1226_v27 = vpop.f32.mrb[5].mxu1  ;;  %v1187_v29 = vpop.f32.mrb[6].mxu0 }
 0x16f   : > { %v1227_v28 = vadd.f32 %v1226_v27, %v1185_v25  ;;  %v1228_v30 = vpop.f32.mrb[6].mxu1  ;;  %v1188_v32 = vpop.f32.mrb[7].mxu0 }
 0x170   : > { %v1233_v31 = vadd.f32 %v1225_v8, %v281_v7  ;;  %v1229_v33 = vpop.f32.mrb[7].mxu1 }
 0x171   : > { %v1234_v34 = vadd.f32 %v1227_v28, %v282_v26 }
 0x172   : > { %1237 = vst [vmem:[#allocation2 + $0x10] sm:$0xff] %v1233_v31 }
 0x173   : > { %1238 = vst [vmem:[#allocation2 + $0x18] sm:$0xff] %v1234_v34 }
 0x179   : > { %v1245_v48 = vld [vmem:[#allocation2 + $0x10] sm:$0xff] }
 0x17a   : > { %v1246_v49 = vld [vmem:[#allocation2 + $0x18] sm:$0xff]  ;;  %v1271_v58 = vadd.f32 %v1260_v54, %v1245_v48 }
 0x17b   : > { %v1272_v59 = vadd.f32 %v1264_v55, %v1246_v49 }
 0x17c   : > { %v1281_v62 = vadd.f32 %v1277_v50, %v1271_v58 }
 0x17d   : > { %v1282_v63 = vadd.f32 %v1278_v51, %v1272_v59 }
 0x17e   : > { %v1285_v2 = vmax.f32 %v1281_v62, 0.0 }
 0x17f   : > { %v1286_v3 = vmax.f32 %v1282_v63, 0.0 }
 0x181   : > { %v1550_v5 = vpack.c.bf16 %v1286_v3, %v1285_v2 }
 0x183   : > { %1304 = vst [vmem:[%s2026_s4 + $0x8] sm:$0xff] %v1550_v5 }
 0x184 PF: > { %s14_s17 = sadd.s32 1, %s1794_s17   ;;  %s2027_s15 = smov %s1790_s16 }
 0x185   : > { %p11_p8 = scmp.ge.s32.totalorder %s14_s17, 11   ;;  %s2028_s16 = smov %s2030_s18 }
 0x187   :  { %13 = sbr.rel (!%p11_p8) target bundleno = 2 (0x2), region = 80 }

// kernel: _lambda_.27
= control target key start
LH: loop header
LB: loop body
LE: loop exit
PB: predicated region body
PF: predicated region fallthrough
CT: control target
= control target key end

     0   :  { %v94_v51 = vlaneseq  ;;  %s696_s0 = inlined_call_operand.vmem [shape: bf16[2,1,512], index: 0, kind: input, shape index: {}]   ;;  %s697_s1 = inlined_call_operand.vmem [shape: f32[512,10], index: 1, kind: input, shape index: {}]   ;;  %s698_s2 = inlined_call_operand.vmem [shape: f32[1,10], index: 2, kind: input, shape index: {}]   ;;  %s699_s3 = inlined_call_operand.hbm [shape: f32[2,10], index: 3, kind: output, shape index: {}]  }
   0x1   :  { %v37_v0 = vld [vmem:[%s697_s1 + $0x80] sm:$0xff]  ;;  %v38_v1 = vld [vmem:[%s697_s1 + $0x88] sm:$0xff]  ;;  %v39_v11 = vld [vmem:[%s697_s1 + $0x90] sm:$0xff] }
   0x2   :  { %v21_v2 = vld [vmem:[%s697_s1] sm:$0xff]  ;;  %v366_v3 = vpack.c.bf16 %v38_v1, %v37_v0  ;;  %v22_v4 = vld [vmem:[%s697_s1 + $0x8] sm:$0xff]  ;;  %v40_v13 = vld [vmem:[%s697_s1 + $0x98] sm:$0xff]  ;;  %v608_v0 = vshrl.u32 %v94_v51, 7 }
   0x3   :  { %v69_v5 = vld [vmem:[%s697_s1 + $0x180] sm:$0xff]  ;;  %v70_v6 = vld [vmem:[%s697_s1 + $0x188] sm:$0xff]  ;;  %v368_v7 = vpack.c.bf16 %v22_v4, %v21_v2  ;;  %v23_v14 = vld [vmem:[%s697_s1 + $0x10] sm:$0xff]  ;;  %v370_v16 = vpack.c.bf16 %v40_v13, %v39_v11 }
   0x4   :  { %v398_v8 = vpack.c.bf16 %v70_v6, %v69_v5  ;;  %v53_v9 = vld [vmem:[%s697_s1 + $0x100] sm:$0xff]  ;;  %v54_v10 = vld [vmem:[%s697_s1 + $0x108] sm:$0xff]  ;;  %367 = vmatprep.subr.bf16.mxu0 %v366_v3  ;;  %v24_v15 = vld [vmem:[%s697_s1 + $0x18] sm:$0xff] }
   0x5   :  { %v400_v12 = vpack.c.bf16 %v54_v10, %v53_v9  ;;  %369 = vmatpush3.bf16.msra.mxu0 %v368_v7  ;;  %v372_v17 = vpack.c.bf16 %v24_v15, %v23_v14  ;;  %v71_v18 = vld [vmem:[%s697_s1 + $0x190] sm:$0xff]  ;;  %v72_v19 = vld [vmem:[%s697_s1 + $0x198] sm:$0xff]  ;;  %v41_v23 = vld [vmem:[%s697_s1 + $0xa0] sm:$0xff] }
   0x6   :  { %399 = vmatprep.subr.bf16.mxu1 %v398_v8  ;;  %v55_v20 = vld [vmem:[%s697_s1 + $0x110] sm:$0xff]  ;;  %v402_v21 = vpack.c.bf16 %v72_v19, %v71_v18  ;;  %v56_v22 = vld [vmem:[%s697_s1 + $0x118] sm:$0xff]  ;;  %v42_v24 = vld [vmem:[%s697_s1 + $0xa8] sm:$0xff]  ;;  %371 = vmatprep.subr.bf16.mxu0 %v370_v16  ;;  %v100_v16 = vsub.s32 2, %v608_v0 }
   0x7   :  { %401 = vmatpush3.bf16.msra.mxu1 %v400_v12  ;;  %v404_v25 = vpack.c.bf16 %v56_v22, %v55_v20  ;;  %v374_v26 = vpack.c.bf16 %v42_v24, %v41_v23  ;;  %v25_v27 = vld [vmem:[%s697_s1 + $0x20] sm:$0xff]  ;;  %v26_v28 = vld [vmem:[%s697_s1 + $0x28] sm:$0xff]  ;;  %v43_v35 = vld [vmem:[%s697_s1 + $0xb0] sm:$0xff] }
   0x8   :  { %v73_v29 = vld [vmem:[%s697_s1 + $0x1a0] sm:$0xff]  ;;  %403 = vmatprep.subr.bf16.mxu1 %v402_v21  ;;  %v74_v30 = vld [vmem:[%s697_s1 + $0x1a8] sm:$0xff]  ;;  %v376_v33 = vpack.c.bf16 %v26_v28, %v25_v27  ;;  %v44_v36 = vld [vmem:[%s697_s1 + $0xb8] sm:$0xff]  ;;  %v108_v21 = vsub.s32 6, %v608_v0 }
   0x9   :  { %v57_v31 = vld [vmem:[%s697_s1 + $0x120] sm:$0xff]  ;;  %v58_v32 = vld [vmem:[%s697_s1 + $0x128] sm:$0xff]  ;;  %373 = vmatpush3.bf16.msra.mxu0 %v372_v17  ;;  %v406_v34 = vpack.c.bf16 %v74_v30, %v73_v29  ;;  %v27_v37 = vld [vmem:[%s697_s1 + $0x30] sm:$0xff]  ;;  %v378_v39 = vpack.c.bf16 %v44_v36, %v43_v35 }
   0xa   :  { %375 = vmatprep.subr.bf16.mxu0 %v374_v26  ;;  %v408_v38 = vpack.c.bf16 %v58_v32, %v57_v31  ;;  %v28_v40 = vld [vmem:[%s697_s1 + $0x38] sm:$0xff]  ;;  %v75_v41 = vld [vmem:[%s697_s1 + $0x1b0] sm:$0xff]  ;;  %v45_v46 = vld [vmem:[%s697_s1 + $0xc0] sm:$0xff] }
   0xb   :  { %405 = vmatpush3.bf16.msra.mxu1 %v404_v25  ;;  %v76_v42 = vld [vmem:[%s697_s1 + $0x1b8] sm:$0xff]  ;;  %v59_v44 = vld [vmem:[%s697_s1 + $0x130] sm:$0xff]  ;;  %v46_v47 = vld [vmem:[%s697_s1 + $0xc8] sm:$0xff]  ;;  %v380_v48 = vpack.c.bf16 %v28_v40, %v27_v37 }
   0xc   :  { %407 = vmatprep.subr.bf16.mxu1 %v406_v34  ;;  %v410_v43 = vpack.c.bf16 %v76_v42, %v75_v41  ;;  %v60_v45 = vld [vmem:[%s697_s1 + $0x138] sm:$0xff]  ;;  %v77_v49 = vld [vmem:[%s697_s1 + $0x1c0] sm:$0xff]  ;;  %v78_v50 = vld [vmem:[%s697_s1 + $0x1c8] sm:$0xff]  ;;  %v382_v53 = vpack.c.bf16 %v46_v47, %v45_v46 }
   0xd   :  { %377 = vmatpush3.bf16.msra.mxu0 %v376_v33  ;;  %v412_v52 = vpack.c.bf16 %v60_v45, %v59_v44  ;;  %v29_v54 = vld [vmem:[%s697_s1 + $0x40] sm:$0xff]  ;;  %v30_v55 = vld [vmem:[%s697_s1 + $0x48] sm:$0xff]  ;;  %v414_v57 = vpack.c.bf16 %v78_v50, %v77_v49  ;;  %v47_v59 = vld [vmem:[%s697_s1 + $0xd0] sm:$0xff] }
   0xe   :  { %379 = vmatprep.subr.bf16.mxu0 %v378_v39  ;;  %v61_v56 = vld [vmem:[%s697_s1 + $0x140] sm:$0xff]  ;;  %v62_v58 = vld [vmem:[%s697_s1 + $0x148] sm:$0xff]  ;;  %v48_v60 = vld [vmem:[%s697_s1 + $0xd8] sm:$0xff]  ;;  %v384_v63 = vpack.c.bf16 %v30_v55, %v29_v54 }
   0xf   :  { %409 = vmatpush3.bf16.msra.mxu1 %v408_v38  ;;  %v79_v61 = vld [vmem:[%s697_s1 + $0x1d0] sm:$0xff]  ;;  %v80_v62 = vld [vmem:[%s697_s1 + $0x1d8] sm:$0xff]  ;;  %v416_v1 = vpack.c.bf16 %v62_v58, %v61_v56  ;;  %v386_v2 = vpack.c.bf16 %v48_v60, %v47_v59  ;;  %v49_v8 = vld [vmem:[%s697_s1 + $0xe0] sm:$0xff] }
  0x10   :  { %411 = vmatprep.subr.bf16.mxu1 %v410_v43  ;;  %v31_v3 = vld [vmem:[%s697_s1 + $0x50] sm:$0xff]  ;;  %v32_v4 = vld [vmem:[%s697_s1 + $0x58] sm:$0xff]  ;;  %v418_v6 = vpack.c.bf16 %v80_v62, %v79_v61  ;;  %v50_v9 = vld [vmem:[%s697_s1 + $0xe8] sm:$0xff] }
  0x11   :  { %381 = vmatpush3.bf16.msra.mxu0 %v380_v48  ;;  %v63_v5 = vld [vmem:[%s697_s1 + $0x150] sm:$0xff]  ;;  %v64_v7 = vld [vmem:[%s697_s1 + $0x158] sm:$0xff]  ;;  %v81_v10 = vld [vmem:[%s697_s1 + $0x1e0] sm:$0xff]  ;;  %v388_v12 = vpack.c.bf16 %v32_v4, %v31_v3  ;;  %v390_v18 = vpack.c.bf16 %v50_v9, %v49_v8 }
  0x12   :  { %383 = vmatprep.subr.bf16.mxu0 %v382_v53  ;;  %v82_v11 = vld [vmem:[%s697_s1 + $0x1e8] sm:$0xff]  ;;  %v33_v13 = vld [vmem:[%s697_s1 + $0x60] sm:$0xff]  ;;  %v420_v17 = vpack.c.bf16 %v64_v7, %v63_v5 }
  0x13   :  { %413 = vmatpush3.bf16.msra.mxu1 %v412_v52  ;;  %v34_v14 = vld [vmem:[%s697_s1 + $0x68] sm:$0xff]  ;;  %v65_v15 = vld [vmem:[%s697_s1 + $0x160] sm:$0xff] }
  0x14   :  { %415 = vmatprep.subr.bf16.mxu1 %v414_v57  ;;  %v66_v19 = vld [vmem:[%s697_s1 + $0x168] sm:$0xff]  ;;  %v293_v20 = vld [vmem:[%s696_s0] sm:$0xff]  }
  0x15   :  { %385 = vmatpush3.bf16.msra.mxu0 %v384_v63 }
  0x16   :  { %387 = vmatprep.subr.bf16.mxu0 %v386_v2 }
  0x17   :  { %417 = vmatpush3.bf16.msra.mxu1 %v416_v1 }
  0x18   :  { %8 = vsyncpa [#allocation3], 0  ;;  %419 = vmatprep.subr.bf16.mxu1 %v418_v6  ;;  %v422_v22 = vpack.c.bf16 %v82_v11, %v81_v10  ;;  %v51_v23 = vld [vmem:[%s697_s1 + $0xf0] sm:$0xff]  ;;  %v52_v24 = vld [vmem:[%s697_s1 + $0xf8] sm:$0xff]  ;;  %v294_v25 = vunpack.c.l.bf16 %v293_v20  ;;  %v295_v26 = vunpack.c.h.bf16 %v293_v20  ;;  %vm126_vm0 = vcmask 1041409   ;;  %s455_s7 = smov [#allocation2]  }
  0x19   :  { %v83_v27 = vld [vmem:[%s697_s1 + $0x1f0] sm:$0xff]  ;;  %v84_v28 = vld [vmem:[%s697_s1 + $0x1f8] sm:$0xff]  ;;  %v96_v29 = vsub.s32 0, %v608_v0  ;;  %389 = vmatpush3.bf16.msra.mxu0 %v388_v12  ;;  %v392_v30 = vpack.c.bf16 %v34_v14, %v33_v13  ;;  %v424_v31 = vpack.c.bf16 %v66_v19, %v65_v15  ;;  %v394_v34 = vpack.c.bf16 %v52_v24, %v51_v23  ;;  %v291_v54 = vld [vmem:[%s698_s2] ss:$0 sm:$0xff]  ;;  %s283_s8 = sshll.u32 %s455_s7, 4  ;;  %s284_s8 = int_to_ptr.vmem [resolvable:$true] %s283_s8 }
  0x1a   :  { %v101_v32 = vrot.slane %v294_v25, %v100_v16  ;;  %v117_v33 = vrot.slane %v295_v26, %v100_v16  ;;  %391 = vmatprep.subr.bf16.mxu0 %v390_v18  ;;  %v35_v35 = vld [vmem:[%s697_s1 + $0x70] sm:$0xff]  ;;  %v36_v36 = vld [vmem:[%s697_s1 + $0x78] sm:$0xff]  ;;  %v109_v37 = vrot.slane %v294_v25, %v108_v21  ;;  %v125_v38 = vrot.slane %v295_v26, %v108_v21  ;;  %s431_s9 = scalar_lea.vmem %s284_s8, 32  ;;  %p436_p1 = scmp.lt.s32.totalorder %s284_s8, %s284_s8 }
  0x1b   :  { %421 = vmatpush3.bf16.msra.mxu1 %v420_v17  ;;  %v104_v39 = vsub.s32 4, %v608_v0  ;;  %v426_v40 = vpack.c.bf16 %v84_v28, %v83_v27  ;;  %v67_v41 = vld [vmem:[%s697_s1 + $0x170] sm:$0xff]  ;;  %v68_v42 = vld [vmem:[%s697_s1 + $0x178] sm:$0xff]  ;;  %v396_v45 = vpack.c.bf16 %v36_v36, %v35_v35  ;;  %v97_v46 = vrot.slane %v294_v25, %v96_v29  ;;  %p432_p0 = scmp.ne.s32.totalorder %s284_s8, %s431_s9  ;;  %p437_p2 = scmp.lt.s32.totalorder %s431_s9, %s431_s9 }
  0x1c   :  { %423 = vmatprep.subr.bf16.mxu1 %v422_v22  ;;  %v128_v43 = vsel %vm126_vm0, %v117_v33, %v101_v32  ;;  %v130_v44 = vsel %vm126_vm0, %v125_v38, %v109_v37  ;;  %v113_v47 = vrot.slane %v295_v26, %v96_v29  ;;  %v428_v48 = vpack.c.bf16 %v68_v42, %v67_v41 }
  0x1d   :  { %199 = vmatprep.mubr.f32.mxu0 %v128_v43  ;;  %393 = vmatpush3.bf16.msra.mxu0 %v392_v30  ;;  %v105_v49 = vrot.slane %v294_v25, %v104_v39  ;;  %v121_v50 = vrot.slane %v295_v26, %v104_v39  ;;  %vm275_vm1 = vcmask 74752   ;;  %p438_p3 = por %p437_p2, %p436_p1 }
  0x1e   :  { %269 = vmatprep.mubr.f32.mxu1 %v130_v44  ;;  %395 = vmatprep.subr.bf16.mxu0 %v394_v34  ;;  %v127_v51 = vsel %vm126_vm0, %v113_v47, %v97_v46 }
  0x1f   :  { %425 = vmatpush3.bf16.msra.mxu1 %v424_v31  ;;  %v129_v52 = vsel %vm126_vm0, %v121_v50, %v105_v49  ;;  %p439_p4 = pnand %p438_p3, %p432_p0 }
  0x20   :  { %427 = vmatprep.subr.bf16.mxu1 %v426_v40 }
  0x21   :  { %397 = vmatpush3.bf16.msra.mxu0 %v396_v45 }
  0x23   :  { %429 = vmatpush3.bf16.msra.mxu1 %v428_v48 }
  0x24   :  { %200 = vmatmul.mubr.f32.vlgmr.msra.gmra.mrb[0].mxu0 %v127_v51 }
  0x26   :  { %270 = vmatmul.mubr.f32.vlgmr.msra.gmra.mrb[0].mxu1 %v129_v52 }
  0xf7   :  { %v328_v53 = vpop.f32.mrb[0].mxu0 }
  0xf8   :  { %v329_v55 = vpop.f32.mrb[1].mxu0 }
  0xf9   :  { %v363_v56 = vpop.f32.mrb[0].mxu1  ;;  %v330_v57 = vadd.f32 %v329_v55, %v328_v53 }
  0xfa   :  { %v364_v58 = vpop.f32.mrb[1].mxu1 }
  0xfb   :  { %v365_v59 = vadd.f32 %v364_v58, %v363_v56  ;;  %v202_v60 = vadd.f32 %v330_v57, %v291_v54 }
  0xfd   :  { %v272_v61 = vadd.f32 %v365_v59, %v202_v60 }
  0xff   :  { %276 = vst.msk [vmem:[#allocation2] sm:$0x3] %vm275_vm1, %v272_v61 }
 0x100   :  { %442 = shalt.err (!%p439_p4)
}
 0x101   :  { %s443_s11 = scalar_lea.hbm %s699_s3, 32 }
 0x102   :  { %p444_p5 = scmp.ne.s32.totalorder %s699_s3, %s443_s11  ;;  %p447_p6 = scmp.lt.u32.totalorder %s443_s11, %s699_s3 }
 0x104   :  { %p449_p7 = pnand %p447_p6, %p444_p5 }
 0x106   :  { %452 = shalt.err (!%p449_p7)
}
 0x107   :  { %286 = dma.vmem_to_hbm [thread:$0]  %s284_s8, 32, %s699_s3, [#allocation3]  }
 0x108   :  { %453 = dma.done.wait [#allocation3], 32  }
 0x109   :  { %454 = vsyncadd [#allocation3], 4294967264 }
 0x10a   :  { %290 = vsyncpa [#allocation3], 1 }

</bundles_post_ra>
